<compile_context>
chip_gen: v7x
topology: tpu7x:2x2x1
jax: 0.10.0
libtpu: 0.0.40
codegen_flags: <defaults>
</compile_context>

<pallas_src>
import functools

import numpy as np
import jax
import jax.numpy as jnp
from jax.experimental import pallas as pl
from jax.experimental.pallas import tpu as pltpu


# ----------------------------------------------------------------------------
# Pallas kernel
# ----------------------------------------------------------------------------
def qgen_kernel(x_ref, w_ref, b_ref, o_ref, buf_ref,
                *, n_qubits, n_circuits, n_rots):
    f32 = jnp.float32
    dim = 2 ** n_qubits
    TB = x_ref.shape[-1]                       # batch tile (lane axis)
    xT = x_ref[...]                            # (n_qubits, TB)

    # ---- hoisted per-qubit constants (computed once, reused by every circuit)
    row = jax.lax.broadcasted_iota(jnp.int32, (dim, 1), 0)        # basis index
    mask0, sgn, cmask = [], [], []
    for q in range(n_qubits):
        bit_is_one = (row & (1 << q)) != 0
        bf = bit_is_one.astype(f32)
        mask0.append(jnp.logical_not(bit_is_one))    # True where bit q == 0
        sgn.append(2.0 * bf - 1.0)                   # -1 (bit 0) / +1 (bit 1)
        cmask.append(bf)                             # 1.0 where control bit == 1

    # ---- doubled-state staging + window reads realise l -> l ^ (1<<q) along
    #      the basis (sublane) axis without any permutation matmul / MXU.
    def stage(ar, ai):
        buf_ref[0:dim, 0:TB] = ar
        buf_ref[dim:2 * dim, 0:TB] = ar
        buf_ref[0:dim, TB:2 * TB] = ai
        buf_ref[dim:2 * dim, TB:2 * TB] = ai

    def read_flip(q):
        s = 1 << q
        up = buf_ref[pl.ds(s, dim), :]              # a[(l + s) % dim]
        if 2 * s == dim:                            # top bit: pure cyclic shift,
            f = up                                  # aligned load, no select
        else:
            dn = buf_ref[pl.ds(dim - s, dim), :]    # a[(l - s) % dim]
            f = jnp.where(mask0[q], up, dn)         # bit==0 -> l+s ; bit==1 -> l-s
        return f[:, 0:TB], f[:, TB:2 * TB]

    def flip_pair(ar, ai, q):
        stage(ar, ai)
        return read_flip(q)

    # ---- initial state |0...0>
    basis = jax.lax.broadcasted_iota(jnp.int32, (dim, TB), 0)
    re = jnp.where(basis == 0, 1.0, 0.0).astype(f32)
    im = jnp.zeros((dim, TB), f32)

    # ---- circuits
    for i in range(n_circuits):
        # rot_params[i]: Linear(n_qubits -> n_qubits*n_rots), Dropout = identity.
        # K = n_qubits is tiny, so do it as VPU multiply-adds (no MXU latency).
        w_i = w_ref[i]                                     # (n_rots*n_qubits, n_qubits)
        ang = jnp.zeros((n_rots * n_qubits, TB), f32) + b_ref[i]
        for k in range(n_qubits):
            ang = ang + w_i[:, k:k + 1] * xT[k:k + 1, :]
        half = 0.5 * ang
        ca = jnp.cos(half)                                 # (n_rots*n_qubits, TB)
        sa = jnp.sin(half)

        def cs(r, q):
            idx = r * n_qubits + q     # rotations.reshape(n_rots, n_qubits)[r, q]
            return ca[idx:idx + 1, :], sa[idx:idx + 1, :]  # (1, TB) each

        # single-qubit layer: RY, RZ, RY, RZ (params 0..3)
        # One staging per qubit; (fre, fim) = flip of the current state is
        # tracked algebraically through RY(0) and RZ(1) so RY(2) reuses it.
        for q in range(n_qubits):
            sq = sgn[q]
            fre, fim = flip_pair(re, im, q)                # flip of entering state
            # RY (param 0):   x' = c*x + p*flip(x);  flip(x') = c*flip(x) - p*x
            c0, s0 = cs(0, q); p0 = s0 * sq
            re, im, fre, fim = (c0 * re + p0 * fre, c0 * im + p0 * fim,
                                c0 * fre - p0 * re, c0 * fim - p0 * im)
            # RZ (param 1):   x' = (c + i p)*x;      flip(x') = (c - i p)*flip(x)
            c1, s1 = cs(1, q); p1 = s1 * sq
            re, im, fre, fim = (c1 * re - p1 * im, c1 * im + p1 * re,
                                c1 * fre + p1 * fim, c1 * fim - p1 * fre)
            # RY (param 2)
            c2, s2 = cs(2, q); p2 = s2 * sq
            re, im = c2 * re + p2 * fre, c2 * im + p2 * fim
            # RZ (param 3)
            c3, s3 = cs(3, q); p3 = s3 * sq
            re, im = c3 * re - p3 * im, c3 * im + p3 * re

        # entangling ring: CRY (param 4) then CRZ (param 5) on wires [q, (q+1)%n]
        for q in range(n_qubits):
            tq = (q + 1) % n_qubits
            cm = cmask[q]                       # 1.0 where control bit == 1
            st = sgn[tq]
            c4, s4 = cs(4, q)
            fre, fim = flip_pair(re, im, tq)
            ry_re = c4 * re + (s4 * st) * fre
            ry_im = c4 * im + (s4 * st) * fim
            re = re + cm * (ry_re - re)
            im = im + cm * (ry_im - im)
            c5, s5 = cs(5, q)
            cosp = 1.0 + cm * (c5 - 1.0)
            sinp = (cm * st) * s5
            re, im = cosp * re - sinp * im, cosp * im + sinp * re

    # ---- measurements: stage the final state once, read all flip windows from
    # it; every store is a full 128-lane-wide output row.
    prob = re * re + im * im                    # (dim, TB)
    stage(re, im)
    for q in range(n_qubits):
        fre, fim = read_flip(q)
        o_ref[q:q + 1, :] = jnp.sum(re * fre + im * fim, axis=0, keepdims=True)       # <X_q>
        o_ref[n_qubits + q:n_qubits + q + 1, :] = jnp.sum(
            prob * (-sgn[q]), axis=0, keepdims=True)                                  # <Z_q>


# ----------------------------------------------------------------------------
# Wrapper
# ----------------------------------------------------------------------------
def quantum_generator_forward(x, weights, biases, n_qubits, n_rots, *, batch_tile=128):
    """x: (B, n_qubits); weights: (n_circuits, n_qubits*n_rots, n_qubits) in torch
    nn.Linear layout; biases: (n_circuits, n_qubits*n_rots).
    Returns (B, 2*n_qubits): [<X_0..X_{n-1}>, <Z_0..Z_{n-1}>] per batch element."""
    assert n_rots == 6, "circuit consumes exactly 6 rotation params per qubit"
    n_circuits, n_out, n_in = weights.shape
    assert n_in == n_qubits and n_out == n_qubits * n_rots
    B = x.shape[0]
    dim = 2 ** n_qubits

    TB = batch_tile
    B_pad = pl.cdiv(B, TB) * TB

    # Batch on the lane axis (transposed), zero-padded to a multiple of the tile.
    xT = jnp.zeros((n_qubits, B_pad), jnp.float32).at[:, :B].set(
        jnp.transpose(x.astype(jnp.float32)))
    w = weights.astype(jnp.float32)                      # (nc, nq*nr, nq) torch layout
    b3 = biases.astype(jnp.float32)[:, :, None]          # (nc, nq*nr, 1)

    kernel = functools.partial(qgen_kernel, n_qubits=n_qubits,
                               n_circuits=n_circuits, n_rots=n_rots)

    flops = int(B_pad) * n_circuits * (60 * n_qubits * dim + 8 * n_qubits * n_rots) \
        + int(B_pad) * 8 * n_qubits * dim
    transcendentals = int(B_pad) * n_circuits * 2 * n_qubits * n_rots
    bytes_accessed = 4 * int(xT.size + w.size + b3.size + 2 * n_qubits * B_pad)

    out_t = pl.pallas_call(
        kernel,
        out_shape=jax.ShapeDtypeStruct((2 * n_qubits, B_pad), jnp.float32),
        grid=(B_pad // TB,),
        in_specs=[
            pl.BlockSpec((n_qubits, TB), lambda i: (0, i)),            # x (batch-tiled)
            pl.BlockSpec((n_circuits, n_qubits * n_rots, n_qubits),
                         lambda i: (0, 0, 0)),                         # weights (resident)
            pl.BlockSpec((n_circuits, n_qubits * n_rots, 1),
                         lambda i: (0, 0, 0)),                         # biases (resident)
        ],
        out_specs=pl.BlockSpec((2 * n_qubits, TB), lambda i: (0, i)),
        scratch_shapes=[pltpu.VMEM((2 * dim, 2 * TB), jnp.float32)],   # flip window buffer
        compiler_params=pltpu.CompilerParams(dimension_semantics=("parallel",)),
        cost_estimate=pl.CostEstimate(flops=flops,
                                      transcendentals=transcendentals,
                                      bytes_accessed=bytes_accessed),
    )(xT, w, b3)

    return jnp.transpose(out_t)[:B]                      # (B, 2*n_qubits)


# ----------------------------------------------------------------------------
# Plain-JAX reference (independent mechanics: exact gather-based bit flips,
# highest-precision Linear) for validating the Pallas kernel.
# ----------------------------------------------------------------------------
def reference_forward(x, weights, biases, n_qubits, n_rots):
    B = x.shape[0]
    dim = 2 ** n_qubits
    idx = np.arange(dim)
    perm = [idx ^ (1 << q) for q in range(n_qubits)]
    zsgn = [jnp.asarray((1.0 - 2.0 * ((idx >> q) & 1)).astype(np.float32))[None, :]
            for q in range(n_qubits)]

    x = x.astype(jnp.float32)
    re = jnp.zeros((B, dim), jnp.float32).at[:, 0].set(1.0)
    im = jnp.zeros((B, dim), jnp.float32)

    for i in range(weights.shape[0]):
        ang = jnp.dot(x, weights[i].astype(jnp.float32).T,
                      precision=jax.lax.Precision.HIGHEST) + biases[i].astype(jnp.float32)
        ca, sa = jnp.cos(0.5 * ang), jnp.sin(0.5 * ang)

        def cs(r, q):
            j = r * n_qubits + q
            return ca[:, j:j + 1], sa[:, j:j + 1]

        for q in range(n_qubits):
            sg = -zsgn[q]
            for r, kind in ((0, "ry"), (1, "rz"), (2, "ry"), (3, "rz")):
                c, s = cs(r, q)
                if kind == "ry":
                    pre, pim = re[:, perm[q]], im[:, perm[q]]
                    re, im = c * re + s * sg * pre, c * im + s * sg * pim
                else:
                    re, im = c * re - s * sg * im, c * im + s * sg * re
        for q in range(n_qubits):
            tq = (q + 1) % n_qubits
            cm = (1.0 - zsgn[q]) * 0.5
            st = -zsgn[tq]
            c, s = cs(4, q)
            pre, pim = re[:, perm[tq]], im[:, perm[tq]]
            re = re + cm * (c * re + s * st * pre - re)
            im = im + cm * (c * im + s * st * pim - im)
            c, s = cs(5, q)
            cosp, sinp = 1.0 + cm * (c - 1.0), cm * s * st
            re, im = cosp * re - sinp * im, cosp * im + sinp * re

    outs = []
    for q in range(n_qubits):
        outs.append(jnp.sum(re * re[:, perm[q]] + im * im[:, perm[q]], axis=-1))
    for q in range(n_qubits):
        outs.append(jnp.sum((re * re + im * im) * zsgn[q], axis=-1))
    return jnp.stack(outs, axis=-1)


# ----------------------------------------------------------------------------
if __name__ == "__main__":
    B, n_qubits, n_circuits, n_rots = 8, 4, 2, 6     # dropout unused (eval mode)

    key = jax.random.PRNGKey(0)
    k1, k2, k3 = jax.random.split(key, 3)
    x = jax.random.normal(k1, (B, n_qubits), dtype=jnp.float32)
    # nn.init.uniform_(-0.01, 0.01) for weight and bias of every Linear
    weights = jax.random.uniform(k2, (n_circuits, n_qubits * n_rots, n_qubits),
                                 dtype=jnp.float32, minval=-0.01, maxval=0.01)
    biases = jax.random.uniform(k3, (n_circuits, n_qubits * n_rots),
                                dtype=jnp.float32, minval=-0.01, maxval=0.01)

    out = quantum_generator_forward(x, weights, biases, n_qubits, n_rots)
    out = jax.block_until_ready(out)

    ref = reference_forward(x, weights, biases, n_qubits, n_rots)
    assert out.shape == (B, 2 * n_qubits)
    assert jnp.allclose(out, ref, atol=1e-4), (out, ref)

    print("KERNEL_OK")
</pallas_src>

<mosaic_0001>
module attributes {stable_mosaic.version = 11 : i64} {
  func.func @qgen_kernel(%arg0: i32, %arg1: memref<4x128xf32, #tpu.memory_space<vmem>>, %arg2: memref<2x24x4xf32, #tpu.memory_space<vmem>>, %arg3: memref<2x24x1xf32, #tpu.memory_space<vmem>>, %arg4: memref<8x128xf32, #tpu.memory_space<vmem>>, %arg5: memref<32x256xf32, #tpu.memory_space<vmem>>) attributes {dimension_semantics = [#tpu.dimension_semantics<parallel>], iteration_bounds = array<i64: 1>, scalar_prefetch = 0 : i64, scratch_operands = 1 : i64, tpu.core_type = #tpu.core_type<tc>, window_params = [{transform_indices = @transform_0, window_bounds = array<i64: 4, 128>}, {pipeline_mode = #tpu.pipeline_mode<synchronous>, transform_indices = @transform_1, window_bounds = array<i64: 2, 24, 4>}, {pipeline_mode = #tpu.pipeline_mode<synchronous>, transform_indices = @transform_2, window_bounds = array<i64: 2, 24, 1>}, {transform_indices = @transform_3, window_bounds = array<i64: 8, 128>}]} {
    %c0 = arith.constant 0 : index
    %c0_0 = arith.constant 0 : index
    %0 = vector.load %arg1[%c0, %c0_0] : memref<4x128xf32, #tpu.memory_space<vmem>>, vector<4x128xf32>
    %1 = tpu.iota {dimensions = array<i32: 0>} : vector<16x1xi32>
    %c1_i32 = arith.constant 1 : i32
    %2 = vector.broadcast %c1_i32 : i32 to vector<16x1xi32>
    %3 = arith.andi %1, %2 : vector<16x1xi32>
    %c0_i32 = arith.constant 0 : i32
    %4 = vector.broadcast %c0_i32 : i32 to vector<16x1xi32>
    %5 = arith.cmpi ne, %3, %4 : vector<16x1xi32>
    %6 = arith.extui %5 : vector<16x1xi1> to vector<16x1xi32>
    %7 = arith.sitofp %6 : vector<16x1xi32> to vector<16x1xf32>
    %cst = arith.constant dense<true> : vector<16x1xi1>
    %8 = arith.xori %5, %cst : vector<16x1xi1>
    %cst_1 = arith.constant 2.000000e+00 : f32
    %9 = vector.broadcast %cst_1 : f32 to vector<16x1xf32>
    %10 = arith.mulf %9, %7 : vector<16x1xf32>
    %cst_2 = arith.constant 1.000000e+00 : f32
    %11 = vector.broadcast %cst_2 : f32 to vector<16x1xf32>
    %12 = arith.subf %10, %11 : vector<16x1xf32>
    %c2_i32 = arith.constant 2 : i32
    %13 = vector.broadcast %c2_i32 : i32 to vector<16x1xi32>
    %14 = arith.andi %1, %13 : vector<16x1xi32>
    %c0_i32_3 = arith.constant 0 : i32
    %15 = vector.broadcast %c0_i32_3 : i32 to vector<16x1xi32>
    %16 = arith.cmpi ne, %14, %15 : vector<16x1xi32>
    %17 = arith.extui %16 : vector<16x1xi1> to vector<16x1xi32>
    %18 = arith.sitofp %17 : vector<16x1xi32> to vector<16x1xf32>
    %cst_4 = arith.constant dense<true> : vector<16x1xi1>
    %19 = arith.xori %16, %cst_4 : vector<16x1xi1>
    %cst_5 = arith.constant 2.000000e+00 : f32
    %20 = vector.broadcast %cst_5 : f32 to vector<16x1xf32>
    %21 = arith.mulf %20, %18 : vector<16x1xf32>
    %cst_6 = arith.constant 1.000000e+00 : f32
    %22 = vector.broadcast %cst_6 : f32 to vector<16x1xf32>
    %23 = arith.subf %21, %22 : vector<16x1xf32>
    %c4_i32 = arith.constant 4 : i32
    %24 = vector.broadcast %c4_i32 : i32 to vector<16x1xi32>
    %25 = arith.andi %1, %24 : vector<16x1xi32>
    %c0_i32_7 = arith.constant 0 : i32
    %26 = vector.broadcast %c0_i32_7 : i32 to vector<16x1xi32>
    %27 = arith.cmpi ne, %25, %26 : vector<16x1xi32>
    %28 = arith.extui %27 : vector<16x1xi1> to vector<16x1xi32>
    %29 = arith.sitofp %28 : vector<16x1xi32> to vector<16x1xf32>
    %cst_8 = arith.constant dense<true> : vector<16x1xi1>
    %30 = arith.xori %27, %cst_8 : vector<16x1xi1>
    %cst_9 = arith.constant 2.000000e+00 : f32
    %31 = vector.broadcast %cst_9 : f32 to vector<16x1xf32>
    %32 = arith.mulf %31, %29 : vector<16x1xf32>
    %cst_10 = arith.constant 1.000000e+00 : f32
    %33 = vector.broadcast %cst_10 : f32 to vector<16x1xf32>
    %34 = arith.subf %32, %33 : vector<16x1xf32>
    %c8_i32 = arith.constant 8 : i32
    %35 = vector.broadcast %c8_i32 : i32 to vector<16x1xi32>
    %36 = arith.andi %1, %35 : vector<16x1xi32>
    %c0_i32_11 = arith.constant 0 : i32
    %37 = vector.broadcast %c0_i32_11 : i32 to vector<16x1xi32>
    %38 = arith.cmpi ne, %36, %37 : vector<16x1xi32>
    %39 = arith.extui %38 : vector<16x1xi1> to vector<16x1xi32>
    %40 = arith.sitofp %39 : vector<16x1xi32> to vector<16x1xf32>
    %cst_12 = arith.constant 2.000000e+00 : f32
    %41 = vector.broadcast %cst_12 : f32 to vector<16x1xf32>
    %42 = arith.mulf %41, %40 : vector<16x1xf32>
    %cst_13 = arith.constant 1.000000e+00 : f32
    %43 = vector.broadcast %cst_13 : f32 to vector<16x1xf32>
    %44 = arith.subf %42, %43 : vector<16x1xf32>
    %45 = tpu.iota {dimensions = array<i32: 0>} : vector<16x128xi32>
    %c0_i32_14 = arith.constant 0 : i32
    %46 = vector.broadcast %c0_i32_14 : i32 to vector<16x128xi32>
    %47 = arith.cmpi eq, %45, %46 : vector<16x128xi32>
    %cst_15 = arith.constant 1.000000e+00 : f32
    %cst_16 = arith.constant 0.000000e+00 : f32
    %48 = vector.broadcast %cst_15 : f32 to vector<16x128xf32>
    %49 = vector.broadcast %cst_16 : f32 to vector<16x128xf32>
    %50 = arith.select %47, %48, %49 : vector<16x128xi1>, vector<16x128xf32>
    %cst_17 = arith.constant 0.000000e+00 : f32
    %51 = vector.broadcast %cst_17 : f32 to vector<16x128xf32>
    %c0_18 = arith.constant 0 : index
    %c0_19 = arith.constant 0 : index
    %c0_20 = arith.constant 0 : index
    %52 = vector.load %arg2[%c0_18, %c0_19, %c0_20] : memref<2x24x4xf32, #tpu.memory_space<vmem>>, vector<1x24x4xf32>
    %53 = vector.shape_cast %52 : vector<1x24x4xf32> to vector<24x4xf32>
    %cst_21 = arith.constant 0.000000e+00 : f32
    %54 = vector.broadcast %cst_21 : f32 to vector<24x128xf32>
    %c0_22 = arith.constant 0 : index
    %c0_23 = arith.constant 0 : index
    %c0_24 = arith.constant 0 : index
    %55 = vector.load %arg3[%c0_22, %c0_23, %c0_24] : memref<2x24x1xf32, #tpu.memory_space<vmem>>, vector<1x24x1xf32>
    %56 = vector.shape_cast %55 : vector<1x24x1xf32> to vector<24x1xf32>
    %57 = vector.broadcast %56 : vector<24x1xf32> to vector<24x128xf32>
    %58 = arith.addf %54, %57 : vector<24x128xf32>
    %59 = vector.extract_strided_slice %53 {offsets = [0, 0], sizes = [24, 1], strides = [1, 1]} : vector<24x4xf32> to vector<24x1xf32>
    %60 = vector.extract_strided_slice %0 {offsets = [0, 0], sizes = [1, 128], strides = [1, 1]} : vector<4x128xf32> to vector<1x128xf32>
    %61 = vector.broadcast %59 : vector<24x1xf32> to vector<24x128xf32>
    %62 = vector.broadcast %60 : vector<1x128xf32> to vector<24x128xf32>
    %63 = arith.mulf %61, %62 : vector<24x128xf32>
    %64 = arith.addf %58, %63 : vector<24x128xf32>
    %65 = vector.extract_strided_slice %53 {offsets = [0, 1], sizes = [24, 1], strides = [1, 1]} : vector<24x4xf32> to vector<24x1xf32>
    %66 = vector.extract_strided_slice %0 {offsets = [1, 0], sizes = [1, 128], strides = [1, 1]} : vector<4x128xf32> to vector<1x128xf32>
    %67 = vector.broadcast %65 : vector<24x1xf32> to vector<24x128xf32>
    %68 = vector.broadcast %66 : vector<1x128xf32> to vector<24x128xf32>
    %69 = arith.mulf %67, %68 : vector<24x128xf32>
    %70 = arith.addf %64, %69 : vector<24x128xf32>
    %71 = vector.extract_strided_slice %53 {offsets = [0, 2], sizes = [24, 1], strides = [1, 1]} : vector<24x4xf32> to vector<24x1xf32>
    %72 = vector.extract_strided_slice %0 {offsets = [2, 0], sizes = [1, 128], strides = [1, 1]} : vector<4x128xf32> to vector<1x128xf32>
    %73 = vector.broadcast %71 : vector<24x1xf32> to vector<24x128xf32>
    %74 = vector.broadcast %72 : vector<1x128xf32> to vector<24x128xf32>
    %75 = arith.mulf %73, %74 : vector<24x128xf32>
    %76 = arith.addf %70, %75 : vector<24x128xf32>
    %77 = vector.extract_strided_slice %53 {offsets = [0, 3], sizes = [24, 1], strides = [1, 1]} : vector<24x4xf32> to vector<24x1xf32>
    %78 = vector.extract_strided_slice %0 {offsets = [3, 0], sizes = [1, 128], strides = [1, 1]} : vector<4x128xf32> to vector<1x128xf32>
    %79 = vector.broadcast %77 : vector<24x1xf32> to vector<24x128xf32>
    %80 = vector.broadcast %78 : vector<1x128xf32> to vector<24x128xf32>
    %81 = arith.mulf %79, %80 : vector<24x128xf32>
    %82 = arith.addf %76, %81 : vector<24x128xf32>
    %cst_25 = arith.constant 5.000000e-01 : f32
    %83 = vector.broadcast %cst_25 : f32 to vector<24x128xf32>
    %84 = arith.mulf %83, %82 : vector<24x128xf32>
    %85 = math.cos %84 : vector<24x128xf32>
    %86 = math.sin %84 : vector<24x128xf32>
    %c0_26 = arith.constant 0 : index
    %c0_27 = arith.constant 0 : index
    %87 = vector.load %arg5[%c0_26, %c0_27] : memref<32x256xf32, #tpu.memory_space<vmem>>, vector<16x128xf32>
    tpu.vector_store %arg5[%c0_26, %c0_27], %50 {strides = array<i32>} : memref<32x256xf32, #tpu.memory_space<vmem>>, vector<16x128xf32>,
    %c16 = arith.constant 16 : index
    %c0_28 = arith.constant 0 : index
    %88 = vector.load %arg5[%c16, %c0_28] : memref<32x256xf32, #tpu.memory_space<vmem>>, vector<16x128xf32>
    tpu.vector_store %arg5[%c16, %c0_28], %50 {strides = array<i32>} : memref<32x256xf32, #tpu.memory_space<vmem>>, vector<16x128xf32>,
    %c0_29 = arith.constant 0 : index
    %c128 = arith.constant 128 : index
    %89 = vector.load %arg5[%c0_29, %c128] : memref<32x256xf32, #tpu.memory_space<vmem>>, vector<16x128xf32>
    tpu.vector_store %arg5[%c0_29, %c128], %51 {strides = array<i32>} : memref<32x256xf32, #tpu.memory_space<vmem>>, vector<16x128xf32>,
    %c16_30 = arith.constant 16 : index
    %c128_31 = arith.constant 128 : index
    %90 = vector.load %arg5[%c16_30, %c128_31] : memref<32x256xf32, #tpu.memory_space<vmem>>, vector<16x128xf32>
    tpu.vector_store %arg5[%c16_30, %c128_31], %51 {strides = array<i32>} : memref<32x256xf32, #tpu.memory_space<vmem>>, vector<16x128xf32>,
    %c1 = arith.constant 1 : index
    %c0_32 = arith.constant 0 : index
    %91 = vector.load %arg5[%c1, %c0_32] : memref<32x256xf32, #tpu.memory_space<vmem>>, vector<16x256xf32>
    %c15 = arith.constant 15 : index
    %c0_33 = arith.constant 0 : index
    %92 = vector.load %arg5[%c15, %c0_33] : memref<32x256xf32, #tpu.memory_space<vmem>>, vector<16x256xf32>
    %93 = vector.shape_cast %8 : vector<16x1xi1> to vector<16x1xi1>
    %94 = vector.broadcast %93 : vector<16x1xi1> to vector<16x256xi1>
    %95 = arith.select %94, %91, %92 : vector<16x256xi1>, vector<16x256xf32>
    %96 = vector.extract_strided_slice %95 {offsets = [0, 0], sizes = [16, 128], strides = [1, 1]} : vector<16x256xf32> to vector<16x128xf32>
    %97 = vector.extract_strided_slice %95 {offsets = [0, 128], sizes = [16, 128], strides = [1, 1]} : vector<16x256xf32> to vector<16x128xf32>
    %98 = vector.extract_strided_slice %85 {offsets = [0, 0], sizes = [1, 128], strides = [1, 1]} : vector<24x128xf32> to vector<1x128xf32>
    %99 = vector.extract_strided_slice %86 {offsets = [0, 0], sizes = [1, 128], strides = [1, 1]} : vector<24x128xf32> to vector<1x128xf32>
    %100 = vector.broadcast %99 : vector<1x128xf32> to vector<16x128xf32>
    %101 = vector.broadcast %12 : vector<16x1xf32> to vector<16x128xf32>
    %102 = arith.mulf %100, %101 : vector<16x128xf32>
    %103 = vector.broadcast %98 : vector<1x128xf32> to vector<16x128xf32>
    %104 = arith.mulf %103, %50 : vector<16x128xf32>
    %105 = arith.mulf %102, %96 : vector<16x128xf32>
    %106 = arith.addf %104, %105 : vector<16x128xf32>
    %107 = vector.broadcast %98 : vector<1x128xf32> to vector<16x128xf32>
    %108 = arith.mulf %107, %51 : vector<16x128xf32>
    %109 = arith.mulf %102, %97 : vector<16x128xf32>
    %110 = arith.addf %108, %109 : vector<16x128xf32>
    %111 = vector.broadcast %98 : vector<1x128xf32> to vector<16x128xf32>
    %112 = arith.mulf %111, %96 : vector<16x128xf32>
    %113 = arith.mulf %102, %50 : vector<16x128xf32>
    %114 = arith.subf %112, %113 : vector<16x128xf32>
    %115 = vector.broadcast %98 : vector<1x128xf32> to vector<16x128xf32>
    %116 = arith.mulf %115, %97 : vector<16x128xf32>
    %117 = arith.mulf %102, %51 : vector<16x128xf32>
    %118 = arith.subf %116, %117 : vector<16x128xf32>
    %119 = vector.extract_strided_slice %85 {offsets = [4, 0], sizes = [1, 128], strides = [1, 1]} : vector<24x128xf32> to vector<1x128xf32>
    %120 = vector.extract_strided_slice %86 {offsets = [4, 0], sizes = [1, 128], strides = [1, 1]} : vector<24x128xf32> to vector<1x128xf32>
    %121 = vector.broadcast %120 : vector<1x128xf32> to vector<16x128xf32>
    %122 = vector.broadcast %12 : vector<16x1xf32> to vector<16x128xf32>
    %123 = arith.mulf %121, %122 : vector<16x128xf32>
    %124 = vector.broadcast %119 : vector<1x128xf32> to vector<16x128xf32>
    %125 = arith.mulf %124, %106 : vector<16x128xf32>
    %126 = arith.mulf %123, %110 : vector<16x128xf32>
    %127 = arith.subf %125, %126 : vector<16x128xf32>
    %128 = vector.broadcast %119 : vector<1x128xf32> to vector<16x128xf32>
    %129 = arith.mulf %128, %110 : vector<16x128xf32>
    %130 = arith.mulf %123, %106 : vector<16x128xf32>
    %131 = arith.addf %129, %130 : vector<16x128xf32>
    %132 = vector.broadcast %119 : vector<1x128xf32> to vector<16x128xf32>
    %133 = arith.mulf %132, %114 : vector<16x128xf32>
    %134 = arith.mulf %123, %118 : vector<16x128xf32>
    %135 = arith.addf %133, %134 : vector<16x128xf32>
    %136 = vector.broadcast %119 : vector<1x128xf32> to vector<16x128xf32>
    %137 = arith.mulf %136, %118 : vector<16x128xf32>
    %138 = arith.mulf %123, %114 : vector<16x128xf32>
    %139 = arith.subf %137, %138 : vector<16x128xf32>
    %140 = vector.extract_strided_slice %85 {offsets = [8, 0], sizes = [1, 128], strides = [1, 1]} : vector<24x128xf32> to vector<1x128xf32>
    %141 = vector.extract_strided_slice %86 {offsets = [8, 0], sizes = [1, 128], strides = [1, 1]} : vector<24x128xf32> to vector<1x128xf32>
    %142 = vector.broadcast %141 : vector<1x128xf32> to vector<16x128xf32>
    %143 = vector.broadcast %12 : vector<16x1xf32> to vector<16x128xf32>
    %144 = arith.mulf %142, %143 : vector<16x128xf32>
    %145 = vector.broadcast %140 : vector<1x128xf32> to vector<16x128xf32>
    %146 = arith.mulf %145, %127 : vector<16x128xf32>
    %147 = arith.mulf %144, %135 : vector<16x128xf32>
    %148 = arith.addf %146, %147 : vector<16x128xf32>
    %149 = vector.broadcast %140 : vector<1x128xf32> to vector<16x128xf32>
    %150 = arith.mulf %149, %131 : vector<16x128xf32>
    %151 = arith.mulf %144, %139 : vector<16x128xf32>
    %152 = arith.addf %150, %151 : vector<16x128xf32>
    %153 = vector.extract_strided_slice %85 {offsets = [12, 0], sizes = [1, 128], strides = [1, 1]} : vector<24x128xf32> to vector<1x128xf32>
    %154 = vector.extract_strided_slice %86 {offsets = [12, 0], sizes = [1, 128], strides = [1, 1]} : vector<24x128xf32> to vector<1x128xf32>
    %155 = vector.broadcast %154 : vector<1x128xf32> to vector<16x128xf32>
    %156 = vector.broadcast %12 : vector<16x1xf32> to vector<16x128xf32>
    %157 = arith.mulf %155, %156 : vector<16x128xf32>
    %158 = vector.broadcast %153 : vector<1x128xf32> to vector<16x128xf32>
    %159 = arith.mulf %158, %148 : vector<16x128xf32>
    %160 = arith.mulf %157, %152 : vector<16x128xf32>
    %161 = arith.subf %159, %160 : vector<16x128xf32>
    %162 = vector.broadcast %153 : vector<1x128xf32> to vector<16x128xf32>
    %163 = arith.mulf %162, %152 : vector<16x128xf32>
    %164 = arith.mulf %157, %148 : vector<16x128xf32>
    %165 = arith.addf %163, %164 : vector<16x128xf32>
    %c0_34 = arith.constant 0 : index
    %c0_35 = arith.constant 0 : index
    %166 = vector.load %arg5[%c0_34, %c0_35] : memref<32x256xf32, #tpu.memory_space<vmem>>, vector<16x128xf32>
    tpu.vector_store %arg5[%c0_34, %c0_35], %161 {strides = array<i32>} : memref<32x256xf32, #tpu.memory_space<vmem>>, vector<16x128xf32>,
    %c16_36 = arith.constant 16 : index
    %c0_37 = arith.constant 0 : index
    %167 = vector.load %arg5[%c16_36, %c0_37] : memref<32x256xf32, #tpu.memory_space<vmem>>, vector<16x128xf32>
    tpu.vector_store %arg5[%c16_36, %c0_37], %161 {strides = array<i32>} : memref<32x256xf32, #tpu.memory_space<vmem>>, vector<16x128xf32>,
    %c0_38 = arith.constant 0 : index
    %c128_39 = arith.constant 128 : index
    %168 = vector.load %arg5[%c0_38, %c128_39] : memref<32x256xf32, #tpu.memory_space<vmem>>, vector<16x128xf32>
    tpu.vector_store %arg5[%c0_38, %c128_39], %165 {strides = array<i32>} : memref<32x256xf32, #tpu.memory_space<vmem>>, vector<16x128xf32>,
    %c16_40 = arith.constant 16 : index
    %c128_41 = arith.constant 128 : index
    %169 = vector.load %arg5[%c16_40, %c128_41] : memref<32x256xf32, #tpu.memory_space<vmem>>, vector<16x128xf32>
    tpu.vector_store %arg5[%c16_40, %c128_41], %165 {strides = array<i32>} : memref<32x256xf32, #tpu.memory_space<vmem>>, vector<16x128xf32>,
    %c2 = arith.constant 2 : index
    %c0_42 = arith.constant 0 : index
    %170 = vector.load %arg5[%c2, %c0_42] : memref<32x256xf32, #tpu.memory_space<vmem>>, vector<16x256xf32>
    %c14 = arith.constant 14 : index
    %c0_43 = arith.constant 0 : index
    %171 = vector.load %arg5[%c14, %c0_43] : memref<32x256xf32, #tpu.memory_space<vmem>>, vector<16x256xf32>
    %172 = vector.shape_cast %19 : vector<16x1xi1> to vector<16x1xi1>
    %173 = vector.broadcast %172 : vector<16x1xi1> to vector<16x256xi1>
    %174 = arith.select %173, %170, %171 : vector<16x256xi1>, vector<16x256xf32>
    %175 = vector.extract_strided_slice %174 {offsets = [0, 0], sizes = [16, 128], strides = [1, 1]} : vector<16x256xf32> to vector<16x128xf32>
    %176 = vector.extract_strided_slice %174 {offsets = [0, 128], sizes = [16, 128], strides = [1, 1]} : vector<16x256xf32> to vector<16x128xf32>
    %177 = vector.extract_strided_slice %85 {offsets = [1, 0], sizes = [1, 128], strides = [1, 1]} : vector<24x128xf32> to vector<1x128xf32>
    %178 = vector.extract_strided_slice %86 {offsets = [1, 0], sizes = [1, 128], strides = [1, 1]} : vector<24x128xf32> to vector<1x128xf32>
    %179 = vector.broadcast %178 : vector<1x128xf32> to vector<16x128xf32>
    %180 = vector.broadcast %23 : vector<16x1xf32> to vector<16x128xf32>
    %181 = arith.mulf %179, %180 : vector<16x128xf32>
    %182 = vector.broadcast %177 : vector<1x128xf32> to vector<16x128xf32>
    %183 = arith.mulf %182, %161 : vector<16x128xf32>
    %184 = arith.mulf %181, %175 : vector<16x128xf32>
    %185 = arith.addf %183, %184 : vector<16x128xf32>
    %186 = vector.broadcast %177 : vector<1x128xf32> to vector<16x128xf32>
    %187 = arith.mulf %186, %165 : vector<16x128xf32>
    %188 = arith.mulf %181, %176 : vector<16x128xf32>
    %189 = arith.addf %187, %188 : vector<16x128xf32>
    %190 = vector.broadcast %177 : vector<1x128xf32> to vector<16x128xf32>
    %191 = arith.mulf %190, %175 : vector<16x128xf32>
    %192 = arith.mulf %181, %161 : vector<16x128xf32>
    %193 = arith.subf %191, %192 : vector<16x128xf32>
    %194 = vector.broadcast %177 : vector<1x128xf32> to vector<16x128xf32>
    %195 = arith.mulf %194, %176 : vector<16x128xf32>
    %196 = arith.mulf %181, %165 : vector<16x128xf32>
    %197 = arith.subf %195, %196 : vector<16x128xf32>
    %198 = vector.extract_strided_slice %85 {offsets = [5, 0], sizes = [1, 128], strides = [1, 1]} : vector<24x128xf32> to vector<1x128xf32>
    %199 = vector.extract_strided_slice %86 {offsets = [5, 0], sizes = [1, 128], strides = [1, 1]} : vector<24x128xf32> to vector<1x128xf32>
    %200 = vector.broadcast %199 : vector<1x128xf32> to vector<16x128xf32>
    %201 = vector.broadcast %23 : vector<16x1xf32> to vector<16x128xf32>
    %202 = arith.mulf %200, %201 : vector<16x128xf32>
    %203 = vector.broadcast %198 : vector<1x128xf32> to vector<16x128xf32>
    %204 = arith.mulf %203, %185 : vector<16x128xf32>
    %205 = arith.mulf %202, %189 : vector<16x128xf32>
    %206 = arith.subf %204, %205 : vector<16x128xf32>
    %207 = vector.broadcast %198 : vector<1x128xf32> to vector<16x128xf32>
    %208 = arith.mulf %207, %189 : vector<16x128xf32>
    %209 = arith.mulf %202, %185 : vector<16x128xf32>
    %210 = arith.addf %208, %209 : vector<16x128xf32>
    %211 = vector.broadcast %198 : vector<1x128xf32> to vector<16x128xf32>
    %212 = arith.mulf %211, %193 : vector<16x128xf32>
    %213 = arith.mulf %202, %197 : vector<16x128xf32>
    %214 = arith.addf %212, %213 : vector<16x128xf32>
    %215 = vector.broadcast %198 : vector<1x128xf32> to vector<16x128xf32>
    %216 = arith.mulf %215, %197 : vector<16x128xf32>
    %217 = arith.mulf %202, %193 : vector<16x128xf32>
    %218 = arith.subf %216, %217 : vector<16x128xf32>
    %219 = vector.extract_strided_slice %85 {offsets = [9, 0], sizes = [1, 128], strides = [1, 1]} : vector<24x128xf32> to vector<1x128xf32>
    %220 = vector.extract_strided_slice %86 {offsets = [9, 0], sizes = [1, 128], strides = [1, 1]} : vector<24x128xf32> to vector<1x128xf32>
    %221 = vector.broadcast %220 : vector<1x128xf32> to vector<16x128xf32>
    %222 = vector.broadcast %23 : vector<16x1xf32> to vector<16x128xf32>
    %223 = arith.mulf %221, %222 : vector<16x128xf32>
    %224 = vector.broadcast %219 : vector<1x128xf32> to vector<16x128xf32>
    %225 = arith.mulf %224, %206 : vector<16x128xf32>
    %226 = arith.mulf %223, %214 : vector<16x128xf32>
    %227 = arith.addf %225, %226 : vector<16x128xf32>
    %228 = vector.broadcast %219 : vector<1x128xf32> to vector<16x128xf32>
    %229 = arith.mulf %228, %210 : vector<16x128xf32>
    %230 = arith.mulf %223, %218 : vector<16x128xf32>
    %231 = arith.addf %229, %230 : vector<16x128xf32>
    %232 = vector.extract_strided_slice %85 {offsets = [13, 0], sizes = [1, 128], strides = [1, 1]} : vector<24x128xf32> to vector<1x128xf32>
    %233 = vector.extract_strided_slice %86 {offsets = [13, 0], sizes = [1, 128], strides = [1, 1]} : vector<24x128xf32> to vector<1x128xf32>
    %234 = vector.broadcast %233 : vector<1x128xf32> to vector<16x128xf32>
    %235 = vector.broadcast %23 : vector<16x1xf32> to vector<16x128xf32>
    %236 = arith.mulf %234, %235 : vector<16x128xf32>
    %237 = vector.broadcast %232 : vector<1x128xf32> to vector<16x128xf32>
    %238 = arith.mulf %237, %227 : vector<16x128xf32>
    %239 = arith.mulf %236, %231 : vector<16x128xf32>
    %240 = arith.subf %238, %239 : vector<16x128xf32>
    %241 = vector.broadcast %232 : vector<1x128xf32> to vector<16x128xf32>
    %242 = arith.mulf %241, %231 : vector<16x128xf32>
    %243 = arith.mulf %236, %227 : vector<16x128xf32>
    %244 = arith.addf %242, %243 : vector<16x128xf32>
    %c0_44 = arith.constant 0 : index
    %c0_45 = arith.constant 0 : index
    %245 = vector.load %arg5[%c0_44, %c0_45] : memref<32x256xf32, #tpu.memory_space<vmem>>, vector<16x128xf32>
    tpu.vector_store %arg5[%c0_44, %c0_45], %240 {strides = array<i32>} : memref<32x256xf32, #tpu.memory_space<vmem>>, vector<16x128xf32>,
    %c16_46 = arith.constant 16 : index
    %c0_47 = arith.constant 0 : index
    %246 = vector.load %arg5[%c16_46, %c0_47] : memref<32x256xf32, #tpu.memory_space<vmem>>, vector<16x128xf32>
    tpu.vector_store %arg5[%c16_46, %c0_47], %240 {strides = array<i32>} : memref<32x256xf32, #tpu.memory_space<vmem>>, vector<16x128xf32>,
    %c0_48 = arith.constant 0 : index
    %c128_49 = arith.constant 128 : index
    %247 = vector.load %arg5[%c0_48, %c128_49] : memref<32x256xf32, #tpu.memory_space<vmem>>, vector<16x128xf32>
    tpu.vector_store %arg5[%c0_48, %c128_49], %244 {strides = array<i32>} : memref<32x256xf32, #tpu.memory_space<vmem>>, vector<16x128xf32>,
    %c16_50 = arith.constant 16 : index
    %c128_51 = arith.constant 128 : index
    %248 = vector.load %arg5[%c16_50, %c128_51] : memref<32x256xf32, #tpu.memory_space<vmem>>, vector<16x128xf32>
    tpu.vector_store %arg5[%c16_50, %c128_51], %244 {strides = array<i32>} : memref<32x256xf32, #tpu.memory_space<vmem>>, vector<16x128xf32>,
    %c4 = arith.constant 4 : index
    %c0_52 = arith.constant 0 : index
    %249 = vector.load %arg5[%c4, %c0_52] : memref<32x256xf32, #tpu.memory_space<vmem>>, vector<16x256xf32>
    %c12 = arith.constant 12 : index
    %c0_53 = arith.constant 0 : index
    %250 = vector.load %arg5[%c12, %c0_53] : memref<32x256xf32, #tpu.memory_space<vmem>>, vector<16x256xf32>
    %251 = vector.shape_cast %30 : vector<16x1xi1> to vector<16x1xi1>
    %252 = vector.broadcast %251 : vector<16x1xi1> to vector<16x256xi1>
    %253 = arith.select %252, %249, %250 : vector<16x256xi1>, vector<16x256xf32>
    %254 = vector.extract_strided_slice %253 {offsets = [0, 0], sizes = [16, 128], strides = [1, 1]} : vector<16x256xf32> to vector<16x128xf32>
    %255 = vector.extract_strided_slice %253 {offsets = [0, 128], sizes = [16, 128], strides = [1, 1]} : vector<16x256xf32> to vector<16x128xf32>
    %256 = vector.extract_strided_slice %85 {offsets = [2, 0], sizes = [1, 128], strides = [1, 1]} : vector<24x128xf32> to vector<1x128xf32>
    %257 = vector.extract_strided_slice %86 {offsets = [2, 0], sizes = [1, 128], strides = [1, 1]} : vector<24x128xf32> to vector<1x128xf32>
    %258 = vector.broadcast %257 : vector<1x128xf32> to vector<16x128xf32>
    %259 = vector.broadcast %34 : vector<16x1xf32> to vector<16x128xf32>
    %260 = arith.mulf %258, %259 : vector<16x128xf32>
    %261 = vector.broadcast %256 : vector<1x128xf32> to vector<16x128xf32>
    %262 = arith.mulf %261, %240 : vector<16x128xf32>
    %263 = arith.mulf %260, %254 : vector<16x128xf32>
    %264 = arith.addf %262, %263 : vector<16x128xf32>
    %265 = vector.broadcast %256 : vector<1x128xf32> to vector<16x128xf32>
    %266 = arith.mulf %265, %244 : vector<16x128xf32>
    %267 = arith.mulf %260, %255 : vector<16x128xf32>
    %268 = arith.addf %266, %267 : vector<16x128xf32>
    %269 = vector.broadcast %256 : vector<1x128xf32> to vector<16x128xf32>
    %270 = arith.mulf %269, %254 : vector<16x128xf32>
    %271 = arith.mulf %260, %240 : vector<16x128xf32>
    %272 = arith.subf %270, %271 : vector<16x128xf32>
    %273 = vector.broadcast %256 : vector<1x128xf32> to vector<16x128xf32>
    %274 = arith.mulf %273, %255 : vector<16x128xf32>
    %275 = arith.mulf %260, %244 : vector<16x128xf32>
    %276 = arith.subf %274, %275 : vector<16x128xf32>
    %277 = vector.extract_strided_slice %85 {offsets = [6, 0], sizes = [1, 128], strides = [1, 1]} : vector<24x128xf32> to vector<1x128xf32>
    %278 = vector.extract_strided_slice %86 {offsets = [6, 0], sizes = [1, 128], strides = [1, 1]} : vector<24x128xf32> to vector<1x128xf32>
    %279 = vector.broadcast %278 : vector<1x128xf32> to vector<16x128xf32>
    %280 = vector.broadcast %34 : vector<16x1xf32> to vector<16x128xf32>
    %281 = arith.mulf %279, %280 : vector<16x128xf32>
    %282 = vector.broadcast %277 : vector<1x128xf32> to vector<16x128xf32>
    %283 = arith.mulf %282, %264 : vector<16x128xf32>
    %284 = arith.mulf %281, %268 : vector<16x128xf32>
    %285 = arith.subf %283, %284 : vector<16x128xf32>
    %286 = vector.broadcast %277 : vector<1x128xf32> to vector<16x128xf32>
    %287 = arith.mulf %286, %268 : vector<16x128xf32>
    %288 = arith.mulf %281, %264 : vector<16x128xf32>
    %289 = arith.addf %287, %288 : vector<16x128xf32>
    %290 = vector.broadcast %277 : vector<1x128xf32> to vector<16x128xf32>
    %291 = arith.mulf %290, %272 : vector<16x128xf32>
    %292 = arith.mulf %281, %276 : vector<16x128xf32>
    %293 = arith.addf %291, %292 : vector<16x128xf32>
    %294 = vector.broadcast %277 : vector<1x128xf32> to vector<16x128xf32>
    %295 = arith.mulf %294, %276 : vector<16x128xf32>
    %296 = arith.mulf %281, %272 : vector<16x128xf32>
    %297 = arith.subf %295, %296 : vector<16x128xf32>
    %298 = vector.extract_strided_slice %85 {offsets = [10, 0], sizes = [1, 128], strides = [1, 1]} : vector<24x128xf32> to vector<1x128xf32>
    %299 = vector.extract_strided_slice %86 {offsets = [10, 0], sizes = [1, 128], strides = [1, 1]} : vector<24x128xf32> to vector<1x128xf32>
    %300 = vector.broadcast %299 : vector<1x128xf32> to vector<16x128xf32>
    %301 = vector.broadcast %34 : vector<16x1xf32> to vector<16x128xf32>
    %302 = arith.mulf %300, %301 : vector<16x128xf32>
    %303 = vector.broadcast %298 : vector<1x128xf32> to vector<16x128xf32>
    %304 = arith.mulf %303, %285 : vector<16x128xf32>
    %305 = arith.mulf %302, %293 : vector<16x128xf32>
    %306 = arith.addf %304, %305 : vector<16x128xf32>
    %307 = vector.broadcast %298 : vector<1x128xf32> to vector<16x128xf32>
    %308 = arith.mulf %307, %289 : vector<16x128xf32>
    %309 = arith.mulf %302, %297 : vector<16x128xf32>
    %310 = arith.addf %308, %309 : vector<16x128xf32>
    %311 = vector.extract_strided_slice %85 {offsets = [14, 0], sizes = [1, 128], strides = [1, 1]} : vector<24x128xf32> to vector<1x128xf32>
    %312 = vector.extract_strided_slice %86 {offsets = [14, 0], sizes = [1, 128], strides = [1, 1]} : vector<24x128xf32> to vector<1x128xf32>
    %313 = vector.broadcast %312 : vector<1x128xf32> to vector<16x128xf32>
    %314 = vector.broadcast %34 : vector<16x1xf32> to vector<16x128xf32>
    %315 = arith.mulf %313, %314 : vector<16x128xf32>
    %316 = vector.broadcast %311 : vector<1x128xf32> to vector<16x128xf32>
    %317 = arith.mulf %316, %306 : vector<16x128xf32>
    %318 = arith.mulf %315, %310 : vector<16x128xf32>
    %319 = arith.subf %317, %318 : vector<16x128xf32>
    %320 = vector.broadcast %311 : vector<1x128xf32> to vector<16x128xf32>
    %321 = arith.mulf %320, %310 : vector<16x128xf32>
    %322 = arith.mulf %315, %306 : vector<16x128xf32>
    %323 = arith.addf %321, %322 : vector<16x128xf32>
    %c0_54 = arith.constant 0 : index
    %c0_55 = arith.constant 0 : index
    %324 = vector.load %arg5[%c0_54, %c0_55] : memref<32x256xf32, #tpu.memory_space<vmem>>, vector<16x128xf32>
    tpu.vector_store %arg5[%c0_54, %c0_55], %319 {strides = array<i32>} : memref<32x256xf32, #tpu.memory_space<vmem>>, vector<16x128xf32>,
    %c16_56 = arith.constant 16 : index
    %c0_57 = arith.constant 0 : index
    %325 = vector.load %arg5[%c16_56, %c0_57] : memref<32x256xf32, #tpu.memory_space<vmem>>, vector<16x128xf32>
    tpu.vector_store %arg5[%c16_56, %c0_57], %319 {strides = array<i32>} : memref<32x256xf32, #tpu.memory_space<vmem>>, vector<16x128xf32>,
    %c0_58 = arith.constant 0 : index
    %c128_59 = arith.constant 128 : index
    %326 = vector.load %arg5[%c0_58, %c128_59] : memref<32x256xf32, #tpu.memory_space<vmem>>, vector<16x128xf32>
    tpu.vector_store %arg5[%c0_58, %c128_59], %323 {strides = array<i32>} : memref<32x256xf32, #tpu.memory_space<vmem>>, vector<16x128xf32>,
    %c16_60 = arith.constant 16 : index
    %c128_61 = arith.constant 128 : index
    %327 = vector.load %arg5[%c16_60, %c128_61] : memref<32x256xf32, #tpu.memory_space<vmem>>, vector<16x128xf32>
    tpu.vector_store %arg5[%c16_60, %c128_61], %323 {strides = array<i32>} : memref<32x256xf32, #tpu.memory_space<vmem>>, vector<16x128xf32>,
    %c8 = arith.constant 8 : index
    %c0_62 = arith.constant 0 : index
    %328 = vector.load %arg5[%c8, %c0_62] : memref<32x256xf32, #tpu.memory_space<vmem>>, vector<16x256xf32>
    %329 = vector.extract_strided_slice %328 {offsets = [0, 0], sizes = [16, 128], strides = [1, 1]} : vector<16x256xf32> to vector<16x128xf32>
    %330 = vector.extract_strided_slice %328 {offsets = [0, 128], sizes = [16, 128], strides = [1, 1]} : vector<16x256xf32> to vector<16x128xf32>
    %331 = vector.extract_strided_slice %85 {offsets = [3, 0], sizes = [1, 128], strides = [1, 1]} : vector<24x128xf32> to vector<1x128xf32>
    %332 = vector.extract_strided_slice %86 {offsets = [3, 0], sizes = [1, 128], strides = [1, 1]} : vector<24x128xf32> to vector<1x128xf32>
    %333 = vector.broadcast %332 : vector<1x128xf32> to vector<16x128xf32>
    %334 = vector.broadcast %44 : vector<16x1xf32> to vector<16x128xf32>
    %335 = arith.mulf %333, %334 : vector<16x128xf32>
    %336 = vector.broadcast %331 : vector<1x128xf32> to vector<16x128xf32>
    %337 = arith.mulf %336, %319 : vector<16x128xf32>
    %338 = arith.mulf %335, %329 : vector<16x128xf32>
    %339 = arith.addf %337, %338 : vector<16x128xf32>
    %340 = vector.broadcast %331 : vector<1x128xf32> to vector<16x128xf32>
    %341 = arith.mulf %340, %323 : vector<16x128xf32>
    %342 = arith.mulf %335, %330 : vector<16x128xf32>
    %343 = arith.addf %341, %342 : vector<16x128xf32>
    %344 = vector.broadcast %331 : vector<1x128xf32> to vector<16x128xf32>
    %345 = arith.mulf %344, %329 : vector<16x128xf32>
    %346 = arith.mulf %335, %319 : vector<16x128xf32>
    %347 = arith.subf %345, %346 : vector<16x128xf32>
    %348 = vector.broadcast %331 : vector<1x128xf32> to vector<16x128xf32>
    %349 = arith.mulf %348, %330 : vector<16x128xf32>
    %350 = arith.mulf %335, %323 : vector<16x128xf32>
    %351 = arith.subf %349, %350 : vector<16x128xf32>
    %352 = vector.extract_strided_slice %85 {offsets = [7, 0], sizes = [1, 128], strides = [1, 1]} : vector<24x128xf32> to vector<1x128xf32>
    %353 = vector.extract_strided_slice %86 {offsets = [7, 0], sizes = [1, 128], strides = [1, 1]} : vector<24x128xf32> to vector<1x128xf32>
    %354 = vector.broadcast %353 : vector<1x128xf32> to vector<16x128xf32>
    %355 = vector.broadcast %44 : vector<16x1xf32> to vector<16x128xf32>
    %356 = arith.mulf %354, %355 : vector<16x128xf32>
    %357 = vector.broadcast %352 : vector<1x128xf32> to vector<16x128xf32>
    %358 = arith.mulf %357, %339 : vector<16x128xf32>
    %359 = arith.mulf %356, %343 : vector<16x128xf32>
    %360 = arith.subf %358, %359 : vector<16x128xf32>
    %361 = vector.broadcast %352 : vector<1x128xf32> to vector<16x128xf32>
    %362 = arith.mulf %361, %343 : vector<16x128xf32>
    %363 = arith.mulf %356, %339 : vector<16x128xf32>
    %364 = arith.addf %362, %363 : vector<16x128xf32>
    %365 = vector.broadcast %352 : vector<1x128xf32> to vector<16x128xf32>
    %366 = arith.mulf %365, %347 : vector<16x128xf32>
    %367 = arith.mulf %356, %351 : vector<16x128xf32>
    %368 = arith.addf %366, %367 : vector<16x128xf32>
    %369 = vector.broadcast %352 : vector<1x128xf32> to vector<16x128xf32>
    %370 = arith.mulf %369, %351 : vector<16x128xf32>
    %371 = arith.mulf %356, %347 : vector<16x128xf32>
    %372 = arith.subf %370, %371 : vector<16x128xf32>
    %373 = vector.extract_strided_slice %85 {offsets = [11, 0], sizes = [1, 128], strides = [1, 1]} : vector<24x128xf32> to vector<1x128xf32>
    %374 = vector.extract_strided_slice %86 {offsets = [11, 0], sizes = [1, 128], strides = [1, 1]} : vector<24x128xf32> to vector<1x128xf32>
    %375 = vector.broadcast %374 : vector<1x128xf32> to vector<16x128xf32>
    %376 = vector.broadcast %44 : vector<16x1xf32> to vector<16x128xf32>
    %377 = arith.mulf %375, %376 : vector<16x128xf32>
    %378 = vector.broadcast %373 : vector<1x128xf32> to vector<16x128xf32>
    %379 = arith.mulf %378, %360 : vector<16x128xf32>
    %380 = arith.mulf %377, %368 : vector<16x128xf32>
    %381 = arith.addf %379, %380 : vector<16x128xf32>
    %382 = vector.broadcast %373 : vector<1x128xf32> to vector<16x128xf32>
    %383 = arith.mulf %382, %364 : vector<16x128xf32>
    %384 = arith.mulf %377, %372 : vector<16x128xf32>
    %385 = arith.addf %383, %384 : vector<16x128xf32>
    %386 = vector.extract_strided_slice %85 {offsets = [15, 0], sizes = [1, 128], strides = [1, 1]} : vector<24x128xf32> to vector<1x128xf32>
    %387 = vector.extract_strided_slice %86 {offsets = [15, 0], sizes = [1, 128], strides = [1, 1]} : vector<24x128xf32> to vector<1x128xf32>
    %388 = vector.broadcast %387 : vector<1x128xf32> to vector<16x128xf32>
    %389 = vector.broadcast %44 : vector<16x1xf32> to vector<16x128xf32>
    %390 = arith.mulf %388, %389 : vector<16x128xf32>
    %391 = vector.broadcast %386 : vector<1x128xf32> to vector<16x128xf32>
    %392 = arith.mulf %391, %381 : vector<16x128xf32>
    %393 = arith.mulf %390, %385 : vector<16x128xf32>
    %394 = arith.subf %392, %393 : vector<16x128xf32>
    %395 = vector.broadcast %386 : vector<1x128xf32> to vector<16x128xf32>
    %396 = arith.mulf %395, %385 : vector<16x128xf32>
    %397 = arith.mulf %390, %381 : vector<16x128xf32>
    %398 = arith.addf %396, %397 : vector<16x128xf32>
    %399 = vector.extract_strided_slice %85 {offsets = [16, 0], sizes = [1, 128], strides = [1, 1]} : vector<24x128xf32> to vector<1x128xf32>
    %400 = vector.extract_strided_slice %86 {offsets = [16, 0], sizes = [1, 128], strides = [1, 1]} : vector<24x128xf32> to vector<1x128xf32>
    %c0_63 = arith.constant 0 : index
    %c0_64 = arith.constant 0 : index
    %401 = vector.load %arg5[%c0_63, %c0_64] : memref<32x256xf32, #tpu.memory_space<vmem>>, vector<16x128xf32>
    tpu.vector_store %arg5[%c0_63, %c0_64], %394 {strides = array<i32>} : memref<32x256xf32, #tpu.memory_space<vmem>>, vector<16x128xf32>,
    %c16_65 = arith.constant 16 : index
    %c0_66 = arith.constant 0 : index
    %402 = vector.load %arg5[%c16_65, %c0_66] : memref<32x256xf32, #tpu.memory_space<vmem>>, vector<16x128xf32>
    tpu.vector_store %arg5[%c16_65, %c0_66], %394 {strides = array<i32>} : memref<32x256xf32, #tpu.memory_space<vmem>>, vector<16x128xf32>,
    %c0_67 = arith.constant 0 : index
    %c128_68 = arith.constant 128 : index
    %403 = vector.load %arg5[%c0_67, %c128_68] : memref<32x256xf32, #tpu.memory_space<vmem>>, vector<16x128xf32>
    tpu.vector_store %arg5[%c0_67, %c128_68], %398 {strides = array<i32>} : memref<32x256xf32, #tpu.memory_space<vmem>>, vector<16x128xf32>,
    %c16_69 = arith.constant 16 : index
    %c128_70 = arith.constant 128 : index
    %404 = vector.load %arg5[%c16_69, %c128_70] : memref<32x256xf32, #tpu.memory_space<vmem>>, vector<16x128xf32>
    tpu.vector_store %arg5[%c16_69, %c128_70], %398 {strides = array<i32>} : memref<32x256xf32, #tpu.memory_space<vmem>>, vector<16x128xf32>,
    %c2_71 = arith.constant 2 : index
    %c0_72 = arith.constant 0 : index
    %405 = vector.load %arg5[%c2_71, %c0_72] : memref<32x256xf32, #tpu.memory_space<vmem>>, vector<16x256xf32>
    %c14_73 = arith.constant 14 : index
    %c0_74 = arith.constant 0 : index
    %406 = vector.load %arg5[%c14_73, %c0_74] : memref<32x256xf32, #tpu.memory_space<vmem>>, vector<16x256xf32>
    %407 = vector.shape_cast %19 : vector<16x1xi1> to vector<16x1xi1>
    %408 = vector.broadcast %407 : vector<16x1xi1> to vector<16x256xi1>
    %409 = arith.select %408, %405, %406 : vector<16x256xi1>, vector<16x256xf32>
    %410 = vector.extract_strided_slice %409 {offsets = [0, 0], sizes = [16, 128], strides = [1, 1]} : vector<16x256xf32> to vector<16x128xf32>
    %411 = vector.extract_strided_slice %409 {offsets = [0, 128], sizes = [16, 128], strides = [1, 1]} : vector<16x256xf32> to vector<16x128xf32>
    %412 = vector.broadcast %399 : vector<1x128xf32> to vector<16x128xf32>
    %413 = arith.mulf %412, %394 : vector<16x128xf32>
    %414 = vector.broadcast %400 : vector<1x128xf32> to vector<16x128xf32>
    %415 = vector.broadcast %23 : vector<16x1xf32> to vector<16x128xf32>
    %416 = arith.mulf %414, %415 : vector<16x128xf32>
    %417 = arith.mulf %416, %410 : vector<16x128xf32>
    %418 = arith.addf %413, %417 : vector<16x128xf32>
    %419 = vector.broadcast %399 : vector<1x128xf32> to vector<16x128xf32>
    %420 = arith.mulf %419, %398 : vector<16x128xf32>
    %421 = vector.broadcast %400 : vector<1x128xf32> to vector<16x128xf32>
    %422 = vector.broadcast %23 : vector<16x1xf32> to vector<16x128xf32>
    %423 = arith.mulf %421, %422 : vector<16x128xf32>
    %424 = arith.mulf %423, %411 : vector<16x128xf32>
    %425 = arith.addf %420, %424 : vector<16x128xf32>
    %426 = arith.subf %418, %394 : vector<16x128xf32>
    %427 = vector.broadcast %7 : vector<16x1xf32> to vector<16x128xf32>
    %428 = arith.mulf %427, %426 : vector<16x128xf32>
    %429 = arith.addf %394, %428 : vector<16x128xf32>
    %430 = arith.subf %425, %398 : vector<16x128xf32>
    %431 = vector.broadcast %7 : vector<16x1xf32> to vector<16x128xf32>
    %432 = arith.mulf %431, %430 : vector<16x128xf32>
    %433 = arith.addf %398, %432 : vector<16x128xf32>
    %434 = vector.extract_strided_slice %85 {offsets = [20, 0], sizes = [1, 128], strides = [1, 1]} : vector<24x128xf32> to vector<1x128xf32>
    %435 = vector.extract_strided_slice %86 {offsets = [20, 0], sizes = [1, 128], strides = [1, 1]} : vector<24x128xf32> to vector<1x128xf32>
    %cst_75 = arith.constant 1.000000e+00 : f32
    %436 = vector.broadcast %cst_75 : f32 to vector<1x128xf32>
    %437 = arith.subf %434, %436 : vector<1x128xf32>
    %438 = vector.broadcast %7 : vector<16x1xf32> to vector<16x128xf32>
    %439 = vector.broadcast %437 : vector<1x128xf32> to vector<16x128xf32>
    %440 = arith.mulf %438, %439 : vector<16x128xf32>
    %cst_76 = arith.constant 1.000000e+00 : f32
    %441 = vector.broadcast %cst_76 : f32 to vector<16x128xf32>
    %442 = arith.addf %441, %440 : vector<16x128xf32>
    %443 = arith.mulf %7, %23 : vector<16x1xf32>
    %444 = vector.broadcast %443 : vector<16x1xf32> to vector<16x128xf32>
    %445 = vector.broadcast %435 : vector<1x128xf32> to vector<16x128xf32>
    %446 = arith.mulf %444, %445 : vector<16x128xf32>
    %447 = arith.mulf %442, %429 : vector<16x128xf32>
    %448 = arith.mulf %446, %433 : vector<16x128xf32>
    %449 = arith.subf %447, %448 : vector<16x128xf32>
    %450 = arith.mulf %442, %433 : vector<16x128xf32>
    %451 = arith.mulf %446, %429 : vector<16x128xf32>
    %452 = arith.addf %450, %451 : vector<16x128xf32>
    %453 = vector.extract_strided_slice %85 {offsets = [17, 0], sizes = [1, 128], strides = [1, 1]} : vector<24x128xf32> to vector<1x128xf32>
    %454 = vector.extract_strided_slice %86 {offsets = [17, 0], sizes = [1, 128], strides = [1, 1]} : vector<24x128xf32> to vector<1x128xf32>
    %c0_77 = arith.constant 0 : index
    %c0_78 = arith.constant 0 : index
    %455 = vector.load %arg5[%c0_77, %c0_78] : memref<32x256xf32, #tpu.memory_space<vmem>>, vector<16x128xf32>
    tpu.vector_store %arg5[%c0_77, %c0_78], %449 {strides = array<i32>} : memref<32x256xf32, #tpu.memory_space<vmem>>, vector<16x128xf32>,
    %c16_79 = arith.constant 16 : index
    %c0_80 = arith.constant 0 : index
    %456 = vector.load %arg5[%c16_79, %c0_80] : memref<32x256xf32, #tpu.memory_space<vmem>>, vector<16x128xf32>
    tpu.vector_store %arg5[%c16_79, %c0_80], %449 {strides = array<i32>} : memref<32x256xf32, #tpu.memory_space<vmem>>, vector<16x128xf32>,
    %c0_81 = arith.constant 0 : index
    %c128_82 = arith.constant 128 : index
    %457 = vector.load %arg5[%c0_81, %c128_82] : memref<32x256xf32, #tpu.memory_space<vmem>>, vector<16x128xf32>
    tpu.vector_store %arg5[%c0_81, %c128_82], %452 {strides = array<i32>} : memref<32x256xf32, #tpu.memory_space<vmem>>, vector<16x128xf32>,
    %c16_83 = arith.constant 16 : index
    %c128_84 = arith.constant 128 : index
    %458 = vector.load %arg5[%c16_83, %c128_84] : memref<32x256xf32, #tpu.memory_space<vmem>>, vector<16x128xf32>
    tpu.vector_store %arg5[%c16_83, %c128_84], %452 {strides = array<i32>} : memref<32x256xf32, #tpu.memory_space<vmem>>, vector<16x128xf32>,
    %c4_85 = arith.constant 4 : index
    %c0_86 = arith.constant 0 : index
    %459 = vector.load %arg5[%c4_85, %c0_86] : memref<32x256xf32, #tpu.memory_space<vmem>>, vector<16x256xf32>
    %c12_87 = arith.constant 12 : index
    %c0_88 = arith.constant 0 : index
    %460 = vector.load %arg5[%c12_87, %c0_88] : memref<32x256xf32, #tpu.memory_space<vmem>>, vector<16x256xf32>
    %461 = vector.shape_cast %30 : vector<16x1xi1> to vector<16x1xi1>
    %462 = vector.broadcast %461 : vector<16x1xi1> to vector<16x256xi1>
    %463 = arith.select %462, %459, %460 : vector<16x256xi1>, vector<16x256xf32>
    %464 = vector.extract_strided_slice %463 {offsets = [0, 0], sizes = [16, 128], strides = [1, 1]} : vector<16x256xf32> to vector<16x128xf32>
    %465 = vector.extract_strided_slice %463 {offsets = [0, 128], sizes = [16, 128], strides = [1, 1]} : vector<16x256xf32> to vector<16x128xf32>
    %466 = vector.broadcast %453 : vector<1x128xf32> to vector<16x128xf32>
    %467 = arith.mulf %466, %449 : vector<16x128xf32>
    %468 = vector.broadcast %454 : vector<1x128xf32> to vector<16x128xf32>
    %469 = vector.broadcast %34 : vector<16x1xf32> to vector<16x128xf32>
    %470 = arith.mulf %468, %469 : vector<16x128xf32>
    %471 = arith.mulf %470, %464 : vector<16x128xf32>
    %472 = arith.addf %467, %471 : vector<16x128xf32>
    %473 = vector.broadcast %453 : vector<1x128xf32> to vector<16x128xf32>
    %474 = arith.mulf %473, %452 : vector<16x128xf32>
    %475 = vector.broadcast %454 : vector<1x128xf32> to vector<16x128xf32>
    %476 = vector.broadcast %34 : vector<16x1xf32> to vector<16x128xf32>
    %477 = arith.mulf %475, %476 : vector<16x128xf32>
    %478 = arith.mulf %477, %465 : vector<16x128xf32>
    %479 = arith.addf %474, %478 : vector<16x128xf32>
    %480 = arith.subf %472, %449 : vector<16x128xf32>
    %481 = vector.broadcast %18 : vector<16x1xf32> to vector<16x128xf32>
    %482 = arith.mulf %481, %480 : vector<16x128xf32>
    %483 = arith.addf %449, %482 : vector<16x128xf32>
    %484 = arith.subf %479, %452 : vector<16x128xf32>
    %485 = vector.broadcast %18 : vector<16x1xf32> to vector<16x128xf32>
    %486 = arith.mulf %485, %484 : vector<16x128xf32>
    %487 = arith.addf %452, %486 : vector<16x128xf32>
    %488 = vector.extract_strided_slice %85 {offsets = [21, 0], sizes = [1, 128], strides = [1, 1]} : vector<24x128xf32> to vector<1x128xf32>
    %489 = vector.extract_strided_slice %86 {offsets = [21, 0], sizes = [1, 128], strides = [1, 1]} : vector<24x128xf32> to vector<1x128xf32>
    %cst_89 = arith.constant 1.000000e+00 : f32
    %490 = vector.broadcast %cst_89 : f32 to vector<1x128xf32>
    %491 = arith.subf %488, %490 : vector<1x128xf32>
    %492 = vector.broadcast %18 : vector<16x1xf32> to vector<16x128xf32>
    %493 = vector.broadcast %491 : vector<1x128xf32> to vector<16x128xf32>
    %494 = arith.mulf %492, %493 : vector<16x128xf32>
    %cst_90 = arith.constant 1.000000e+00 : f32
    %495 = vector.broadcast %cst_90 : f32 to vector<16x128xf32>
    %496 = arith.addf %495, %494 : vector<16x128xf32>
    %497 = arith.mulf %18, %34 : vector<16x1xf32>
    %498 = vector.broadcast %497 : vector<16x1xf32> to vector<16x128xf32>
    %499 = vector.broadcast %489 : vector<1x128xf32> to vector<16x128xf32>
    %500 = arith.mulf %498, %499 : vector<16x128xf32>
    %501 = arith.mulf %496, %483 : vector<16x128xf32>
    %502 = arith.mulf %500, %487 : vector<16x128xf32>
    %503 = arith.subf %501, %502 : vector<16x128xf32>
    %504 = arith.mulf %496, %487 : vector<16x128xf32>
    %505 = arith.mulf %500, %483 : vector<16x128xf32>
    %506 = arith.addf %504, %505 : vector<16x128xf32>
    %507 = vector.extract_strided_slice %85 {offsets = [18, 0], sizes = [1, 128], strides = [1, 1]} : vector<24x128xf32> to vector<1x128xf32>
    %508 = vector.extract_strided_slice %86 {offsets = [18, 0], sizes = [1, 128], strides = [1, 1]} : vector<24x128xf32> to vector<1x128xf32>
    %c0_91 = arith.constant 0 : index
    %c0_92 = arith.constant 0 : index
    %509 = vector.load %arg5[%c0_91, %c0_92] : memref<32x256xf32, #tpu.memory_space<vmem>>, vector<16x128xf32>
    tpu.vector_store %arg5[%c0_91, %c0_92], %503 {strides = array<i32>} : memref<32x256xf32, #tpu.memory_space<vmem>>, vector<16x128xf32>,
    %c16_93 = arith.constant 16 : index
    %c0_94 = arith.constant 0 : index
    %510 = vector.load %arg5[%c16_93, %c0_94] : memref<32x256xf32, #tpu.memory_space<vmem>>, vector<16x128xf32>
    tpu.vector_store %arg5[%c16_93, %c0_94], %503 {strides = array<i32>} : memref<32x256xf32, #tpu.memory_space<vmem>>, vector<16x128xf32>,
    %c0_95 = arith.constant 0 : index
    %c128_96 = arith.constant 128 : index
    %511 = vector.load %arg5[%c0_95, %c128_96] : memref<32x256xf32, #tpu.memory_space<vmem>>, vector<16x128xf32>
    tpu.vector_store %arg5[%c0_95, %c128_96], %506 {strides = array<i32>} : memref<32x256xf32, #tpu.memory_space<vmem>>, vector<16x128xf32>,
    %c16_97 = arith.constant 16 : index
    %c128_98 = arith.constant 128 : index
    %512 = vector.load %arg5[%c16_97, %c128_98] : memref<32x256xf32, #tpu.memory_space<vmem>>, vector<16x128xf32>
    tpu.vector_store %arg5[%c16_97, %c128_98], %506 {strides = array<i32>} : memref<32x256xf32, #tpu.memory_space<vmem>>, vector<16x128xf32>,
    %c8_99 = arith.constant 8 : index
    %c0_100 = arith.constant 0 : index
    %513 = vector.load %arg5[%c8_99, %c0_100] : memref<32x256xf32, #tpu.memory_space<vmem>>, vector<16x256xf32>
    %514 = vector.extract_strided_slice %513 {offsets = [0, 0], sizes = [16, 128], strides = [1, 1]} : vector<16x256xf32> to vector<16x128xf32>
    %515 = vector.extract_strided_slice %513 {offsets = [0, 128], sizes = [16, 128], strides = [1, 1]} : vector<16x256xf32> to vector<16x128xf32>
    %516 = vector.broadcast %507 : vector<1x128xf32> to vector<16x128xf32>
    %517 = arith.mulf %516, %503 : vector<16x128xf32>
    %518 = vector.broadcast %508 : vector<1x128xf32> to vector<16x128xf32>
    %519 = vector.broadcast %44 : vector<16x1xf32> to vector<16x128xf32>
    %520 = arith.mulf %518, %519 : vector<16x128xf32>
    %521 = arith.mulf %520, %514 : vector<16x128xf32>
    %522 = arith.addf %517, %521 : vector<16x128xf32>
    %523 = vector.broadcast %507 : vector<1x128xf32> to vector<16x128xf32>
    %524 = arith.mulf %523, %506 : vector<16x128xf32>
    %525 = vector.broadcast %508 : vector<1x128xf32> to vector<16x128xf32>
    %526 = vector.broadcast %44 : vector<16x1xf32> to vector<16x128xf32>
    %527 = arith.mulf %525, %526 : vector<16x128xf32>
    %528 = arith.mulf %527, %515 : vector<16x128xf32>
    %529 = arith.addf %524, %528 : vector<16x128xf32>
    %530 = arith.subf %522, %503 : vector<16x128xf32>
    %531 = vector.broadcast %29 : vector<16x1xf32> to vector<16x128xf32>
    %532 = arith.mulf %531, %530 : vector<16x128xf32>
    %533 = arith.addf %503, %532 : vector<16x128xf32>
    %534 = arith.subf %529, %506 : vector<16x128xf32>
    %535 = vector.broadcast %29 : vector<16x1xf32> to vector<16x128xf32>
    %536 = arith.mulf %535, %534 : vector<16x128xf32>
    %537 = arith.addf %506, %536 : vector<16x128xf32>
    %538 = vector.extract_strided_slice %85 {offsets = [22, 0], sizes = [1, 128], strides = [1, 1]} : vector<24x128xf32> to vector<1x128xf32>
    %539 = vector.extract_strided_slice %86 {offsets = [22, 0], sizes = [1, 128], strides = [1, 1]} : vector<24x128xf32> to vector<1x128xf32>
    %cst_101 = arith.constant 1.000000e+00 : f32
    %540 = vector.broadcast %cst_101 : f32 to vector<1x128xf32>
    %541 = arith.subf %538, %540 : vector<1x128xf32>
    %542 = vector.broadcast %29 : vector<16x1xf32> to vector<16x128xf32>
    %543 = vector.broadcast %541 : vector<1x128xf32> to vector<16x128xf32>
    %544 = arith.mulf %542, %543 : vector<16x128xf32>
    %cst_102 = arith.constant 1.000000e+00 : f32
    %545 = vector.broadcast %cst_102 : f32 to vector<16x128xf32>
    %546 = arith.addf %545, %544 : vector<16x128xf32>
    %547 = arith.mulf %29, %44 : vector<16x1xf32>
    %548 = vector.broadcast %547 : vector<16x1xf32> to vector<16x128xf32>
    %549 = vector.broadcast %539 : vector<1x128xf32> to vector<16x128xf32>
    %550 = arith.mulf %548, %549 : vector<16x128xf32>
    %551 = arith.mulf %546, %533 : vector<16x128xf32>
    %552 = arith.mulf %550, %537 : vector<16x128xf32>
    %553 = arith.subf %551, %552 : vector<16x128xf32>
    %554 = arith.mulf %546, %537 : vector<16x128xf32>
    %555 = arith.mulf %550, %533 : vector<16x128xf32>
    %556 = arith.addf %554, %555 : vector<16x128xf32>
    %557 = vector.extract_strided_slice %85 {offsets = [19, 0], sizes = [1, 128], strides = [1, 1]} : vector<24x128xf32> to vector<1x128xf32>
    %558 = vector.extract_strided_slice %86 {offsets = [19, 0], sizes = [1, 128], strides = [1, 1]} : vector<24x128xf32> to vector<1x128xf32>
    %c0_103 = arith.constant 0 : index
    %c0_104 = arith.constant 0 : index
    %559 = vector.load %arg5[%c0_103, %c0_104] : memref<32x256xf32, #tpu.memory_space<vmem>>, vector<16x128xf32>
    tpu.vector_store %arg5[%c0_103, %c0_104], %553 {strides = array<i32>} : memref<32x256xf32, #tpu.memory_space<vmem>>, vector<16x128xf32>,
    %c16_105 = arith.constant 16 : index
    %c0_106 = arith.constant 0 : index
    %560 = vector.load %arg5[%c16_105, %c0_106] : memref<32x256xf32, #tpu.memory_space<vmem>>, vector<16x128xf32>
    tpu.vector_store %arg5[%c16_105, %c0_106], %553 {strides = array<i32>} : memref<32x256xf32, #tpu.memory_space<vmem>>, vector<16x128xf32>,
    %c0_107 = arith.constant 0 : index
    %c128_108 = arith.constant 128 : index
    %561 = vector.load %arg5[%c0_107, %c128_108] : memref<32x256xf32, #tpu.memory_space<vmem>>, vector<16x128xf32>
    tpu.vector_store %arg5[%c0_107, %c128_108], %556 {strides = array<i32>} : memref<32x256xf32, #tpu.memory_space<vmem>>, vector<16x128xf32>,
    %c16_109 = arith.constant 16 : index
    %c128_110 = arith.constant 128 : index
    %562 = vector.load %arg5[%c16_109, %c128_110] : memref<32x256xf32, #tpu.memory_space<vmem>>, vector<16x128xf32>
    tpu.vector_store %arg5[%c16_109, %c128_110], %556 {strides = array<i32>} : memref<32x256xf32, #tpu.memory_space<vmem>>, vector<16x128xf32>,
    %c1_111 = arith.constant 1 : index
    %c0_112 = arith.constant 0 : index
    %563 = vector.load %arg5[%c1_111, %c0_112] : memref<32x256xf32, #tpu.memory_space<vmem>>, vector<16x256xf32>
    %c15_113 = arith.constant 15 : index
    %c0_114 = arith.constant 0 : index
    %564 = vector.load %arg5[%c15_113, %c0_114] : memref<32x256xf32, #tpu.memory_space<vmem>>, vector<16x256xf32>
    %565 = vector.shape_cast %8 : vector<16x1xi1> to vector<16x1xi1>
    %566 = vector.broadcast %565 : vector<16x1xi1> to vector<16x256xi1>
    %567 = arith.select %566, %563, %564 : vector<16x256xi1>, vector<16x256xf32>
    %568 = vector.extract_strided_slice %567 {offsets = [0, 0], sizes = [16, 128], strides = [1, 1]} : vector<16x256xf32> to vector<16x128xf32>
    %569 = vector.extract_strided_slice %567 {offsets = [0, 128], sizes = [16, 128], strides = [1, 1]} : vector<16x256xf32> to vector<16x128xf32>
    %570 = vector.broadcast %557 : vector<1x128xf32> to vector<16x128xf32>
    %571 = arith.mulf %570, %553 : vector<16x128xf32>
    %572 = vector.broadcast %558 : vector<1x128xf32> to vector<16x128xf32>
    %573 = vector.broadcast %12 : vector<16x1xf32> to vector<16x128xf32>
    %574 = arith.mulf %572, %573 : vector<16x128xf32>
    %575 = arith.mulf %574, %568 : vector<16x128xf32>
    %576 = arith.addf %571, %575 : vector<16x128xf32>
    %577 = vector.broadcast %557 : vector<1x128xf32> to vector<16x128xf32>
    %578 = arith.mulf %577, %556 : vector<16x128xf32>
    %579 = vector.broadcast %558 : vector<1x128xf32> to vector<16x128xf32>
    %580 = vector.broadcast %12 : vector<16x1xf32> to vector<16x128xf32>
    %581 = arith.mulf %579, %580 : vector<16x128xf32>
    %582 = arith.mulf %581, %569 : vector<16x128xf32>
    %583 = arith.addf %578, %582 : vector<16x128xf32>
    %584 = arith.subf %576, %553 : vector<16x128xf32>
    %585 = vector.broadcast %40 : vector<16x1xf32> to vector<16x128xf32>
    %586 = arith.mulf %585, %584 : vector<16x128xf32>
    %587 = arith.addf %553, %586 : vector<16x128xf32>
    %588 = arith.subf %583, %556 : vector<16x128xf32>
    %589 = vector.broadcast %40 : vector<16x1xf32> to vector<16x128xf32>
    %590 = arith.mulf %589, %588 : vector<16x128xf32>
    %591 = arith.addf %556, %590 : vector<16x128xf32>
    %592 = vector.extract_strided_slice %85 {offsets = [23, 0], sizes = [1, 128], strides = [1, 1]} : vector<24x128xf32> to vector<1x128xf32>
    %593 = vector.extract_strided_slice %86 {offsets = [23, 0], sizes = [1, 128], strides = [1, 1]} : vector<24x128xf32> to vector<1x128xf32>
    %cst_115 = arith.constant 1.000000e+00 : f32
    %594 = vector.broadcast %cst_115 : f32 to vector<1x128xf32>
    %595 = arith.subf %592, %594 : vector<1x128xf32>
    %596 = vector.broadcast %40 : vector<16x1xf32> to vector<16x128xf32>
    %597 = vector.broadcast %595 : vector<1x128xf32> to vector<16x128xf32>
    %598 = arith.mulf %596, %597 : vector<16x128xf32>
    %cst_116 = arith.constant 1.000000e+00 : f32
    %599 = vector.broadcast %cst_116 : f32 to vector<16x128xf32>
    %600 = arith.addf %599, %598 : vector<16x128xf32>
    %601 = arith.mulf %40, %12 : vector<16x1xf32>
    %602 = vector.broadcast %601 : vector<16x1xf32> to vector<16x128xf32>
    %603 = vector.broadcast %593 : vector<1x128xf32> to vector<16x128xf32>
    %604 = arith.mulf %602, %603 : vector<16x128xf32>
    %605 = arith.mulf %600, %587 : vector<16x128xf32>
    %606 = arith.mulf %604, %591 : vector<16x128xf32>
    %607 = arith.subf %605, %606 : vector<16x128xf32>
    %608 = arith.mulf %600, %591 : vector<16x128xf32>
    %609 = arith.mulf %604, %587 : vector<16x128xf32>
    %610 = arith.addf %608, %609 : vector<16x128xf32>
    %c1_117 = arith.constant 1 : index
    %c0_118 = arith.constant 0 : index
    %c0_119 = arith.constant 0 : index
    %611 = vector.load %arg2[%c1_117, %c0_118, %c0_119] : memref<2x24x4xf32, #tpu.memory_space<vmem>>, vector<1x24x4xf32>
    %612 = vector.shape_cast %611 : vector<1x24x4xf32> to vector<24x4xf32>
    %cst_120 = arith.constant 0.000000e+00 : f32
    %613 = vector.broadcast %cst_120 : f32 to vector<24x128xf32>
    %c1_121 = arith.constant 1 : index
    %c0_122 = arith.constant 0 : index
    %c0_123 = arith.constant 0 : index
    %614 = vector.load %arg3[%c1_121, %c0_122, %c0_123] : memref<2x24x1xf32, #tpu.memory_space<vmem>>, vector<1x24x1xf32>
    %615 = vector.shape_cast %614 : vector<1x24x1xf32> to vector<24x1xf32>
    %616 = vector.broadcast %615 : vector<24x1xf32> to vector<24x128xf32>
    %617 = arith.addf %613, %616 : vector<24x128xf32>
    %618 = vector.extract_strided_slice %612 {offsets = [0, 0], sizes = [24, 1], strides = [1, 1]} : vector<24x4xf32> to vector<24x1xf32>
    %619 = vector.extract_strided_slice %0 {offsets = [0, 0], sizes = [1, 128], strides = [1, 1]} : vector<4x128xf32> to vector<1x128xf32>
    %620 = vector.broadcast %618 : vector<24x1xf32> to vector<24x128xf32>
    %621 = vector.broadcast %619 : vector<1x128xf32> to vector<24x128xf32>
    %622 = arith.mulf %620, %621 : vector<24x128xf32>
    %623 = arith.addf %617, %622 : vector<24x128xf32>
    %624 = vector.extract_strided_slice %612 {offsets = [0, 1], sizes = [24, 1], strides = [1, 1]} : vector<24x4xf32> to vector<24x1xf32>
    %625 = vector.extract_strided_slice %0 {offsets = [1, 0], sizes = [1, 128], strides = [1, 1]} : vector<4x128xf32> to vector<1x128xf32>
    %626 = vector.broadcast %624 : vector<24x1xf32> to vector<24x128xf32>
    %627 = vector.broadcast %625 : vector<1x128xf32> to vector<24x128xf32>
    %628 = arith.mulf %626, %627 : vector<24x128xf32>
    %629 = arith.addf %623, %628 : vector<24x128xf32>
    %630 = vector.extract_strided_slice %612 {offsets = [0, 2], sizes = [24, 1], strides = [1, 1]} : vector<24x4xf32> to vector<24x1xf32>
    %631 = vector.extract_strided_slice %0 {offsets = [2, 0], sizes = [1, 128], strides = [1, 1]} : vector<4x128xf32> to vector<1x128xf32>
    %632 = vector.broadcast %630 : vector<24x1xf32> to vector<24x128xf32>
    %633 = vector.broadcast %631 : vector<1x128xf32> to vector<24x128xf32>
    %634 = arith.mulf %632, %633 : vector<24x128xf32>
    %635 = arith.addf %629, %634 : vector<24x128xf32>
    %636 = vector.extract_strided_slice %612 {offsets = [0, 3], sizes = [24, 1], strides = [1, 1]} : vector<24x4xf32> to vector<24x1xf32>
    %637 = vector.extract_strided_slice %0 {offsets = [3, 0], sizes = [1, 128], strides = [1, 1]} : vector<4x128xf32> to vector<1x128xf32>
    %638 = vector.broadcast %636 : vector<24x1xf32> to vector<24x128xf32>
    %639 = vector.broadcast %637 : vector<1x128xf32> to vector<24x128xf32>
    %640 = arith.mulf %638, %639 : vector<24x128xf32>
    %641 = arith.addf %635, %640 : vector<24x128xf32>
    %cst_124 = arith.constant 5.000000e-01 : f32
    %642 = vector.broadcast %cst_124 : f32 to vector<24x128xf32>
    %643 = arith.mulf %642, %641 : vector<24x128xf32>
    %644 = math.cos %643 : vector<24x128xf32>
    %645 = math.sin %643 : vector<24x128xf32>
    %c0_125 = arith.constant 0 : index
    %c0_126 = arith.constant 0 : index
    %646 = vector.load %arg5[%c0_125, %c0_126] : memref<32x256xf32, #tpu.memory_space<vmem>>, vector<16x128xf32>
    tpu.vector_store %arg5[%c0_125, %c0_126], %607 {strides = array<i32>} : memref<32x256xf32, #tpu.memory_space<vmem>>, vector<16x128xf32>,
    %c16_127 = arith.constant 16 : index
    %c0_128 = arith.constant 0 : index
    %647 = vector.load %arg5[%c16_127, %c0_128] : memref<32x256xf32, #tpu.memory_space<vmem>>, vector<16x128xf32>
    tpu.vector_store %arg5[%c16_127, %c0_128], %607 {strides = array<i32>} : memref<32x256xf32, #tpu.memory_space<vmem>>, vector<16x128xf32>,
    %c0_129 = arith.constant 0 : index
    %c128_130 = arith.constant 128 : index
    %648 = vector.load %arg5[%c0_129, %c128_130] : memref<32x256xf32, #tpu.memory_space<vmem>>, vector<16x128xf32>
    tpu.vector_store %arg5[%c0_129, %c128_130], %610 {strides = array<i32>} : memref<32x256xf32, #tpu.memory_space<vmem>>, vector<16x128xf32>,
    %c16_131 = arith.constant 16 : index
    %c128_132 = arith.constant 128 : index
    %649 = vector.load %arg5[%c16_131, %c128_132] : memref<32x256xf32, #tpu.memory_space<vmem>>, vector<16x128xf32>
    tpu.vector_store %arg5[%c16_131, %c128_132], %610 {strides = array<i32>} : memref<32x256xf32, #tpu.memory_space<vmem>>, vector<16x128xf32>,
    %c1_133 = arith.constant 1 : index
    %c0_134 = arith.constant 0 : index
    %650 = vector.load %arg5[%c1_133, %c0_134] : memref<32x256xf32, #tpu.memory_space<vmem>>, vector<16x256xf32>
    %c15_135 = arith.constant 15 : index
    %c0_136 = arith.constant 0 : index
    %651 = vector.load %arg5[%c15_135, %c0_136] : memref<32x256xf32, #tpu.memory_space<vmem>>, vector<16x256xf32>
    %652 = vector.shape_cast %8 : vector<16x1xi1> to vector<16x1xi1>
    %653 = vector.broadcast %652 : vector<16x1xi1> to vector<16x256xi1>
    %654 = arith.select %653, %650, %651 : vector<16x256xi1>, vector<16x256xf32>
    %655 = vector.extract_strided_slice %654 {offsets = [0, 0], sizes = [16, 128], strides = [1, 1]} : vector<16x256xf32> to vector<16x128xf32>
    %656 = vector.extract_strided_slice %654 {offsets = [0, 128], sizes = [16, 128], strides = [1, 1]} : vector<16x256xf32> to vector<16x128xf32>
    %657 = vector.extract_strided_slice %644 {offsets = [0, 0], sizes = [1, 128], strides = [1, 1]} : vector<24x128xf32> to vector<1x128xf32>
    %658 = vector.extract_strided_slice %645 {offsets = [0, 0], sizes = [1, 128], strides = [1, 1]} : vector<24x128xf32> to vector<1x128xf32>
    %659 = vector.broadcast %658 : vector<1x128xf32> to vector<16x128xf32>
    %660 = vector.broadcast %12 : vector<16x1xf32> to vector<16x128xf32>
    %661 = arith.mulf %659, %660 : vector<16x128xf32>
    %662 = vector.broadcast %657 : vector<1x128xf32> to vector<16x128xf32>
    %663 = arith.mulf %662, %607 : vector<16x128xf32>
    %664 = arith.mulf %661, %655 : vector<16x128xf32>
    %665 = arith.addf %663, %664 : vector<16x128xf32>
    %666 = vector.broadcast %657 : vector<1x128xf32> to vector<16x128xf32>
    %667 = arith.mulf %666, %610 : vector<16x128xf32>
    %668 = arith.mulf %661, %656 : vector<16x128xf32>
    %669 = arith.addf %667, %668 : vector<16x128xf32>
    %670 = vector.broadcast %657 : vector<1x128xf32> to vector<16x128xf32>
    %671 = arith.mulf %670, %655 : vector<16x128xf32>
    %672 = arith.mulf %661, %607 : vector<16x128xf32>
    %673 = arith.subf %671, %672 : vector<16x128xf32>
    %674 = vector.broadcast %657 : vector<1x128xf32> to vector<16x128xf32>
    %675 = arith.mulf %674, %656 : vector<16x128xf32>
    %676 = arith.mulf %661, %610 : vector<16x128xf32>
    %677 = arith.subf %675, %676 : vector<16x128xf32>
    %678 = vector.extract_strided_slice %644 {offsets = [4, 0], sizes = [1, 128], strides = [1, 1]} : vector<24x128xf32> to vector<1x128xf32>
    %679 = vector.extract_strided_slice %645 {offsets = [4, 0], sizes = [1, 128], strides = [1, 1]} : vector<24x128xf32> to vector<1x128xf32>
    %680 = vector.broadcast %679 : vector<1x128xf32> to vector<16x128xf32>
    %681 = vector.broadcast %12 : vector<16x1xf32> to vector<16x128xf32>
    %682 = arith.mulf %680, %681 : vector<16x128xf32>
    %683 = vector.broadcast %678 : vector<1x128xf32> to vector<16x128xf32>
    %684 = arith.mulf %683, %665 : vector<16x128xf32>
    %685 = arith.mulf %682, %669 : vector<16x128xf32>
    %686 = arith.subf %684, %685 : vector<16x128xf32>
    %687 = vector.broadcast %678 : vector<1x128xf32> to vector<16x128xf32>
    %688 = arith.mulf %687, %669 : vector<16x128xf32>
    %689 = arith.mulf %682, %665 : vector<16x128xf32>
    %690 = arith.addf %688, %689 : vector<16x128xf32>
    %691 = vector.broadcast %678 : vector<1x128xf32> to vector<16x128xf32>
    %692 = arith.mulf %691, %673 : vector<16x128xf32>
    %693 = arith.mulf %682, %677 : vector<16x128xf32>
    %694 = arith.addf %692, %693 : vector<16x128xf32>
    %695 = vector.broadcast %678 : vector<1x128xf32> to vector<16x128xf32>
    %696 = arith.mulf %695, %677 : vector<16x128xf32>
    %697 = arith.mulf %682, %673 : vector<16x128xf32>
    %698 = arith.subf %696, %697 : vector<16x128xf32>
    %699 = vector.extract_strided_slice %644 {offsets = [8, 0], sizes = [1, 128], strides = [1, 1]} : vector<24x128xf32> to vector<1x128xf32>
    %700 = vector.extract_strided_slice %645 {offsets = [8, 0], sizes = [1, 128], strides = [1, 1]} : vector<24x128xf32> to vector<1x128xf32>
    %701 = vector.broadcast %700 : vector<1x128xf32> to vector<16x128xf32>
    %702 = vector.broadcast %12 : vector<16x1xf32> to vector<16x128xf32>
    %703 = arith.mulf %701, %702 : vector<16x128xf32>
    %704 = vector.broadcast %699 : vector<1x128xf32> to vector<16x128xf32>
    %705 = arith.mulf %704, %686 : vector<16x128xf32>
    %706 = arith.mulf %703, %694 : vector<16x128xf32>
    %707 = arith.addf %705, %706 : vector<16x128xf32>
    %708 = vector.broadcast %699 : vector<1x128xf32> to vector<16x128xf32>
    %709 = arith.mulf %708, %690 : vector<16x128xf32>
    %710 = arith.mulf %703, %698 : vector<16x128xf32>
    %711 = arith.addf %709, %710 : vector<16x128xf32>
    %712 = vector.extract_strided_slice %644 {offsets = [12, 0], sizes = [1, 128], strides = [1, 1]} : vector<24x128xf32> to vector<1x128xf32>
    %713 = vector.extract_strided_slice %645 {offsets = [12, 0], sizes = [1, 128], strides = [1, 1]} : vector<24x128xf32> to vector<1x128xf32>
    %714 = vector.broadcast %713 : vector<1x128xf32> to vector<16x128xf32>
    %715 = vector.broadcast %12 : vector<16x1xf32> to vector<16x128xf32>
    %716 = arith.mulf %714, %715 : vector<16x128xf32>
    %717 = vector.broadcast %712 : vector<1x128xf32> to vector<16x128xf32>
    %718 = arith.mulf %717, %707 : vector<16x128xf32>
    %719 = arith.mulf %716, %711 : vector<16x128xf32>
    %720 = arith.subf %718, %719 : vector<16x128xf32>
    %721 = vector.broadcast %712 : vector<1x128xf32> to vector<16x128xf32>
    %722 = arith.mulf %721, %711 : vector<16x128xf32>
    %723 = arith.mulf %716, %707 : vector<16x128xf32>
    %724 = arith.addf %722, %723 : vector<16x128xf32>
    %c0_137 = arith.constant 0 : index
    %c0_138 = arith.constant 0 : index
    %725 = vector.load %arg5[%c0_137, %c0_138] : memref<32x256xf32, #tpu.memory_space<vmem>>, vector<16x128xf32>
    tpu.vector_store %arg5[%c0_137, %c0_138], %720 {strides = array<i32>} : memref<32x256xf32, #tpu.memory_space<vmem>>, vector<16x128xf32>,
    %c16_139 = arith.constant 16 : index
    %c0_140 = arith.constant 0 : index
    %726 = vector.load %arg5[%c16_139, %c0_140] : memref<32x256xf32, #tpu.memory_space<vmem>>, vector<16x128xf32>
    tpu.vector_store %arg5[%c16_139, %c0_140], %720 {strides = array<i32>} : memref<32x256xf32, #tpu.memory_space<vmem>>, vector<16x128xf32>,
    %c0_141 = arith.constant 0 : index
    %c128_142 = arith.constant 128 : index
    %727 = vector.load %arg5[%c0_141, %c128_142] : memref<32x256xf32, #tpu.memory_space<vmem>>, vector<16x128xf32>
    tpu.vector_store %arg5[%c0_141, %c128_142], %724 {strides = array<i32>} : memref<32x256xf32, #tpu.memory_space<vmem>>, vector<16x128xf32>,
    %c16_143 = arith.constant 16 : index
    %c128_144 = arith.constant 128 : index
    %728 = vector.load %arg5[%c16_143, %c128_144] : memref<32x256xf32, #tpu.memory_space<vmem>>, vector<16x128xf32>
    tpu.vector_store %arg5[%c16_143, %c128_144], %724 {strides = array<i32>} : memref<32x256xf32, #tpu.memory_space<vmem>>, vector<16x128xf32>,
    %c2_145 = arith.constant 2 : index
    %c0_146 = arith.constant 0 : index
    %729 = vector.load %arg5[%c2_145, %c0_146] : memref<32x256xf32, #tpu.memory_space<vmem>>, vector<16x256xf32>
    %c14_147 = arith.constant 14 : index
    %c0_148 = arith.constant 0 : index
    %730 = vector.load %arg5[%c14_147, %c0_148] : memref<32x256xf32, #tpu.memory_space<vmem>>, vector<16x256xf32>
    %731 = vector.shape_cast %19 : vector<16x1xi1> to vector<16x1xi1>
    %732 = vector.broadcast %731 : vector<16x1xi1> to vector<16x256xi1>
    %733 = arith.select %732, %729, %730 : vector<16x256xi1>, vector<16x256xf32>
    %734 = vector.extract_strided_slice %733 {offsets = [0, 0], sizes = [16, 128], strides = [1, 1]} : vector<16x256xf32> to vector<16x128xf32>
    %735 = vector.extract_strided_slice %733 {offsets = [0, 128], sizes = [16, 128], strides = [1, 1]} : vector<16x256xf32> to vector<16x128xf32>
    %736 = vector.extract_strided_slice %644 {offsets = [1, 0], sizes = [1, 128], strides = [1, 1]} : vector<24x128xf32> to vector<1x128xf32>
    %737 = vector.extract_strided_slice %645 {offsets = [1, 0], sizes = [1, 128], strides = [1, 1]} : vector<24x128xf32> to vector<1x128xf32>
    %738 = vector.broadcast %737 : vector<1x128xf32> to vector<16x128xf32>
    %739 = vector.broadcast %23 : vector<16x1xf32> to vector<16x128xf32>
    %740 = arith.mulf %738, %739 : vector<16x128xf32>
    %741 = vector.broadcast %736 : vector<1x128xf32> to vector<16x128xf32>
    %742 = arith.mulf %741, %720 : vector<16x128xf32>
    %743 = arith.mulf %740, %734 : vector<16x128xf32>
    %744 = arith.addf %742, %743 : vector<16x128xf32>
    %745 = vector.broadcast %736 : vector<1x128xf32> to vector<16x128xf32>
    %746 = arith.mulf %745, %724 : vector<16x128xf32>
    %747 = arith.mulf %740, %735 : vector<16x128xf32>
    %748 = arith.addf %746, %747 : vector<16x128xf32>
    %749 = vector.broadcast %736 : vector<1x128xf32> to vector<16x128xf32>
    %750 = arith.mulf %749, %734 : vector<16x128xf32>
    %751 = arith.mulf %740, %720 : vector<16x128xf32>
    %752 = arith.subf %750, %751 : vector<16x128xf32>
    %753 = vector.broadcast %736 : vector<1x128xf32> to vector<16x128xf32>
    %754 = arith.mulf %753, %735 : vector<16x128xf32>
    %755 = arith.mulf %740, %724 : vector<16x128xf32>
    %756 = arith.subf %754, %755 : vector<16x128xf32>
    %757 = vector.extract_strided_slice %644 {offsets = [5, 0], sizes = [1, 128], strides = [1, 1]} : vector<24x128xf32> to vector<1x128xf32>
    %758 = vector.extract_strided_slice %645 {offsets = [5, 0], sizes = [1, 128], strides = [1, 1]} : vector<24x128xf32> to vector<1x128xf32>
    %759 = vector.broadcast %758 : vector<1x128xf32> to vector<16x128xf32>
    %760 = vector.broadcast %23 : vector<16x1xf32> to vector<16x128xf32>
    %761 = arith.mulf %759, %760 : vector<16x128xf32>
    %762 = vector.broadcast %757 : vector<1x128xf32> to vector<16x128xf32>
    %763 = arith.mulf %762, %744 : vector<16x128xf32>
    %764 = arith.mulf %761, %748 : vector<16x128xf32>
    %765 = arith.subf %763, %764 : vector<16x128xf32>
    %766 = vector.broadcast %757 : vector<1x128xf32> to vector<16x128xf32>
    %767 = arith.mulf %766, %748 : vector<16x128xf32>
    %768 = arith.mulf %761, %744 : vector<16x128xf32>
    %769 = arith.addf %767, %768 : vector<16x128xf32>
    %770 = vector.broadcast %757 : vector<1x128xf32> to vector<16x128xf32>
    %771 = arith.mulf %770, %752 : vector<16x128xf32>
    %772 = arith.mulf %761, %756 : vector<16x128xf32>
    %773 = arith.addf %771, %772 : vector<16x128xf32>
    %774 = vector.broadcast %757 : vector<1x128xf32> to vector<16x128xf32>
    %775 = arith.mulf %774, %756 : vector<16x128xf32>
    %776 = arith.mulf %761, %752 : vector<16x128xf32>
    %777 = arith.subf %775, %776 : vector<16x128xf32>
    %778 = vector.extract_strided_slice %644 {offsets = [9, 0], sizes = [1, 128], strides = [1, 1]} : vector<24x128xf32> to vector<1x128xf32>
    %779 = vector.extract_strided_slice %645 {offsets = [9, 0], sizes = [1, 128], strides = [1, 1]} : vector<24x128xf32> to vector<1x128xf32>
    %780 = vector.broadcast %779 : vector<1x128xf32> to vector<16x128xf32>
    %781 = vector.broadcast %23 : vector<16x1xf32> to vector<16x128xf32>
    %782 = arith.mulf %780, %781 : vector<16x128xf32>
    %783 = vector.broadcast %778 : vector<1x128xf32> to vector<16x128xf32>
    %784 = arith.mulf %783, %765 : vector<16x128xf32>
    %785 = arith.mulf %782, %773 : vector<16x128xf32>
    %786 = arith.addf %784, %785 : vector<16x128xf32>
    %787 = vector.broadcast %778 : vector<1x128xf32> to vector<16x128xf32>
    %788 = arith.mulf %787, %769 : vector<16x128xf32>
    %789 = arith.mulf %782, %777 : vector<16x128xf32>
    %790 = arith.addf %788, %789 : vector<16x128xf32>
    %791 = vector.extract_strided_slice %644 {offsets = [13, 0], sizes = [1, 128], strides = [1, 1]} : vector<24x128xf32> to vector<1x128xf32>
    %792 = vector.extract_strided_slice %645 {offsets = [13, 0], sizes = [1, 128], strides = [1, 1]} : vector<24x128xf32> to vector<1x128xf32>
    %793 = vector.broadcast %792 : vector<1x128xf32> to vector<16x128xf32>
    %794 = vector.broadcast %23 : vector<16x1xf32> to vector<16x128xf32>
    %795 = arith.mulf %793, %794 : vector<16x128xf32>
    %796 = vector.broadcast %791 : vector<1x128xf32> to vector<16x128xf32>
    %797 = arith.mulf %796, %786 : vector<16x128xf32>
    %798 = arith.mulf %795, %790 : vector<16x128xf32>
    %799 = arith.subf %797, %798 : vector<16x128xf32>
    %800 = vector.broadcast %791 : vector<1x128xf32> to vector<16x128xf32>
    %801 = arith.mulf %800, %790 : vector<16x128xf32>
    %802 = arith.mulf %795, %786 : vector<16x128xf32>
    %803 = arith.addf %801, %802 : vector<16x128xf32>
    %c0_149 = arith.constant 0 : index
    %c0_150 = arith.constant 0 : index
    %804 = vector.load %arg5[%c0_149, %c0_150] : memref<32x256xf32, #tpu.memory_space<vmem>>, vector<16x128xf32>
    tpu.vector_store %arg5[%c0_149, %c0_150], %799 {strides = array<i32>} : memref<32x256xf32, #tpu.memory_space<vmem>>, vector<16x128xf32>,
    %c16_151 = arith.constant 16 : index
    %c0_152 = arith.constant 0 : index
    %805 = vector.load %arg5[%c16_151, %c0_152] : memref<32x256xf32, #tpu.memory_space<vmem>>, vector<16x128xf32>
    tpu.vector_store %arg5[%c16_151, %c0_152], %799 {strides = array<i32>} : memref<32x256xf32, #tpu.memory_space<vmem>>, vector<16x128xf32>,
    %c0_153 = arith.constant 0 : index
    %c128_154 = arith.constant 128 : index
    %806 = vector.load %arg5[%c0_153, %c128_154] : memref<32x256xf32, #tpu.memory_space<vmem>>, vector<16x128xf32>
    tpu.vector_store %arg5[%c0_153, %c128_154], %803 {strides = array<i32>} : memref<32x256xf32, #tpu.memory_space<vmem>>, vector<16x128xf32>,
    %c16_155 = arith.constant 16 : index
    %c128_156 = arith.constant 128 : index
    %807 = vector.load %arg5[%c16_155, %c128_156] : memref<32x256xf32, #tpu.memory_space<vmem>>, vector<16x128xf32>
    tpu.vector_store %arg5[%c16_155, %c128_156], %803 {strides = array<i32>} : memref<32x256xf32, #tpu.memory_space<vmem>>, vector<16x128xf32>,
    %c4_157 = arith.constant 4 : index
    %c0_158 = arith.constant 0 : index
    %808 = vector.load %arg5[%c4_157, %c0_158] : memref<32x256xf32, #tpu.memory_space<vmem>>, vector<16x256xf32>
    %c12_159 = arith.constant 12 : index
    %c0_160 = arith.constant 0 : index
    %809 = vector.load %arg5[%c12_159, %c0_160] : memref<32x256xf32, #tpu.memory_space<vmem>>, vector<16x256xf32>
    %810 = vector.shape_cast %30 : vector<16x1xi1> to vector<16x1xi1>
    %811 = vector.broadcast %810 : vector<16x1xi1> to vector<16x256xi1>
    %812 = arith.select %811, %808, %809 : vector<16x256xi1>, vector<16x256xf32>
    %813 = vector.extract_strided_slice %812 {offsets = [0, 0], sizes = [16, 128], strides = [1, 1]} : vector<16x256xf32> to vector<16x128xf32>
    %814 = vector.extract_strided_slice %812 {offsets = [0, 128], sizes = [16, 128], strides = [1, 1]} : vector<16x256xf32> to vector<16x128xf32>
    %815 = vector.extract_strided_slice %644 {offsets = [2, 0], sizes = [1, 128], strides = [1, 1]} : vector<24x128xf32> to vector<1x128xf32>
    %816 = vector.extract_strided_slice %645 {offsets = [2, 0], sizes = [1, 128], strides = [1, 1]} : vector<24x128xf32> to vector<1x128xf32>
    %817 = vector.broadcast %816 : vector<1x128xf32> to vector<16x128xf32>
    %818 = vector.broadcast %34 : vector<16x1xf32> to vector<16x128xf32>
    %819 = arith.mulf %817, %818 : vector<16x128xf32>
    %820 = vector.broadcast %815 : vector<1x128xf32> to vector<16x128xf32>
    %821 = arith.mulf %820, %799 : vector<16x128xf32>
    %822 = arith.mulf %819, %813 : vector<16x128xf32>
    %823 = arith.addf %821, %822 : vector<16x128xf32>
    %824 = vector.broadcast %815 : vector<1x128xf32> to vector<16x128xf32>
    %825 = arith.mulf %824, %803 : vector<16x128xf32>
    %826 = arith.mulf %819, %814 : vector<16x128xf32>
    %827 = arith.addf %825, %826 : vector<16x128xf32>
    %828 = vector.broadcast %815 : vector<1x128xf32> to vector<16x128xf32>
    %829 = arith.mulf %828, %813 : vector<16x128xf32>
    %830 = arith.mulf %819, %799 : vector<16x128xf32>
    %831 = arith.subf %829, %830 : vector<16x128xf32>
    %832 = vector.broadcast %815 : vector<1x128xf32> to vector<16x128xf32>
    %833 = arith.mulf %832, %814 : vector<16x128xf32>
    %834 = arith.mulf %819, %803 : vector<16x128xf32>
    %835 = arith.subf %833, %834 : vector<16x128xf32>
    %836 = vector.extract_strided_slice %644 {offsets = [6, 0], sizes = [1, 128], strides = [1, 1]} : vector<24x128xf32> to vector<1x128xf32>
    %837 = vector.extract_strided_slice %645 {offsets = [6, 0], sizes = [1, 128], strides = [1, 1]} : vector<24x128xf32> to vector<1x128xf32>
    %838 = vector.broadcast %837 : vector<1x128xf32> to vector<16x128xf32>
    %839 = vector.broadcast %34 : vector<16x1xf32> to vector<16x128xf32>
    %840 = arith.mulf %838, %839 : vector<16x128xf32>
    %841 = vector.broadcast %836 : vector<1x128xf32> to vector<16x128xf32>
    %842 = arith.mulf %841, %823 : vector<16x128xf32>
    %843 = arith.mulf %840, %827 : vector<16x128xf32>
    %844 = arith.subf %842, %843 : vector<16x128xf32>
    %845 = vector.broadcast %836 : vector<1x128xf32> to vector<16x128xf32>
    %846 = arith.mulf %845, %827 : vector<16x128xf32>
    %847 = arith.mulf %840, %823 : vector<16x128xf32>
    %848 = arith.addf %846, %847 : vector<16x128xf32>
    %849 = vector.broadcast %836 : vector<1x128xf32> to vector<16x128xf32>
    %850 = arith.mulf %849, %831 : vector<16x128xf32>
    %851 = arith.mulf %840, %835 : vector<16x128xf32>
    %852 = arith.addf %850, %851 : vector<16x128xf32>
    %853 = vector.broadcast %836 : vector<1x128xf32> to vector<16x128xf32>
    %854 = arith.mulf %853, %835 : vector<16x128xf32>
    %855 = arith.mulf %840, %831 : vector<16x128xf32>
    %856 = arith.subf %854, %855 : vector<16x128xf32>
    %857 = vector.extract_strided_slice %644 {offsets = [10, 0], sizes = [1, 128], strides = [1, 1]} : vector<24x128xf32> to vector<1x128xf32>
    %858 = vector.extract_strided_slice %645 {offsets = [10, 0], sizes = [1, 128], strides = [1, 1]} : vector<24x128xf32> to vector<1x128xf32>
    %859 = vector.broadcast %858 : vector<1x128xf32> to vector<16x128xf32>
    %860 = vector.broadcast %34 : vector<16x1xf32> to vector<16x128xf32>
    %861 = arith.mulf %859, %860 : vector<16x128xf32>
    %862 = vector.broadcast %857 : vector<1x128xf32> to vector<16x128xf32>
    %863 = arith.mulf %862, %844 : vector<16x128xf32>
    %864 = arith.mulf %861, %852 : vector<16x128xf32>
    %865 = arith.addf %863, %864 : vector<16x128xf32>
    %866 = vector.broadcast %857 : vector<1x128xf32> to vector<16x128xf32>
    %867 = arith.mulf %866, %848 : vector<16x128xf32>
    %868 = arith.mulf %861, %856 : vector<16x128xf32>
    %869 = arith.addf %867, %868 : vector<16x128xf32>
    %870 = vector.extract_strided_slice %644 {offsets = [14, 0], sizes = [1, 128], strides = [1, 1]} : vector<24x128xf32> to vector<1x128xf32>
    %871 = vector.extract_strided_slice %645 {offsets = [14, 0], sizes = [1, 128], strides = [1, 1]} : vector<24x128xf32> to vector<1x128xf32>
    %872 = vector.broadcast %871 : vector<1x128xf32> to vector<16x128xf32>
    %873 = vector.broadcast %34 : vector<16x1xf32> to vector<16x128xf32>
    %874 = arith.mulf %872, %873 : vector<16x128xf32>
    %875 = vector.broadcast %870 : vector<1x128xf32> to vector<16x128xf32>
    %876 = arith.mulf %875, %865 : vector<16x128xf32>
    %877 = arith.mulf %874, %869 : vector<16x128xf32>
    %878 = arith.subf %876, %877 : vector<16x128xf32>
    %879 = vector.broadcast %870 : vector<1x128xf32> to vector<16x128xf32>
    %880 = arith.mulf %879, %869 : vector<16x128xf32>
    %881 = arith.mulf %874, %865 : vector<16x128xf32>
    %882 = arith.addf %880, %881 : vector<16x128xf32>
    %c0_161 = arith.constant 0 : index
    %c0_162 = arith.constant 0 : index
    %883 = vector.load %arg5[%c0_161, %c0_162] : memref<32x256xf32, #tpu.memory_space<vmem>>, vector<16x128xf32>
    tpu.vector_store %arg5[%c0_161, %c0_162], %878 {strides = array<i32>} : memref<32x256xf32, #tpu.memory_space<vmem>>, vector<16x128xf32>,
    %c16_163 = arith.constant 16 : index
    %c0_164 = arith.constant 0 : index
    %884 = vector.load %arg5[%c16_163, %c0_164] : memref<32x256xf32, #tpu.memory_space<vmem>>, vector<16x128xf32>
    tpu.vector_store %arg5[%c16_163, %c0_164], %878 {strides = array<i32>} : memref<32x256xf32, #tpu.memory_space<vmem>>, vector<16x128xf32>,
    %c0_165 = arith.constant 0 : index
    %c128_166 = arith.constant 128 : index
    %885 = vector.load %arg5[%c0_165, %c128_166] : memref<32x256xf32, #tpu.memory_space<vmem>>, vector<16x128xf32>
    tpu.vector_store %arg5[%c0_165, %c128_166], %882 {strides = array<i32>} : memref<32x256xf32, #tpu.memory_space<vmem>>, vector<16x128xf32>,
    %c16_167 = arith.constant 16 : index
    %c128_168 = arith.constant 128 : index
    %886 = vector.load %arg5[%c16_167, %c128_168] : memref<32x256xf32, #tpu.memory_space<vmem>>, vector<16x128xf32>
    tpu.vector_store %arg5[%c16_167, %c128_168], %882 {strides = array<i32>} : memref<32x256xf32, #tpu.memory_space<vmem>>, vector<16x128xf32>,
    %c8_169 = arith.constant 8 : index
    %c0_170 = arith.constant 0 : index
    %887 = vector.load %arg5[%c8_169, %c0_170] : memref<32x256xf32, #tpu.memory_space<vmem>>, vector<16x256xf32>
    %888 = vector.extract_strided_slice %887 {offsets = [0, 0], sizes = [16, 128], strides = [1, 1]} : vector<16x256xf32> to vector<16x128xf32>
    %889 = vector.extract_strided_slice %887 {offsets = [0, 128], sizes = [16, 128], strides = [1, 1]} : vector<16x256xf32> to vector<16x128xf32>
    %890 = vector.extract_strided_slice %644 {offsets = [3, 0], sizes = [1, 128], strides = [1, 1]} : vector<24x128xf32> to vector<1x128xf32>
    %891 = vector.extract_strided_slice %645 {offsets = [3, 0], sizes = [1, 128], strides = [1, 1]} : vector<24x128xf32> to vector<1x128xf32>
    %892 = vector.broadcast %891 : vector<1x128xf32> to vector<16x128xf32>
    %893 = vector.broadcast %44 : vector<16x1xf32> to vector<16x128xf32>
    %894 = arith.mulf %892, %893 : vector<16x128xf32>
    %895 = vector.broadcast %890 : vector<1x128xf32> to vector<16x128xf32>
    %896 = arith.mulf %895, %878 : vector<16x128xf32>
    %897 = arith.mulf %894, %888 : vector<16x128xf32>
    %898 = arith.addf %896, %897 : vector<16x128xf32>
    %899 = vector.broadcast %890 : vector<1x128xf32> to vector<16x128xf32>
    %900 = arith.mulf %899, %882 : vector<16x128xf32>
    %901 = arith.mulf %894, %889 : vector<16x128xf32>
    %902 = arith.addf %900, %901 : vector<16x128xf32>
    %903 = vector.broadcast %890 : vector<1x128xf32> to vector<16x128xf32>
    %904 = arith.mulf %903, %888 : vector<16x128xf32>
    %905 = arith.mulf %894, %878 : vector<16x128xf32>
    %906 = arith.subf %904, %905 : vector<16x128xf32>
    %907 = vector.broadcast %890 : vector<1x128xf32> to vector<16x128xf32>
    %908 = arith.mulf %907, %889 : vector<16x128xf32>
    %909 = arith.mulf %894, %882 : vector<16x128xf32>
    %910 = arith.subf %908, %909 : vector<16x128xf32>
    %911 = vector.extract_strided_slice %644 {offsets = [7, 0], sizes = [1, 128], strides = [1, 1]} : vector<24x128xf32> to vector<1x128xf32>
    %912 = vector.extract_strided_slice %645 {offsets = [7, 0], sizes = [1, 128], strides = [1, 1]} : vector<24x128xf32> to vector<1x128xf32>
    %913 = vector.broadcast %912 : vector<1x128xf32> to vector<16x128xf32>
    %914 = vector.broadcast %44 : vector<16x1xf32> to vector<16x128xf32>
    %915 = arith.mulf %913, %914 : vector<16x128xf32>
    %916 = vector.broadcast %911 : vector<1x128xf32> to vector<16x128xf32>
    %917 = arith.mulf %916, %898 : vector<16x128xf32>
    %918 = arith.mulf %915, %902 : vector<16x128xf32>
    %919 = arith.subf %917, %918 : vector<16x128xf32>
    %920 = vector.broadcast %911 : vector<1x128xf32> to vector<16x128xf32>
    %921 = arith.mulf %920, %902 : vector<16x128xf32>
    %922 = arith.mulf %915, %898 : vector<16x128xf32>
    %923 = arith.addf %921, %922 : vector<16x128xf32>
    %924 = vector.broadcast %911 : vector<1x128xf32> to vector<16x128xf32>
    %925 = arith.mulf %924, %906 : vector<16x128xf32>
    %926 = arith.mulf %915, %910 : vector<16x128xf32>
    %927 = arith.addf %925, %926 : vector<16x128xf32>
    %928 = vector.broadcast %911 : vector<1x128xf32> to vector<16x128xf32>
    %929 = arith.mulf %928, %910 : vector<16x128xf32>
    %930 = arith.mulf %915, %906 : vector<16x128xf32>
    %931 = arith.subf %929, %930 : vector<16x128xf32>
    %932 = vector.extract_strided_slice %644 {offsets = [11, 0], sizes = [1, 128], strides = [1, 1]} : vector<24x128xf32> to vector<1x128xf32>
    %933 = vector.extract_strided_slice %645 {offsets = [11, 0], sizes = [1, 128], strides = [1, 1]} : vector<24x128xf32> to vector<1x128xf32>
    %934 = vector.broadcast %933 : vector<1x128xf32> to vector<16x128xf32>
    %935 = vector.broadcast %44 : vector<16x1xf32> to vector<16x128xf32>
    %936 = arith.mulf %934, %935 : vector<16x128xf32>
    %937 = vector.broadcast %932 : vector<1x128xf32> to vector<16x128xf32>
    %938 = arith.mulf %937, %919 : vector<16x128xf32>
    %939 = arith.mulf %936, %927 : vector<16x128xf32>
    %940 = arith.addf %938, %939 : vector<16x128xf32>
    %941 = vector.broadcast %932 : vector<1x128xf32> to vector<16x128xf32>
    %942 = arith.mulf %941, %923 : vector<16x128xf32>
    %943 = arith.mulf %936, %931 : vector<16x128xf32>
    %944 = arith.addf %942, %943 : vector<16x128xf32>
    %945 = vector.extract_strided_slice %644 {offsets = [15, 0], sizes = [1, 128], strides = [1, 1]} : vector<24x128xf32> to vector<1x128xf32>
    %946 = vector.extract_strided_slice %645 {offsets = [15, 0], sizes = [1, 128], strides = [1, 1]} : vector<24x128xf32> to vector<1x128xf32>
    %947 = vector.broadcast %946 : vector<1x128xf32> to vector<16x128xf32>
    %948 = vector.broadcast %44 : vector<16x1xf32> to vector<16x128xf32>
    %949 = arith.mulf %947, %948 : vector<16x128xf32>
    %950 = vector.broadcast %945 : vector<1x128xf32> to vector<16x128xf32>
    %951 = arith.mulf %950, %940 : vector<16x128xf32>
    %952 = arith.mulf %949, %944 : vector<16x128xf32>
    %953 = arith.subf %951, %952 : vector<16x128xf32>
    %954 = vector.broadcast %945 : vector<1x128xf32> to vector<16x128xf32>
    %955 = arith.mulf %954, %944 : vector<16x128xf32>
    %956 = arith.mulf %949, %940 : vector<16x128xf32>
    %957 = arith.addf %955, %956 : vector<16x128xf32>
    %958 = vector.extract_strided_slice %644 {offsets = [16, 0], sizes = [1, 128], strides = [1, 1]} : vector<24x128xf32> to vector<1x128xf32>
    %959 = vector.extract_strided_slice %645 {offsets = [16, 0], sizes = [1, 128], strides = [1, 1]} : vector<24x128xf32> to vector<1x128xf32>
    %c0_171 = arith.constant 0 : index
    %c0_172 = arith.constant 0 : index
    %960 = vector.load %arg5[%c0_171, %c0_172] : memref<32x256xf32, #tpu.memory_space<vmem>>, vector<16x128xf32>
    tpu.vector_store %arg5[%c0_171, %c0_172], %953 {strides = array<i32>} : memref<32x256xf32, #tpu.memory_space<vmem>>, vector<16x128xf32>,
    %c16_173 = arith.constant 16 : index
    %c0_174 = arith.constant 0 : index
    %961 = vector.load %arg5[%c16_173, %c0_174] : memref<32x256xf32, #tpu.memory_space<vmem>>, vector<16x128xf32>
    tpu.vector_store %arg5[%c16_173, %c0_174], %953 {strides = array<i32>} : memref<32x256xf32, #tpu.memory_space<vmem>>, vector<16x128xf32>,
    %c0_175 = arith.constant 0 : index
    %c128_176 = arith.constant 128 : index
    %962 = vector.load %arg5[%c0_175, %c128_176] : memref<32x256xf32, #tpu.memory_space<vmem>>, vector<16x128xf32>
    tpu.vector_store %arg5[%c0_175, %c128_176], %957 {strides = array<i32>} : memref<32x256xf32, #tpu.memory_space<vmem>>, vector<16x128xf32>,
    %c16_177 = arith.constant 16 : index
    %c128_178 = arith.constant 128 : index
    %963 = vector.load %arg5[%c16_177, %c128_178] : memref<32x256xf32, #tpu.memory_space<vmem>>, vector<16x128xf32>
    tpu.vector_store %arg5[%c16_177, %c128_178], %957 {strides = array<i32>} : memref<32x256xf32, #tpu.memory_space<vmem>>, vector<16x128xf32>,
    %c2_179 = arith.constant 2 : index
    %c0_180 = arith.constant 0 : index
    %964 = vector.load %arg5[%c2_179, %c0_180] : memref<32x256xf32, #tpu.memory_space<vmem>>, vector<16x256xf32>
    %c14_181 = arith.constant 14 : index
    %c0_182 = arith.constant 0 : index
    %965 = vector.load %arg5[%c14_181, %c0_182] : memref<32x256xf32, #tpu.memory_space<vmem>>, vector<16x256xf32>
    %966 = vector.shape_cast %19 : vector<16x1xi1> to vector<16x1xi1>
    %967 = vector.broadcast %966 : vector<16x1xi1> to vector<16x256xi1>
    %968 = arith.select %967, %964, %965 : vector<16x256xi1>, vector<16x256xf32>
    %969 = vector.extract_strided_slice %968 {offsets = [0, 0], sizes = [16, 128], strides = [1, 1]} : vector<16x256xf32> to vector<16x128xf32>
    %970 = vector.extract_strided_slice %968 {offsets = [0, 128], sizes = [16, 128], strides = [1, 1]} : vector<16x256xf32> to vector<16x128xf32>
    %971 = vector.broadcast %958 : vector<1x128xf32> to vector<16x128xf32>
    %972 = arith.mulf %971, %953 : vector<16x128xf32>
    %973 = vector.broadcast %959 : vector<1x128xf32> to vector<16x128xf32>
    %974 = vector.broadcast %23 : vector<16x1xf32> to vector<16x128xf32>
    %975 = arith.mulf %973, %974 : vector<16x128xf32>
    %976 = arith.mulf %975, %969 : vector<16x128xf32>
    %977 = arith.addf %972, %976 : vector<16x128xf32>
    %978 = vector.broadcast %958 : vector<1x128xf32> to vector<16x128xf32>
    %979 = arith.mulf %978, %957 : vector<16x128xf32>
    %980 = vector.broadcast %959 : vector<1x128xf32> to vector<16x128xf32>
    %981 = vector.broadcast %23 : vector<16x1xf32> to vector<16x128xf32>
    %982 = arith.mulf %980, %981 : vector<16x128xf32>
    %983 = arith.mulf %982, %970 : vector<16x128xf32>
    %984 = arith.addf %979, %983 : vector<16x128xf32>
    %985 = arith.subf %977, %953 : vector<16x128xf32>
    %986 = vector.broadcast %7 : vector<16x1xf32> to vector<16x128xf32>
    %987 = arith.mulf %986, %985 : vector<16x128xf32>
    %988 = arith.addf %953, %987 : vector<16x128xf32>
    %989 = arith.subf %984, %957 : vector<16x128xf32>
    %990 = vector.broadcast %7 : vector<16x1xf32> to vector<16x128xf32>
    %991 = arith.mulf %990, %989 : vector<16x128xf32>
    %992 = arith.addf %957, %991 : vector<16x128xf32>
    %993 = vector.extract_strided_slice %644 {offsets = [20, 0], sizes = [1, 128], strides = [1, 1]} : vector<24x128xf32> to vector<1x128xf32>
    %994 = vector.extract_strided_slice %645 {offsets = [20, 0], sizes = [1, 128], strides = [1, 1]} : vector<24x128xf32> to vector<1x128xf32>
    %cst_183 = arith.constant 1.000000e+00 : f32
    %995 = vector.broadcast %cst_183 : f32 to vector<1x128xf32>
    %996 = arith.subf %993, %995 : vector<1x128xf32>
    %997 = vector.broadcast %7 : vector<16x1xf32> to vector<16x128xf32>
    %998 = vector.broadcast %996 : vector<1x128xf32> to vector<16x128xf32>
    %999 = arith.mulf %997, %998 : vector<16x128xf32>
    %cst_184 = arith.constant 1.000000e+00 : f32
    %1000 = vector.broadcast %cst_184 : f32 to vector<16x128xf32>
    %1001 = arith.addf %1000, %999 : vector<16x128xf32>
    %1002 = arith.mulf %7, %23 : vector<16x1xf32>
    %1003 = vector.broadcast %1002 : vector<16x1xf32> to vector<16x128xf32>
    %1004 = vector.broadcast %994 : vector<1x128xf32> to vector<16x128xf32>
    %1005 = arith.mulf %1003, %1004 : vector<16x128xf32>
    %1006 = arith.mulf %1001, %988 : vector<16x128xf32>
    %1007 = arith.mulf %1005, %992 : vector<16x128xf32>
    %1008 = arith.subf %1006, %1007 : vector<16x128xf32>
    %1009 = arith.mulf %1001, %992 : vector<16x128xf32>
    %1010 = arith.mulf %1005, %988 : vector<16x128xf32>
    %1011 = arith.addf %1009, %1010 : vector<16x128xf32>
    %1012 = vector.extract_strided_slice %644 {offsets = [17, 0], sizes = [1, 128], strides = [1, 1]} : vector<24x128xf32> to vector<1x128xf32>
    %1013 = vector.extract_strided_slice %645 {offsets = [17, 0], sizes = [1, 128], strides = [1, 1]} : vector<24x128xf32> to vector<1x128xf32>
    %c0_185 = arith.constant 0 : index
    %c0_186 = arith.constant 0 : index
    %1014 = vector.load %arg5[%c0_185, %c0_186] : memref<32x256xf32, #tpu.memory_space<vmem>>, vector<16x128xf32>
    tpu.vector_store %arg5[%c0_185, %c0_186], %1008 {strides = array<i32>} : memref<32x256xf32, #tpu.memory_space<vmem>>, vector<16x128xf32>,
    %c16_187 = arith.constant 16 : index
    %c0_188 = arith.constant 0 : index
    %1015 = vector.load %arg5[%c16_187, %c0_188] : memref<32x256xf32, #tpu.memory_space<vmem>>, vector<16x128xf32>
    tpu.vector_store %arg5[%c16_187, %c0_188], %1008 {strides = array<i32>} : memref<32x256xf32, #tpu.memory_space<vmem>>, vector<16x128xf32>,
    %c0_189 = arith.constant 0 : index
    %c128_190 = arith.constant 128 : index
    %1016 = vector.load %arg5[%c0_189, %c128_190] : memref<32x256xf32, #tpu.memory_space<vmem>>, vector<16x128xf32>
    tpu.vector_store %arg5[%c0_189, %c128_190], %1011 {strides = array<i32>} : memref<32x256xf32, #tpu.memory_space<vmem>>, vector<16x128xf32>,
    %c16_191 = arith.constant 16 : index
    %c128_192 = arith.constant 128 : index
    %1017 = vector.load %arg5[%c16_191, %c128_192] : memref<32x256xf32, #tpu.memory_space<vmem>>, vector<16x128xf32>
    tpu.vector_store %arg5[%c16_191, %c128_192], %1011 {strides = array<i32>} : memref<32x256xf32, #tpu.memory_space<vmem>>, vector<16x128xf32>,
    %c4_193 = arith.constant 4 : index
    %c0_194 = arith.constant 0 : index
    %1018 = vector.load %arg5[%c4_193, %c0_194] : memref<32x256xf32, #tpu.memory_space<vmem>>, vector<16x256xf32>
    %c12_195 = arith.constant 12 : index
    %c0_196 = arith.constant 0 : index
    %1019 = vector.load %arg5[%c12_195, %c0_196] : memref<32x256xf32, #tpu.memory_space<vmem>>, vector<16x256xf32>
    %1020 = vector.shape_cast %30 : vector<16x1xi1> to vector<16x1xi1>
    %1021 = vector.broadcast %1020 : vector<16x1xi1> to vector<16x256xi1>
    %1022 = arith.select %1021, %1018, %1019 : vector<16x256xi1>, vector<16x256xf32>
    %1023 = vector.extract_strided_slice %1022 {offsets = [0, 0], sizes = [16, 128], strides = [1, 1]} : vector<16x256xf32> to vector<16x128xf32>
    %1024 = vector.extract_strided_slice %1022 {offsets = [0, 128], sizes = [16, 128], strides = [1, 1]} : vector<16x256xf32> to vector<16x128xf32>
    %1025 = vector.broadcast %1012 : vector<1x128xf32> to vector<16x128xf32>
    %1026 = arith.mulf %1025, %1008 : vector<16x128xf32>
    %1027 = vector.broadcast %1013 : vector<1x128xf32> to vector<16x128xf32>
    %1028 = vector.broadcast %34 : vector<16x1xf32> to vector<16x128xf32>
    %1029 = arith.mulf %1027, %1028 : vector<16x128xf32>
    %1030 = arith.mulf %1029, %1023 : vector<16x128xf32>
    %1031 = arith.addf %1026, %1030 : vector<16x128xf32>
    %1032 = vector.broadcast %1012 : vector<1x128xf32> to vector<16x128xf32>
    %1033 = arith.mulf %1032, %1011 : vector<16x128xf32>
    %1034 = vector.broadcast %1013 : vector<1x128xf32> to vector<16x128xf32>
    %1035 = vector.broadcast %34 : vector<16x1xf32> to vector<16x128xf32>
    %1036 = arith.mulf %1034, %1035 : vector<16x128xf32>
    %1037 = arith.mulf %1036, %1024 : vector<16x128xf32>
    %1038 = arith.addf %1033, %1037 : vector<16x128xf32>
    %1039 = arith.subf %1031, %1008 : vector<16x128xf32>
    %1040 = vector.broadcast %18 : vector<16x1xf32> to vector<16x128xf32>
    %1041 = arith.mulf %1040, %1039 : vector<16x128xf32>
    %1042 = arith.addf %1008, %1041 : vector<16x128xf32>
    %1043 = arith.subf %1038, %1011 : vector<16x128xf32>
    %1044 = vector.broadcast %18 : vector<16x1xf32> to vector<16x128xf32>
    %1045 = arith.mulf %1044, %1043 : vector<16x128xf32>
    %1046 = arith.addf %1011, %1045 : vector<16x128xf32>
    %1047 = vector.extract_strided_slice %644 {offsets = [21, 0], sizes = [1, 128], strides = [1, 1]} : vector<24x128xf32> to vector<1x128xf32>
    %1048 = vector.extract_strided_slice %645 {offsets = [21, 0], sizes = [1, 128], strides = [1, 1]} : vector<24x128xf32> to vector<1x128xf32>
    %cst_197 = arith.constant 1.000000e+00 : f32
    %1049 = vector.broadcast %cst_197 : f32 to vector<1x128xf32>
    %1050 = arith.subf %1047, %1049 : vector<1x128xf32>
    %1051 = vector.broadcast %18 : vector<16x1xf32> to vector<16x128xf32>
    %1052 = vector.broadcast %1050 : vector<1x128xf32> to vector<16x128xf32>
    %1053 = arith.mulf %1051, %1052 : vector<16x128xf32>
    %cst_198 = arith.constant 1.000000e+00 : f32
    %1054 = vector.broadcast %cst_198 : f32 to vector<16x128xf32>
    %1055 = arith.addf %1054, %1053 : vector<16x128xf32>
    %1056 = arith.mulf %18, %34 : vector<16x1xf32>
    %1057 = vector.broadcast %1056 : vector<16x1xf32> to vector<16x128xf32>
    %1058 = vector.broadcast %1048 : vector<1x128xf32> to vector<16x128xf32>
    %1059 = arith.mulf %1057, %1058 : vector<16x128xf32>
    %1060 = arith.mulf %1055, %1042 : vector<16x128xf32>
    %1061 = arith.mulf %1059, %1046 : vector<16x128xf32>
    %1062 = arith.subf %1060, %1061 : vector<16x128xf32>
    %1063 = arith.mulf %1055, %1046 : vector<16x128xf32>
    %1064 = arith.mulf %1059, %1042 : vector<16x128xf32>
    %1065 = arith.addf %1063, %1064 : vector<16x128xf32>
    %1066 = vector.extract_strided_slice %644 {offsets = [18, 0], sizes = [1, 128], strides = [1, 1]} : vector<24x128xf32> to vector<1x128xf32>
    %1067 = vector.extract_strided_slice %645 {offsets = [18, 0], sizes = [1, 128], strides = [1, 1]} : vector<24x128xf32> to vector<1x128xf32>
    %c0_199 = arith.constant 0 : index
    %c0_200 = arith.constant 0 : index
    %1068 = vector.load %arg5[%c0_199, %c0_200] : memref<32x256xf32, #tpu.memory_space<vmem>>, vector<16x128xf32>
    tpu.vector_store %arg5[%c0_199, %c0_200], %1062 {strides = array<i32>} : memref<32x256xf32, #tpu.memory_space<vmem>>, vector<16x128xf32>,
    %c16_201 = arith.constant 16 : index
    %c0_202 = arith.constant 0 : index
    %1069 = vector.load %arg5[%c16_201, %c0_202] : memref<32x256xf32, #tpu.memory_space<vmem>>, vector<16x128xf32>
    tpu.vector_store %arg5[%c16_201, %c0_202], %1062 {strides = array<i32>} : memref<32x256xf32, #tpu.memory_space<vmem>>, vector<16x128xf32>,
    %c0_203 = arith.constant 0 : index
    %c128_204 = arith.constant 128 : index
    %1070 = vector.load %arg5[%c0_203, %c128_204] : memref<32x256xf32, #tpu.memory_space<vmem>>, vector<16x128xf32>
    tpu.vector_store %arg5[%c0_203, %c128_204], %1065 {strides = array<i32>} : memref<32x256xf32, #tpu.memory_space<vmem>>, vector<16x128xf32>,
    %c16_205 = arith.constant 16 : index
    %c128_206 = arith.constant 128 : index
    %1071 = vector.load %arg5[%c16_205, %c128_206] : memref<32x256xf32, #tpu.memory_space<vmem>>, vector<16x128xf32>
    tpu.vector_store %arg5[%c16_205, %c128_206], %1065 {strides = array<i32>} : memref<32x256xf32, #tpu.memory_space<vmem>>, vector<16x128xf32>,
    %c8_207 = arith.constant 8 : index
    %c0_208 = arith.constant 0 : index
    %1072 = vector.load %arg5[%c8_207, %c0_208] : memref<32x256xf32, #tpu.memory_space<vmem>>, vector<16x256xf32>
    %1073 = vector.extract_strided_slice %1072 {offsets = [0, 0], sizes = [16, 128], strides = [1, 1]} : vector<16x256xf32> to vector<16x128xf32>
    %1074 = vector.extract_strided_slice %1072 {offsets = [0, 128], sizes = [16, 128], strides = [1, 1]} : vector<16x256xf32> to vector<16x128xf32>
    %1075 = vector.broadcast %1066 : vector<1x128xf32> to vector<16x128xf32>
    %1076 = arith.mulf %1075, %1062 : vector<16x128xf32>
    %1077 = vector.broadcast %1067 : vector<1x128xf32> to vector<16x128xf32>
    %1078 = vector.broadcast %44 : vector<16x1xf32> to vector<16x128xf32>
    %1079 = arith.mulf %1077, %1078 : vector<16x128xf32>
    %1080 = arith.mulf %1079, %1073 : vector<16x128xf32>
    %1081 = arith.addf %1076, %1080 : vector<16x128xf32>
    %1082 = vector.broadcast %1066 : vector<1x128xf32> to vector<16x128xf32>
    %1083 = arith.mulf %1082, %1065 : vector<16x128xf32>
    %1084 = vector.broadcast %1067 : vector<1x128xf32> to vector<16x128xf32>
    %1085 = vector.broadcast %44 : vector<16x1xf32> to vector<16x128xf32>
    %1086 = arith.mulf %1084, %1085 : vector<16x128xf32>
    %1087 = arith.mulf %1086, %1074 : vector<16x128xf32>
    %1088 = arith.addf %1083, %1087 : vector<16x128xf32>
    %1089 = arith.subf %1081, %1062 : vector<16x128xf32>
    %1090 = vector.broadcast %29 : vector<16x1xf32> to vector<16x128xf32>
    %1091 = arith.mulf %1090, %1089 : vector<16x128xf32>
    %1092 = arith.addf %1062, %1091 : vector<16x128xf32>
    %1093 = arith.subf %1088, %1065 : vector<16x128xf32>
    %1094 = vector.broadcast %29 : vector<16x1xf32> to vector<16x128xf32>
    %1095 = arith.mulf %1094, %1093 : vector<16x128xf32>
    %1096 = arith.addf %1065, %1095 : vector<16x128xf32>
    %1097 = vector.extract_strided_slice %644 {offsets = [22, 0], sizes = [1, 128], strides = [1, 1]} : vector<24x128xf32> to vector<1x128xf32>
    %1098 = vector.extract_strided_slice %645 {offsets = [22, 0], sizes = [1, 128], strides = [1, 1]} : vector<24x128xf32> to vector<1x128xf32>
    %cst_209 = arith.constant 1.000000e+00 : f32
    %1099 = vector.broadcast %cst_209 : f32 to vector<1x128xf32>
    %1100 = arith.subf %1097, %1099 : vector<1x128xf32>
    %1101 = vector.broadcast %29 : vector<16x1xf32> to vector<16x128xf32>
    %1102 = vector.broadcast %1100 : vector<1x128xf32> to vector<16x128xf32>
    %1103 = arith.mulf %1101, %1102 : vector<16x128xf32>
    %cst_210 = arith.constant 1.000000e+00 : f32
    %1104 = vector.broadcast %cst_210 : f32 to vector<16x128xf32>
    %1105 = arith.addf %1104, %1103 : vector<16x128xf32>
    %1106 = arith.mulf %29, %44 : vector<16x1xf32>
    %1107 = vector.broadcast %1106 : vector<16x1xf32> to vector<16x128xf32>
    %1108 = vector.broadcast %1098 : vector<1x128xf32> to vector<16x128xf32>
    %1109 = arith.mulf %1107, %1108 : vector<16x128xf32>
    %1110 = arith.mulf %1105, %1092 : vector<16x128xf32>
    %1111 = arith.mulf %1109, %1096 : vector<16x128xf32>
    %1112 = arith.subf %1110, %1111 : vector<16x128xf32>
    %1113 = arith.mulf %1105, %1096 : vector<16x128xf32>
    %1114 = arith.mulf %1109, %1092 : vector<16x128xf32>
    %1115 = arith.addf %1113, %1114 : vector<16x128xf32>
    %1116 = vector.extract_strided_slice %644 {offsets = [19, 0], sizes = [1, 128], strides = [1, 1]} : vector<24x128xf32> to vector<1x128xf32>
    %1117 = vector.extract_strided_slice %645 {offsets = [19, 0], sizes = [1, 128], strides = [1, 1]} : vector<24x128xf32> to vector<1x128xf32>
    %c0_211 = arith.constant 0 : index
    %c0_212 = arith.constant 0 : index
    %1118 = vector.load %arg5[%c0_211, %c0_212] : memref<32x256xf32, #tpu.memory_space<vmem>>, vector<16x128xf32>
    tpu.vector_store %arg5[%c0_211, %c0_212], %1112 {strides = array<i32>} : memref<32x256xf32, #tpu.memory_space<vmem>>, vector<16x128xf32>,
    %c16_213 = arith.constant 16 : index
    %c0_214 = arith.constant 0 : index
    %1119 = vector.load %arg5[%c16_213, %c0_214] : memref<32x256xf32, #tpu.memory_space<vmem>>, vector<16x128xf32>
    tpu.vector_store %arg5[%c16_213, %c0_214], %1112 {strides = array<i32>} : memref<32x256xf32, #tpu.memory_space<vmem>>, vector<16x128xf32>,
    %c0_215 = arith.constant 0 : index
    %c128_216 = arith.constant 128 : index
    %1120 = vector.load %arg5[%c0_215, %c128_216] : memref<32x256xf32, #tpu.memory_space<vmem>>, vector<16x128xf32>
    tpu.vector_store %arg5[%c0_215, %c128_216], %1115 {strides = array<i32>} : memref<32x256xf32, #tpu.memory_space<vmem>>, vector<16x128xf32>,
    %c16_217 = arith.constant 16 : index
    %c128_218 = arith.constant 128 : index
    %1121 = vector.load %arg5[%c16_217, %c128_218] : memref<32x256xf32, #tpu.memory_space<vmem>>, vector<16x128xf32>
    tpu.vector_store %arg5[%c16_217, %c128_218], %1115 {strides = array<i32>} : memref<32x256xf32, #tpu.memory_space<vmem>>, vector<16x128xf32>,
    %c1_219 = arith.constant 1 : index
    %c0_220 = arith.constant 0 : index
    %1122 = vector.load %arg5[%c1_219, %c0_220] : memref<32x256xf32, #tpu.memory_space<vmem>>, vector<16x256xf32>
    %c15_221 = arith.constant 15 : index
    %c0_222 = arith.constant 0 : index
    %1123 = vector.load %arg5[%c15_221, %c0_222] : memref<32x256xf32, #tpu.memory_space<vmem>>, vector<16x256xf32>
    %1124 = vector.shape_cast %8 : vector<16x1xi1> to vector<16x1xi1>
    %1125 = vector.broadcast %1124 : vector<16x1xi1> to vector<16x256xi1>
    %1126 = arith.select %1125, %1122, %1123 : vector<16x256xi1>, vector<16x256xf32>
    %1127 = vector.extract_strided_slice %1126 {offsets = [0, 0], sizes = [16, 128], strides = [1, 1]} : vector<16x256xf32> to vector<16x128xf32>
    %1128 = vector.extract_strided_slice %1126 {offsets = [0, 128], sizes = [16, 128], strides = [1, 1]} : vector<16x256xf32> to vector<16x128xf32>
    %1129 = vector.broadcast %1116 : vector<1x128xf32> to vector<16x128xf32>
    %1130 = arith.mulf %1129, %1112 : vector<16x128xf32>
    %1131 = vector.broadcast %1117 : vector<1x128xf32> to vector<16x128xf32>
    %1132 = vector.broadcast %12 : vector<16x1xf32> to vector<16x128xf32>
    %1133 = arith.mulf %1131, %1132 : vector<16x128xf32>
    %1134 = arith.mulf %1133, %1127 : vector<16x128xf32>
    %1135 = arith.addf %1130, %1134 : vector<16x128xf32>
    %1136 = vector.broadcast %1116 : vector<1x128xf32> to vector<16x128xf32>
    %1137 = arith.mulf %1136, %1115 : vector<16x128xf32>
    %1138 = vector.broadcast %1117 : vector<1x128xf32> to vector<16x128xf32>
    %1139 = vector.broadcast %12 : vector<16x1xf32> to vector<16x128xf32>
    %1140 = arith.mulf %1138, %1139 : vector<16x128xf32>
    %1141 = arith.mulf %1140, %1128 : vector<16x128xf32>
    %1142 = arith.addf %1137, %1141 : vector<16x128xf32>
    %1143 = arith.subf %1135, %1112 : vector<16x128xf32>
    %1144 = vector.broadcast %40 : vector<16x1xf32> to vector<16x128xf32>
    %1145 = arith.mulf %1144, %1143 : vector<16x128xf32>
    %1146 = arith.addf %1112, %1145 : vector<16x128xf32>
    %1147 = arith.subf %1142, %1115 : vector<16x128xf32>
    %1148 = vector.broadcast %40 : vector<16x1xf32> to vector<16x128xf32>
    %1149 = arith.mulf %1148, %1147 : vector<16x128xf32>
    %1150 = arith.addf %1115, %1149 : vector<16x128xf32>
    %1151 = vector.extract_strided_slice %644 {offsets = [23, 0], sizes = [1, 128], strides = [1, 1]} : vector<24x128xf32> to vector<1x128xf32>
    %1152 = vector.extract_strided_slice %645 {offsets = [23, 0], sizes = [1, 128], strides = [1, 1]} : vector<24x128xf32> to vector<1x128xf32>
    %cst_223 = arith.constant 1.000000e+00 : f32
    %1153 = vector.broadcast %cst_223 : f32 to vector<1x128xf32>
    %1154 = arith.subf %1151, %1153 : vector<1x128xf32>
    %1155 = vector.broadcast %40 : vector<16x1xf32> to vector<16x128xf32>
    %1156 = vector.broadcast %1154 : vector<1x128xf32> to vector<16x128xf32>
    %1157 = arith.mulf %1155, %1156 : vector<16x128xf32>
    %cst_224 = arith.constant 1.000000e+00 : f32
    %1158 = vector.broadcast %cst_224 : f32 to vector<16x128xf32>
    %1159 = arith.addf %1158, %1157 : vector<16x128xf32>
    %1160 = arith.mulf %40, %12 : vector<16x1xf32>
    %1161 = vector.broadcast %1160 : vector<16x1xf32> to vector<16x128xf32>
    %1162 = vector.broadcast %1152 : vector<1x128xf32> to vector<16x128xf32>
    %1163 = arith.mulf %1161, %1162 : vector<16x128xf32>
    %1164 = arith.mulf %1159, %1146 : vector<16x128xf32>
    %1165 = arith.mulf %1163, %1150 : vector<16x128xf32>
    %1166 = arith.subf %1164, %1165 : vector<16x128xf32>
    %1167 = arith.mulf %1159, %1150 : vector<16x128xf32>
    %1168 = arith.mulf %1163, %1146 : vector<16x128xf32>
    %1169 = arith.addf %1167, %1168 : vector<16x128xf32>
    %1170 = arith.mulf %1166, %1166 : vector<16x128xf32>
    %1171 = arith.mulf %1169, %1169 : vector<16x128xf32>
    %1172 = arith.addf %1170, %1171 : vector<16x128xf32>
    %c0_225 = arith.constant 0 : index
    %c0_226 = arith.constant 0 : index
    %1173 = vector.load %arg5[%c0_225, %c0_226] : memref<32x256xf32, #tpu.memory_space<vmem>>, vector<16x128xf32>
    tpu.vector_store %arg5[%c0_225, %c0_226], %1166 {strides = array<i32>} : memref<32x256xf32, #tpu.memory_space<vmem>>, vector<16x128xf32>,
    %c16_227 = arith.constant 16 : index
    %c0_228 = arith.constant 0 : index
    %1174 = vector.load %arg5[%c16_227, %c0_228] : memref<32x256xf32, #tpu.memory_space<vmem>>, vector<16x128xf32>
    tpu.vector_store %arg5[%c16_227, %c0_228], %1166 {strides = array<i32>} : memref<32x256xf32, #tpu.memory_space<vmem>>, vector<16x128xf32>,
    %c0_229 = arith.constant 0 : index
    %c128_230 = arith.constant 128 : index
    %1175 = vector.load %arg5[%c0_229, %c128_230] : memref<32x256xf32, #tpu.memory_space<vmem>>, vector<16x128xf32>
    tpu.vector_store %arg5[%c0_229, %c128_230], %1169 {strides = array<i32>} : memref<32x256xf32, #tpu.memory_space<vmem>>, vector<16x128xf32>,
    %c16_231 = arith.constant 16 : index
    %c128_232 = arith.constant 128 : index
    %1176 = vector.load %arg5[%c16_231, %c128_232] : memref<32x256xf32, #tpu.memory_space<vmem>>, vector<16x128xf32>
    tpu.vector_store %arg5[%c16_231, %c128_232], %1169 {strides = array<i32>} : memref<32x256xf32, #tpu.memory_space<vmem>>, vector<16x128xf32>,
    %c1_233 = arith.constant 1 : index
    %c0_234 = arith.constant 0 : index
    %1177 = vector.load %arg5[%c1_233, %c0_234] : memref<32x256xf32, #tpu.memory_space<vmem>>, vector<16x256xf32>
    %c15_235 = arith.constant 15 : index
    %c0_236 = arith.constant 0 : index
    %1178 = vector.load %arg5[%c15_235, %c0_236] : memref<32x256xf32, #tpu.memory_space<vmem>>, vector<16x256xf32>
    %1179 = vector.shape_cast %8 : vector<16x1xi1> to vector<16x1xi1>
    %1180 = vector.broadcast %1179 : vector<16x1xi1> to vector<16x256xi1>
    %1181 = arith.select %1180, %1177, %1178 : vector<16x256xi1>, vector<16x256xf32>
    %1182 = vector.extract_strided_slice %1181 {offsets = [0, 0], sizes = [16, 128], strides = [1, 1]} : vector<16x256xf32> to vector<16x128xf32>
    %1183 = vector.extract_strided_slice %1181 {offsets = [0, 128], sizes = [16, 128], strides = [1, 1]} : vector<16x256xf32> to vector<16x128xf32>
    %1184 = arith.mulf %1166, %1182 : vector<16x128xf32>
    %1185 = arith.mulf %1169, %1183 : vector<16x128xf32>
    %1186 = arith.addf %1184, %1185 : vector<16x128xf32>
    %cst_237 = arith.constant dense<0.000000e+00> : vector<128xf32>
    %1187 = vector.multi_reduction <add>, %1186, %cst_237 [0] : vector<16x128xf32> to vector<128xf32>
    %1188 = vector.shape_cast %1187 : vector<128xf32> to vector<1x128xf32>
    %c0_238 = arith.constant 0 : index
    %c0_239 = arith.constant 0 : index
    %1189 = vector.load %arg4[%c0_238, %c0_239] : memref<8x128xf32, #tpu.memory_space<vmem>>, vector<1x128xf32>
    tpu.vector_store %arg4[%c0_238, %c0_239], %1188 {strides = array<i32>} : memref<8x128xf32, #tpu.memory_space<vmem>>, vector<1x128xf32>,
    %cst_240 = arith.constant 0.000000e+00 : f32
    %1190 = vector.broadcast %cst_240 : f32 to vector<16x1xf32>
    %1191 = arith.subf %1190, %12 : vector<16x1xf32>
    %1192 = vector.broadcast %1191 : vector<16x1xf32> to vector<16x128xf32>
    %1193 = arith.mulf %1172, %1192 : vector<16x128xf32>
    %cst_241 = arith.constant dense<0.000000e+00> : vector<128xf32>
    %1194 = vector.multi_reduction <add>, %1193, %cst_241 [0] : vector<16x128xf32> to vector<128xf32>
    %1195 = vector.shape_cast %1194 : vector<128xf32> to vector<1x128xf32>
    %c4_242 = arith.constant 4 : index
    %c0_243 = arith.constant 0 : index
    %1196 = vector.load %arg4[%c4_242, %c0_243] : memref<8x128xf32, #tpu.memory_space<vmem>>, vector<1x128xf32>
    tpu.vector_store %arg4[%c4_242, %c0_243], %1195 {strides = array<i32>} : memref<8x128xf32, #tpu.memory_space<vmem>>, vector<1x128xf32>,
    %c2_244 = arith.constant 2 : index
    %c0_245 = arith.constant 0 : index
    %1197 = vector.load %arg5[%c2_244, %c0_245] : memref<32x256xf32, #tpu.memory_space<vmem>>, vector<16x256xf32>
    %c14_246 = arith.constant 14 : index
    %c0_247 = arith.constant 0 : index
    %1198 = vector.load %arg5[%c14_246, %c0_247] : memref<32x256xf32, #tpu.memory_space<vmem>>, vector<16x256xf32>
    %1199 = vector.shape_cast %19 : vector<16x1xi1> to vector<16x1xi1>
    %1200 = vector.broadcast %1199 : vector<16x1xi1> to vector<16x256xi1>
    %1201 = arith.select %1200, %1197, %1198 : vector<16x256xi1>, vector<16x256xf32>
    %1202 = vector.extract_strided_slice %1201 {offsets = [0, 0], sizes = [16, 128], strides = [1, 1]} : vector<16x256xf32> to vector<16x128xf32>
    %1203 = vector.extract_strided_slice %1201 {offsets = [0, 128], sizes = [16, 128], strides = [1, 1]} : vector<16x256xf32> to vector<16x128xf32>
    %1204 = arith.mulf %1166, %1202 : vector<16x128xf32>
    %1205 = arith.mulf %1169, %1203 : vector<16x128xf32>
    %1206 = arith.addf %1204, %1205 : vector<16x128xf32>
    %cst_248 = arith.constant dense<0.000000e+00> : vector<128xf32>
    %1207 = vector.multi_reduction <add>, %1206, %cst_248 [0] : vector<16x128xf32> to vector<128xf32>
    %1208 = vector.shape_cast %1207 : vector<128xf32> to vector<1x128xf32>
    %c1_249 = arith.constant 1 : index
    %c0_250 = arith.constant 0 : index
    %1209 = vector.load %arg4[%c1_249, %c0_250] : memref<8x128xf32, #tpu.memory_space<vmem>>, vector<1x128xf32>
    tpu.vector_store %arg4[%c1_249, %c0_250], %1208 {strides = array<i32>} : memref<8x128xf32, #tpu.memory_space<vmem>>, vector<1x128xf32>,
    %cst_251 = arith.constant 0.000000e+00 : f32
    %1210 = vector.broadcast %cst_251 : f32 to vector<16x1xf32>
    %1211 = arith.subf %1210, %23 : vector<16x1xf32>
    %1212 = vector.broadcast %1211 : vector<16x1xf32> to vector<16x128xf32>
    %1213 = arith.mulf %1172, %1212 : vector<16x128xf32>
    %cst_252 = arith.constant dense<0.000000e+00> : vector<128xf32>
    %1214 = vector.multi_reduction <add>, %1213, %cst_252 [0] : vector<16x128xf32> to vector<128xf32>
    %1215 = vector.shape_cast %1214 : vector<128xf32> to vector<1x128xf32>
    %c5 = arith.constant 5 : index
    %c0_253 = arith.constant 0 : index
    %1216 = vector.load %arg4[%c5, %c0_253] : memref<8x128xf32, #tpu.memory_space<vmem>>, vector<1x128xf32>
    tpu.vector_store %arg4[%c5, %c0_253], %1215 {strides = array<i32>} : memref<8x128xf32, #tpu.memory_space<vmem>>, vector<1x128xf32>,
    %c4_254 = arith.constant 4 : index
    %c0_255 = arith.constant 0 : index
    %1217 = vector.load %arg5[%c4_254, %c0_255] : memref<32x256xf32, #tpu.memory_space<vmem>>, vector<16x256xf32>
    %c12_256 = arith.constant 12 : index
    %c0_257 = arith.constant 0 : index
    %1218 = vector.load %arg5[%c12_256, %c0_257] : memref<32x256xf32, #tpu.memory_space<vmem>>, vector<16x256xf32>
    %1219 = vector.shape_cast %30 : vector<16x1xi1> to vector<16x1xi1>
    %1220 = vector.broadcast %1219 : vector<16x1xi1> to vector<16x256xi1>
    %1221 = arith.select %1220, %1217, %1218 : vector<16x256xi1>, vector<16x256xf32>
    %1222 = vector.extract_strided_slice %1221 {offsets = [0, 0], sizes = [16, 128], strides = [1, 1]} : vector<16x256xf32> to vector<16x128xf32>
    %1223 = vector.extract_strided_slice %1221 {offsets = [0, 128], sizes = [16, 128], strides = [1, 1]} : vector<16x256xf32> to vector<16x128xf32>
    %1224 = arith.mulf %1166, %1222 : vector<16x128xf32>
    %1225 = arith.mulf %1169, %1223 : vector<16x128xf32>
    %1226 = arith.addf %1224, %1225 : vector<16x128xf32>
    %cst_258 = arith.constant dense<0.000000e+00> : vector<128xf32>
    %1227 = vector.multi_reduction <add>, %1226, %cst_258 [0] : vector<16x128xf32> to vector<128xf32>
    %1228 = vector.shape_cast %1227 : vector<128xf32> to vector<1x128xf32>
    %c2_259 = arith.constant 2 : index
    %c0_260 = arith.constant 0 : index
    %1229 = vector.load %arg4[%c2_259, %c0_260] : memref<8x128xf32, #tpu.memory_space<vmem>>, vector<1x128xf32>
    tpu.vector_store %arg4[%c2_259, %c0_260], %1228 {strides = array<i32>} : memref<8x128xf32, #tpu.memory_space<vmem>>, vector<1x128xf32>,
    %cst_261 = arith.constant 0.000000e+00 : f32
    %1230 = vector.broadcast %cst_261 : f32 to vector<16x1xf32>
    %1231 = arith.subf %1230, %34 : vector<16x1xf32>
    %1232 = vector.broadcast %1231 : vector<16x1xf32> to vector<16x128xf32>
    %1233 = arith.mulf %1172, %1232 : vector<16x128xf32>
    %cst_262 = arith.constant dense<0.000000e+00> : vector<128xf32>
    %1234 = vector.multi_reduction <add>, %1233, %cst_262 [0] : vector<16x128xf32> to vector<128xf32>
    %1235 = vector.shape_cast %1234 : vector<128xf32> to vector<1x128xf32>
    %c6 = arith.constant 6 : index
    %c0_263 = arith.constant 0 : index
    %1236 = vector.load %arg4[%c6, %c0_263] : memref<8x128xf32, #tpu.memory_space<vmem>>, vector<1x128xf32>
    tpu.vector_store %arg4[%c6, %c0_263], %1235 {strides = array<i32>} : memref<8x128xf32, #tpu.memory_space<vmem>>, vector<1x128xf32>,
    %c8_264 = arith.constant 8 : index
    %c0_265 = arith.constant 0 : index
    %1237 = vector.load %arg5[%c8_264, %c0_265] : memref<32x256xf32, #tpu.memory_space<vmem>>, vector<16x256xf32>
    %1238 = vector.extract_strided_slice %1237 {offsets = [0, 0], sizes = [16, 128], strides = [1, 1]} : vector<16x256xf32> to vector<16x128xf32>
    %1239 = vector.extract_strided_slice %1237 {offsets = [0, 128], sizes = [16, 128], strides = [1, 1]} : vector<16x256xf32> to vector<16x128xf32>
    %1240 = arith.mulf %1166, %1238 : vector<16x128xf32>
    %1241 = arith.mulf %1169, %1239 : vector<16x128xf32>
    %1242 = arith.addf %1240, %1241 : vector<16x128xf32>
    %cst_266 = arith.constant dense<0.000000e+00> : vector<128xf32>
    %1243 = vector.multi_reduction <add>, %1242, %cst_266 [0] : vector<16x128xf32> to vector<128xf32>
    %1244 = vector.shape_cast %1243 : vector<128xf32> to vector<1x128xf32>
    %c3 = arith.constant 3 : index
    %c0_267 = arith.constant 0 : index
    %1245 = vector.load %arg4[%c3, %c0_267] : memref<8x128xf32, #tpu.memory_space<vmem>>, vector<1x128xf32>
    tpu.vector_store %arg4[%c3, %c0_267], %1244 {strides = array<i32>} : memref<8x128xf32, #tpu.memory_space<vmem>>, vector<1x128xf32>,
    %cst_268 = arith.constant 0.000000e+00 : f32
    %1246 = vector.broadcast %cst_268 : f32 to vector<16x1xf32>
    %1247 = arith.subf %1246, %44 : vector<16x1xf32>
    %1248 = vector.broadcast %1247 : vector<16x1xf32> to vector<16x128xf32>
    %1249 = arith.mulf %1172, %1248 : vector<16x128xf32>
    %cst_269 = arith.constant dense<0.000000e+00> : vector<128xf32>
    %1250 = vector.multi_reduction <add>, %1249, %cst_269 [0] : vector<16x128xf32> to vector<128xf32>
    %1251 = vector.shape_cast %1250 : vector<128xf32> to vector<1x128xf32>
    %c7 = arith.constant 7 : index
    %c0_270 = arith.constant 0 : index
    %1252 = vector.load %arg4[%c7, %c0_270] : memref<8x128xf32, #tpu.memory_space<vmem>>, vector<1x128xf32>
    tpu.vector_store %arg4[%c7, %c0_270], %1251 {strides = array<i32>} : memref<8x128xf32, #tpu.memory_space<vmem>>, vector<1x128xf32>,
    return
  }
  func.func @transform_0(%arg0: i32) -> (i32, i32) {
    %c0_i32 = arith.constant 0 : i32
    %c0_i32_0 = arith.constant 0 : i32
    return %c0_i32, %arg0 : i32, i32
  }
  func.func @transform_1(%arg0: i32) -> (i32, i32, i32) {
    %c0_i32 = arith.constant 0 : i32
    %c0_i32_0 = arith.constant 0 : i32
    %c0_i32_1 = arith.constant 0 : i32
    %c0_i32_2 = arith.constant 0 : i32
    return %c0_i32, %c0_i32_0, %c0_i32_1 : i32, i32, i32
  }
  func.func @transform_2(%arg0: i32) -> (i32, i32, i32) {
    %c0_i32 = arith.constant 0 : i32
    %c0_i32_0 = arith.constant 0 : i32
    %c0_i32_1 = arith.constant 0 : i32
    %c0_i32_2 = arith.constant 0 : i32
    return %c0_i32, %c0_i32_0, %c0_i32_1 : i32, i32, i32
  }
  func.func @transform_3(%arg0: i32) -> (i32, i32) {
    %c0_i32 = arith.constant 0 : i32
    %c0_i32_0 = arith.constant 0 : i32
    return %c0_i32, %arg0 : i32, i32
  }
}

</mosaic_0001>

<bundles_post_ra>
// kernel: tpu_custom_call.1
= control target key start
LH: loop header
LB: loop body
LE: loop exit
PB: predicated region body
PF: predicated region fallthrough
CT: control target
= control target key end

     0   :  { %v4244_v1 = vmov 1   ;;  %v4245_v2 = vmov 0   ;;  %s6804_s0 = inlined_call_operand.vmem [shape: f32[4,128], index: 0, kind: input, shape index: {}]   ;;  %s6805_s1 = inlined_call_operand.vmem [shape: f32[2,24,4], index: 1, kind: input, shape index: {}]   ;;  %s6806_s2 = inlined_call_operand.vmem [shape: f32[2,24,1], index: 2, kind: input, shape index: {}]   ;;  %s6807_s3 = inlined_call_operand.hbm [shape: f32[8,128], index: 3, kind: output, shape index: {}]  }
   0x1   :  { %v77_v0 = vld [vmem:[%s6805_s1] sm:$0xff]  ;;  %4169 = vset.pattern.permute.xlu1 %v4244_v1  ;;  %4168 = vset.pattern.permute.xlu0 %v4245_v2 }
   0x2   :  { %127 = vperm.xlu1 %4169, %v77_v0   ;;  %103 = vperm.xlu0 %4168, %v77_v0   ;;  %v80_v3 = vld [vmem:[%s6806_s2] sm:$0xff] }
   0x3   :  { %8 = vsyncpa [#allocation4], 0  ;;  %v4246_v4 = vmov 2   ;;  %v78_v5 = vld [vmem:[%s6805_s1 + $0x8] sm:$0xff]  ;;  %v4247_v6 = vmov 3   ;;  %v16_v7 = vlaneseq  ;;  %v6820_v10 = vmov 0.0  }
   0x4   :  { %v81_v8 = vld [vmem:[%s6806_s2 + $0x8] sm:$0xff]  ;;  %817 = vst [vmem:[#allocation2 + $0x10] sm:$0xff] %v6820_v10  ;;  %819 = vst [vmem:[#allocation2 + $0x30] sm:$0xff] %v6820_v10  ;;  %v79_v11 = vld [vmem:[%s6805_s1 + $0x10] sm:$0xff] }
   0x5   :  { %v4294_v9 = vshrl.u32 %v16_v7, 7  ;;  %820 = vst [vmem:[#allocation2 + $0x8] sm:$0xff] %v6820_v10  ;;  %821 = vst [vmem:[#allocation2 + $0x18] sm:$0xff] %v6820_v10  ;;  %v82_v13 = vld [vmem:[%s6806_s2 + $0x10] sm:$0xff]  ;;  %v4103_v14 = vld [vmem:[%s6806_s2 + $0x18] sm:$0xff] }
   0x6   :  { %4170 = vset.pattern.permute.xlu1 %v4246_v4  ;;  %85 = vperm.xlu0 %4168, %v80_v3   ;;  %822 = vst [vmem:[#allocation2 + $0x28] sm:$0xff] %v6820_v10  ;;  %823 = vst [vmem:[#allocation2 + $0x38] sm:$0xff] %v6820_v10  ;;  %v4100_v15 = vld [vmem:[%s6805_s1 + $0x18] sm:$0xff]  ;;  %v4101_v16 = vld [vmem:[%s6805_s1 + $0x20] sm:$0xff]  ;;  %v6821_v3 = vmov 683565275  }
   0x7   :  { %149 = vperm.xlu1 %4170, %v77_v0   ;;  %vm73_vm0 = vcmp.eq.s32.totalorder %v4294_v9, 0  ;;  %v4104_v17 = vld [vmem:[%s6806_s2 + $0x20] sm:$0xff]  ;;  %v4346_v18 = vsub.s32 0, %v4294_v9  ;;  %v4352_v20 = vsub.s32 1, %v4294_v9  ;;  %v4358_v22 = vsub.s32 2, %v4294_v9 }
   0x8   :  { %v4308_v12 = vsel %vm73_vm0, 1.0, %v6820_v10  ;;  %v15_v19 = vld [vmem:[%s6804_s0] sm:$0xf]  ;;  %v4368_v28 = vsub.s32 3, %v4294_v9  ;;  %v6816_v7 = vmov 2475754826  }
   0x9   :  { %816 = vst [vmem:[#allocation2] sm:$0xff] %v4308_v12  ;;  %818 = vst [vmem:[#allocation2 + $0x20] sm:$0xff] %v4308_v12  ;;  %v4355_v21 = vrot.slane %v15_v19, %v4346_v18  ;;  %v4361_v25 = vrot.slane %v15_v19, %v4352_v20  ;;  %v4365_v27 = vrot.slane %v15_v19, %v4358_v22 }
   0xa   :  { %4171 = vset.pattern.permute.xlu0 %v4247_v6  ;;  %6924 = vst [vmem:[#allocation6_spill] sm:$0xff] %v4346_v18  ;;  %6925 = vst [vmem:[#allocation7_spill] sm:$0xff] %v4352_v20  ;;  %v4373_v34 = vrot.slane %v15_v19, %v4368_v28 }
   0xb   :  { %4172 = vset.pattern.permute.xlu1 %v4245_v2  ;;  %171 = vperm.xlu0 %4171, %v77_v0   ;;  %6926 = vst [vmem:[#allocation8_spill] sm:$0xff] %v4355_v21  ;;  %6927 = vst [vmem:[#allocation9_spill] sm:$0xff] %v4358_v22 }
   0xc   :  { %108 = vperm.xlu1 %4172, %v78_v5   ;;  %6928 = vst [vmem:[#allocation10_spill] sm:$0xff] %v4361_v25  ;;  %6929 = vst [vmem:[#allocation11_spill] sm:$0xff] %v4365_v27 }
   0xd   :  { %6930 = vst [vmem:[#allocation12_spill] sm:$0xff] %v4368_v28  ;;  %6931 = vst [vmem:[#allocation13_spill] sm:$0xff] %v4373_v34 }
   0xf   :  { %4173 = vset.pattern.permute.xlu0 %v4244_v1 }
  0x10   :  { %90 = vperm.xlu1 %4172, %v81_v8   ;;  %131 = vperm.xlu0 %4173, %v78_v5  }
  0x14   :  { %4174 = vset.pattern.permute.xlu1 %v4246_v4  ;;  %4176 = vset.pattern.permute.xlu0 %v4245_v2 }
  0x15   :  { %153 = vperm.xlu1 %4174, %v78_v5   ;;  %113 = vperm.xlu0 %4176, %v79_v11  }
  0x19   :  { %4175 = vset.pattern.permute.xlu1 %v4247_v6  ;;  %4179 = vset.pattern.permute.xlu0 %v4246_v4 }
  0x1a   :  { %175 = vperm.xlu1 %4175, %v78_v5   ;;  %157 = vperm.xlu0 %4179, %v79_v11  }
  0x1e   :  { %4177 = vset.pattern.permute.xlu1 %v4245_v2  ;;  %4182 = vset.pattern.permute.xlu0 %v4245_v2 }
  0x1f   :  { %95 = vperm.xlu1 %4177, %v82_v13   ;;  %1947 = vperm.xlu0 %4182, %v4103_v14   ;;  %v6814_v14 = vmov 2131351028  }
  0x23   :  { %4178 = vset.pattern.permute.xlu1 %v4244_v1  ;;  %4185 = vset.pattern.permute.xlu0 %v4247_v6 }
  0x24   :  { %135 = vperm.xlu1 %4178, %v79_v11   ;;  %2021 = vperm.xlu0 %4185, %v4100_v15  }
  0x28   :  { %4180 = vset.pattern.permute.xlu1 %v4247_v6  ;;  %4187 = vset.pattern.permute.xlu0 %v4244_v1 }
  0x29   :  { %179 = vperm.xlu1 %4180, %v79_v11   ;;  %1989 = vperm.xlu0 %4187, %v4101_v16  }
  0x2d   :  { %4181 = vset.pattern.permute.xlu1 %v4245_v2  ;;  %4190 = vset.pattern.permute.xlu0 %v4245_v2 }
  0x2e   :  { %1965 = vperm.xlu1 %4181, %v4100_v15  }
  0x32   :  { %4183 = vset.pattern.permute.xlu1 %v4244_v1 }
  0x33   :  { %1985 = vperm.xlu1 %4183, %v4100_v15  }
  0x37   :  { %4184 = vset.pattern.permute.xlu1 %v4246_v4 }
  0x38   :  { %2003 = vperm.xlu1 %4184, %v4100_v15  }
  0x3c   :  { %4186 = vset.pattern.permute.xlu1 %v4245_v2 }
  0x3d   :  { %1970 = vperm.xlu1 %4186, %v4101_v16  }
  0x41   :  { %1952 = vperm.xlu1 %4186, %v4104_v17   ;;  %v6812_v17 = vmov 2102212464  }
  0x45   :  { %4188 = vset.pattern.permute.xlu1 %v4246_v4 }
  0x46   :  { %2007 = vperm.xlu1 %4188, %v4101_v16  }
  0x4a   :  { %4189 = vset.pattern.permute.xlu1 %v4247_v6 }
  0x4b   :  { %2025 = vperm.xlu1 %4189, %v4101_v16  }
  0x4f   :  { %4191 = vset.pattern.permute.xlu1 %v4245_v2 }
  0x81   :  { %v128_v23 = vpop.permute.xlu1 %127  ;;  %v104_v24 = vpop.permute.xlu0 %103 }
  0x82   :  { %v120_v26 = vmul.f32 %v4355_v21, %v104_v24  ;;  %v142_v30 = vmul.f32 %v4361_v25, %v128_v23 }
  0x85   :  { %v86_v29 = vpop.permute.xlu0 %85 }
  0x86   :  { %v123_v31 = vadd.f32 %v120_v26, %v86_v29  ;;  %v150_v32 = vpop.permute.xlu1 %149  ;;  %v6810_v26 = vmov 920167782  }
  0x87   :  { %v164_v33 = vmul.f32 %v4365_v27, %v150_v32 }
  0x88   :  { %v145_v35 = vadd.f32 %v142_v30, %v123_v31  ;;  %v6808_v31 = vmov 1326507024  }
  0x8a   :  { %v167_v36 = vadd.f32 %v164_v33, %v145_v35  ;;  %v172_v37 = vpop.permute.xlu0 %171 }
  0x8b   :  { %v186_v38 = vmul.f32 %v4373_v34, %v172_v37  ;;  %v109_v39 = vpop.permute.xlu1 %108 }
  0x8c   :  { %v121_v46 = vmul.f32 %v4355_v21, %v109_v39 }
  0x8d   :  { %v189_v40 = vadd.f32 %v186_v38, %v167_v36 }
  0x8f   :  { %v4376_v41 = vmul.f32 0.5, %v189_v40  ;;  %v91_v42 = vpop.permute.xlu1 %90  ;;  %v132_v45 = vpop.permute.xlu0 %131 }
  0x90   :  { %v124_v50 = vadd.f32 %v121_v46, %v91_v42  ;;  %v143_v51 = vmul.f32 %v4361_v25, %v132_v45 }
  0x91   :  { %v198_v43 = vand.u32 2139095040, %v4376_v41  ;;  %v195_v48 = vand.u32 2147483647, %v4376_v41  ;;  %vm197_vm0 = vcmp.lt.s32.totalorder %v4376_v41, 0 }
  0x92   :  { %v146_v57 = vadd.f32 %v143_v51, %v124_v50 }
  0x93   :  { %v199_v44 = vshrl.u32 %v198_v43, 23  ;;  %v202_v54 = vand.u32 8388607, %v195_v48 }
  0x94   :  { %v154_v47 = vpop.permute.xlu1 %153  ;;  %v114_v59 = vpop.permute.xlu0 %113 }
  0x95   :  { %v4075_v49 = vadd.s32 4294967169, %v199_v44  ;;  %v165_v53 = vmul.f32 %v4365_v27, %v154_v47  ;;  %v203_v62 = vor.u32 8388608, %v202_v54  ;;  %v122_v0 = vmul.f32 %v4355_v21, %v114_v59 }
  0x97   :  { %v205_v52 = vadd.s32 1, %v4075_v49  ;;  %v168_v61 = vadd.f32 %v165_v53, %v146_v57  ;;  %v243_v37 = vshll.u32 %v203_v62, 8 }
  0x99   :  { %vm206_vm1 = vcmp.gt.s32.totalorder %v205_v52, 0  ;;  %v176_v55 = vpop.permute.xlu1 %175 }
  0x9a   :  { %v207_v56 = vsel %vm206_vm1, %v205_v52, 0  ;;  %v187_v58 = vmul.f32 %v4373_v34, %v176_v55 }
  0x9b   :  { %v209_v60 = vand.u32 31, %v207_v56  ;;  %v208_v2 = vshrl.u32 %v207_v56, 5 }
  0x9c   :  { %v190_v11 = vadd.f32 %v187_v58, %v168_v61  ;;  %v158_v61 = vpop.permute.xlu0 %157 }
  0x9d   :  { %v210_v63 = vsub.s32 32, %v209_v60  ;;  %v212_v5 = vshll.u32 %v6821_v3, %v209_v60  ;;  %v215_v8 = vshll.u32 %v6816_v7, %v209_v60  ;;  %v218_v16 = vshll.u32 %v6814_v14, %v209_v60 }
  0x9e   :  { %v96_v23 = vpop.permute.xlu1 %95  ;;  %v221_v24 = vshll.u32 %v6812_v17, %v209_v60  ;;  %v224_v30 = vshll.u32 %v6810_v26, %v209_v60  ;;  %vm227_vm2 = vcmp.lt.s32.totalorder %v208_v2, 1  ;;  %vm230_vm3 = vcmp.lt.s32.totalorder %v208_v2, 4 }
  0x9f   :  { %v213_v13 = vshrl.u32 %v6816_v7, %v210_v63  ;;  %v216_v15 = vshrl.u32 %v6814_v14, %v210_v63  ;;  %v219_v19 = vshrl.u32 %v6812_v17, %v210_v63  ;;  %v222_v29 = vshrl.u32 %v6810_v26, %v210_v63 }
  0xa0   :  { %v225_v32 = vshrl.u32 %v6808_v31, %v210_v63  ;;  %v211_v40 = vshrl.u32 %v6821_v3, %v210_v63  ;;  %vm229_vm4 = vcmp.lt.s32.totalorder %v208_v2, 3  ;;  %v4398_v47 = vmul.f32 0.5, %v190_v11 }
  0xa1   :  { %v214_v33 = vor.u32 %v213_v13, %v212_v5  ;;  %v217_v35 = vor.u32 %v216_v15, %v215_v8  ;;  %v220_v36 = vor.u32 %v219_v19, %v218_v16  ;;  %v223_v38 = vor.u32 %v222_v29, %v221_v24 }
  0xa2   :  { %v226_v39 = vor.u32 %v225_v32, %v224_v30  ;;  %vm228_vm5 = vcmp.lt.s32.totalorder %v208_v2, 2  ;;  %v125_v51 = vadd.f32 %v122_v0, %v96_v23  ;;  %v301_v62 = vand.u32 2139095040, %v4398_v47 }
  0xa3   :  { %v232_v42 = vsel %vm230_vm3, %v220_v36, 2102212464  ;;  %v235_v43 = vsel %vm227_vm2, %v214_v33, %v217_v35  ;;  %v239_v44 = vsel %vm227_vm2, %v217_v35, %v220_v36  ;;  %v236_v45 = vsel %vm230_vm3, %v223_v38, 920167782  ;;  %v136_v52 = vpop.permute.xlu1 %135 }
  0xa4   :  { %v240_v46 = vsel %vm230_vm3, %v226_v39, 1326507024  ;;  %v237_v49 = vsel %vm229_vm4, %v220_v36, %v236_v45  ;;  %v231_v53 = vsel %vm227_vm2, %v211_v40, %v214_v33  ;;  %v233_v54 = vsel %vm229_vm4, %v217_v35, %v232_v42 }
  0xa5   :  { %v241_v50 = vsel %vm229_vm4, %v223_v38, %v240_v46  ;;  %v238_v55 = vsel %vm228_vm5, %v235_v43, %v237_v49  ;;  %v144_v63 = vmul.f32 %v4361_v25, %v136_v52  ;;  %v234_v2 = vsel %vm228_vm5, %v231_v53, %v233_v54 }
  0xa6   :  { %v242_v56 = vsel %vm228_vm5, %v239_v44, %v241_v50  ;;  %v4403_v59 = vmul.u32.u64.low %v243_v37, %v238_v55  ;;  %v4404_v60 = vmul.u32.u64.high %v243_v37, %v238_v55, %v4403_v59  ;;  %v302_v5 = vshrl.u32 %v301_v62, 23 }
  0xa7   :  { %v4400_v57 = vmul.u32.u64.low %v243_v37, %v242_v56  ;;  %v4401_v58 = vmul.u32.u64.high %v243_v37, %v242_v56, %v4400_v57  ;;  %v147_v0 = vadd.f32 %v144_v63, %v125_v51  ;;  %v166_v8 = vmul.f32 %v4365_v27, %v158_v61 }
  0xa8   :  { %v253_v11 = vadd.s32 1, %v4404_v60  ;;  %v180_v13 = vpop.permute.xlu1 %179  ;;  %v250_v15 = vmul.u32 %v243_v37, %v234_v2  ;;  %v4079_v16 = vadd.s32 4294967169, %v302_v5  ;;  %v6819_v23 = vand.u32 2147483647, %v4398_v47 }
  0xa9   :  { %vm252_vm6 = vc.u32 %v4401_v58, %v4403_v59  ;;  %v169_v30 = vadd.f32 %v166_v8, %v147_v0  ;;  %v188_v32 = vmul.f32 %v4373_v34, %v180_v13  ;;  %vm4468_vm2 = vcmp.le.f32.partialorder %v195_v48, 0.7853982 }
  0xaa   :  { %v254_v19 = vsel %vm252_vm6, %v253_v11, %v4404_v60  ;;  %v308_v29 = vadd.s32 1, %v4079_v16  ;;  %v305_v35 = vand.u32 8388607, %v6819_v23  ;;  %v47_v48 = vand.u32 4, %v4294_v9 }
  0xab   :  { %v255_v24 = vadd.s32 %v254_v19, %v250_v15  ;;  %v191_v37 = vadd.f32 %v188_v32, %v169_v30 }
  0xac   :  { %vm309_vm7 = vcmp.gt.s32.totalorder %v308_v29, 0  ;;  %v306_v43 = vor.u32 8388608, %v305_v35  ;;  %vm4510_vm5 = vcmp.ne.s32.totalorder %v47_v48, 0 }
  0xad   :  { %v256_v33 = vadd.s32 536870912, %v255_v24  ;;  %v310_v36 = vsel %vm309_vm7, %v308_v29, 0  ;;  %v4422_v49 = vmul.f32 0.5, %v191_v37 }
  0xae   :  { %v312_v39 = vand.u32 31, %v310_v36  ;;  %v311_v45 = vshrl.u32 %v310_v36, 5  ;;  %v346_v13 = vshll.u32 %v306_v43, 8 }
  0xaf   :  { %v4418_v38 = vshrl.u32 %v256_v33, 30  ;;  %v404_v15 = vand.u32 2139095040, %v4422_v49 }
  0xb0   :  { %v313_v42 = vsub.s32 32, %v312_v39  ;;  %v321_v51 = vshll.u32 %v6814_v14, %v312_v39  ;;  %v315_v55 = vshll.u32 %v6821_v3, %v312_v39  ;;  %v318_v56 = vshll.u32 %v6816_v7, %v312_v39 }
  0xb1   :  { %v258_v40 = vshll.u32 %v4418_v38, 30  ;;  %v324_v57 = vshll.u32 %v6812_v17, %v312_v39  ;;  %v327_v61 = vshll.u32 %v6810_v26, %v312_v39  ;;  %vm333_vm8 = vcmp.lt.s32.totalorder %v311_v45, 4 }
  0xb2   :  { %v316_v46 = vshrl.u32 %v6816_v7, %v313_v42  ;;  %v319_v50 = vshrl.u32 %v6814_v14, %v313_v42  ;;  %v322_v52 = vshrl.u32 %v6812_v17, %v313_v42  ;;  %v325_v53 = vshrl.u32 %v6810_v26, %v313_v42 }
  0xb3   :  { %v259_v44 = vsub.s32 %v255_v24, %v258_v40  ;;  %v328_v62 = vshrl.u32 %v6808_v31, %v313_v42  ;;  %v314_v16 = vshrl.u32 %v6821_v3, %v313_v42  ;;  %vm330_vm9 = vcmp.lt.s32.totalorder %v311_v45, 1 }
  0xb4   :  { %v323_v60 = vor.u32 %v322_v52, %v321_v51  ;;  %v317_v2 = vor.u32 %v316_v46, %v315_v55  ;;  %v320_v5 = vor.u32 %v319_v50, %v318_v56  ;;  %v326_v0 = vor.u32 %v325_v53, %v324_v57 }
  0xb5   :  { %v261_v54 = vsub.s32 0, %v259_v44  ;;  %v329_v8 = vor.u32 %v328_v62, %v327_v61  ;;  %vm331_vm10 = vcmp.lt.s32.totalorder %v311_v45, 2  ;;  %vm332_vm11 = vcmp.lt.s32.totalorder %v311_v45, 3 }
  0xb6   :  { %v335_v19 = vsel %vm333_vm8, %v323_v60, 2102212464  ;;  %v338_v29 = vsel %vm330_vm9, %v317_v2, %v320_v5  ;;  %v339_v30 = vsel %vm333_vm8, %v326_v0, 920167782  ;;  %v334_v32 = vsel %vm330_vm9, %v314_v16, %v317_v2 }
  0xb7   :  { %v4076_v63 = vmin.u32 %v261_v54, %v259_v44  ;;  %v340_v33 = vsel %vm332_vm11, %v323_v60, %v339_v30  ;;  %v342_v35 = vsel %vm330_vm9, %v320_v5, %v323_v60  ;;  %v343_v36 = vsel %vm333_vm8, %v329_v8, 1326507024 }
  0xb8   :  { %v336_v39 = vsel %vm332_vm11, %v320_v5, %v335_v19  ;;  %v341_v37 = vsel %vm331_vm10, %v338_v29, %v340_v33  ;;  %v344_v40 = vsel %vm332_vm11, %v326_v0, %v343_v36  ;;  %v251_v51 = vadd.s32 %v4403_v59, %v4401_v58 }
  0xb9   :  { %v263_v11 = vclz %v4076_v63  ;;  %v345_v46 = vsel %vm331_vm10, %v342_v35, %v344_v40  ;;  %v4437_v42 = vmul.u32.u64.low %v346_v13, %v341_v37  ;;  %v4438_v50 = vmul.u32.u64.high %v346_v13, %v341_v37, %v4437_v42 }
  0xba   :  { %v4443_v54 = vmul.u32.u64.low %v346_v13, %v345_v46  ;;  %v4444_v55 = vmul.u32.u64.high %v346_v13, %v345_v46, %v4443_v54  ;;  %v405_v56 = vshrl.u32 %v404_v15, 23  ;;  %v337_v62 = vsel %vm331_vm10, %v334_v32, %v336_v39 }
  0xbb   :  { %v4077_v24 = vadd.s32 4294967294, %v263_v11  ;;  %v356_v63 = vadd.s32 1, %v4438_v50  ;;  %v353_v8 = vmul.u32 %v346_v13, %v337_v62  ;;  %v18_v19 = vadd.s32 8, %v4294_v9 }
  0xbc   :  { %v4083_v2 = vadd.s32 4294967169, %v405_v56  ;;  %vm355_vm13 = vc.u32 %v4444_v55, %v4437_v42  ;;  %v19_v45 = vand.u32 1, %v4294_v9  ;;  %v33_v29 = vand.u32 2, %v4294_v9 }
  0xbd   :  { %vm4078_vm12 = vcmp.lt.s32.totalorder %v4077_v24, 0  ;;  %v357_v11 = vsel %vm355_vm13, %v356_v63, %v4438_v50  ;;  %v20_v35 = vand.u32 1, %v18_v19  ;;  %v34_v37 = vand.u32 2, %v18_v19 }
  0xbe   :  { %v266_v43 = vsel %vm4078_vm12, 0, %v4077_v24  ;;  %v411_v58 = vadd.s32 1, %v4083_v2  ;;  %v358_v16 = vadd.s32 %v357_v11, %v353_v8  ;;  %vm4456_vm15 = vcmp.ne.s32.totalorder %v19_v45, 0 }
  0xbf   :  { %v267_v52 = vsub.s32 32, %v266_v43  ;;  %v271_v53 = vsub.s32 4294967266, %v266_v43  ;;  %v268_v57 = vshll.u32 %v259_v44, %v266_v43  ;;  %vm4462_vm1 = vcmp.ne.s32.totalorder %v33_v29, 0  ;;  %v4102_v29 = vld [vmem:[%s6805_s1 + $0x28] sm:$0xff]  ;;  %s4256_s1 = smov [#allocation3]  }
  0xc0   :  { %v359_v24 = vadd.s32 536870912, %v358_v16  ;;  %vm412_vm14 = vcmp.gt.s32.totalorder %v411_v58, 0  ;;  %v281_v50 = vsub.s32 4, %v4418_v38  ;;  %v4483_v54 = vsel %vm4456_vm15, 1.0, %v6820_v10  ;;  %1975 = vperm.xlu0 %4190, %v4102_v29   ;;  %s4055_s9 = sshll.u32 %s4256_s1, 4  ;;  %s4056_s9 = int_to_ptr.vmem [resolvable:$true] %s4055_s9 }
  0xc1   :  { %v269_v60 = vshrl.u32 %v251_v51, %v267_v52  ;;  %v272_v61 = vadd.s32 127, %v271_v53  ;;  %v413_v33 = vsel %vm412_vm14, %v411_v58, 0  ;;  %6938 = vst [vmem:[#allocation14_spill] sm:$0xff] %v4483_v54  ;;  %v48_v56 = vand.u32 4, %v18_v19  ;;  %s4220_s10 = scalar_lea.vmem %s4056_s9, 128  ;;  %p4225_p1 = scmp.lt.s32.totalorder %s4056_s9, %s4056_s9 }
  0xc2   :  { %v4454_v13 = vshrl.u32 %v359_v24, 30  ;;  %v415_v53 = vand.u32 31, %v413_v33  ;;  %vm4487_vm3 = vcmp.ne.s32.totalorder %v20_v35, 0  ;;  %vm4491_vm4 = vcmp.ne.s32.totalorder %v34_v37, 0  ;;  %p4221_p0 = scmp.ne.s32.totalorder %s4056_s9, %s4220_s10  ;;  %p4226_p2 = scmp.lt.s32.totalorder %s4220_s10, %s4220_s10 }
  0xc3   :  { %v270_v5 = vor.u32 %v269_v60, %v268_v57  ;;  %v273_v0 = vshll.u32 %v272_v61, 23  ;;  %v4498_v62 = vsel %vm4462_vm1, 1.0, %v6820_v10  ;;  %v282_v63 = vsel %vm197_vm0, %v281_v50, %v4418_v38 }
  0xc4   :  { %v361_v39 = vshll.u32 %v4454_v13, 30  ;;  %6943 = vst [vmem:[#allocation15_spill] sm:$0xff] %v4498_v62  ;;  %v29_v8 = vmul.f32 2.0, %v4483_v54  ;;  %v6944_v58 = vmov 0  ;;  %v4517_v38 = vsel %vm4487_vm3, 1.0, %v6820_v10  ;;  %4193 = vset.pattern.permute.xlu0 %v4246_v4  ;;  %p4227_p3 = por %p4226_p2, %p4225_p1 }
  0xc5   :  { %v274_v59 = vor.u32 4788187, %v273_v0  ;;  %v277_v44 = vcvt.s32.f32 %v270_v5  ;;  %v4504_v5 = vsub.s32 32, %v415_v53  ;;  %v4105_v0 = vld [vmem:[%s6806_s2 + $0x28] sm:$0xff]  ;;  %v6945_v58 = vsel %vm4510_vm5, 4294967295, %v6944_v58  ;;  %6947 = vst [vmem:[#allocation17_spill] sm:$0xff] %v4517_v38  ;;  %2011 = vperm.xlu0 %4193, %v4102_v29  }
  0xc6   :  { %v4478_v52 = vsub.s32 %v358_v16, %v361_v39  ;;  %6946 = vst [vmem:[#allocation16_spill] sm:$0xff] %v6945_v58  ;;  %1957 = vperm.xlu1 %4191, %v4105_v0   ;;  %v4522_v11 = vsel %vm4491_vm4, 1.0, %v6820_v10  ;;  %v43_v16 = vmul.f32 2.0, %v4498_v62  ;;  %vm4527_vm6 = vcmp.ne.s32.totalorder %v48_v56, 0  ;;  %p4228_p4 = pnand %p4227_p3, %p4221_p0 }
  0xc7   :  { %v275_v15 = vand.u32 2147483647, %v274_v59  ;;  %6948 = vst [vmem:[#allocation18_spill] sm:$0xff] %v4522_v11  ;;  %v6818_v19 = vand.u32 2147483647, %v4422_v49  ;;  %v427_v45 = vshll.u32 %v6812_v17, %v415_v53  ;;  %v428_v24 = vshrl.u32 %v6810_v26, %v4504_v5 }
  0xc8   :  { %v364_v57 = vsub.s32 0, %v4478_v52  ;;  %v430_v35 = vshll.u32 %v6810_v26, %v415_v53  ;;  %v431_v39 = vshrl.u32 %v6808_v31, %v4504_v5  ;;  %v30_v37 = vmul.f32 2.0, %v4517_v38 }
  0xc9   :  { %v278_v30 = vmul.f32 %v277_v44, %v275_v15  ;;  %v284_v15 = vsel %vm4468_vm2, 0, %v282_v63  ;;  %v6949_v44 = vmov 0  ;;  %v421_v50 = vshll.u32 %v6816_v7, %v415_v53  ;;  %4195 = vset.pattern.permute.xlu0 %v4247_v6 }
  0xca   :  { %v4080_v2 = vmin.u32 %v364_v57, %v4478_v52  ;;  %v6950_v44 = vsel %vm4527_vm6, 4294967295, %v6949_v44  ;;  %v597_v43 = vadd.s32 3, %v284_v15  ;;  %4192 = vset.pattern.permute.xlu1 %v4244_v1  ;;  %v422_v48 = vshrl.u32 %v6814_v14, %v4504_v5 }
  0xcb   :  { %v279_v32 = vxor.u32 2147483648, %v278_v30  ;;  %6951 = vst [vmem:[#allocation19_spill] sm:$0xff] %v6950_v44  ;;  %v424_v56 = vshll.u32 %v6814_v14, %v415_v53  ;;  %v425_v57 = vshrl.u32 %v6812_v17, %v4504_v5  ;;  %1993 = vperm.xlu1 %4192, %v4102_v29   ;;  %v4556_v63 = vadd.f32 -1.0, %v29_v8  ;;  %v834_v44 = vld [vmem:[#allocation2 + $0x30] sm:$0x7f] }
  0xcc   :  { %v366_v59 = vclz %v4080_v2  ;;  %v4559_v2 = vmul.f32 2.0, %v4522_v11  ;;  %v4564_v1 = vsel %vm4510_vm5, 1.0, %v6820_v10  ;;  %v429_v0 = vor.u32 %v428_v24, %v427_v45 }
  0xcd   :  { %v280_v46 = vsel %vm197_vm0, %v279_v32, %v278_v30  ;;  %v4538_v32 = vshrl.u32 %v413_v33, 5  ;;  %v419_v33 = vshrl.u32 %v6816_v7, %v4504_v5  ;;  %6952 = vst [vmem:[#allocation20_spill] sm:$0xff] %v4556_v63  ;;  %6953 = vst [vmem:[#allocation21_spill] sm:$0xff] %v4564_v1  ;;  %v432_v31 = vor.u32 %v431_v39, %v430_v35  ;;  %v4584_v35 = vld [vmem:[#allocation2 + $0x8] sm:$0xfe] }
  0xce   :  { %v283_v51 = vsel %vm4468_vm2, %v4376_v41, %v280_v46  ;;  %v4081_v30 = vadd.s32 4294967294, %v366_v59  ;;  %v418_v46 = vshll.u32 %v6821_v3, %v415_v53  ;;  %v408_v53 = vand.u32 8388607, %v6818_v19  ;;  %v4586_v39 = vld [vmem:[#allocation2 + $0x20] sm:$0x1] }
  0xcf   :  { %4196 = vcosq.f32 %v283_v51  ;;  %vm436_vm8 = vcmp.lt.s32.totalorder %v4538_v32, 4  ;;  %v4574_v26 = vadd.f32 -1.0, %v30_v37  ;;  %v4576_v17 = vadd.f32 -1.0, %v43_v16  ;;  %4194 = vset.pattern.permute.xlu1 %v4247_v6 }
  0xd0   :  { %4198 = vsinq.f32 %v283_v51  ;;  %v4547_v51 = vld [vmem:[#allocation2] sm:$0xfe]  ;;  %vm4082_vm7 = vcmp.lt.s32.totalorder %v4081_v30, 0  ;;  %v4581_v45 = vsel %vm4527_vm6, 1.0, %v6820_v10  ;;  %v598_v14 = vand.u32 3, %v597_v43  ;;  %2029 = vperm.xlu1 %4194, %v4102_v29  }
  0xd1   :  { %6954 = vst [vmem:[#allocation22_spill] sm:$0xff] %v4574_v26  ;;  %6955 = vst [vmem:[#allocation23_spill] sm:$0xff] %v4576_v17  ;;  %v420_v4 = vor.u32 %v419_v33, %v418_v46  ;;  %v423_v7 = vor.u32 %v422_v48, %v421_v50  ;;  %v426_v19 = vor.u32 %v425_v57, %v424_v56  ;;  %v4590_v16 = vsel %vm4082_vm7, 0, %v4081_v30  ;;  %v829_v29 = vld [vmem:[#allocation2 + $0x28] sm:$0x1] }
  0xd2   :  { %6956 = vst [vmem:[#allocation24_spill] sm:$0xff] %v4581_v45  ;;  %vm433_vm9 = vcmp.lt.s32.totalorder %v4538_v32, 1  ;;  %vm435_vm10 = vcmp.lt.s32.totalorder %v4538_v32, 3  ;;  %v442_v37 = vsel %vm436_vm8, %v429_v0, 920167782  ;;  %v409_v46 = vor.u32 8388608, %v408_v53 }
  0xd3   :  { %v446_v50 = vsel %vm436_vm8, %v432_v31, 1326507024  ;;  %vm6871_vm11 = vcmask 1046528   ;;  %v288_v33 = vand.u32 3, %v284_v15  ;;  %v4601_v30 = vrot.slane %v6820_v10, 1 }
  0xd4   :  { %v850_v48 = vrot.slane %v4584_v35, 1  ;;  %v853_v56 = vrot.slane %v4586_v39, 1  ;;  %v4606_v57 = vld [vmem:[#allocation2 + $0x10] sm:$0x80]  ;;  %v374_v24 = vsub.s32 4294967266, %v4590_v16  ;;  %vm434_vm12 = vcmp.lt.s32.totalorder %v4538_v32, 2 }
  0xd5   :  { %v441_v31 = vsel %vm433_vm9, %v420_v4, %v423_v7  ;;  %v443_v15 = vsel %vm435_vm10, %v426_v19, %v442_v37  ;;  %vm600_vm13 = vcmp.eq.s32.totalorder %v598_v14, 0  ;;  %vm603_vm14 = vcmp.eq.s32.totalorder %v598_v14, 2 }
  0xd6   :  { %v445_v53 = vsel %vm433_vm9, %v423_v7, %v426_v19  ;;  %v447_v6 = vsel %vm435_vm10, %v429_v0, %v446_v50  ;;  %vm6870_vm0 = vcmask 1040384   ;;  %v370_v10 = vsub.s32 32, %v4590_v16 }
  0xd7   :  { %v4621_v3 = vshll.u32 %v409_v46, 8  ;;  %v855_v11 = vrot.slane %v829_v29, 1  ;;  %v868_v37 = vrot.slane %v4606_v57, 7  ;;  %v869_v62 = vrot.slane %v4308_v12, 7 }
  0xd8   :  { %v444_v38 = vsel %vm434_vm12, %v441_v31, %v443_v15  ;;  %vm599_vm2 = vcmp.lt.s32.totalorder %v598_v14, 2  ;;  %v354_v0 = vadd.s32 %v4437_v42, %v4444_v55  ;;  %v375_v50 = vadd.s32 127, %v374_v24  ;;  %v831_v42 = vld [vmem:[#allocation2 + $0x18] sm:$0x80] }
  0xd9   :  { %v4566_v59 = vpop.eup %4196  ;;  %v448_v54 = vsel %vm434_vm12, %v445_v53, %v447_v6  ;;  %vm287_vm7 = vweird.f32 %v4376_v41  ;;  %v6957_v29 = vmov 683565275   ;;  %v438_v31 = vsel %vm436_vm8, %v426_v19, 2102212464 }
  0xda   :  { %v4572_v8 = vpop.eup %4198  ;;  %v294_v23 = vxor.u32 2147483648, %v4566_v59  ;;  %v417_v57 = vshrl.u32 %v6957_v29, %v4504_v5  ;;  %v372_v58 = vshrl.u32 %v354_v0, %v370_v10  ;;  %v371_v55 = vshll.u32 %v4478_v52, %v4590_v16 }
  0xdb   :  { %v291_v43 = vxor.u32 2147483648, %v4572_v8  ;;  %v4637_v14 = vmul.u32.u64.low %v4621_v3, %v444_v38  ;;  %v4638_v15 = vmul.u32.u64.high %v4621_v3, %v444_v38, %v4637_v14  ;;  %v835_v38 = vld [vmem:[#allocation2 + $0x38] sm:$0x7f]  ;;  %v376_v6 = vshll.u32 %v375_v50, 23 }
  0xdc   :  { %v605_v39 = vsel %vm603_vm14, %v294_v23, %v4572_v8  ;;  %vm293_vm14 = vcmp.eq.s32.totalorder %v288_v33, 2  ;;  %v4644_v24 = vmul.u32.u64.low %v4621_v3, %v448_v54  ;;  %v4645_v53 = vmul.u32.u64.high %v4621_v3, %v448_v54, %v4644_v24 }
  0xdd   :  { %v602_v35 = vsel %vm600_vm13, %v4566_v59, %v291_v43  ;;  %vm290_vm13 = vcmp.eq.s32.totalorder %v288_v33, 0  ;;  %v295_v10 = vsel %vm293_vm14, %v294_v23, %v4572_v8  ;;  %v437_v52 = vsel %vm433_vm9, %v417_v57, %v420_v4 }
  0xde   :  { %v606_v46 = vsel %vm599_vm2, %v602_v35, %v605_v39  ;;  %v292_v5 = vsel %vm290_vm13, %v4566_v59, %v291_v43  ;;  %v874_v35 = vrot.slane %v834_v44, 7  ;;  %v384_v39 = vsub.s32 4, %v4454_v13 }
  0xdf   :  { %v4651_v19 = vsel %vm287_vm7, nan, %v606_v46  ;;  %v439_v54 = vsel %vm435_vm10, %v423_v7, %v438_v31  ;;  %vm289_vm8 = vcmp.lt.s32.totalorder %v288_v33, 2  ;;  %v6958_v59 = vrot.slane %v4547_v51, 1 }
  0xe0   :  { %v871_v8 = vrot.slane %v831_v42, 7  ;;  %v373_v16 = vor.u32 %v372_v58, %v371_v55  ;;  %v296_v43 = vsel %vm289_vm8, %v292_v5, %v295_v10  ;;  %v6959_v0 = vmov 0.0  }
  0xe1   :  { %v849_v23 = vsel %vm6871_vm11, %v6958_v59, %v4601_v30  ;;  %v872_v50 = vrot.slane %v6959_v0, 7  ;;  %v876_v44 = vrot.slane %v835_v38, 7  ;;  %v889_v46 = vrot.slane %v4651_v19, %v4346_v18 }
  0xe2   :  { %v852_v4 = vsel %vm6871_vm11, %v850_v48, %v4601_v30  ;;  %vm300_vm9 = vcmp.lt.s32.totalorder %v4398_v47, 0  ;;  %v377_v7 = vor.u32 4788187, %v376_v6  ;;  %v440_v51 = vsel %vm434_vm12, %v437_v52, %v439_v54 }
  0xe3   :  { %v854_v33 = vsel %vm6871_vm11, %v4601_v30, %v853_v56  ;;  %v856_v58 = vsel %vm6871_vm11, %v4601_v30, %v855_v11  ;;  %v875_v57 = vsel %vm6870_vm0, %v869_v62, %v874_v35  ;;  %v385_v31 = vsel %vm300_vm9, %v384_v39, %v4454_v13 }
  0xe4   :  { %vm4255_vm10 = vmmov 1   ;;  %v6960_v48 = vmov 0  ;;  %v4687_v32 = vsel %vm287_vm7, nan, %v296_v43  ;;  %v378_v56 = vand.u32 2147483647, %v377_v7 }
  0xe5   :  { %vm4681_vm2 = vmxor %vm4487_vm3, %vm4255_vm10  ;;  %v380_v11 = vcvt.s32.f32 %v373_v16  ;;  %v459_v30 = vadd.s32 1, %v4638_v15  ;;  %v877_v42 = vsel %vm6870_vm0, %v872_v50, %v876_v44  ;;  %v891_v13 = vmul.f32 %v4574_v26, %v889_v46 }
  0xe6   :  { %v6961_v48 = vsel %vm4681_vm2, 4294967295, %v6960_v48  ;;  %v456_v55 = vmul.u32 %v4621_v3, %v440_v51  ;;  %vm458_vm3 = vc.u32 %v4645_v53, %v4637_v14  ;;  %v870_v60 = vsel %vm6870_vm0, %v868_v37, %v869_v62  ;;  %vm4706_vm7 = vmxor %vm4456_vm15, %vm4255_vm10 }
  0xe7   :  { %6962 = vst [vmem:[#allocation25_spill] sm:$0xff] %v6961_v48  ;;  %v873_v24 = vsel %vm6870_vm0, %v871_v8, %v872_v50  ;;  %v6963_v41 = vand.u32 2147483647, %v4398_v47  ;;  %v381_v10 = vmul.f32 %v380_v11, %v378_v56  ;;  %v6966_v38 = vmov 0 }
  0xe8   :  { %v6967_v38 = vsel %vm4706_vm7, 4294967295, %v6966_v38  ;;  %v884_v3 = vsel %vm4681_vm2, %v854_v33, %v875_v57  ;;  %v895_v62 = vrot.slane %v4687_v32, %v4346_v18  ;;  %v4715_v37 = vsub.s32 4, %v4294_v9 }
  0xe9   :  { %vm4699_vm12 = vcmp.le.f32.partialorder %v6963_v41, 0.7853982  ;;  %6968 = vst [vmem:[#allocation26_spill] sm:$0xff] %v6967_v38  ;;  %v885_v35 = vsel %vm4681_vm2, %v856_v58, %v877_v42  ;;  %v890_v36 = vmul.f32 %v4556_v63, %v889_v46  ;;  %v382_v39 = vxor.u32 2147483648, %v381_v10 }
  0xea   :  { %6969 = vst [vmem:[#allocation27_spill] sm:$0xff] %v4715_v37  ;;  %v387_v6 = vsel %vm4699_vm12, 0, %v385_v31  ;;  %v460_v52 = vsel %vm458_vm3, %v459_v30, %v4638_v15  ;;  %v4724_v54 = vmul.f32 2.0, %v4564_v1  ;;  %v899_v59 = vmul.f32 %v891_v13, %v884_v3 }
  0xeb   :  { %v904_v8 = vmul.f32 %v891_v13, %v885_v35  ;;  %v461_v16 = vadd.s32 %v460_v52, %v456_v55  ;;  %v882_v43 = vsel %vm4706_vm7, %v849_v23, %v870_v60  ;;  %v883_v0 = vsel %vm4706_vm7, %v852_v4, %v873_v24 }
  0xec   :  { %v383_v50 = vsel %vm300_vm9, %v382_v39, %v381_v10  ;;  %v701_v44 = vadd.s32 3, %v387_v6  ;;  %v897_v46 = vmul.f32 0.0, %v895_v62  ;;  %v922_v15 = vrot.slane %v4651_v19, %v4715_v37  ;;  %v1966_v39 = vpop.permute.xlu1 %1965 }
  0xed   :  { %v386_v7 = vsel %vm4699_vm12, %v4398_v47, %v383_v50  ;;  %v462_v51 = vadd.s32 536870912, %v461_v16  ;;  %v898_v33 = vmul.f32 %v890_v36, %v882_v43  ;;  %v903_v58 = vmul.f32 %v890_v36, %v883_v0 }
  0xee   :  { %4200 = vcosq.f32 %v386_v7  ;;  %v4737_v23 = vand.u32 3, %v387_v6  ;;  %v901_v57 = vadd.f32 %v899_v59, %v897_v46  ;;  %v906_v4 = vadd.f32 %v904_v8, %v897_v46 }
  0xef   :  { %4202 = vsinq.f32 %v386_v7  ;;  %v4739_v31 = vshrl.u32 %v462_v51, 30  ;;  %v4742_v56 = vadd.f32 -1.0, %v4559_v2  ;;  %v928_v11 = vrot.slane %v4687_v32, %v4715_v37 }
  0xf0   :  { %v4747_v30 = vsub.s32 5, %v4294_v9  ;;  %v702_v42 = vand.u32 3, %v701_v44  ;;  %v896_v55 = vmul.f32 %v895_v62, %v4308_v12  ;;  %v910_v60 = vmul.f32 0.0, %v891_v13 }
  0xf1   :  { %6970 = vst [vmem:[#allocation28_spill] sm:$0xff] %v4742_v56  ;;  %v924_v24 = vmul.f32 %v4574_v26, %v922_v15  ;;  %v464_v41 = vshll.u32 %v4739_v31, 30  ;;  %v908_v5 = vmul.f32 %v895_v62, %v884_v3  ;;  %v909_v10 = vmul.f32 %v890_v36, %v4308_v12 }
  0xf2   :  { %6971 = vst [vmem:[#allocation29_spill] sm:$0xff] %v4747_v30  ;;  %v914_v6 = vmul.f32 %v895_v62, %v885_v35  ;;  %v915_v2 = vmul.f32 0.0, %v890_v36  ;;  %vm396_vm15 = vcmp.eq.s32.totalorder %v4737_v23, 2  ;;  %v900_v52 = vadd.f32 %v898_v33, %v896_v55 }
  0xf3   :  { %v905_v59 = vadd.f32 %v903_v58, %v897_v46  ;;  %v4754_v8 = vmul.f32 %v928_v11, %v901_v57  ;;  %v4756_v50 = vmul.f32 %v924_v24, %v906_v4  ;;  %vm393_vm13 = vcmp.eq.s32.totalorder %v4737_v23, 0 }
  0xf4   :  { %v936_v13 = vmul.f32 %v928_v11, %v906_v4  ;;  %v938_v44 = vmul.f32 %v924_v24, %v901_v57  ;;  %vm392_vm14 = vcmp.lt.s32.totalorder %v4737_v23, 2  ;;  %v907_v3 = vmul.f32 %v895_v62, %v882_v43 }
  0xf5   :  { %v4760_v7 = vsub.s32 %v461_v16, %v464_v41  ;;  %v912_v12 = vsub.f32 %v908_v5, %v910_v60  ;;  %v918_v35 = vsub.f32 %v914_v6, %v910_v60  ;;  %v923_v36 = vmul.f32 %v4556_v63, %v922_v15  ;;  %v1986_v15 = vpop.permute.xlu1 %1985 }
  0xf6   :  { %vm390_vm8 = vweird.f32 %v4398_v47  ;;  %v913_v46 = vmul.f32 %v895_v62, %v883_v0  ;;  %vm703_vm9 = vcmp.lt.s32.totalorder %v702_v42, 2  ;;  %vm704_vm3 = vcmp.eq.s32.totalorder %v702_v42, 0 }
  0xf7   :  { %vm707_vm12 = vcmp.eq.s32.totalorder %v702_v42, 2  ;;  %v911_v51 = vsub.f32 %v907_v3, %v909_v10  ;;  %v931_v33 = vmul.f32 %v923_v36, %v905_v59  ;;  %v937_v58 = vmul.f32 %v923_v36, %v900_v52 }
  0xf8   :  { %v917_v4 = vsub.f32 %v913_v46, %v915_v2  ;;  %v929_v57 = vmul.f32 %v928_v11, %v900_v52  ;;  %v4201_v55 = vpop.eup %4200  ;;  %v934_v16 = vsub.f32 %v4754_v8, %v4756_v50  ;;  %v935_v43 = vmul.f32 %v928_v11, %v905_v59  ;;  %v1948_v52 = vpop.permute.xlu0 %1947 }
  0xf9   :  { %v940_v41 = vadd.f32 %v938_v44, %v936_v13  ;;  %v467_v60 = vsub.s32 0, %v4760_v7  ;;  %v4203_v5 = vpop.eup %4202  ;;  %v397_v6 = vxor.u32 2147483648, %v4201_v55  ;;  %v942_v62 = vmul.f32 %v928_v11, %v912_v12 }
  0xfa   :  { %v944_v0 = vmul.f32 %v924_v24, %v918_v35  ;;  %v1978_v48 = vmul.f32 %v1966_v39, %v4355_v21  ;;  %v394_v10 = vxor.u32 2147483648, %v4203_v5  ;;  %v941_v3 = vmul.f32 %v928_v11, %v911_v51 }
  0xfb   :  { %v948_v38 = vmul.f32 %v928_v11, %v918_v35  ;;  %v949_v2 = vmul.f32 %v923_v36, %v911_v51  ;;  %v398_v46 = vsel %vm396_vm15, %v397_v6, %v4203_v5  ;;  %v709_v59 = vsel %vm707_vm12, %v397_v6, %v4203_v5  ;;  %vm5114_vm12 = vmxor %vm4510_vm5, %vm4255_vm10 }
  0xfc   :  { %v943_v8 = vmul.f32 %v923_v36, %v917_v4  ;;  %v947_v50 = vmul.f32 %v928_v11, %v917_v4  ;;  %v395_v13 = vsel %vm393_vm13, %v4201_v55, %v394_v10  ;;  %v706_v44 = vsel %vm704_vm3, %v4201_v55, %v394_v10 }
  0xfd   :  { %v950_v1 = vmul.f32 %v924_v24, %v912_v12  ;;  %v4084_v39 = vmin.u32 %v467_v60, %v4760_v7  ;;  %v399_v35 = vsel %vm392_vm14, %v395_v13, %v398_v46  ;;  %v710_v51 = vsel %vm703_vm9, %v706_v44, %v709_v59  ;;  %v2004_v12 = vpop.permute.xlu1 %2003  ;;  %vm4903_vm9 = vmxor %vm4491_vm4, %vm4255_vm10 }
  0xfe   :  { %v1996_v29 = vmul.f32 %v1986_v15, %v4361_v25  ;;  %v1981_v21 = vadd.f32 %v1978_v48, %v1948_v52  ;;  %v4781_v36 = vsel %vm390_vm8, nan, %v399_v35  ;;  %v4785_v11 = vsel %vm390_vm8, nan, %v710_v51  ;;  %vm4896_vm8 = vmxor %vm4462_vm1, %vm4255_vm10 }
  0xff   :  { %v933_v4 = vsub.f32 %v929_v57, %v931_v33  ;;  %v939_v24 = vadd.f32 %v937_v58, %v935_v43  ;;  %v945_v55 = vadd.f32 %v943_v8, %v941_v3  ;;  %v946_v60 = vadd.f32 %v944_v0, %v942_v62 }
 0x100   :  { %v956_v23 = vrot.slane %v4785_v11, %v4346_v18  ;;  %v962_v42 = vrot.slane %v4781_v36, %v4346_v18  ;;  %v951_v48 = vsub.f32 %v947_v50, %v949_v2  ;;  %v952_v15 = vsub.f32 %v948_v38, %v950_v1  ;;  %v2022_v1 = vpop.permute.xlu0 %2021 }
 0x101   :  { %v978_v5 = vrot.slane %v4785_v11, %v4715_v37  ;;  %v469_v6 = vclz %v4084_v39  ;;  %v1999_v58 = vadd.f32 %v1996_v29, %v1981_v21  ;;  %v2014_v57 = vmul.f32 %v2004_v12, %v4365_v27 }
 0x102   :  { %v957_v47 = vmul.f32 %v4556_v63, %v956_v23  ;;  %v958_v33 = vmul.f32 %v4574_v26, %v956_v23  ;;  %v963_v43 = vmul.f32 %v962_v42, %v933_v4  ;;  %v964_v62 = vmul.f32 %v962_v42, %v934_v16 }
 0x103   :  { %v969_v0 = vmul.f32 %v962_v42, %v939_v24  ;;  %v970_v10 = vmul.f32 %v962_v42, %v940_v41  ;;  %v979_v38 = vmul.f32 %v4556_v63, %v978_v5  ;;  %v980_v59 = vmul.f32 %v4574_v26, %v978_v5 }
 0x104   :  { %v965_v3 = vmul.f32 %v957_v47, %v945_v55  ;;  %v966_v52 = vmul.f32 %v958_v33, %v946_v60  ;;  %v971_v46 = vmul.f32 %v957_v47, %v951_v48  ;;  %v972_v2 = vmul.f32 %v958_v33, %v952_v15 }
 0x105   :  { %v984_v8 = vrot.slane %v4781_v36, %v4715_v37  ;;  %v4085_v50 = vadd.s32 4294967294, %v469_v6  ;;  %v58_v16 = vmul.f32 2.0, %v4581_v45  ;;  %v1070_v41 = vrot.slane %v4651_v19, %v4352_v20 }
 0x106   :  { %v967_v21 = vadd.f32 %v965_v3, %v963_v43  ;;  %v968_v29 = vadd.f32 %v966_v52, %v964_v62  ;;  %v973_v13 = vadd.f32 %v971_v46, %v969_v0  ;;  %v974_v44 = vadd.f32 %v972_v2, %v970_v10 }
 0x107   :  { %v2017_v39 = vadd.f32 %v2014_v57, %v1999_v58  ;;  %v2032_v35 = vmul.f32 %v2022_v1, %v4373_v34  ;;  %v1104_v48 = vrot.slane %v4651_v19, %v4747_v30  ;;  %vm4086_vm15 = vcmp.lt.s32.totalorder %v4085_v50, 0 }
 0x108   :  { %v985_v51 = vmul.f32 %v984_v8, %v967_v21  ;;  %v986_v4 = vmul.f32 %v984_v8, %v968_v29  ;;  %v987_v24 = vmul.f32 %v979_v38, %v973_v13  ;;  %v988_v12 = vmul.f32 %v980_v59, %v974_v44 }
 0x109   :  { %v991_v55 = vmul.f32 %v984_v8, %v973_v13  ;;  %v992_v60 = vmul.f32 %v984_v8, %v974_v44  ;;  %v993_v23 = vmul.f32 %v979_v38, %v967_v21  ;;  %v994_v42 = vmul.f32 %v980_v59, %v968_v29 }
 0x10a   :  { %v4806_v15 = vsub.f32 %v985_v51, %v987_v24  ;;  %v4808_v5 = vsub.f32 %v986_v4, %v988_v12  ;;  %v2035_v33 = vadd.f32 %v2032_v35, %v2017_v39  ;;  %v4815_v58 = vadd.f32 -1.0, %v4724_v54 }
 0x10b   :  { %v4810_v6 = vadd.f32 %v993_v23, %v991_v55  ;;  %v4812_v47 = vadd.f32 %v994_v42, %v992_v60  ;;  %v4817_v57 = vadd.f32 -1.0, %v58_v16  ;;  %v4820_v43 = vsub.s32 7, %v4294_v9 }
 0x10c   :  { %6972 = vst [vmem:[#allocation30_spill] sm:$0xff] %v4815_v58  ;;  %vm6914_vm13 = vcmask 1045504   ;;  %997 = vst [vmem:[#allocation2] sm:$0xff] %v4806_v15  ;;  %v4828_v62 = vrot.slane %v4687_v32, %v4352_v20  ;;  %vm6913_vm14 = vcmask 1041408   ;;  %v1138_v54 = vrot.slane %v4785_v11, %v4352_v20 }
 0x10d   :  { %6973 = vst [vmem:[#allocation31_spill] sm:$0xff] %v4817_v57  ;;  %6974 = vst [vmem:[#allocation32_spill] sm:$0xff] %v4820_v43  ;;  %v457_v0 = vadd.s32 %v4637_v14, %v4645_v53  ;;  %v472_v10 = vsel %vm4086_vm15, 0, %v4085_v50  ;;  %v1071_v3 = vmul.f32 %v4576_v17, %v1070_v41  ;;  %v1072_v52 = vmul.f32 %v4742_v56, %v1070_v41 }
 0x10e   :  { %998 = vst [vmem:[#allocation2 + $0x10] sm:$0xff] %v4808_v5  ;;  %999 = vst [vmem:[#allocation2 + $0x20] sm:$0xff] %v4806_v15  ;;  %v4842_v46 = vmul.f32 %v4576_v17, %v1104_v48  ;;  %v4846_v2 = vrot.slane %v4687_v32, %v4747_v30  ;;  %v4849_v1 = vmul.f32 %v4742_v56, %v1104_v48  ;;  %v4856_v53 = vmul.f32 0.5, %v2035_v33 }
 0x10f   :  { %1000 = vst [vmem:[#allocation2 + $0x30] sm:$0xff] %v4808_v5  ;;  %1001 = vst [vmem:[#allocation2 + $0x8] sm:$0xff] %v4810_v6  ;;  %v4853_v38 = vrot.slane %v4651_v19, %v4358_v22  ;;  %v4860_v59 = vrot.slane %v4781_v36, %v4352_v20  ;;  %v4864_v8 = vrot.slane %v4785_v11, %v4747_v30  ;;  %v473_v50 = vsub.s32 32, %v472_v10 }
 0x110   :  { %1002 = vst [vmem:[#allocation2 + $0x18] sm:$0xff] %v4812_v47  ;;  %1003 = vst [vmem:[#allocation2 + $0x28] sm:$0xff] %v4810_v6  ;;  %v477_v21 = vsub.s32 4294967266, %v472_v10  ;;  %v1029_v29 = vrot.slane %v4808_v5, 2  ;;  %v1050_v13 = vrot.slane %v4806_v15, 6  ;;  %v4869_v44 = vmul.f32 %v4576_v17, %v1138_v54 }
 0x111   :  { %1004 = vst [vmem:[#allocation2 + $0x38] sm:$0xff] %v4812_v47  ;;  %6975 = vst [vmem:[#allocation33_spill] sm:$0xff] %v4856_v53  ;;  %v474_v16 = vshll.u32 %v4760_v7, %v472_v10  ;;  %v1032_v41 = vrot.slane %v4812_v47, 2  ;;  %v1053_v39 = vrot.slane %v4810_v6, 6  ;;  %v475_v35 = vshrl.u32 %v457_v0, %v473_v50 }
 0x112   :  { %v4874_v51 = vadd.s32 127, %v477_v21  ;;  %v1077_v55 = vmul.f32 %v4828_v62, %v4806_v15  ;;  %v1078_v60 = vmul.f32 %v4828_v62, %v4808_v5  ;;  %v1083_v23 = vmul.f32 %v4828_v62, %v4810_v6  ;;  %vm5121_vm15 = vmxor %vm4527_vm6, %vm4255_vm10 }
 0x113   :  { %v1005_v4 = vld [vmem:[#allocation2] sm:$0xfc]  ;;  %v4883_v7 = vmul.f32 %v4742_v56, %v1138_v54  ;;  %v1084_v0 = vmul.f32 %v4828_v62, %v4812_v47  ;;  %v1091_v10 = vmul.f32 %v1071_v3, %v4806_v15  ;;  %v1092_v50 = vmul.f32 %v1072_v52, %v4808_v5 }
 0x114   :  { %v1097_v21 = vmul.f32 %v1071_v3, %v4810_v6  ;;  %v1028_v45 = vrot.slane %v1005_v4, 2  ;;  %v1098_v20 = vmul.f32 %v1072_v52, %v4812_v47  ;;  %v4891_v54 = vor.u32 %v475_v35, %v474_v16 }
 0x115   :  { %v1009_v24 = vld [vmem:[#allocation2 + $0x20] sm:$0x3]  ;;  %v1011_v12 = vld [vmem:[#allocation2 + $0x10] sm:$0xc0]  ;;  %v6976_v37 = vmov 0  ;;  %v6979_v6 = vmov 0  ;;  %vm493_vm11 = vweird.f32 %v4422_v49 }
 0x116   :  { %v1006_v42 = vld [vmem:[#allocation2 + $0x8] sm:$0xfc]  ;;  %v1015_v14 = vld [vmem:[#allocation2 + $0x30] sm:$0x3f]  ;;  %v6977_v37 = vsel %vm4896_vm8, 4294967295, %v6976_v37  ;;  %v1034_v15 = vrot.slane %v1009_v24, 2  ;;  %v1030_v47 = vsel %vm6914_vm13, %v1028_v45, %v1029_v29 }
 0x117   :  { %v1010_v48 = vld [vmem:[#allocation2 + $0x28] sm:$0x3]  ;;  %v1012_v33 = vld [vmem:[#allocation2 + $0x18] sm:$0xc0]  ;;  %v1031_v63 = vrot.slane %v1006_v42, 2  ;;  %6978 = vst [vmem:[#allocation34_spill] sm:$0xff] %v6977_v37 }
 0x118   :  { %v1016_v26 = vld [vmem:[#allocation2 + $0x38] sm:$0x3f]  ;;  %v1036_v18 = vrot.slane %v1010_v48, 2  ;;  %v1049_v5 = vrot.slane %v1011_v12, 6  ;;  %v1052_v34 = vrot.slane %v1012_v33, 6  ;;  %v6980_v6 = vsel %vm4903_vm9, 4294967295, %v6979_v6 }
 0x119   :  { %6981 = vst [vmem:[#allocation35_spill] sm:$0xff] %v6980_v6  ;;  %v1033_v16 = vsel %vm6914_vm13, %v1031_v63, %v1032_v41  ;;  %v1055_v40 = vrot.slane %v1015_v14, 6  ;;  %v1057_v35 = vrot.slane %v1016_v26, 6  ;;  %v1035_v4 = vsel %vm6914_vm13, %v1029_v29, %v1034_v15 }
 0x11a   :  { %v1037_v24 = vsel %vm6914_vm13, %v1032_v41, %v1036_v18  ;;  %v1051_v12 = vsel %vm6913_vm14, %v1049_v5, %v1050_v13  ;;  %v1054_v42 = vsel %vm6913_vm14, %v1052_v34, %v1053_v39  ;;  %vm403_vm1 = vcmp.lt.s32.totalorder %v4422_v49, 0 }
 0x11b   :  { %v1056_v61 = vsel %vm6913_vm14, %v1050_v13, %v1055_v40  ;;  %v1058_v48 = vsel %vm6913_vm14, %v1053_v39, %v1057_v35  ;;  %v1063_v33 = vsel %vm4896_vm8, %v1030_v47, %v1051_v12  ;;  %v1064_v63 = vsel %vm4896_vm8, %v1033_v16, %v1054_v42 }
 0x11c   :  { %v1065_v26 = vsel %vm4903_vm9, %v1035_v4, %v1056_v61  ;;  %v1066_v18 = vsel %vm4903_vm9, %v1037_v24, %v1058_v48  ;;  %v1079_v45 = vmul.f32 %v1071_v3, %v1063_v33  ;;  %v1085_v14 = vmul.f32 %v1071_v3, %v1064_v63 }
 0x11d   :  { %v1080_v29 = vmul.f32 %v1072_v52, %v1065_v26  ;;  %v1086_v34 = vmul.f32 %v1072_v52, %v1066_v18  ;;  %v1089_v13 = vmul.f32 %v4828_v62, %v1063_v33  ;;  %v1090_v41 = vmul.f32 %v4828_v62, %v1065_v26 }
 0x11e   :  { %v1081_v39 = vadd.f32 %v1079_v45, %v1077_v55  ;;  %v1087_v15 = vadd.f32 %v1085_v14, %v1083_v23  ;;  %v1095_v5 = vmul.f32 %v4828_v62, %v1064_v63  ;;  %v1096_v47 = vmul.f32 %v4828_v62, %v1066_v18 }
 0x11f   :  { %v1082_v16 = vadd.f32 %v1080_v29, %v1078_v60  ;;  %v1088_v40 = vadd.f32 %v1086_v34, %v1084_v0  ;;  %v1093_v35 = vsub.f32 %v1089_v13, %v1091_v10  ;;  %v1094_v4 = vsub.f32 %v1090_v41, %v1092_v50 }
 0x120   :  { %v1099_v24 = vsub.f32 %v1095_v5, %v1097_v21  ;;  %v1100_v3 = vsub.f32 %v1096_v47, %v1098_v20  ;;  %v1111_v52 = vmul.f32 %v4846_v2, %v1081_v39  ;;  %v1113_v12 = vmul.f32 %v4842_v46, %v1087_v15 }
 0x121   :  { %v1112_v42 = vmul.f32 %v4846_v2, %v1082_v16  ;;  %v1114_v55 = vmul.f32 %v4849_v1, %v1088_v40  ;;  %v1117_v23 = vmul.f32 %v4846_v2, %v1087_v15  ;;  %v1118_v62 = vmul.f32 %v4846_v2, %v1088_v40 }
 0x122   :  { %v1115_v60 = vsub.f32 %v1111_v52, %v1113_v12  ;;  %v1119_v0 = vmul.f32 %v4842_v46, %v1081_v39  ;;  %v1120_v10 = vmul.f32 %v4849_v1, %v1082_v16  ;;  %v1123_v50 = vmul.f32 %v4846_v2, %v1093_v35 }
 0x123   :  { %v1116_v20 = vsub.f32 %v1112_v42, %v1114_v55  ;;  %v1124_v21 = vmul.f32 %v4846_v2, %v1094_v4  ;;  %v1125_v61 = vmul.f32 %v4842_v46, %v1099_v24  ;;  %v1126_v48 = vmul.f32 %v4849_v1, %v1100_v3 }
 0x124   :  { %v1121_v33 = vadd.f32 %v1119_v0, %v1117_v23  ;;  %v1122_v63 = vadd.f32 %v1120_v10, %v1118_v62  ;;  %v1129_v26 = vmul.f32 %v4846_v2, %v1099_v24  ;;  %v1130_v18 = vmul.f32 %v4846_v2, %v1100_v3 }
 0x125   :  { %v1127_v45 = vadd.f32 %v1125_v61, %v1123_v50  ;;  %v1128_v14 = vadd.f32 %v1126_v48, %v1124_v21  ;;  %v1131_v29 = vmul.f32 %v4842_v46, %v1093_v35  ;;  %v1132_v34 = vmul.f32 %v4849_v1, %v1094_v4 }
 0x126   :  { %v6982_v13 = vand.u32 2147483647, %v4422_v49  ;;  %v1145_v39 = vmul.f32 %v4860_v59, %v1115_v60  ;;  %v1146_v15 = vmul.f32 %v4860_v59, %v1116_v20  ;;  %v1151_v5 = vmul.f32 %v4860_v59, %v1121_v33 }
 0x127   :  { %v1152_v2 = vmul.f32 %v4860_v59, %v1122_v63  ;;  %v1133_v47 = vsub.f32 %v1129_v26, %v1131_v29  ;;  %v1134_v16 = vsub.f32 %v1130_v18, %v1132_v34  ;;  %v1147_v46 = vmul.f32 %v4869_v44, %v1127_v45 }
 0x128   :  { %vm4946_vm4 = vcmp.le.f32.partialorder %v6982_v13, 0.7853982  ;;  %v1148_v1 = vmul.f32 %v4883_v7, %v1128_v14  ;;  %v1166_v40 = vrot.slane %v4781_v36, %v4747_v30  ;;  %v479_v35 = vshll.u32 %v4874_v51, 23 }
 0x129   :  { %v6985_v4 = vsub.s32 4, %v4739_v31  ;;  %v2044_v3 = vand.u32 2139095040, %v4856_v53  ;;  %v1149_v59 = vadd.f32 %v1147_v46, %v1145_v39  ;;  %v1153_v12 = vmul.f32 %v4869_v44, %v1133_v47 }
 0x12a   :  { %v1150_v52 = vadd.f32 %v1148_v1, %v1146_v15  ;;  %v1154_v42 = vmul.f32 %v4883_v7, %v1134_v16  ;;  %v1161_v55 = vmul.f32 %v4576_v17, %v4864_v8  ;;  %v1162_v51 = vmul.f32 %v4742_v56, %v4864_v8 }
 0x12b   :  { %v488_v24 = vsel %vm403_vm1, %v6985_v4, %v4739_v31  ;;  %v480_v23 = vor.u32 4788187, %v479_v35  ;;  %v483_v62 = vcvt.s32.f32 %v4891_v54  ;;  %v1155_v60 = vadd.f32 %v1153_v12, %v1151_v5 }
 0x12c   :  { %v1156_v0 = vadd.f32 %v1154_v42, %v1152_v2  ;;  %v1167_v31 = vmul.f32 %v1166_v40, %v1149_v59  ;;  %v1168_v10 = vmul.f32 %v1166_v40, %v1150_v52  ;;  %v1175_v50 = vmul.f32 %v1161_v55, %v1149_v59 }
 0x12d   :  { %v1176_v20 = vmul.f32 %v1162_v51, %v1150_v52  ;;  %v481_v21 = vand.u32 2147483647, %v480_v23  ;;  %v2045_v61 = vshrl.u32 %v2044_v3, 23  ;;  %v1169_v44 = vmul.f32 %v1161_v55, %v1155_v60 }
 0x12e   :  { %v1170_v48 = vmul.f32 %v1162_v51, %v1156_v0  ;;  %v1173_v7 = vmul.f32 %v1166_v40, %v1155_v60  ;;  %v1174_v33 = vmul.f32 %v1166_v40, %v1156_v0  ;;  %v4974_v63 = vrot.slane %v4687_v32, %v4358_v22 }
 0x12f   :  { %v4977_v8 = vsub.s32 6, %v4294_v9  ;;  %v484_v54 = vmul.f32 %v483_v62, %v481_v21  ;;  %v490_v26 = vsel %vm4946_vm4, 0, %v488_v24  ;;  %v4981_v18 = vsub.f32 %v1167_v31, %v1169_v44 }
 0x130   :  { %v4983_v45 = vsub.f32 %v1168_v10, %v1170_v48  ;;  %v4985_v14 = vadd.f32 %v1175_v50, %v1173_v7  ;;  %v4987_v29 = vadd.f32 %v1176_v20, %v1174_v33  ;;  %v4991_v34 = vmul.f32 %v4815_v58, %v4853_v38 }
 0x131   :  { %6986 = vst [vmem:[#allocation36_spill] sm:$0xff] %v4977_v8  ;;  %v4995_v9 = vmul.f32 %v4817_v57, %v4853_v38  ;;  %v4999_v13 = vrot.slane %v4651_v19, %v4368_v28  ;;  %v485_v39 = vxor.u32 2147483648, %v484_v54  ;;  %v5003_v15 = vrot.slane %v4651_v19, %v4820_v43  ;;  %1179 = vst [vmem:[#allocation2] sm:$0xff] %v4981_v18 }
 0x132   :  { %vm6912_vm3 = vcmask 1043456   ;;  %1180 = vst [vmem:[#allocation2 + $0x10] sm:$0xff] %v4983_v45  ;;  %1181 = vst [vmem:[#allocation2 + $0x20] sm:$0xff] %v4981_v18  ;;  %v805_v38 = vadd.s32 3, %v490_v26  ;;  %v6855_v5 = vand.u32 2147483647, %v4856_v53  ;;  %v5016_v47 = vmul.f32 %v4974_v63, %v4981_v18 }
 0x133   :  { %1182 = vst [vmem:[#allocation2 + $0x30] sm:$0xff] %v4983_v45  ;;  %1183 = vst [vmem:[#allocation2 + $0x8] sm:$0xff] %v4985_v14  ;;  %v4106_v2 = vadd.s32 4294967169, %v2045_v61  ;;  %v5020_v16 = vmul.f32 %v4974_v63, %v4983_v45  ;;  %v5024_v46 = vmul.f32 %v4974_v63, %v4985_v14  ;;  %v5028_v1 = vmul.f32 %v4974_v63, %v4987_v29 }
 0x134   :  { %1184 = vst [vmem:[#allocation2 + $0x18] sm:$0xff] %v4987_v29  ;;  %1185 = vst [vmem:[#allocation2 + $0x28] sm:$0xff] %v4985_v14  ;;  %v5032_v40 = vmul.f32 %v4991_v34, %v4981_v18  ;;  %v5036_v35 = vmul.f32 %v4995_v9, %v4983_v45  ;;  %v5040_v4 = vmul.f32 %v4991_v34, %v4985_v14  ;;  %v5059_v42 = vmul.f32 -1.0, %v4999_v13 }
 0x135   :  { %1186 = vst [vmem:[#allocation2 + $0x38] sm:$0xff] %v4987_v29  ;;  %v5044_v24 = vmul.f32 %v4995_v9, %v4987_v29  ;;  %v1285_v3 = vrot.slane %v4651_v19, %v4977_v8  ;;  %v5050_v59 = vrot.slane %v4687_v32, %v4977_v8  ;;  %v5054_v52 = vrot.slane %v4687_v32, %v4368_v28 }
 0x136   :  { %v486_v12 = vsel %vm403_vm1, %v485_v39, %v484_v54  ;;  %v5062_v55 = vmul.f32 -1.0, %v5003_v15  ;;  %v1319_v19 = vrot.slane %v4785_v11, %v4358_v22  ;;  %v5066_v51 = vand.u32 3, %v490_v26 }
 0x137   :  { %v489_v23 = vsel %vm4946_vm4, %v4422_v49, %v486_v12  ;;  %v5071_v62 = vand.u32 3, %v805_v38  ;;  %v5075_v60 = vand.u32 8388607, %v6855_v5  ;;  %v5077_v0 = vadd.s32 1, %v4106_v2 }
 0x138   :  { %v1211_v31 = vrot.slane %v4983_v45, 4  ;;  %v1214_v10 = vrot.slane %v4987_v29, 4  ;;  %v1231_v50 = vrot.slane %v4981_v18, 4  ;;  %v1234_v20 = vrot.slane %v4985_v14, 4  ;;  %v1187_v44 = vld [vmem:[#allocation2] sm:$0xf0] }
 0x139   :  { %v5084_v21 = vmul.f32 %v4815_v58, %v1285_v3  ;;  %v5087_v41 = vmul.f32 %v4817_v57, %v1285_v3  ;;  %v5091_v61 = vrot.slane %v4687_v32, %v4820_v43  ;;  %v1191_v7 = vld [vmem:[#allocation2 + $0x20] sm:$0xf]  ;;  %v5095_v33 = vrot.slane %v4781_v36, %v4358_v22  ;;  %v1193_v26 = vld [vmem:[#allocation2 + $0x10] sm:$0xf0] }
 0x13a   :  { %v1188_v48 = vld [vmem:[#allocation2 + $0x8] sm:$0xf0]  ;;  %v5098_v45 = vmul.f32 %v4815_v58, %v1319_v19  ;;  %v5102_v14 = vrot.slane %v4785_v11, %v4977_v8  ;;  %v5106_v32 = vrot.slane %v4781_v36, %v4977_v8  ;;  %4204 = vcosq.f32 %v489_v23  ;;  %v1197_v29 = vld [vmem:[#allocation2 + $0x30] sm:$0xf] }
 0x13b   :  { %v1192_v54 = vld [vmem:[#allocation2 + $0x28] sm:$0xf]  ;;  %v1194_v18 = vld [vmem:[#allocation2 + $0x18] sm:$0xf0]  ;;  %v1210_v38 = vrot.slane %v1187_v44, 4  ;;  %v1213_v2 = vrot.slane %v1188_v48, 4  ;;  %v5109_v3 = vmul.f32 %v4817_v57, %v1319_v19  ;;  %4206 = vsinq.f32 %v489_v23 }
 0x13c   :  { %v1198_v39 = vld [vmem:[#allocation2 + $0x38] sm:$0xf]  ;;  %v6988_v5 = vmov 0  ;;  %v1216_v53 = vrot.slane %v1191_v7, 4  ;;  %v1218_v22 = vrot.slane %v1192_v54, 4  ;;  %v1230_v8 = vrot.slane %v1193_v26, 4 }
 0x13d   :  { %v6989_v5 = vsel %vm5114_vm12, 4294967295, %v6988_v5  ;;  %v1233_v30 = vrot.slane %v1194_v18, 4  ;;  %v6992_v44 = vmov 0  ;;  %v1212_v19 = vsel %vm6912_vm3, %v1210_v38, %v1211_v31 }
 0x13e   :  { %6990 = vst [vmem:[#allocation16_spill] sm:$0xff] %v6989_v5  ;;  %v6993_v44 = vsel %vm5121_vm15, 4294967295, %v6992_v44  ;;  %v1215_v23 = vsel %vm6912_vm3, %v1213_v2, %v1214_v10  ;;  %v1236_v48 = vrot.slane %v1197_v29, 4  ;;  %v1238_v12 = vrot.slane %v1198_v39, 4 }
 0x13f   :  { %6994 = vst [vmem:[#allocation19_spill] sm:$0xff] %v6993_v44  ;;  %v1217_v37 = vsel %vm6912_vm3, %v1211_v31, %v1216_v53  ;;  %v1219_v7 = vsel %vm6912_vm3, %v1214_v10, %v1218_v22  ;;  %v1232_v54 = vsel %vm6912_vm3, %v1230_v8, %v1231_v50  ;;  %v1235_v26 = vsel %vm6912_vm3, %v1233_v30, %v1234_v20 }
 0x140   :  { %v1237_v6 = vsel %vm6912_vm3, %v1231_v50, %v1236_v48  ;;  %v1239_v18 = vsel %vm6912_vm3, %v1234_v20, %v1238_v12  ;;  %v1244_v56 = vsel %vm5114_vm12, %v1212_v19, %v1232_v54  ;;  %v1245_v38 = vsel %vm5114_vm12, %v1215_v23, %v1235_v26 }
 0x141   :  { %v1246_v29 = vsel %vm5121_vm15, %v1217_v37, %v1237_v6  ;;  %v1247_v22 = vsel %vm5121_vm15, %v1219_v7, %v1239_v18  ;;  %v1260_v53 = vmul.f32 %v4991_v34, %v1244_v56  ;;  %v1266_v30 = vmul.f32 %v4991_v34, %v1245_v38 }
 0x142   :  { %v1261_v8 = vmul.f32 %v4995_v9, %v1246_v29  ;;  %v1267_v31 = vmul.f32 %v4995_v9, %v1247_v22  ;;  %v1270_v10 = vmul.f32 %v4974_v63, %v1244_v56  ;;  %v1271_v50 = vmul.f32 %v4974_v63, %v1246_v29 }
 0x143   :  { %vm2052_vm5 = vcmp.gt.s32.totalorder %v5077_v0, 0  ;;  %v1262_v20 = vadd.f32 %v1260_v53, %v5016_v47  ;;  %v1268_v37 = vadd.f32 %v1266_v30, %v5024_v46  ;;  %v1276_v39 = vmul.f32 %v4974_v63, %v1245_v38 }
 0x144   :  { %v1277_v2 = vmul.f32 %v4974_v63, %v1247_v22  ;;  %v1263_v34 = vadd.f32 %v1261_v8, %v5020_v16  ;;  %v1269_v19 = vadd.f32 %v1267_v31, %v5028_v1  ;;  %v1274_v9 = vsub.f32 %v1270_v10, %v5032_v40  ;;  %v5156_v23 = vpop.eup %4204 }
 0x145   :  { %v1275_v56 = vsub.f32 %v1271_v50, %v5036_v35  ;;  %v1280_v48 = vsub.f32 %v1276_v39, %v5040_v4  ;;  %v1292_v46 = vmul.f32 %v5050_v59, %v1262_v20  ;;  %v1294_v12 = vmul.f32 %v5084_v21, %v1268_v37  ;;  %v5162_v7 = vpop.eup %4206 }
 0x146   :  { %v1281_v47 = vsub.f32 %v1277_v2, %v5044_v24  ;;  %v1293_v63 = vmul.f32 %v5050_v59, %v1263_v34  ;;  %v1295_v16 = vmul.f32 %v5087_v41, %v1269_v19  ;;  %v1298_v1 = vmul.f32 %v5050_v59, %v1268_v37 }
 0x147   :  { %v1299_v40 = vmul.f32 %v5050_v59, %v1269_v19  ;;  %v1296_v35 = vsub.f32 %v1292_v46, %v1294_v12  ;;  %v1300_v54 = vmul.f32 %v5084_v21, %v1262_v20  ;;  %v1301_v4 = vmul.f32 %v5087_v41, %v1263_v34 }
 0x148   :  { %v1304_v24 = vmul.f32 %v5050_v59, %v1274_v9  ;;  %v1297_v26 = vsub.f32 %v1293_v63, %v1295_v16  ;;  %v1305_v6 = vmul.f32 %v5050_v59, %v1275_v56  ;;  %v1306_v18 = vmul.f32 %v5084_v21, %v1280_v48 }
 0x149   :  { %v1307_v38 = vmul.f32 %v5087_v41, %v1281_v47  ;;  %v1302_v29 = vadd.f32 %v1300_v54, %v1298_v1  ;;  %v1303_v22 = vadd.f32 %v1301_v4, %v1299_v40  ;;  %v1310_v53 = vmul.f32 %v5050_v59, %v1280_v48  ;;  %v6995_v40 = vld [vmem:[#allocation8_spill] sm:$0xff]  ;;  %v1990_v4 = vpop.permute.xlu0 %1989 }
 0x14a   :  { %v1311_v30 = vmul.f32 %v5050_v59, %v1281_v47  ;;  %v1308_v8 = vadd.f32 %v1306_v18, %v1304_v24  ;;  %v1312_v10 = vmul.f32 %v5084_v21, %v1274_v9  ;;  %v1313_v50 = vmul.f32 %v5087_v41, %v1275_v56  ;;  %v1971_v47 = vpop.permute.xlu1 %1970 }
 0x14b   :  { %v1309_v31 = vadd.f32 %v1307_v38, %v1305_v6  ;;  %v1326_v20 = vmul.f32 %v5095_v33, %v1296_v35  ;;  %v1327_v37 = vmul.f32 %v5095_v33, %v1297_v26  ;;  %v1332_v39 = vmul.f32 %v5095_v33, %v1302_v29 }
 0x14c   :  { %v1333_v2 = vmul.f32 %v5095_v33, %v1303_v22  ;;  %v1314_v34 = vsub.f32 %v1310_v53, %v1312_v10  ;;  %v1315_v19 = vsub.f32 %v1311_v30, %v1313_v50  ;;  %v1328_v48 = vmul.f32 %v5098_v45, %v1308_v8 }
 0x14d   :  { %v1329_v59 = vmul.f32 %v5109_v3, %v1309_v31  ;;  %v1342_v21 = vmul.f32 %v4815_v58, %v5102_v14  ;;  %v1343_v41 = vmul.f32 %v4817_v57, %v5102_v14  ;;  %v5190_v9 = vrot.slane %v4785_v11, %v4368_v28 }
 0x14e   :  { %v2053_v33 = vsel %vm2052_vm5, %v5077_v0, 0  ;;  %v1330_v56 = vadd.f32 %v1328_v48, %v1326_v20  ;;  %v1334_v12 = vmul.f32 %v5098_v45, %v1314_v34  ;;  %v1335_v63 = vmul.f32 %v5109_v3, %v1315_v19  ;;  %v1953_v22 = vpop.permute.xlu1 %1952 }
 0x14f   :  { %v1331_v46 = vadd.f32 %v1329_v59, %v1327_v37  ;;  %v5199_v16 = vrot.slane %v4781_v36, %v4368_v28  ;;  %v5203_v14 = vrot.slane %v4785_v11, %v4820_v43  ;;  %v5207_v1 = vrot.slane %v4781_v36, %v4820_v43 }
 0x150   :  { %v1979_v0 = vmul.f32 %v1971_v47, %v6995_v40  ;;  %v1336_v35 = vadd.f32 %v1334_v12, %v1332_v39  ;;  %v1337_v54 = vadd.f32 %v1335_v63, %v1333_v2  ;;  %v1348_v45 = vmul.f32 %v5106_v32, %v1330_v56 }
 0x151   :  { %v1349_v3 = vmul.f32 %v5106_v32, %v1331_v46  ;;  %v1356_v24 = vmul.f32 %v1342_v21, %v1330_v56  ;;  %v1357_v26 = vmul.f32 %v1343_v41, %v1331_v46  ;;  %v5213_v6 = vmul.f32 -1.0, %v5190_v9 }
 0x152   :  { %v5215_v11 = vand.u32 31, %v2053_v33  ;;  %v1350_v18 = vmul.f32 %v1342_v21, %v1336_v35  ;;  %v1351_v38 = vmul.f32 %v1343_v41, %v1337_v54  ;;  %v1354_v36 = vmul.f32 %v5106_v32, %v1336_v35 }
 0x153   :  { %v1355_v29 = vmul.f32 %v5106_v32, %v1337_v54  ;;  %v5220_v53 = vmul.f32 -1.0, %v5203_v14  ;;  %v5222_v30 = vshrl.u32 %v2053_v33, 5  ;;  %v5224_v8 = vadd.f32 %v1979_v0, %v1953_v22 }
 0x154   :  { %v5227_v31 = vmul.f32 %v1990_v4, %v4361_v25  ;;  %v1352_v10 = vsub.f32 %v1348_v45, %v1350_v18  ;;  %v1353_v50 = vsub.f32 %v1349_v3, %v1351_v38  ;;  %v1358_v20 = vadd.f32 %v1356_v24, %v1354_v36 }
 0x155   :  { %v1359_v37 = vadd.f32 %v1357_v26, %v1355_v29  ;;  %v497_v39 = vxor.u32 2147483648, %v5162_v7  ;;  %v500_v2 = vxor.u32 2147483648, %v5156_v23  ;;  %v5232_v32 = vsub.s32 32, %v5215_v11 }
 0x156   :  { %v6996_v34 = vmov 683565275   ;;  %v1382_v48 = vmul.f32 %v5054_v52, %v1352_v10  ;;  %v1383_v59 = vmul.f32 %v5054_v52, %v1353_v50  ;;  %v1384_v47 = vmul.f32 %v5059_v42, %v1353_v50 }
 0x157   :  { %v5236_v19 = vshll.u32 %v6996_v34, %v5215_v11  ;;  %v1385_v21 = vmul.f32 %v4999_v13, %v1352_v10  ;;  %v1388_v41 = vmul.f32 %v5054_v52, %v1358_v20  ;;  %v1389_v33 = vmul.f32 %v5054_v52, %v1359_v37 }
 0x158   :  { %v1390_v56 = vmul.f32 %v5059_v42, %v1359_v37  ;;  %v1391_v46 = vmul.f32 %v4999_v13, %v1358_v20  ;;  %vm496_vm6 = vcmp.eq.s32.totalorder %v5066_v51, 0  ;;  %vm499_vm10 = vcmp.eq.s32.totalorder %v5066_v51, 2 }
 0x159   :  { %v1386_v12 = vadd.f32 %v1384_v47, %v1382_v48  ;;  %v1387_v63 = vadd.f32 %v1385_v21, %v1383_v59  ;;  %v1396_v0 = vmul.f32 %v5059_v42, %v1352_v10  ;;  %v1397_v35 = vmul.f32 %v4999_v13, %v1353_v50 }
 0x15a   :  { %v1392_v54 = vadd.f32 %v1390_v56, %v1388_v41  ;;  %v1393_v45 = vadd.f32 %v1391_v46, %v1389_v33  ;;  %v1402_v3 = vmul.f32 %v5059_v42, %v1358_v20  ;;  %v1403_v52 = vmul.f32 %v4999_v13, %v1359_v37 }
 0x15b   :  { %vm808_vm1 = vcmp.eq.s32.totalorder %v5071_v62, 0  ;;  %v1398_v4 = vsub.f32 %v1383_v59, %v1396_v0  ;;  %v1399_v24 = vsub.f32 %v1382_v48, %v1397_v35  ;;  %v1416_v26 = vmul.f32 %v5091_v61, %v1386_v12 }
 0x15c   :  { %v1417_v18 = vmul.f32 %v5091_v61, %v1387_v63  ;;  %vm495_vm4 = vcmp.lt.s32.totalorder %v5066_v51, 2  ;;  %vm811_vm5 = vcmp.eq.s32.totalorder %v5071_v62, 2  ;;  %v1404_v38 = vsub.f32 %v1389_v33, %v1402_v3 }
 0x15d   :  { %v1405_v36 = vsub.f32 %v1388_v41, %v1403_v52  ;;  %v1418_v29 = vmul.f32 %v5062_v55, %v1392_v54  ;;  %v1419_v42 = vmul.f32 %v5003_v15, %v1393_v45  ;;  %v1422_v13 = vmul.f32 %v5091_v61, %v1392_v54 }
 0x15e   :  { %v1423_v22 = vmul.f32 %v5091_v61, %v1393_v45  ;;  %v1424_v10 = vmul.f32 %v5062_v55, %v1386_v12  ;;  %v1425_v50 = vmul.f32 %v5003_v15, %v1387_v63  ;;  %v1428_v48 = vmul.f32 %v5091_v61, %v1398_v4 }
 0x15f   :  { %v1420_v20 = vsub.f32 %v1416_v26, %v1418_v29  ;;  %v1421_v37 = vsub.f32 %v1417_v18, %v1419_v42  ;;  %v1429_v59 = vmul.f32 %v5091_v61, %v1399_v24  ;;  %vm807_vm0 = vcmp.lt.s32.totalorder %v5071_v62, 2 }
 0x160   :  { %v1426_v47 = vadd.f32 %v1424_v10, %v1422_v13  ;;  %v1427_v21 = vadd.f32 %v1425_v50, %v1423_v22  ;;  %v1430_v41 = vmul.f32 %v5062_v55, %v1404_v38  ;;  %v1431_v33 = vmul.f32 %v5003_v15, %v1405_v36 }
 0x161   :  { %v1434_v56 = vmul.f32 %v5091_v61, %v1404_v38  ;;  %v1435_v46 = vmul.f32 %v5091_v61, %v1405_v36  ;;  %v1436_v12 = vmul.f32 %v5062_v55, %v1398_v4  ;;  %v1437_v63 = vmul.f32 %v5003_v15, %v1399_v24 }
 0x162   :  { %v1432_v0 = vadd.f32 %v1430_v41, %v1428_v48  ;;  %v1433_v35 = vadd.f32 %v1431_v33, %v1429_v59  ;;  %v1450_v54 = vmul.f32 %v5199_v16, %v1420_v20  ;;  %v1451_v45 = vmul.f32 %v5199_v16, %v1421_v37  ;;  %v2008_v48 = vpop.permute.xlu1 %2007 }
 0x163   :  { %v1438_v3 = vsub.f32 %v1434_v56, %v1436_v12  ;;  %v1439_v52 = vsub.f32 %v1435_v46, %v1437_v63  ;;  %v1456_v26 = vmul.f32 %v5199_v16, %v1426_v47  ;;  %v1457_v18 = vmul.f32 %v5199_v16, %v1427_v21 }
 0x164   :  { %v1452_v61 = vmul.f32 %v5213_v6, %v1432_v0  ;;  %v1453_v55 = vmul.f32 %v5190_v9, %v1433_v35  ;;  %v498_v15 = vsel %vm496_vm6, %v5156_v23, %v497_v39  ;;  %v501_v4 = vsel %vm499_vm10, %v500_v2, %v5162_v7 }
 0x165   :  { %v1458_v24 = vmul.f32 %v5213_v6, %v1438_v3  ;;  %v1459_v16 = vmul.f32 %v5190_v9, %v1439_v52  ;;  %v6997_v38 = vmov 2475754826   ;;  %v810_v22 = vsel %vm808_vm1, %v5156_v23, %v497_v39 }
 0x166   :  { %v2059_v36 = vshrl.u32 %v6997_v38, %v5232_v32  ;;  %v2061_v29 = vshll.u32 %v6997_v38, %v5215_v11  ;;  %v1454_v42 = vadd.f32 %v1452_v61, %v1450_v54  ;;  %v1455_v13 = vadd.f32 %v1453_v55, %v1451_v45  ;;  %v2026_v45 = vpop.permute.xlu1 %2025  ;;  %v7001_v55 = vld [vmem:[#allocation14_spill] sm:$0xff] }
 0x167   :  { %v6998_v10 = vmov 2131351028   ;;  %v1460_v6 = vadd.f32 %v1458_v24, %v1456_v26  ;;  %v1461_v20 = vadd.f32 %v1459_v16, %v1457_v18  ;;  %v502_v9 = vsel %vm495_vm4, %v498_v15, %v501_v4  ;;  %v7004_v24 = vld [vmem:[#allocation13_spill] sm:$0xff] }
 0x168   :  { %v2062_v50 = vshrl.u32 %v6998_v10, %v5232_v32  ;;  %v813_v37 = vsel %vm811_vm5, %v500_v2, %v5162_v7  ;;  %v1472_v59 = vmul.f32 %v5207_v1, %v1454_v42  ;;  %v1473_v47 = vmul.f32 %v5207_v1, %v1455_v13 }
 0x169   :  { %v1480_v39 = vmul.f32 %v5220_v53, %v1454_v42  ;;  %v1481_v21 = vmul.f32 %v5203_v14, %v1455_v13  ;;  %v1474_v41 = vmul.f32 %v5220_v53, %v1460_v6  ;;  %v1475_v51 = vmul.f32 %v5203_v14, %v1461_v20  ;;  %v7006_v42 = vld [vmem:[#allocation27_spill] sm:$0xff] }
 0x16a   :  { %v1478_v33 = vmul.f32 %v5207_v1, %v1460_v6  ;;  %v1479_v23 = vmul.f32 %v5207_v1, %v1461_v20  ;;  %v5319_v7 = vsel %vm493_vm11, nan, %v502_v9  ;;  %v814_v2 = vsel %vm807_vm0, %v810_v22, %v813_v37  ;;  %v7007_v22 = vld [vmem:[#allocation17_spill] sm:$0xff] }
 0x16b   :  { %v2064_v56 = vshll.u32 %v6998_v10, %v5215_v11  ;;  %v6999_v46 = vmov 2102212464   ;;  %v5327_v53 = vsub.f32 %v1472_v59, %v1474_v41  ;;  %v5329_v14 = vsub.f32 %v1473_v47, %v1475_v51 }
 0x16c   :  { %v2065_v12 = vshrl.u32 %v6999_v46, %v5232_v32  ;;  %v5331_v63 = vadd.f32 %v1480_v39, %v1478_v33  ;;  %v5333_v1 = vadd.f32 %v1481_v21, %v1479_v23  ;;  %v2015_v0 = vmul.f32 %v2008_v48, %v4365_v27 }
 0x16d   :  { %v2000_v62 = vadd.f32 %v5227_v31, %v5224_v8  ;;  %1484 = vst [vmem:[#allocation2] sm:$0xff] %v5327_v53  ;;  %1485 = vst [vmem:[#allocation2 + $0x10] sm:$0xff] %v5329_v14  ;;  %v5347_v35 = vadd.f32 -1.0, %v5319_v7  ;;  %v2049_v8 = vor.u32 8388608, %v5075_v60  ;;  %v5351_v31 = vor.u32 %v2059_v36, %v5236_v19  ;;  %v7005_v36 = vld [vmem:[#allocation6_spill] sm:$0xff] }
 0x16e   :  { %1487 = vst [vmem:[#allocation2 + $0x30] sm:$0xff] %v5329_v14  ;;  %1488 = vst [vmem:[#allocation2 + $0x8] sm:$0xff] %v5331_v63  ;;  %v2067_v54 = vshll.u32 %v6999_v46, %v5215_v11  ;;  %v5357_v3 = vsel %vm493_vm11, nan, %v814_v2  ;;  %v5359_v52 = vor.u32 %v2062_v50, %v2061_v29  ;;  %v5361_v26 = vor.u32 %v2065_v12, %v2064_v56  ;;  %v7008_v50 = vld [vmem:[#allocation28_spill] sm:$0xff] }
 0x16f   :  { %1489 = vst [vmem:[#allocation2 + $0x18] sm:$0xff] %v5333_v1  ;;  %1491 = vst [vmem:[#allocation2 + $0x38] sm:$0xff] %v5333_v1  ;;  %v7000_v18 = vmov 920167782   ;;  %v5367_v60 = vmul.f32 %v4576_v17, %v7001_v55  ;;  %vm2073_vm0 = vcmp.lt.s32.totalorder %v5222_v30, 1  ;;  %v2018_v4 = vadd.f32 %v2015_v0, %v2000_v62 }
 0x170   :  { %1486 = vst [vmem:[#allocation2 + $0x20] sm:$0xff] %v5327_v53  ;;  %1490 = vst [vmem:[#allocation2 + $0x28] sm:$0xff] %v5331_v63  ;;  %v2068_v61 = vshrl.u32 %v7000_v18, %v5232_v32  ;;  %v5372_v19 = vshll.u32 %v7000_v18, %v5215_v11  ;;  %v7003_v49 = vmov 1326507024   ;;  %v2033_v16 = vmul.f32 %v2026_v45, %v7004_v24 }
 0x171   :  { %7002 = vst [vmem:[#allocation37_spill] sm:$0xff] %v5367_v60  ;;  %v5376_v15 = vshrl.u32 %v7003_v49, %v5232_v32  ;;  %v1557_v29 = vrot.slane %v5357_v3, %v7005_v36  ;;  %v1586_v13 = vrot.slane %v5347_v35, %v7006_v42  ;;  %v5385_v6 = vmul.f32 %v7008_v50, %v7007_v22 }
 0x172   :  { %v5387_v20 = vshll.u32 %v2049_v8, 8  ;;  %v5391_v11 = vshrl.u32 %v6996_v34, %v5232_v32  ;;  %v5393_v9 = vor.u32 %v2068_v61, %v2067_v54  ;;  %v5399_v37 = vsel %vm2073_vm0, %v5351_v31, %v5359_v52 }
 0x173   :  { %7009 = vst [vmem:[#allocation38_spill] sm:$0xff] %v5385_v6  ;;  %v5405_v48 = vsel %vm2073_vm0, %v5359_v52, %v5361_v26  ;;  %v1511_v59 = vrot.slane %v5329_v14, 2  ;;  %v1514_v47 = vrot.slane %v5333_v1, 2  ;;  %v1531_v32 = vrot.slane %v5327_v53, 6 }
 0x174   :  { %v1534_v39 = vrot.slane %v5331_v63, 6  ;;  %vm2076_vm11 = vcmp.lt.s32.totalorder %v5222_v30, 4  ;;  %v1492_v21 = vld [vmem:[#allocation2] sm:$0xfc]  ;;  %v1551_v33 = vrot.slane %v5319_v7, %v7005_v36  ;;  %v1596_v23 = vrot.slane %v5357_v3, %v7006_v42  ;;  %v1498_v0 = vld [vmem:[#allocation2 + $0x10] sm:$0xc0] }
 0x175   :  { %v1493_v41 = vld [vmem:[#allocation2 + $0x8] sm:$0xfc]  ;;  %v2072_v2 = vor.u32 %v5376_v15, %v5372_v19  ;;  %v5418_v56 = vadd.f32 %v2033_v16, %v2018_v4  ;;  %v1558_v8 = vmul.f32 %v4576_v17, %v1557_v29  ;;  %v1559_v54 = vmul.f32 %v7008_v50, %v1557_v29  ;;  %v1502_v24 = vld [vmem:[#allocation2 + $0x30] sm:$0x3f] }
 0x176   :  { %v1499_v62 = vld [vmem:[#allocation2 + $0x18] sm:$0xc0]  ;;  %v1587_v45 = vmul.f32 %v7001_v55, %v1586_v13  ;;  %v1588_v61 = vmul.f32 %v7007_v22, %v1586_v13  ;;  %v1503_v36 = vld [vmem:[#allocation2 + $0x38] sm:$0x3f]  ;;  %v1510_v27 = vrot.slane %v1492_v21, 2  ;;  %v1513_v42 = vrot.slane %v1493_v41, 2 }
 0x177   :  { %v1496_v51 = vld [vmem:[#allocation2 + $0x20] sm:$0x3]  ;;  %v1497_v12 = vld [vmem:[#allocation2 + $0x28] sm:$0x3]  ;;  %v1552_v25 = vmul.f32 %v1551_v33, %v5327_v53  ;;  %v1564_v19 = vmul.f32 %v1551_v33, %v5331_v63  ;;  %v1530_v16 = vrot.slane %v1498_v0, 6  ;;  %v1533_v40 = vrot.slane %v1499_v62, 6 }
 0x178   :  { %v1516_v15 = vrot.slane %v1496_v51, 2  ;;  %v1518_v4 = vrot.slane %v1497_v12, 2  ;;  %v1512_v17 = vsel %vm6914_vm13, %v1510_v27, %v1511_v59  ;;  %v1515_v29 = vsel %vm6914_vm13, %v1513_v42, %v1514_v47 }
 0x179   :  { %v1536_v50 = vrot.slane %v1502_v24, 6  ;;  %v1538_v49 = vrot.slane %v1503_v36, 6  ;;  %v1532_v21 = vsel %vm6913_vm14, %v1530_v16, %v1531_v32  ;;  %v1535_v41 = vsel %vm6913_vm14, %v1533_v40, %v1534_v39 }
 0x17a   :  { %v1517_v13 = vsel %vm6914_vm13, %v1511_v59, %v1516_v15  ;;  %v1519_v18 = vsel %vm6914_vm13, %v1514_v47, %v1518_v4  ;;  %v1544_v0 = vsel %vm4896_vm8, %v1512_v17, %v1532_v21  ;;  %v1545_v27 = vsel %vm4896_vm8, %v1515_v29, %v1535_v41  ;;  %v7012_v41 = vld [vmem:[#allocation29_spill] sm:$0xff] }
 0x17b   :  { %v1537_v46 = vsel %vm6913_vm14, %v1531_v32, %v1536_v50  ;;  %v1539_v51 = vsel %vm6913_vm14, %v1534_v39, %v1538_v49  ;;  %v1560_v59 = vmul.f32 %v1558_v8, %v1544_v0  ;;  %v1566_v47 = vmul.f32 %v1558_v8, %v1545_v27 }
 0x17c   :  { %v1546_v36 = vsel %vm4903_vm9, %v1517_v13, %v1537_v46  ;;  %v1547_v42 = vsel %vm4903_vm9, %v1519_v18, %v1539_v51  ;;  %v1553_v40 = vmul.f32 %v1551_v33, %v5329_v14  ;;  %v1565_v50 = vmul.f32 %v1551_v33, %v5333_v1 }
 0x17d   :  { %v1561_v62 = vmul.f32 %v1559_v54, %v1546_v36  ;;  %v1567_v49 = vmul.f32 %v1559_v54, %v1547_v42  ;;  %v1562_v32 = vadd.f32 %v1560_v59, %v1552_v25  ;;  %v1568_v39 = vadd.f32 %v1566_v47, %v1564_v19 }
 0x17e   :  { %vm2074_vm6 = vcmp.lt.s32.totalorder %v5222_v30, 2  ;;  %vm2075_vm10 = vcmp.lt.s32.totalorder %v5222_v30, 3  ;;  %v1597_v46 = vmul.f32 %v1596_v23, %v5367_v60  ;;  %v2082_v18 = vsel %vm2076_vm11, %v5393_v9, 920167782  ;;  %v7018_v30 = vld [vmem:[#allocation20_spill] sm:$0xff] }
 0x17f   :  { %v1563_v17 = vadd.f32 %v1561_v62, %v1553_v40  ;;  %v1569_v15 = vadd.f32 %v1567_v49, %v1565_v50  ;;  %v1570_v8 = vsub.f32 %v1562_v32, %v5327_v53  ;;  %v1576_v4 = vsub.f32 %v1568_v39, %v5331_v63 }
 0x180   :  { %v1589_v33 = vadd.f32 1.0, %v1587_v45  ;;  %v1598_v25 = vmul.f32 %v1596_v23, %v5385_v6  ;;  %v1590_v16 = vadd.f32 1.0, %v1588_v61  ;;  %v2083_v29 = vsel %vm2075_vm10, %v5361_v26, %v2082_v18 }
 0x181   :  { %v1571_v54 = vsub.f32 %v1563_v17, %v5329_v14  ;;  %v1577_v19 = vsub.f32 %v1569_v15, %v5333_v1  ;;  %v1572_v13 = vmul.f32 %v7001_v55, %v1570_v8  ;;  %v1578_v21 = vmul.f32 %v7001_v55, %v1576_v4  ;;  %v7013_v4 = vld [vmem:[#allocation15_spill] sm:$0xff] }
 0x182   :  { %v1712_v51 = vrot.slane %v5347_v35, %v7012_v41  ;;  %v2086_v45 = vsel %vm2076_vm11, %v2072_v2, 1326507024  ;;  %v2078_v61 = vsel %vm2076_vm11, %v5361_v26, 2102212464  ;;  %v2084_v2 = vsel %vm2074_vm6, %v5399_v37, %v2083_v29 }
 0x183   :  { %v1573_v23 = vmul.f32 %v7007_v22, %v1571_v54  ;;  %v1579_v0 = vmul.f32 %v7007_v22, %v1577_v19  ;;  %v2087_v27 = vsel %vm2075_vm10, %v5393_v9, %v2086_v45  ;;  %v1574_v36 = vadd.f32 %v1572_v13, %v5327_v53  ;;  %v7015_v19 = vld [vmem:[#allocation7_spill] sm:$0xff] }
 0x184   :  { %v1580_v42 = vadd.f32 %v1578_v21, %v5331_v63  ;;  %v2088_v59 = vsel %vm2074_vm6, %v5405_v48, %v2087_v27  ;;  %v2079_v8 = vsel %vm2075_vm10, %v5359_v52, %v2078_v61  ;;  %v5520_v54 = vmul.f32 0.5, %v5418_v56  ;;  %v7016_v21 = vld [vmem:[#allocation21_spill] sm:$0xff] }
 0x185   :  { %v1575_v47 = vadd.f32 %v1573_v23, %v5329_v14  ;;  %v1581_v26 = vadd.f32 %v1579_v0, %v5333_v1  ;;  %v5483_v40 = vmul.u32.u64.low %v5387_v20, %v2088_v59  ;;  %v5484_v62 = vmul.u32.u64.high %v5387_v20, %v2088_v59, %v5483_v40 }
 0x186   :  { %v1599_v9 = vmul.f32 %v1589_v33, %v1574_v36  ;;  %v1601_v53 = vmul.f32 %v1597_v46, %v1580_v42  ;;  %v1605_v50 = vmul.f32 %v1589_v33, %v1580_v42  ;;  %v1607_v63 = vmul.f32 %v1597_v46, %v1574_v36 }
 0x187   :  { %v1600_v49 = vmul.f32 %v1590_v16, %v1575_v47  ;;  %v1602_v32 = vmul.f32 %v1598_v25, %v1581_v26  ;;  %v1606_v39 = vmul.f32 %v1590_v16, %v1581_v26  ;;  %v1608_v37 = vmul.f32 %v1598_v25, %v1575_v47 }
 0x188   :  { %v5486_v17 = vsub.f32 %v1599_v9, %v1601_v53  ;;  %v5488_v15 = vadd.f32 %v1607_v63, %v1605_v50  ;;  %v5491_v14 = vmul.u32.u64.low %v5387_v20, %v2084_v2  ;;  %v5492_v48 = vmul.u32.u64.high %v5387_v20, %v2084_v2, %v5491_v14 }
 0x189   :  { %v5495_v1 = vsub.f32 %v1600_v49, %v1602_v32  ;;  %v5497_v18 = vadd.f32 %v1608_v37, %v1606_v39  ;;  %v2077_v46 = vsel %vm2073_vm0, %v5391_v11, %v5351_v31  ;;  %v1713_v33 = vmul.f32 %v7013_v4, %v1712_v51  ;;  %v7014_v31 = vld [vmem:[#allocation18_spill] sm:$0xff] }
 0x18a   :  { %1611 = vst [vmem:[#allocation2] sm:$0xff] %v5486_v17  ;;  %1613 = vst [vmem:[#allocation2 + $0x20] sm:$0xff] %v5486_v17  ;;  %v1714_v52 = vmul.f32 %v7014_v31, %v1712_v51  ;;  %v2080_v11 = vsel %vm2074_vm6, %v2077_v46, %v2079_v8  ;;  %v2099_v25 = vadd.s32 1, %v5492_v48  ;;  %v1684_v16 = vrot.slane %v5357_v3, %v7015_v19 }
 0x18b   :  { %1615 = vst [vmem:[#allocation2 + $0x8] sm:$0xff] %v5488_v15  ;;  %1617 = vst [vmem:[#allocation2 + $0x28] sm:$0xff] %v5488_v15  ;;  %vm2098_vm1 = vc.u32 %v5484_v62, %v5491_v14  ;;  %v1678_v29 = vrot.slane %v5319_v7, %v7015_v19  ;;  %v5528_v13 = vadd.f32 1.0, %v1713_v33  ;;  %v5531_v51 = vmul.f32 -1.0, %v7016_v21 }
 0x18c   :  { %1612 = vst [vmem:[#allocation2 + $0x10] sm:$0xff] %v5495_v1  ;;  %1614 = vst [vmem:[#allocation2 + $0x30] sm:$0xff] %v5495_v1  ;;  %v5534_v45 = vmul.f32 0.0, %v7018_v30  ;;  %v1658_v56 = vrot.slane %v5486_v17, 4  ;;  %v1661_v23 = vrot.slane %v5488_v15, 4  ;;  %v5538_v0 = vadd.f32 1.0, %v1714_v52 }
 0x18d   :  { %1616 = vst [vmem:[#allocation2 + $0x18] sm:$0xff] %v5497_v18  ;;  %1618 = vst [vmem:[#allocation2 + $0x38] sm:$0xff] %v5497_v18  ;;  %v2096_v61 = vmul.u32 %v5387_v20, %v2080_v11  ;;  %v1638_v27 = vrot.slane %v5495_v1, 4  ;;  %v1641_v36 = vrot.slane %v5497_v18, 4  ;;  %v2100_v42 = vsel %vm2098_vm1, %v2099_v25, %v5492_v48  ;;  %v7022_v48 = vld [vmem:[#allocation9_spill] sm:$0xff] }
 0x18e   :  { %7017 = vst [vmem:[#allocation39_spill] sm:$0xff] %v5531_v51  ;;  %7019 = vst [vmem:[#allocation40_spill] sm:$0xff] %v5534_v45  ;;  %v2147_v2 = vand.u32 2139095040, %v5520_v54  ;;  %v1685_v40 = vmul.f32 %v4815_v58, %v1684_v16  ;;  %v1686_v9 = vmul.f32 %v4817_v57, %v1684_v16  ;;  %v5549_v53 = vmul.f32 %v4815_v58, %v7013_v4 }
 0x18f   :  { %v5553_v20 = vmul.f32 %v4817_v57, %v7014_v31  ;;  %v1679_v32 = vmul.f32 %v1678_v29, %v5486_v17  ;;  %v1691_v39 = vmul.f32 %v1678_v29, %v5488_v15  ;;  %v1722_v37 = vrot.slane %v5357_v3, %v7012_v41 }
 0x190   :  { %7020 = vst [vmem:[#allocation41_spill] sm:$0xff] %v5549_v53  ;;  %v5561_v46 = vrot.slane %v5319_v7, %v7022_v48  ;;  %v1680_v25 = vmul.f32 %v1678_v29, %v5495_v1  ;;  %v2101_v16 = vadd.s32 %v2100_v42, %v2096_v61  ;;  %vm7033_vm10 = vcmask 1046528  }
 0x191   :  { %v1619_v59 = vld [vmem:[#allocation2] sm:$0xf0]  ;;  %v1623_v26 = vld [vmem:[#allocation2 + $0x20] sm:$0xf]  ;;  %7021 = vst [vmem:[#allocation42_spill] sm:$0xff] %v5553_v20  ;;  %vm7034_vm1 = vmmov %vm7033_vm10 }
 0x192   :  { %v1620_v47 = vld [vmem:[#allocation2 + $0x8] sm:$0xf0]  ;;  %v1624_v50 = vld [vmem:[#allocation2 + $0x28] sm:$0xf]  ;;  %v1637_v52 = vrot.slane %v1619_v59, 4  ;;  %v1643_v6 = vrot.slane %v1623_v26, 4 }
 0x193   :  { %v1625_v63 = vld [vmem:[#allocation2 + $0x10] sm:$0xf0]  ;;  %v1629_v8 = vld [vmem:[#allocation2 + $0x30] sm:$0xf]  ;;  %v1640_v11 = vrot.slane %v1620_v47, 4  ;;  %v1645_v60 = vrot.slane %v1624_v50, 4 }
 0x194   :  { %v1626_v49 = vld [vmem:[#allocation2 + $0x18] sm:$0xf0]  ;;  %v1630_v33 = vld [vmem:[#allocation2 + $0x38] sm:$0xf]  ;;  %v1657_v22 = vrot.slane %v1625_v63, 4  ;;  %v1639_v57 = vsel %vm6912_vm3, %v1637_v52, %v1638_v27  ;;  %v1663_v24 = vrot.slane %v1629_v8, 4  ;;  %v1644_v41 = vsel %vm6912_vm3, %v1638_v27, %v1643_v6 }
 0x195   :  { %v1660_v55 = vrot.slane %v1626_v49, 4  ;;  %v1642_v58 = vsel %vm6912_vm3, %v1640_v11, %v1641_v36  ;;  %v1665_v12 = vrot.slane %v1630_v33, 4  ;;  %v1646_v19 = vsel %vm6912_vm3, %v1641_v36, %v1645_v60  ;;  %v7023_v36 = vld [vmem:[#allocation36_spill] sm:$0xff] }
 0x196   :  { %v1659_v59 = vsel %vm6912_vm3, %v1657_v22, %v1658_v56  ;;  %v1664_v61 = vsel %vm6912_vm3, %v1658_v56, %v1663_v24  ;;  %v2102_v56 = vadd.s32 536870912, %v2101_v16  ;;  %v1723_v52 = vmul.f32 %v1722_v37, %v5549_v53 }
 0x197   :  { %v1662_v47 = vsel %vm6912_vm3, %v1660_v55, %v1661_v23  ;;  %v1666_v42 = vsel %vm6912_vm3, %v1661_v23, %v1665_v12  ;;  %v1671_v26 = vsel %vm5114_vm12, %v1639_v57, %v1659_v59  ;;  %v1673_v63 = vsel %vm5121_vm15, %v1644_v41, %v1664_v61 }
 0x198   :  { %v1672_v50 = vsel %vm5114_vm12, %v1642_v58, %v1662_v47  ;;  %v1674_v60 = vsel %vm5121_vm15, %v1646_v19, %v1666_v42  ;;  %v1687_v6 = vmul.f32 %v1685_v40, %v1671_v26  ;;  %v1688_v27 = vmul.f32 %v1686_v9, %v1673_v63 }
 0x199   :  { %v1693_v22 = vmul.f32 %v1685_v40, %v1672_v50  ;;  %v1692_v55 = vmul.f32 %v1678_v29, %v5497_v18  ;;  %v1694_v24 = vmul.f32 %v1686_v9, %v1674_v60  ;;  %v1758_v57 = vrot.slane %v5357_v3, %v7022_v48 }
 0x19a   :  { %v1689_v12 = vadd.f32 %v1687_v6, %v1679_v32  ;;  %v1786_v58 = vrot.slane %v5347_v35, %v7023_v36  ;;  %v1690_v49 = vadd.f32 %v1688_v27, %v1680_v25  ;;  %v1796_v19 = vrot.slane %v5357_v3, %v7023_v36 }
 0x19b   :  { %v1695_v23 = vadd.f32 %v1693_v22, %v1691_v39  ;;  %v1696_v41 = vadd.f32 %v1694_v24, %v1692_v55  ;;  %v5587_v8 = vshrl.u32 %v2102_v56, 30  ;;  %v5593_v9 = vrot.slane %v5319_v7, %v4368_v28 }
 0x19c   :  { %v1697_v40 = vsub.f32 %v1689_v12, %v5486_v17  ;;  %v2148_v32 = vshrl.u32 %v2147_v2, 23  ;;  %v1698_v39 = vsub.f32 %v1690_v49, %v5495_v1  ;;  %v1724_v47 = vmul.f32 %v1722_v37, %v5553_v20 }
 0x19d   :  { %v1703_v29 = vsub.f32 %v1695_v23, %v5488_v15  ;;  %v1704_v33 = vsub.f32 %v1696_v41, %v5497_v18  ;;  %v2104_v11 = vshll.u32 %v5587_v8, 30  ;;  %v5604_v61 = vrot.slane %v5357_v3, %v4368_v28 }
 0x19e   :  { %v1699_v25 = vmul.f32 %v7013_v4, %v1697_v40  ;;  %v1700_v7 = vmul.f32 %v7014_v31, %v1698_v39  ;;  %v5610_v42 = vrot.slane %v5347_v35, %v4820_v43  ;;  %v1759_v60 = vmul.f32 -1.0, %v1758_v57 }
 0x19f   :  { %v1705_v59 = vmul.f32 %v7013_v4, %v1703_v29  ;;  %v1706_v2 = vmul.f32 %v7014_v31, %v1704_v33  ;;  %v5612_v26 = vsub.s32 %v2101_v16, %v2104_v11  ;;  %v4110_v37 = vadd.s32 4294967169, %v2148_v32  ;;  %v7024_v32 = vld [vmem:[#allocation24_spill] sm:$0xff]  ;;  %v7025_v11 = vld [vmem:[#allocation33_spill] sm:$0xff] }
 0x1a0   :  { %v1701_v50 = vadd.f32 %v1699_v25, %v5486_v17  ;;  %v1702_v6 = vadd.f32 %v1700_v7, %v5495_v1  ;;  %v1787_v27 = vmul.f32 %v7016_v21, %v1786_v58  ;;  %v1788_v39 = vmul.f32 %v7024_v32, %v1786_v58 }
 0x1a1   :  { %v1707_v63 = vadd.f32 %v1705_v59, %v5488_v15  ;;  %v1708_v22 = vadd.f32 %v1706_v2, %v5497_v18  ;;  %v2107_v55 = vsub.s32 0, %v5612_v26  ;;  %v2154_v41 = vadd.s32 1, %v4110_v37 }
 0x1a2   :  { %v1725_v24 = vmul.f32 %v5528_v13, %v1701_v50  ;;  %v1733_v56 = vmul.f32 %v1723_v52, %v1701_v50  ;;  %v1726_v17 = vmul.f32 %v5538_v0, %v1702_v6  ;;  %v1734_v23 = vmul.f32 %v1724_v47, %v1702_v6 }
 0x1a3   :  { %v1727_v35 = vmul.f32 %v1723_v52, %v1707_v63  ;;  %v1731_v16 = vmul.f32 %v5528_v13, %v1707_v63  ;;  %v1728_v12 = vmul.f32 %v1724_v47, %v1708_v22  ;;  %v1732_v15 = vmul.f32 %v5538_v0, %v1708_v22 }
 0x1a4   :  { %v4107_v18 = vmin.u32 %v2107_v55, %v5612_v26  ;;  %v1797_v33 = vmul.f32 %v1796_v19, %v5531_v51  ;;  %vm6915_vm4 = vcmp.lt.s32.totalorder %v7025_v11, 0  ;;  %v1798_v50 = vmul.f32 %v7024_v32, %v1796_v19 }
 0x1a5   :  { %v1729_v49 = vsub.f32 %v1725_v24, %v1727_v35  ;;  %v1735_v1 = vadd.f32 %v1733_v56, %v1731_v16  ;;  %v1730_v40 = vsub.f32 %v1726_v17, %v1728_v12  ;;  %v1736_v29 = vadd.f32 %v1734_v23, %v1732_v15 }
 0x1a6   :  { %v5635_v58 = vmul.f32 %v7018_v30, %v5604_v61  ;;  %v2109_v63 = vclz %v4107_v18  ;;  %vm2155_vm5 = vcmp.gt.s32.totalorder %v2154_v41, 0  ;;  %v2127_v35 = vsub.s32 4, %v5587_v8 }
 0x1a7   :  { %v1753_v13 = vmul.f32 %v5561_v46, %v1729_v49  ;;  %v1762_v52 = vmul.f32 %v1758_v57, %v1729_v49  ;;  %v1765_v25 = vmul.f32 %v5561_v46, %v1735_v1  ;;  %v1768_v0 = vmul.f32 %v1758_v57, %v1735_v1 }
 0x1a8   :  { %v1754_v59 = vmul.f32 %v5561_v46, %v1730_v40  ;;  %v1761_v47 = vmul.f32 %v1759_v60, %v1730_v40  ;;  %v1766_v7 = vmul.f32 %v5561_v46, %v1736_v29  ;;  %v1767_v2 = vmul.f32 %v1759_v60, %v1736_v29 }
 0x1a9   :  { %v1913_v57 = vmul.f32 0.0, %v5610_v42  ;;  %v4108_v24 = vadd.s32 4294967294, %v2109_v63  ;;  %v6893_v46 = vand.u32 2147483647, %v5520_v54  ;;  %v7026_v17 = vand.u32 2147483647, %v7025_v11 }
 0x1aa   :  { %v1763_v37 = vadd.f32 %v1761_v47, %v1753_v13  ;;  %v1764_v6 = vadd.f32 %v1762_v52, %v1754_v59  ;;  %v1769_v22 = vadd.f32 %v1767_v2, %v1765_v25  ;;  %v1770_v55 = vadd.f32 %v1768_v0, %v1766_v7 }
 0x1ab   :  { %vm5642_vm0 = vcmp.le.f32.partialorder %v7026_v17, 0.7853982  ;;  %v1789_v15 = vadd.f32 1.0, %v1787_v27  ;;  %v1790_v23 = vadd.f32 1.0, %v1788_v39  ;;  %vm4109_vm11 = vcmp.lt.s32.totalorder %v4108_v24, 0 }
 0x1ac   :  { %v1771_v60 = vsub.f32 %v1763_v37, %v1729_v49  ;;  %v1772_v16 = vsub.f32 %v1764_v6, %v1730_v40  ;;  %v1777_v19 = vsub.f32 %v1769_v22, %v1735_v1  ;;  %v1778_v56 = vsub.f32 %v1770_v55, %v1736_v29 }
 0x1ad   :  { %v2156_v18 = vsel %vm2155_vm5, %v2154_v41, 0  ;;  %v2097_v59 = vadd.s32 %v5491_v14, %v5484_v62  ;;  %v2112_v47 = vsel %vm4109_vm11, 0, %v4108_v24  ;;  %v2128_v27 = vsel %vm6915_vm4, %v2127_v35, %v5587_v8  ;;  %vm7035_vm5 = vmmov %vm7034_vm1 }
 0x1ae   :  { %v1773_v13 = vmul.f32 %v7016_v21, %v1771_v60  ;;  %v1774_v52 = vmul.f32 %v7024_v32, %v1772_v16  ;;  %v1779_v25 = vmul.f32 %v7016_v21, %v1777_v19  ;;  %v1780_v0 = vmul.f32 %v7024_v32, %v1778_v56  ;;  %vm7036_vm11 = vmmov %vm7034_vm1 }
 0x1af   :  { %v5658_v39 = vand.u32 8388607, %v6893_v46  ;;  %v2113_v37 = vsub.s32 32, %v2112_v47  ;;  %v2114_v6 = vshll.u32 %v5612_v26, %v2112_v47  ;;  %v2117_v22 = vsub.s32 4294967266, %v2112_v47 }
 0x1b0   :  { %v1775_v41 = vadd.f32 %v1773_v13, %v1729_v49  ;;  %v1776_v7 = vadd.f32 %v1774_v52, %v1730_v40  ;;  %v1781_v2 = vadd.f32 %v1779_v25, %v1735_v1  ;;  %v1782_v63 = vadd.f32 %v1780_v0, %v1736_v29 }
 0x1b1   :  { %v5661_v55 = vand.u32 31, %v2156_v18  ;;  %v2115_v1 = vshrl.u32 %v2097_v59, %v2113_v37  ;;  %v2118_v40 = vadd.s32 127, %v2117_v22  ;;  %v5673_v17 = vsel %vm5642_vm0, 0, %v2128_v27 }
 0x1b2   :  { %v1799_v62 = vmul.f32 %v1789_v15, %v1775_v41  ;;  %v1800_v14 = vmul.f32 %v1790_v23, %v1776_v7  ;;  %v1801_v24 = vmul.f32 %v1797_v33, %v1781_v2  ;;  %v1802_v60 = vmul.f32 %v1798_v50, %v1782_v63 }
 0x1b3   :  { %v1805_v16 = vmul.f32 %v1789_v15, %v1781_v2  ;;  %v1806_v8 = vmul.f32 %v1790_v23, %v1782_v63  ;;  %v1807_v35 = vmul.f32 %v1797_v33, %v1775_v41  ;;  %v1808_v19 = vmul.f32 %v1798_v50, %v1776_v7 }
 0x1b4   :  { %v5663_v56 = vsub.f32 %v1799_v62, %v1801_v24  ;;  %v5665_v49 = vsub.f32 %v1800_v14, %v1802_v60  ;;  %v5676_v13 = vsub.s32 32, %v5661_v55  ;;  %v5690_v15 = vadd.f32 1.0, %v1913_v57 }
 0x1b5   :  { %v5667_v29 = vadd.f32 %v1807_v35, %v1805_v16  ;;  %v5669_v26 = vadd.f32 %v1808_v19, %v1806_v8  ;;  %v1922_v23 = vrot.slane %v5357_v3, %v4820_v43  ;;  %v5707_v57 = vadd.f32 1.0, %v5610_v42 }
 0x1b6   :  { %1811 = vst [vmem:[#allocation2] sm:$0xff] %v5663_v56  ;;  %1812 = vst [vmem:[#allocation2 + $0x10] sm:$0xff] %v5665_v49  ;;  %v5684_v33 = vmul.f32 %v5593_v9, %v5663_v56  ;;  %v5688_v50 = vmul.f32 %v5593_v9, %v5665_v49  ;;  %v2116_v0 = vor.u32 %v2115_v1, %v2114_v6  ;;  %v2119_v59 = vshll.u32 %v2118_v40, 23 }
 0x1b7   :  { %1813 = vst [vmem:[#allocation2 + $0x20] sm:$0xff] %v5663_v56  ;;  %1814 = vst [vmem:[#allocation2 + $0x30] sm:$0xff] %v5665_v49  ;;  %v5700_v52 = vmul.f32 %v5593_v9, %v5667_v29  ;;  %v5704_v25 = vmul.f32 %v5593_v9, %v5669_v26  ;;  %v5711_v47 = vadd.s32 3, %v5673_v17  ;;  %v5713_v27 = vshrl.u32 %v2156_v18, 5 }
 0x1b8   :  { %1815 = vst [vmem:[#allocation2 + $0x8] sm:$0xff] %v5667_v29  ;;  %1816 = vst [vmem:[#allocation2 + $0x18] sm:$0xff] %v5669_v26  ;;  %v2161_v41 = vshll.u32 %v6996_v34, %v5661_v55  ;;  %v2162_v7 = vshrl.u32 %v6997_v38, %v5676_v13  ;;  %v2164_v9 = vshll.u32 %v6997_v38, %v5661_v55  ;;  %v1838_v2 = vrot.slane %v5665_v49, 1 }
 0x1b9   :  { %1817 = vst [vmem:[#allocation2 + $0x28] sm:$0xff] %v5667_v29  ;;  %1818 = vst [vmem:[#allocation2 + $0x38] sm:$0xff] %v5669_v26  ;;  %v2165_v42 = vshrl.u32 %v6998_v10, %v5676_v13  ;;  %v2120_v63 = vor.u32 4788187, %v2119_v59  ;;  %v2167_v37 = vshll.u32 %v6998_v10, %v5661_v55  ;;  %v7029_v18 = vmov 2102212464  }
 0x1ba   :  { %v2168_v6 = vshrl.u32 %v7029_v18, %v5676_v13  ;;  %v1858_v22 = vrot.slane %v5663_v56, 7  ;;  %v2123_v62 = vcvt.s32.f32 %v2116_v0  ;;  %v2170_v14 = vshll.u32 %v7029_v18, %v5661_v55  ;;  %v7031_v59 = vld [vmem:[#allocation22_spill] sm:$0xff] }
 0x1bb   :  { %v7030_v24 = vmov 920167782   ;;  %v1841_v16 = vrot.slane %v5669_v26, 1  ;;  %v1861_v8 = vrot.slane %v5667_v29, 7  ;;  %v2121_v35 = vand.u32 2147483647, %v2120_v63 }
 0x1bc   :  { %v2171_v60 = vshrl.u32 %v7030_v24, %v5676_v13  ;;  %vm2179_vm6 = vcmp.lt.s32.totalorder %v5713_v27, 4  ;;  %v1886_v46 = vmul.f32 %v7031_v59, %v5604_v61  ;;  %v5739_v0 = vmul.f32 %v1922_v23, %v5534_v45 }
 0x1bd   :  { %v1819_v19 = vld [vmem:[#allocation2] sm:$0xfe]  ;;  %v1825_v40 = vld [vmem:[#allocation2 + $0x10] sm:$0x80]  ;;  %v5742_v3 = vmul.f32 %v7031_v59, %v1922_v23  ;;  %v5744_v51 = vor.u32 %v2162_v7, %v2161_v41  ;;  %v5746_v63 = vor.u32 %v2165_v42, %v2164_v9  ;;  %v5748_v53 = vor.u32 %v2168_v6, %v2167_v37 }
 0x1be   :  { %v1823_v1 = vld [vmem:[#allocation2 + $0x20] sm:$0x1]  ;;  %v5752_v31 = vshll.u32 %v7030_v24, %v5661_v55  ;;  %v7032_v61 = vmov 1326507024   ;;  %v1829_v4 = vld [vmem:[#allocation2 + $0x30] sm:$0x7f]  ;;  %v2124_v7 = vmul.f32 %v2123_v62, %v2121_v35  ;;  %v5758_v5 = vor.u32 %v2171_v60, %v2170_v14 }
 0x1bf   :  { %v1820_v32 = vld [vmem:[#allocation2 + $0x8] sm:$0xfe]  ;;  %v1826_v20 = vld [vmem:[#allocation2 + $0x18] sm:$0x80]  ;;  %v5756_v45 = vshrl.u32 %v7032_v61, %v5676_v13  ;;  %v1837_v44 = vrot.slane %v1819_v19, 1  ;;  %v1843_v43 = vrot.slane %v1823_v1, 1 }
 0x1c0   :  { %v1824_v21 = vld [vmem:[#allocation2 + $0x28] sm:$0x1]  ;;  %v1830_v23 = vld [vmem:[#allocation2 + $0x38] sm:$0x7f]  ;;  %v1840_v41 = vrot.slane %v1820_v32, 1  ;;  %v1857_v42 = vrot.slane %v1825_v40, 7 }
 0x1c1   :  { %v1845_v9 = vrot.slane %v1824_v21, 1  ;;  %v1860_v37 = vrot.slane %v1826_v20, 7  ;;  %v1839_v6 = vsel %vm7033_vm10, %v1837_v44, %v1838_v2  ;;  %v1863_v28 = vrot.slane %v1829_v4, 7 }
 0x1c2   :  { %v1842_v55 = vsel %vm7034_vm1, %v1840_v41, %v1841_v16  ;;  %v1865_v36 = vrot.slane %v1830_v23, 7  ;;  %v1844_v48 = vsel %vm7035_vm5, %v1838_v2, %v1843_v43  ;;  %vm7037_vm3 = vcmask 1040384  }
 0x1c3   :  { %v1846_v61 = vsel %vm7036_vm11, %v1841_v16, %v1845_v9  ;;  %v1859_v19 = vsel %vm7037_vm3, %v1857_v42, %v1858_v22  ;;  %vm7038_vm14 = vmmov %vm7037_vm3  ;;  %v7044_v12 = vor.u32 8388608, %v5658_v39 }
 0x1c4   :  { %v1862_v32 = vsel %vm7038_vm14, %v1860_v37, %v1861_v8  ;;  %vm7039_vm13 = vmmov %vm7037_vm3  ;;  %v1871_v20 = vsel %vm4706_vm7, %v1839_v6, %v1859_v19  ;;  %vm2178_vm14 = vcmp.lt.s32.totalorder %v5713_v27, 3  ;;  %v5811_v6 = vand.u32 3, %v5673_v17 }
 0x1c5   :  { %v1864_v62 = vsel %vm7039_vm13, %v1858_v22, %v1863_v28  ;;  %vm7040_vm4 = vmmov %vm7037_vm3  ;;  %v1872_v44 = vsel %vm4706_vm7, %v1842_v55, %v1862_v32  ;;  %v1887_v2 = vmul.f32 %v5635_v58, %v1871_v20  ;;  %v2125_v22 = vxor.u32 2147483648, %v2124_v7 }
 0x1c6   :  { %v1866_v21 = vsel %vm7040_vm4, %v1861_v8, %v1865_v36  ;;  %v1873_v60 = vsel %vm4681_vm2, %v1844_v48, %v1864_v62  ;;  %v1893_v16 = vmul.f32 %v5635_v58, %v1872_v44  ;;  %vm2176_vm13 = vcmp.lt.s32.totalorder %v5713_v27, 1 }
 0x1c7   :  { %v1874_v43 = vsel %vm4681_vm2, %v1846_v61, %v1866_v21  ;;  %v1888_v35 = vmul.f32 %v1886_v46, %v1873_v60  ;;  %v1889_v36 = vadd.f32 %v1887_v2, %v5684_v33  ;;  %v2185_v48 = vsel %vm2179_vm6, %v5758_v5, 920167782 }
 0x1c8   :  { %v1894_v28 = vmul.f32 %v1886_v46, %v1874_v43  ;;  %v1895_v8 = vadd.f32 %v1893_v16, %v5700_v52  ;;  %vm7043_vm3 = vcmp.lt.s32.totalorder %v7025_v11, 0  ;;  %vm2177_vm4 = vcmp.lt.s32.totalorder %v5713_v27, 2 }
 0x1c9   :  { %v1890_v1 = vadd.f32 %v1888_v35, %v5688_v50  ;;  %v2126_v58 = vsel %vm7043_vm3, %v2125_v22, %v2124_v7  ;;  %v1897_v46 = vsub.f32 %v1889_v36, %v5663_v56  ;;  %v2184_v50 = vsel %vm2176_vm13, %v5744_v51, %v5746_v63 }
 0x1ca   :  { %v1896_v40 = vadd.f32 %v1894_v28, %v5704_v25  ;;  %v1903_v33 = vsub.f32 %v1895_v8, %v5667_v29  ;;  %v2129_v52 = vsel %vm5642_vm0, %v7025_v11, %v2126_v58  ;;  %v2186_v23 = vsel %vm2178_vm14, %v5748_v53, %v2185_v48  ;;  %v7045_v48 = vld [vmem:[#allocation8_spill] sm:$0xff] }
 0x1cb   :  { %v1898_v25 = vsub.f32 %v1890_v1, %v5665_v49  ;;  %4208 = vcosq.f32 %v2129_v52  ;;  %v1899_v41 = vmul.f32 0.0, %v1897_v46  ;;  %v5806_v9 = vshll.u32 %v7044_v12, 8 }
 0x1cc   :  { %v1904_v61 = vsub.f32 %v1896_v40, %v5669_v26  ;;  %v1905_v7 = vmul.f32 0.0, %v1903_v33  ;;  %4210 = vsinq.f32 %v2129_v52  ;;  %v2175_v55 = vor.u32 %v5756_v45, %v5752_v31 }
 0x1cd   :  { %v1902_v42 = vadd.f32 %v1898_v25, %v5665_v49  ;;  %v1901_v19 = vadd.f32 %v1899_v41, %v5663_v56  ;;  %v2444_v62 = vand.u32 3, %v5711_v47  ;;  %v2187_v39 = vsel %vm2177_vm4, %v2184_v50, %v2186_v23 }
 0x1ce   :  { %v1908_v37 = vadd.f32 %v1904_v61, %v5669_v26  ;;  %v1907_v32 = vadd.f32 %v1905_v7, %v5667_v29  ;;  %v2160_v44 = vshrl.u32 %v6996_v34, %v5676_v13  ;;  %vm2135_vm10 = vcmp.lt.s32.totalorder %v5811_v6, 2 }
 0x1cf   :  { %v1926_v21 = vmul.f32 %v5707_v57, %v1902_v42  ;;  %v1934_v17 = vmul.f32 %v5742_v3, %v1902_v42  ;;  %v1925_v20 = vmul.f32 %v5690_v15, %v1901_v19  ;;  %v1933_v56 = vmul.f32 %v5739_v0, %v1901_v19 }
 0x1d0   :  { %v1928_v49 = vmul.f32 %v5742_v3, %v1908_v37  ;;  %v1932_v26 = vmul.f32 %v5707_v57, %v1908_v37  ;;  %v1927_v31 = vmul.f32 %v5739_v0, %v1907_v32  ;;  %v1931_v45 = vmul.f32 %v5690_v15, %v1907_v32  ;;  %v1958_v15 = vpop.permute.xlu1 %1957  ;;  %v1976_v0 = vpop.permute.xlu0 %1975 }
 0x1d1   :  { %v2189_v57 = vsel %vm2179_vm6, %v2175_v55, 1326507024  ;;  %v5841_v43 = vmul.u32.u64.low %v5806_v9, %v2187_v39  ;;  %v5842_v2 = vmul.u32.u64.high %v5806_v9, %v2187_v39, %v5841_v43  ;;  %v2181_v13 = vsel %vm2179_vm6, %v5748_v53, 2102212464 }
 0x1d2   :  { %v5828_v29 = vsub.f32 %v1926_v21, %v1928_v49  ;;  %v5830_v47 = vadd.f32 %v1934_v17, %v1932_v26  ;;  %v5836_v60 = vsub.f32 %v1925_v20, %v1927_v31  ;;  %v5838_v3 = vadd.f32 %v1933_v56, %v1931_v45  ;;  %v7048_v26 = vld [vmem:[#allocation10_spill] sm:$0xff]  ;;  %v7049_v17 = vld [vmem:[#allocation11_spill] sm:$0xff] }
 0x1d3   :  { %v2188_v16 = vsel %vm2176_vm13, %v5746_v63, %v5748_v53  ;;  %v2190_v35 = vsel %vm2178_vm14, %v5758_v5, %v2189_v57  ;;  %vm2136_vm1 = vcmp.eq.s32.totalorder %v5811_v6, 0  ;;  %vm2139_vm5 = vcmp.eq.s32.totalorder %v5811_v6, 2 }
 0x1d4   :  { %2663 = vst [vmem:[#allocation2 + $0x10] sm:$0xff] %v5828_v29  ;;  %2665 = vst [vmem:[#allocation2 + $0x30] sm:$0xff] %v5828_v29  ;;  %vm2445_vm11 = vcmp.lt.s32.totalorder %v2444_v62, 2  ;;  %vm2449_vm3 = vcmp.eq.s32.totalorder %v2444_v62, 2  ;;  %vm2446_vm0 = vcmp.eq.s32.totalorder %v2444_v62, 0  ;;  %v2180_v8 = vsel %vm2176_vm13, %v2160_v44, %v5744_v51  ;;  %v1994_v25 = vpop.permute.xlu1 %1993  ;;  %v2012_v51 = vpop.permute.xlu0 %2011  ;;  %v7050_v44 = vld [vmem:[#allocation6_spill] sm:$0xff] }
 0x1d5   :  { %2667 = vst [vmem:[#allocation2 + $0x18] sm:$0xff] %v5830_v47  ;;  %2669 = vst [vmem:[#allocation2 + $0x38] sm:$0xff] %v5830_v47  ;;  %v4209_v28 = vpop.eup %4208  ;;  %v1980_v53 = vmul.f32 %v1976_v0, %v7045_v48  ;;  %v2689_v40 = vrot.slane %v5828_v29, 1  ;;  %v2182_v5 = vsel %vm2178_vm14, %v5746_v63, %v2181_v13  ;;  %v2191_v58 = vsel %vm2177_vm4, %v2188_v16, %v2190_v35 }
 0x1d6   :  { %2662 = vst [vmem:[#allocation2] sm:$0xff] %v5836_v60  ;;  %2664 = vst [vmem:[#allocation2 + $0x20] sm:$0xff] %v5836_v60  ;;  %v4211_v22 = vpop.eup %4210  ;;  %v2140_v36 = vxor.u32 2147483648, %v4209_v28  ;;  %v2692_v52 = vrot.slane %v5830_v47, 1  ;;  %v2709_v50 = vrot.slane %v5836_v60, 7  ;;  %v2712_v41 = vrot.slane %v5838_v3, 7 }
 0x1d7   :  { %2666 = vst [vmem:[#allocation2 + $0x8] sm:$0xff] %v5838_v3  ;;  %2668 = vst [vmem:[#allocation2 + $0x28] sm:$0xff] %v5838_v3  ;;  %v2137_v1 = vxor.u32 2147483648, %v4211_v22  ;;  %v2202_v7 = vadd.s32 1, %v5842_v2  ;;  %v5887_v19 = vmul.u32.u64.low %v5806_v9, %v2191_v58  ;;  %v5888_v32 = vmul.u32.u64.high %v5806_v9, %v2191_v58, %v5887_v19 }
 0x1d8   :  { %v2141_v46 = vsel %vm2139_vm5, %v2140_v36, %v4211_v22  ;;  %v2451_v33 = vsel %vm2449_vm3, %v2140_v36, %v4211_v22  ;;  %vm7046_vm6 = vweird.f32 %v7025_v11  ;;  %v1998_v62 = vmul.f32 %v1994_v25, %v7048_v26  ;;  %v2030_v26 = vpop.permute.xlu1 %2029 }
 0x1d9   :  { %v2138_v61 = vsel %vm2136_vm1, %v4209_v28, %v2137_v1  ;;  %v2448_v23 = vsel %vm2446_vm0, %v4209_v28, %v2137_v1  ;;  %vm7047_vm13 = vmmov %vm7046_vm6  ;;  %v2016_v20 = vmul.f32 %v2012_v51, %v7049_v17  ;;  %v2183_v11 = vsel %vm2177_vm4, %v2180_v8, %v2182_v5  ;;  %v7059_v17 = vld [vmem:[#allocation27_spill] sm:$0xff] }
 0x1da   :  { %v2142_v63 = vsel %vm2135_vm10, %v2138_v61, %v2141_v46  ;;  %v2452_v12 = vsel %vm2445_vm11, %v2448_v23, %v2451_v33  ;;  %v1983_v13 = vadd.f32 %v1980_v53, %v1958_v15  ;;  %vm7051_vm14 = vcmask 1046528  }
 0x1db   :  { %v2676_v42 = vld [vmem:[#allocation2 + $0x10] sm:$0x80]  ;;  %v2680_v55 = vld [vmem:[#allocation2 + $0x30] sm:$0x7f]  ;;  %v5892_v39 = vsel %vm7046_vm6, nan, %v2142_v63  ;;  %v5896_v21 = vsel %vm7047_vm13, nan, %v2452_v12  ;;  %vm7052_vm0 = vmmov %vm7051_vm14  ;;  %vm2201_vm6 = vc.u32 %v5888_v32, %v5841_v43 }
 0x1dc   :  { %v2677_v37 = vld [vmem:[#allocation2 + $0x18] sm:$0x80]  ;;  %v2681_v56 = vld [vmem:[#allocation2 + $0x38] sm:$0x7f]  ;;  %v2729_v57 = vrot.slane %v5896_v21, %v7050_v44  ;;  %v5904_v0 = vrot.slane %v5892_v39, %v7050_v44  ;;  %v2708_v36 = vrot.slane %v2676_v42, 7  ;;  %v2714_v1 = vrot.slane %v2680_v55, 7  ;;  %vm7053_vm10 = vmmov %vm7052_vm0 }
 0x1dd   :  { %v2670_v49 = vld [vmem:[#allocation2] sm:$0xfe]  ;;  %v2674_v31 = vld [vmem:[#allocation2 + $0x20] sm:$0x1]  ;;  %v2711_v48 = vrot.slane %v2677_v37, 7  ;;  %v2716_v58 = vrot.slane %v2681_v56, 7  ;;  %vm7054_vm1 = vmmov %vm7052_vm0 }
 0x1de   :  { %v2671_v6 = vld [vmem:[#allocation2 + $0x8] sm:$0xfe]  ;;  %v2675_v45 = vld [vmem:[#allocation2 + $0x28] sm:$0x1]  ;;  %v2688_v16 = vrot.slane %v2670_v49, 1  ;;  %v2694_v28 = vrot.slane %v2674_v31, 1  ;;  %v2731_v63 = vmul.f32 %v7031_v59, %v2729_v57  ;;  %v2737_v12 = vmul.f32 %v5904_v0, %v5828_v29 }
 0x1df   :  { %v2691_v35 = vrot.slane %v2671_v6, 1  ;;  %v2696_v22 = vrot.slane %v2675_v45, 1  ;;  %vm7055_vm5 = vcmask 1040384   ;;  %v2742_v42 = vmul.f32 %v5904_v0, %v5838_v3 }
 0x1e0   :  { %v2690_v46 = vsel %vm7051_vm14, %v2688_v16, %v2689_v40  ;;  %v2695_v25 = vsel %vm7053_vm10, %v2689_v40, %v2694_v28  ;;  %v2710_v27 = vsel %vm7055_vm5, %v2708_v36, %v2709_v50  ;;  %vm7056_vm4 = vmmov %vm7055_vm5  ;;  %v2743_v37 = vmul.f32 %v5904_v0, %v5830_v47  ;;  %v7060_v28 = vld [vmem:[#allocation13_spill] sm:$0xff] }
 0x1e1   :  { %v2693_v33 = vsel %vm7052_vm0, %v2691_v35, %v2692_v52  ;;  %v2697_v51 = vsel %vm7054_vm1, %v2692_v52, %v2696_v22  ;;  %v2713_v15 = vsel %vm7056_vm4, %v2711_v48, %v2712_v41  ;;  %vm7057_vm11 = vmmov %vm7056_vm4  ;;  %v2722_v5 = vsel %vm4706_vm7, %v2690_v46, %v2710_v27 }
 0x1e2   :  { %v2715_v8 = vsel %vm7057_vm11, %v2709_v50, %v2714_v1  ;;  %vm7058_vm3 = vmmov %vm7056_vm4  ;;  %v2723_v61 = vsel %vm4706_vm7, %v2693_v33, %v2713_v15  ;;  %v2730_v52 = vmul.f32 %v7018_v30, %v2729_v57  ;;  %v2001_v50 = vadd.f32 %v1998_v62, %v1983_v13 }
 0x1e3   :  { %v2717_v53 = vsel %vm7058_vm3, %v2712_v41, %v2716_v58  ;;  %v2724_v23 = vsel %vm4681_vm2, %v2695_v25, %v2715_v8  ;;  %v2736_v41 = vmul.f32 %v5904_v0, %v5836_v60  ;;  %v2763_v62 = vrot.slane %v5896_v21, %v7059_v17 }
 0x1e4   :  { %v2725_v40 = vsel %vm4681_vm2, %v2697_v51, %v2717_v53  ;;  %v2738_v55 = vmul.f32 %v2730_v52, %v2722_v5  ;;  %v2739_v19 = vmul.f32 %v2731_v63, %v2724_v23  ;;  %v2744_v49 = vmul.f32 %v2730_v52, %v2723_v61 }
 0x1e5   :  { %v2745_v6 = vmul.f32 %v2731_v63, %v2725_v40  ;;  %v2199_v31 = vmul.u32 %v5806_v9, %v2183_v11  ;;  %v2203_v45 = vsel %vm2201_vm6, %v2202_v7, %v5842_v2  ;;  %v2019_v35 = vadd.f32 %v2016_v20, %v2001_v50 }
 0x1e6   :  { %v2740_v56 = vadd.f32 %v2738_v55, %v2736_v41  ;;  %v2741_v57 = vadd.f32 %v2739_v19, %v2737_v12  ;;  %v2746_v13 = vadd.f32 %v2744_v49, %v2742_v42  ;;  %v2034_v22 = vmul.f32 %v2030_v26, %v7060_v28 }
 0x1e7   :  { %v2747_v16 = vadd.f32 %v2745_v6, %v2743_v37  ;;  %v2204_v36 = vadd.s32 %v2203_v45, %v2199_v31  ;;  %v2764_v48 = vmul.f32 %v7018_v30, %v2763_v62  ;;  %v2765_v1 = vmul.f32 %v7031_v59, %v2763_v62 }
 0x1e8   :  { %v2750_v58 = vmul.f32 %v2730_v52, %v5836_v60  ;;  %v2751_v46 = vmul.f32 %v2731_v63, %v5828_v29  ;;  %v2769_v9 = vrot.slane %v5892_v39, %v7059_v17  ;;  %v2037_v2 = vadd.f32 %v2034_v22, %v2019_v35 }
 0x1e9   :  { %v2756_v7 = vmul.f32 %v2730_v52, %v5838_v3  ;;  %v2757_v11 = vmul.f32 %v2731_v63, %v5830_v47  ;;  %v5949_v20 = vmul.f32 %v2764_v48, %v2746_v13  ;;  %v5951_v33 = vmul.f32 %v2765_v1, %v2747_v16 }
 0x1ea   :  { %v2778_v25 = vmul.f32 %v2764_v48, %v2740_v56  ;;  %v2779_v51 = vmul.f32 %v2765_v1, %v2741_v57  ;;  %v2205_v27 = vadd.s32 536870912, %v2204_v36  ;;  %v2748_v15 = vmul.f32 %v5904_v0, %v2722_v5 }
 0x1eb   :  { %v2749_v60 = vmul.f32 %v5904_v0, %v2724_v23  ;;  %v2754_v29 = vmul.f32 %v5904_v0, %v2723_v61  ;;  %v2755_v8 = vmul.f32 %v5904_v0, %v2725_v40  ;;  %v5957_v53 = vmul.f32 %v2769_v9, %v2740_v56 }
 0x1ec   :  { %v5959_v3 = vshrl.u32 %v2205_v27, 30  ;;  %v2752_v47 = vsub.f32 %v2748_v15, %v2750_v58  ;;  %v5961_v52 = vmul.f32 %v2769_v9, %v2741_v57  ;;  %v2776_v63 = vmul.f32 %v2769_v9, %v2746_v13 }
 0x1ed   :  { %v2753_v50 = vsub.f32 %v2749_v60, %v2751_v46  ;;  %v2758_v41 = vsub.f32 %v2754_v29, %v2756_v7  ;;  %v2759_v12 = vsub.f32 %v2755_v8, %v2757_v11  ;;  %v2774_v5 = vsub.f32 %v5957_v53, %v5949_v20 }
 0x1ee   :  { %v2207_v23 = vshll.u32 %v5959_v3, 30  ;;  %v2775_v61 = vsub.f32 %v5961_v52, %v5951_v33  ;;  %v2777_v0 = vmul.f32 %v2769_v9, %v2747_v16  ;;  %v5968_v40 = vmul.f32 0.5, %v2037_v2 }
 0x1ef   :  { %v5970_v42 = vadd.f32 %v2778_v25, %v2776_v63  ;;  %v2782_v37 = vmul.f32 %v2769_v9, %v2752_v47  ;;  %v2783_v55 = vmul.f32 %v2769_v9, %v2753_v50  ;;  %v2784_v19 = vmul.f32 %v2764_v48, %v2758_v41 }
 0x1f0   :  { %v2208_v49 = vsub.s32 %v2204_v36, %v2207_v23  ;;  %v5972_v6 = vadd.f32 %v2779_v51, %v2777_v0  ;;  %v2785_v26 = vmul.f32 %v2765_v1, %v2759_v12  ;;  %v5976_v31 = vmul.f32 %v2769_v9, %v2758_v41 }
 0x1f1   :  { %v5974_v62 = vadd.f32 %v2784_v19, %v2782_v37  ;;  %v5978_v45 = vmul.f32 %v2769_v9, %v2759_v12  ;;  %v6916_v13 = vand.u32 2147483647, %v5968_v40  ;;  %v5983_v16 = vmul.f32 %v2764_v48, %v2752_v47 }
 0x1f2   :  { %v2210_v56 = vsub.s32 0, %v2208_v49  ;;  %v5980_v57 = vadd.f32 %v2785_v26, %v2783_v55  ;;  %v5985_v35 = vmul.f32 %v2765_v1, %v2753_v50  ;;  %v2250_v28 = vand.u32 2139095040, %v5968_v40 }
 0x1f3   :  { %v2792_v36 = vsub.f32 %v5976_v31, %v5983_v16  ;;  %v2254_v2 = vand.u32 8388607, %v6916_v13  ;;  %v2200_v1 = vadd.s32 %v5841_v43, %v5888_v32  ;;  %v2230_v8 = vsub.s32 4, %v5959_v3 }
 0x1f4   :  { %v4111_v22 = vmin.u32 %v2210_v56, %v2208_v49  ;;  %v2793_v58 = vsub.f32 %v5978_v45, %v5985_v35  ;;  %v2251_v46 = vshrl.u32 %v2250_v28, 23  ;;  %vm2146_vm0 = vcmp.lt.s32.totalorder %v5520_v54, 0 }
 0x1f5   :  { %v2255_v25 = vor.u32 8388608, %v2254_v2 }
 0x1f6   :  { %v2212_v9 = vclz %v4111_v22  ;;  %v4114_v7 = vadd.s32 4294967169, %v2251_v46 }
 0x1f7   :  { %v2295_v12 = vshll.u32 %v2255_v25, 8 }
 0x1f8   :  { %v4112_v11 = vadd.s32 4294967294, %v2212_v9  ;;  %v2257_v48 = vadd.s32 1, %v4114_v7  ;;  %v7061_v7 = vmov 1326507024  }
 0x1fa   :  { %vm4113_vm13 = vcmp.lt.s32.totalorder %v4112_v11, 0  ;;  %vm2258_vm14 = vcmp.gt.s32.totalorder %v2257_v48, 0 }
 0x1fb   :  { %v2215_v51 = vsel %vm4113_vm13, 0, %v4112_v11  ;;  %v2259_v29 = vsel %vm2258_vm14, %v2257_v48, 0 }
 0x1fc   :  { %v2216_v27 = vsub.s32 32, %v2215_v51  ;;  %v2217_v15 = vshll.u32 %v2208_v49, %v2215_v51  ;;  %v2220_v60 = vsub.s32 4294967266, %v2215_v51  ;;  %v2261_v47 = vand.u32 31, %v2259_v29 }
 0x1fd   :  { %v2260_v41 = vshrl.u32 %v2259_v29, 5 }
 0x1fe   :  { %v2218_v63 = vshrl.u32 %v2200_v1, %v2216_v27  ;;  %v2221_v50 = vadd.s32 127, %v2220_v60  ;;  %v2262_v23 = vsub.s32 32, %v2261_v47  ;;  %v2264_v43 = vshll.u32 %v6996_v34, %v2261_v47 }
 0x1ff   :  { %v2267_v32 = vshll.u32 %v6997_v38, %v2261_v47  ;;  %v2270_v0 = vshll.u32 %v6998_v10, %v2261_v47  ;;  %v2273_v19 = vshll.u32 %v7029_v18, %v2261_v47  ;;  %v2276_v49 = vshll.u32 %v7030_v24, %v2261_v47 }
 0x200   :  { %v2219_v37 = vor.u32 %v2218_v63, %v2217_v15  ;;  %v2222_v55 = vshll.u32 %v2221_v50, 23  ;;  %v2263_v26 = vshrl.u32 %v6996_v34, %v2262_v23  ;;  %v2265_v56 = vshrl.u32 %v6997_v38, %v2262_v23 }
 0x201   :  { %v2268_v28 = vshrl.u32 %v6998_v10, %v2262_v23  ;;  %v2271_v22 = vshrl.u32 %v7029_v18, %v2262_v23  ;;  %v2274_v2 = vshrl.u32 %v7030_v24, %v2262_v23  ;;  %v2277_v11 = vshrl.u32 %v7061_v7, %v2262_v23 }
 0x202   :  { %v2223_v46 = vor.u32 4788187, %v2222_v55  ;;  %v2226_v9 = vcvt.s32.f32 %v2219_v37  ;;  %v2266_v48 = vor.u32 %v2265_v56, %v2264_v43  ;;  %vm2279_vm10 = vcmp.lt.s32.totalorder %v2260_v41, 1 }
 0x203   :  { %v2269_v1 = vor.u32 %v2268_v28, %v2267_v32  ;;  %v2272_v25 = vor.u32 %v2271_v22, %v2270_v0  ;;  %v2275_v27 = vor.u32 %v2274_v2, %v2273_v19  ;;  %v2278_v15 = vor.u32 %v2277_v11, %v2276_v49 }
 0x204   :  { %v2224_v51 = vand.u32 2147483647, %v2223_v46  ;;  %vm2280_vm1 = vcmp.lt.s32.totalorder %v2260_v41, 2  ;;  %vm2281_vm5 = vcmp.lt.s32.totalorder %v2260_v41, 3  ;;  %vm2282_vm4 = vcmp.lt.s32.totalorder %v2260_v41, 4 }
 0x205   :  { %v2283_v34 = vsel %vm2279_vm10, %v2263_v26, %v2266_v48  ;;  %v2287_v38 = vsel %vm2279_vm10, %v2266_v48, %v2269_v1  ;;  %v2284_v18 = vsel %vm2282_vm4, %v2272_v25, 2102212464  ;;  %v2288_v60 = vsel %vm2282_vm4, %v2275_v27, 920167782 }
 0x206   :  { %v2227_v10 = vmul.f32 %v2226_v9, %v2224_v51  ;;  %v2291_v29 = vsel %vm2279_vm10, %v2269_v1, %v2272_v25  ;;  %v7062_v24 = vand.u32 2147483647, %v5520_v54  ;;  %v2285_v47 = vsel %vm2281_vm5, %v2269_v1, %v2284_v18 }
 0x207   :  { %v2289_v63 = vsel %vm2281_vm5, %v2272_v25, %v2288_v60  ;;  %v2292_v50 = vsel %vm2282_vm4, %v2278_v15, 1326507024  ;;  %v2231_v43 = vsel %vm2146_vm0, %v2230_v8, %v5959_v3  ;;  %v2286_v37 = vsel %vm2280_vm1, %v2283_v34, %v2285_v47 }
 0x208   :  { %vm2145_vm11 = vcmp.le.f32.partialorder %v7062_v24, 0.7853982  ;;  %v2228_v23 = vxor.u32 2147483648, %v2227_v10  ;;  %v2290_v32 = vsel %vm2280_vm1, %v2287_v38, %v2289_v63  ;;  %v2293_v0 = vsel %vm2281_vm5, %v2275_v27, %v2292_v50 }
 0x209   :  { %v2294_v55 = vsel %vm2280_vm1, %v2291_v29, %v2293_v0  ;;  %v6017_v19 = vmul.u32.u64.low %v2295_v12, %v2290_v32  ;;  %v6018_v49 = vmul.u32.u64.high %v2295_v12, %v2290_v32, %v6017_v19  ;;  %v2233_v3 = vsel %vm2145_vm11, 0, %v2231_v43 }
 0x20a   :  { %v2229_v26 = vsel %vm2146_vm0, %v2228_v23, %v2227_v10  ;;  %v6023_v56 = vmul.u32.u64.low %v2295_v12, %v2294_v55  ;;  %v6024_v28 = vmul.u32.u64.high %v2295_v12, %v2294_v55, %v6023_v56  ;;  %v2302_v8 = vmul.u32 %v2295_v12, %v2286_v37 }
 0x20b   :  { %v2232_v22 = vsel %vm2145_vm11, %v5520_v54, %v2229_v26  ;;  %v2305_v46 = vadd.s32 1, %v6018_v49  ;;  %v2547_v41 = vadd.s32 3, %v2233_v3  ;;  %v2237_v7 = vand.u32 3, %v2233_v3 }
 0x20c   :  { %4212 = vcosq.f32 %v2232_v22  ;;  %vm2304_vm3 = vc.u32 %v6024_v28, %v6017_v19  ;;  %vm2236_vm5 = vweird.f32 %v5520_v54  ;;  %vm7067_vm4 = vcmask 1045504  }
 0x20d   :  { %4214 = vsinq.f32 %v2232_v22  ;;  %v2306_v9 = vsel %vm2304_vm3, %v2305_v46, %v6018_v49  ;;  %v2548_v11 = vand.u32 3, %v2547_v41  ;;  %vm2242_vm6 = vcmp.eq.s32.totalorder %v2237_v7, 2  ;;  %vm7068_vm11 = vmmov %vm7067_vm4 }
 0x20e   :  { %v2307_v2 = vadd.s32 %v2306_v9, %v2302_v8  ;;  %vm2239_vm14 = vcmp.eq.s32.totalorder %v2237_v7, 0  ;;  %vm2238_vm10 = vcmp.lt.s32.totalorder %v2237_v7, 2  ;;  %vm7069_vm3 = vmmov %vm7067_vm4 }
 0x20f   :  { %vm2553_vm13 = vcmp.eq.s32.totalorder %v2548_v11, 2  ;;  %vm2550_vm0 = vcmp.eq.s32.totalorder %v2548_v11, 0  ;;  %vm2549_vm1 = vcmp.lt.s32.totalorder %v2548_v11, 2  ;;  %v7064_v11 = vld [vmem:[#allocation29_spill] sm:$0xff] }
 0x210   :  { %v2308_v48 = vadd.s32 536870912, %v2307_v2 }
 0x212   :  { %v6031_v27 = vshrl.u32 %v2308_v48, 30  ;;  %v2939_v48 = vrot.slane %v5896_v21, %v7064_v11 }
 0x214   :  { %v2310_v47 = vshll.u32 %v6031_v27, 30 }
 0x216   :  { %v4213_v1 = vpop.eup %4212  ;;  %v6055_v49 = vsub.s32 %v2307_v2, %v2310_v47  ;;  %v7063_v2 = vld [vmem:[#allocation7_spill] sm:$0xff] }
 0x217   :  { %v4215_v25 = vpop.eup %4214  ;;  %v2243_v51 = vxor.u32 2147483648, %v4213_v1  ;;  %v2905_v7 = vrot.slane %v5896_v21, %v7063_v2 }
 0x218   :  { %v2240_v12 = vxor.u32 2147483648, %v4215_v25 }
 0x219   :  { %v2244_v15 = vsel %vm2242_vm6, %v2243_v51, %v4215_v25  ;;  %v2555_v34 = vsel %vm2553_vm13, %v2243_v51, %v4215_v25  ;;  %v2911_v25 = vrot.slane %v5892_v39, %v7063_v2  ;;  %v6087_v51 = vrot.slane %v5892_v39, %v7064_v11  ;;  %vm7070_vm6 = vmmov %vm7069_vm3 }
 0x21a   :  { %v2241_v38 = vsel %vm2239_vm14, %v4213_v1, %v2240_v12  ;;  %v2552_v10 = vsel %vm2550_vm0, %v4213_v1, %v2240_v12  ;;  %vm7071_vm13 = vcmask 1041408  }
 0x21b   :  { %v2245_v18 = vsel %vm2238_vm10, %v2241_v38, %v2244_v15  ;;  %v2556_v60 = vsel %vm2549_vm1, %v2552_v10, %v2555_v34  ;;  %v7065_v15 = vld [vmem:[#allocation23_spill] sm:$0xff]  ;;  %v7066_v38 = vld [vmem:[#allocation28_spill] sm:$0xff]  ;;  %vm7072_vm14 = vmmov %vm7071_vm13 }
 0x21c   :  { %v6034_v29 = vsel %vm2236_vm5, nan, %v2245_v18  ;;  %v6036_v24 = vsel %vm2236_vm5, nan, %v2556_v60  ;;  %v2906_v34 = vmul.f32 %v7065_v15, %v2905_v7  ;;  %v2907_v10 = vmul.f32 %v7066_v38, %v2905_v7  ;;  %vm7073_vm0 = vmmov %vm7071_vm13 }
 0x21d   :  { %v2797_v63 = vrot.slane %v6036_v24, %v7050_v44  ;;  %v2803_v50 = vrot.slane %v6034_v29, %v7050_v44  ;;  %v2819_v54 = vrot.slane %v6036_v24, %v7059_v17  ;;  %v2825_v52 = vrot.slane %v6034_v29, %v7059_v17  ;;  %vm7074_vm10 = vmmov %vm7073_vm0 }
 0x21e   :  { %v2973_v12 = vrot.slane %v6036_v24, %v7063_v2  ;;  %v6094_v18 = vmul.f32 %v7065_v15, %v2939_v48  ;;  %v6097_v47 = vmul.f32 %v7066_v38, %v2939_v48  ;;  %vm7083_vm5 = vcmask 1043456  }
 0x21f   :  { %v2798_v23 = vmul.f32 %v7018_v30, %v2797_v63  ;;  %v2799_v43 = vmul.f32 %v7031_v59, %v2797_v63  ;;  %v2804_v32 = vmul.f32 %v2803_v50, %v2774_v5  ;;  %v2805_v0 = vmul.f32 %v2803_v50, %v2775_v61 }
 0x220   :  { %v2810_v37 = vmul.f32 %v2803_v50, %v5970_v42  ;;  %v2811_v55 = vmul.f32 %v2803_v50, %v5972_v6  ;;  %v2820_v33 = vmul.f32 %v7018_v30, %v2819_v54  ;;  %v2821_v53 = vmul.f32 %v7031_v59, %v2819_v54 }
 0x221   :  { %v2806_v26 = vmul.f32 %v2798_v23, %v5974_v62  ;;  %v2807_v56 = vmul.f32 %v2799_v43, %v5980_v57  ;;  %v2812_v22 = vmul.f32 %v2798_v23, %v2792_v36  ;;  %v2813_v20 = vmul.f32 %v2799_v43, %v2793_v58 }
 0x222   :  { %v2313_v62 = vsub.s32 0, %v6055_v49  ;;  %v6101_v50 = vrot.slane %v6034_v29, %v7063_v2  ;;  %v6105_v54 = vrot.slane %v6036_v24, %v7064_v11 }
 0x223   :  { %v2808_v5 = vadd.f32 %v2806_v26, %v2804_v32  ;;  %v2809_v61 = vadd.f32 %v2807_v56, %v2805_v0  ;;  %v2814_v42 = vadd.f32 %v2812_v22, %v2810_v37  ;;  %v2815_v6 = vadd.f32 %v2813_v20, %v2811_v55 }
 0x224   :  { %v4115_v1 = vmin.u32 %v2313_v62, %v6055_v49  ;;  %v6113_v20 = vmul.f32 %v7065_v15, %v2973_v12 }
 0x225   :  { %v2826_v57 = vmul.f32 %v2825_v52, %v2808_v5  ;;  %v2827_v31 = vmul.f32 %v2825_v52, %v2809_v61  ;;  %v2828_v16 = vmul.f32 %v2820_v33, %v2814_v42  ;;  %v2829_v36 = vmul.f32 %v2821_v53, %v2815_v6 }
 0x226   :  { %v2832_v3 = vmul.f32 %v2825_v52, %v2814_v42  ;;  %v2833_v45 = vmul.f32 %v2825_v52, %v2815_v6  ;;  %v2834_v35 = vmul.f32 %v2820_v33, %v2808_v5  ;;  %v2835_v58 = vmul.f32 %v2821_v53, %v2809_v61 }
 0x227   :  { %v6070_v8 = vsub.f32 %v2826_v57, %v2828_v16  ;;  %v2831_v46 = vsub.f32 %v2827_v31, %v2829_v36  ;;  %v2315_v60 = vclz %v4115_v1  ;;  %v6116_v33 = vmul.f32 %v7066_v38, %v2973_v12 }
 0x228   :  { %v6072_v41 = vadd.f32 %v2834_v35, %v2832_v3  ;;  %v2837_v9 = vadd.f32 %v2835_v58, %v2833_v45 }
 0x229   :  { %2838 = vst [vmem:[#allocation2] sm:$0xff] %v6070_v8  ;;  %2839 = vst [vmem:[#allocation2 + $0x10] sm:$0xff] %v2831_v46  ;;  %v2865_v63 = vrot.slane %v2831_v46, 2  ;;  %v2885_v43 = vrot.slane %v6070_v8, 6  ;;  %v6109_v0 = vadd.s32 4294967294, %v2315_v60  ;;  %v2912_v56 = vmul.f32 %v2911_v25, %v6070_v8 }
 0x22a   :  { %2840 = vst [vmem:[#allocation2 + $0x20] sm:$0xff] %v6070_v8  ;;  %2841 = vst [vmem:[#allocation2 + $0x30] sm:$0xff] %v2831_v46  ;;  %v2868_v23 = vrot.slane %v2837_v9, 2  ;;  %v2888_v32 = vrot.slane %v6072_v41, 6  ;;  %v2913_v22 = vmul.f32 %v2911_v25, %v2831_v46  ;;  %v2918_v61 = vmul.f32 %v2911_v25, %v6072_v41 }
 0x22b   :  { %2842 = vst [vmem:[#allocation2 + $0x8] sm:$0xff] %v6072_v41  ;;  %2843 = vst [vmem:[#allocation2 + $0x18] sm:$0xff] %v2837_v9  ;;  %v2919_v42 = vmul.f32 %v2911_v25, %v2837_v9  ;;  %v2926_v6 = vmul.f32 %v2906_v34, %v6070_v8  ;;  %v2927_v62 = vmul.f32 %v2907_v10, %v2831_v46  ;;  %vm4117_vm1 = vcmp.lt.s32.totalorder %v6109_v0, 0 }
 0x22c   :  { %2844 = vst [vmem:[#allocation2 + $0x28] sm:$0xff] %v6072_v41  ;;  %2845 = vst [vmem:[#allocation2 + $0x38] sm:$0xff] %v2837_v9  ;;  %v2932_v3 = vmul.f32 %v2906_v34, %v6072_v41  ;;  %v2933_v45 = vmul.f32 %v2907_v10, %v2837_v9 }
 0x230   :  { %v2846_v37 = vld [vmem:[#allocation2] sm:$0xfc]  ;;  %v2852_v26 = vld [vmem:[#allocation2 + $0x10] sm:$0xc0] }
 0x231   :  { %v2850_v55 = vld [vmem:[#allocation2 + $0x20] sm:$0x3]  ;;  %v2856_v57 = vld [vmem:[#allocation2 + $0x30] sm:$0x3f]  ;;  %v2864_v16 = vrot.slane %v2846_v37, 2  ;;  %v2884_v7 = vrot.slane %v2852_v26, 6 }
 0x232   :  { %v2847_v53 = vld [vmem:[#allocation2 + $0x8] sm:$0xfc]  ;;  %v2853_v5 = vld [vmem:[#allocation2 + $0x18] sm:$0xc0]  ;;  %v2870_v35 = vrot.slane %v2850_v55, 2  ;;  %v2890_v60 = vrot.slane %v2856_v57, 6 }
 0x233   :  { %v2851_v52 = vld [vmem:[#allocation2 + $0x28] sm:$0x3]  ;;  %v2857_v31 = vld [vmem:[#allocation2 + $0x38] sm:$0x3f]  ;;  %v2867_v36 = vrot.slane %v2847_v53, 2  ;;  %v2887_v48 = vrot.slane %v2853_v5, 6  ;;  %v2866_v1 = vsel %vm7067_vm4, %v2864_v16, %v2865_v63  ;;  %v2886_v37 = vsel %vm7071_vm13, %v2884_v7, %v2885_v43  ;;  %vm7084_vm4 = vmmov %vm7083_vm5 }
 0x234   :  { %v2872_v58 = vrot.slane %v2851_v52, 2  ;;  %v2892_v13 = vrot.slane %v2857_v31, 6  ;;  %v2871_v8 = vsel %vm7069_vm3, %v2865_v63, %v2870_v35  ;;  %v2891_v41 = vsel %vm7073_vm0, %v2885_v43, %v2890_v60  ;;  %vm7086_vm3 = vmmov %vm7084_vm4 }
 0x235   :  { %v2869_v12 = vsel %vm7068_vm11, %v2867_v36, %v2868_v23  ;;  %v2889_v53 = vsel %vm7072_vm14, %v2887_v48, %v2888_v32  ;;  %v2898_v26 = vsel %vm4896_vm8, %v2866_v1, %v2886_v37  ;;  %v2900_v57 = vsel %vm4903_vm9, %v2871_v8, %v2891_v41  ;;  %vm7085_vm11 = vmmov %vm7084_vm4 }
 0x236   :  { %v2873_v46 = vsel %vm7070_vm6, %v2868_v23, %v2872_v58  ;;  %v2893_v9 = vsel %vm7074_vm10, %v2888_v32, %v2892_v13  ;;  %v2899_v52 = vsel %vm4896_vm8, %v2869_v12, %v2889_v53  ;;  %v2914_v23 = vmul.f32 %v2906_v34, %v2898_v26  ;;  %vm7087_vm6 = vmmov %vm7086_vm3 }
 0x237   :  { %v2901_v63 = vsel %vm4903_vm9, %v2873_v46, %v2893_v9  ;;  %v2920_v31 = vmul.f32 %v2906_v34, %v2899_v52  ;;  %v2915_v16 = vmul.f32 %v2907_v10, %v2900_v57  ;;  %v2924_v35 = vmul.f32 %v2911_v25, %v2898_v26  ;;  %vm7088_vm13 = vmmov %vm7086_vm3 }
 0x238   :  { %v2921_v36 = vmul.f32 %v2907_v10, %v2901_v63  ;;  %v2925_v43 = vmul.f32 %v2911_v25, %v2900_v57  ;;  %v2916_v58 = vadd.f32 %v2914_v23, %v2912_v56  ;;  %v2930_v32 = vmul.f32 %v2911_v25, %v2899_v52  ;;  %vm7089_vm14 = vmmov %vm7086_vm3 }
 0x239   :  { %v2922_v13 = vadd.f32 %v2920_v31, %v2918_v61  ;;  %v2931_v7 = vmul.f32 %v2911_v25, %v2901_v63  ;;  %v2917_v48 = vadd.f32 %v2915_v16, %v2913_v22  ;;  %v2928_v60 = vsub.f32 %v2924_v35, %v2926_v6  ;;  %vm7090_vm0 = vmmov %vm7086_vm3 }
 0x23a   :  { %v2923_v1 = vadd.f32 %v2921_v36, %v2919_v42  ;;  %v2929_v12 = vsub.f32 %v2925_v43, %v2927_v62  ;;  %v2934_v37 = vsub.f32 %v2930_v32, %v2932_v3  ;;  %v2946_v8 = vmul.f32 %v6087_v51, %v2916_v58 }
 0x23b   :  { %v2935_v53 = vsub.f32 %v2931_v7, %v2933_v45  ;;  %v2948_v46 = vmul.f32 %v6094_v18, %v2922_v13  ;;  %v2947_v34 = vmul.f32 %v6087_v51, %v2917_v48  ;;  %v2952_v41 = vmul.f32 %v6087_v51, %v2922_v13 }
 0x23c   :  { %v2949_v10 = vmul.f32 %v6097_v47, %v2923_v1  ;;  %v2953_v56 = vmul.f32 %v6087_v51, %v2923_v1  ;;  %v2954_v25 = vmul.f32 %v6094_v18, %v2916_v58  ;;  %v2955_v22 = vmul.f32 %v6097_v47, %v2917_v48 }
 0x23d   :  { %v2950_v61 = vsub.f32 %v2946_v8, %v2948_v46  ;;  %v2958_v42 = vmul.f32 %v6087_v51, %v2928_v60  ;;  %v2959_v62 = vmul.f32 %v6087_v51, %v2929_v12  ;;  %v2960_v3 = vmul.f32 %v6094_v18, %v2934_v37 }
 0x23e   :  { %v2951_v6 = vsub.f32 %v2947_v34, %v2949_v10  ;;  %v2961_v45 = vmul.f32 %v6097_v47, %v2935_v53  ;;  %v2956_v9 = vadd.f32 %v2954_v25, %v2952_v41  ;;  %v2957_v26 = vadd.f32 %v2955_v22, %v2953_v56 }
 0x23f   :  { %v2964_v52 = vmul.f32 %v6087_v51, %v2934_v37  ;;  %v2965_v57 = vmul.f32 %v6087_v51, %v2935_v53  ;;  %v2962_v63 = vadd.f32 %v2960_v3, %v2958_v42  ;;  %v2966_v31 = vmul.f32 %v6094_v18, %v2928_v60 }
 0x240   :  { %v2963_v23 = vadd.f32 %v2961_v45, %v2959_v62  ;;  %v2967_v16 = vmul.f32 %v6097_v47, %v2929_v12  ;;  %v2980_v36 = vmul.f32 %v6101_v50, %v2950_v61  ;;  %v2981_v35 = vmul.f32 %v6101_v50, %v2951_v6  ;;  %v7077_v12 = vld [vmem:[#allocation9_spill] sm:$0xff] }
 0x241   :  { %v2986_v43 = vmul.f32 %v6101_v50, %v2956_v9  ;;  %v2987_v58 = vmul.f32 %v6101_v50, %v2957_v26  ;;  %v2968_v13 = vsub.f32 %v2964_v52, %v2966_v31  ;;  %v2982_v7 = vmul.f32 %v6113_v20, %v2962_v63  ;;  %v7079_v52 = vld [vmem:[#allocation31_spill] sm:$0xff] }
 0x242   :  { %v2969_v32 = vsub.f32 %v2965_v57, %v2967_v16  ;;  %v2983_v51 = vmul.f32 %v6116_v33, %v2963_v23  ;;  %v3001_v48 = vrot.slane %v6034_v29, %v7064_v11  ;;  %v3081_v50 = vrot.slane %v5896_v21, %v7077_v12 }
 0x243   :  { %v2984_v18 = vadd.f32 %v2982_v7, %v2980_v36  ;;  %v2988_v1 = vmul.f32 %v6113_v20, %v2968_v13  ;;  %v2996_v37 = vmul.f32 %v7065_v15, %v6105_v54  ;;  %v2997_v53 = vmul.f32 %v7066_v38, %v6105_v54 }
 0x244   :  { %v2985_v47 = vadd.f32 %v2983_v51, %v2981_v35  ;;  %v2989_v60 = vmul.f32 %v6116_v33, %v2969_v32  ;;  %v2318_v8 = vsel %vm4117_vm1, 0, %v6109_v0  ;;  %v2303_v20 = vadd.s32 %v6017_v19, %v6024_v28  ;;  %v7078_v19 = vld [vmem:[#allocation30_spill] sm:$0xff]  ;;  %v7080_v32 = vld [vmem:[#allocation36_spill] sm:$0xff] }
 0x245   :  { %v2990_v46 = vadd.f32 %v2988_v1, %v2986_v43  ;;  %v3002_v10 = vmul.f32 %v3001_v48, %v2984_v18  ;;  %v3010_v56 = vmul.f32 %v2996_v37, %v2984_v18  ;;  %v2319_v33 = vsub.s32 32, %v2318_v8 }
 0x246   :  { %v2991_v34 = vadd.f32 %v2989_v60, %v2987_v58  ;;  %v3003_v41 = vmul.f32 %v3001_v48, %v2985_v47  ;;  %v3011_v61 = vmul.f32 %v2997_v53, %v2985_v47  ;;  %v2323_v62 = vsub.s32 4294967266, %v2318_v8  ;;  %v7081_v47 = vld [vmem:[#allocation12_spill] sm:$0xff] }
 0x247   :  { %v3004_v25 = vmul.f32 %v2996_v37, %v2990_v46  ;;  %v3008_v42 = vmul.f32 %v3001_v48, %v2990_v46  ;;  %v6183_v9 = vrot.slane %v5892_v39, %v7077_v12  ;;  %v6186_v28 = vmul.f32 %v7078_v19, %v3081_v50 }
 0x248   :  { %v3005_v22 = vmul.f32 %v2997_v53, %v2991_v34  ;;  %v3009_v6 = vmul.f32 %v3001_v48, %v2991_v34  ;;  %v2324_v26 = vadd.s32 127, %v2323_v62  ;;  %v6189_v57 = vmul.f32 %v7079_v52, %v3081_v50 }
 0x249   :  { %v6173_v3 = vsub.f32 %v3002_v10, %v3004_v25  ;;  %v6177_v0 = vadd.f32 %v3010_v56, %v3008_v42  ;;  %v2320_v63 = vshll.u32 %v6055_v49, %v2318_v8  ;;  %v2321_v23 = vshrl.u32 %v2303_v20, %v2319_v33  ;;  %v7082_v56 = vld [vmem:[#allocation32_spill] sm:$0xff] }
 0x24a   :  { %v6175_v54 = vsub.f32 %v3003_v41, %v3005_v22  ;;  %v6179_v45 = vadd.f32 %v3011_v61, %v3009_v6  ;;  %v3115_v7 = vrot.slane %v5896_v21, %v7080_v32  ;;  %v2325_v51 = vshll.u32 %v2324_v26, 23 }
 0x24b   :  { %3014 = vst [vmem:[#allocation2] sm:$0xff] %v6173_v3  ;;  %3016 = vst [vmem:[#allocation2 + $0x20] sm:$0xff] %v6173_v3  ;;  %v6202_v31 = vmul.f32 %v6183_v9, %v6173_v3  ;;  %v6210_v36 = vmul.f32 %v6183_v9, %v6177_v0  ;;  %v6218_v49 = vmul.f32 %v6186_v28, %v6173_v3  ;;  %v3061_v8 = vrot.slane %v6173_v3, 4 }
 0x24c   :  { %3015 = vst [vmem:[#allocation2 + $0x10] sm:$0xff] %v6175_v54  ;;  %3017 = vst [vmem:[#allocation2 + $0x30] sm:$0xff] %v6175_v54  ;;  %v6206_v16 = vmul.f32 %v6183_v9, %v6175_v54  ;;  %v6214_v35 = vmul.f32 %v6183_v9, %v6179_v45  ;;  %v6222_v43 = vmul.f32 %v6189_v57, %v6175_v54  ;;  %v3041_v60 = vrot.slane %v6175_v54, 4 }
 0x24d   :  { %3018 = vst [vmem:[#allocation2 + $0x8] sm:$0xff] %v6177_v0  ;;  %3019 = vst [vmem:[#allocation2 + $0x18] sm:$0xff] %v6179_v45  ;;  %v6226_v58 = vmul.f32 %v6186_v28, %v6177_v0  ;;  %v6230_v13 = vmul.f32 %v6189_v57, %v6179_v45  ;;  %v6236_v48 = vrot.slane %v5892_v39, %v7080_v32  ;;  %v3044_v53 = vrot.slane %v6179_v45, 4 }
 0x24e   :  { %3020 = vst [vmem:[#allocation2 + $0x28] sm:$0xff] %v6177_v0  ;;  %3021 = vst [vmem:[#allocation2 + $0x38] sm:$0xff] %v6179_v45  ;;  %v3149_v18 = vrot.slane %v6036_v24, %v7077_v12  ;;  %v6242_v1 = vrot.slane %v5896_v21, %v7081_v47  ;;  %v6245_v50 = vor.u32 %v2321_v23, %v2320_v63  ;;  %v3064_v46 = vrot.slane %v6177_v0, 4 }
 0x24f   :  { %v6251_v34 = vor.u32 4788187, %v2325_v51  ;;  %v6254_v10 = vmul.f32 %v7078_v19, %v3115_v7  ;;  %v6258_v41 = vrot.slane %v5892_v39, %v7081_v47  ;;  %v6262_v61 = vrot.slane %v5896_v21, %v7082_v56 }
 0x250   :  { %v6266_v20 = vrot.slane %v5892_v39, %v7082_v56  ;;  %v6269_v42 = vmul.f32 %v7079_v52, %v3115_v7  ;;  %v6272_v54 = vmul.f32 %v7078_v19, %v3149_v18  ;;  %v6276_v21 = vrot.slane %v6034_v29, %v7077_v12 }
 0x251   :  { %v6280_v39 = vrot.slane %v6036_v24, %v7080_v32  ;;  %v6283_v23 = vmul.f32 %v7079_v52, %v3149_v18  ;;  %vm2249_vm1 = vcmp.lt.s32.totalorder %v5968_v40, 0 }
 0x252   :  { %v3022_v33 = vld [vmem:[#allocation2] sm:$0xf0]  ;;  %v3026_v22 = vld [vmem:[#allocation2 + $0x20] sm:$0xf] }
 0x253   :  { %v3028_v62 = vld [vmem:[#allocation2 + $0x10] sm:$0xf0]  ;;  %v3032_v0 = vld [vmem:[#allocation2 + $0x30] sm:$0xf]  ;;  %v3040_v26 = vrot.slane %v3022_v33, 4  ;;  %v3046_v51 = vrot.slane %v3026_v22, 4 }
 0x254   :  { %v3023_v25 = vld [vmem:[#allocation2 + $0x8] sm:$0xf0]  ;;  %v3029_v3 = vld [vmem:[#allocation2 + $0x18] sm:$0xf0]  ;;  %v3060_v4 = vrot.slane %v3028_v62, 4  ;;  %v3066_v12 = vrot.slane %v3032_v0, 4 }
 0x255   :  { %v3027_v6 = vld [vmem:[#allocation2 + $0x28] sm:$0xf]  ;;  %v3033_v45 = vld [vmem:[#allocation2 + $0x38] sm:$0xf]  ;;  %v3043_v63 = vrot.slane %v3023_v25, 4  ;;  %v3063_v14 = vrot.slane %v3029_v3, 4  ;;  %v3042_v59 = vsel %vm7083_vm5, %v3040_v26, %v3041_v60  ;;  %v3047_v2 = vsel %vm7085_vm11, %v3041_v60, %v3046_v51 }
 0x256   :  { %v3048_v37 = vrot.slane %v3027_v6, 4  ;;  %v3068_v11 = vrot.slane %v3033_v45, 4  ;;  %v3062_v25 = vsel %vm7087_vm6, %v3060_v4, %v3061_v8  ;;  %v3067_v7 = vsel %vm7089_vm14, %v3061_v8, %v3066_v12 }
 0x257   :  { %v3045_v30 = vsel %vm7084_vm4, %v3043_v63, %v3044_v53  ;;  %v3065_v18 = vsel %vm7088_vm13, %v3063_v14, %v3064_v46  ;;  %v3074_v62 = vsel %vm5114_vm12, %v3042_v59, %v3062_v25  ;;  %v3076_v45 = vsel %vm5121_vm15, %v3047_v2, %v3067_v7 }
 0x258   :  { %v3049_v33 = vsel %vm7086_vm3, %v3044_v53, %v3048_v37  ;;  %v3069_v22 = vsel %vm7090_vm0, %v3064_v46, %v3068_v11  ;;  %v3075_v3 = vsel %vm5114_vm12, %v3045_v30, %v3065_v18  ;;  %v3090_v4 = vmul.f32 %v6186_v28, %v3074_v62 }
 0x259   :  { %v3077_v60 = vsel %vm5121_vm15, %v3049_v33, %v3069_v22  ;;  %v3096_v14 = vmul.f32 %v6186_v28, %v3075_v3  ;;  %v3091_v12 = vmul.f32 %v6189_v57, %v3076_v45  ;;  %v3100_v37 = vmul.f32 %v6183_v9, %v3074_v62 }
 0x25a   :  { %v3097_v11 = vmul.f32 %v6189_v57, %v3077_v60  ;;  %v3101_v59 = vmul.f32 %v6183_v9, %v3076_v45  ;;  %v3092_v30 = vadd.f32 %v3090_v4, %v6202_v31  ;;  %v3106_v2 = vmul.f32 %v6183_v9, %v3075_v3 }
 0x25b   :  { %v3098_v53 = vadd.f32 %v3096_v14, %v6210_v36  ;;  %v3107_v8 = vmul.f32 %v6183_v9, %v3077_v60  ;;  %v3093_v46 = vadd.f32 %v3091_v12, %v6206_v16  ;;  %v3104_v26 = vsub.f32 %v3100_v37, %v6218_v49 }
 0x25c   :  { %v3099_v28 = vadd.f32 %v3097_v11, %v6214_v35  ;;  %v3105_v57 = vsub.f32 %v3101_v59, %v6222_v43  ;;  %v3110_v63 = vsub.f32 %v3106_v2, %v6226_v58  ;;  %v3122_v31 = vmul.f32 %v6236_v48, %v3092_v30 }
 0x25d   :  { %v3111_v7 = vsub.f32 %v3107_v8, %v6230_v13  ;;  %v3124_v36 = vmul.f32 %v6254_v10, %v3098_v53  ;;  %v3123_v51 = vmul.f32 %v6236_v48, %v3093_v46  ;;  %v3128_v16 = vmul.f32 %v6236_v48, %v3098_v53 }
 0x25e   :  { %v3125_v9 = vmul.f32 %v6269_v42, %v3099_v28  ;;  %v3129_v35 = vmul.f32 %v6236_v48, %v3099_v28  ;;  %v3130_v49 = vmul.f32 %v6254_v10, %v3092_v30  ;;  %v3131_v43 = vmul.f32 %v6269_v42, %v3093_v46 }
 0x25f   :  { %v3126_v33 = vsub.f32 %v3122_v31, %v3124_v36  ;;  %v3134_v58 = vmul.f32 %v6236_v48, %v3104_v26  ;;  %v3135_v25 = vmul.f32 %v6236_v48, %v3105_v57  ;;  %v3136_v18 = vmul.f32 %v6254_v10, %v3110_v63 }
 0x260   :  { %v3127_v13 = vsub.f32 %v3123_v51, %v3125_v9  ;;  %v3137_v22 = vmul.f32 %v6269_v42, %v3111_v7  ;;  %v3132_v62 = vadd.f32 %v3130_v49, %v3128_v16  ;;  %v3133_v3 = vadd.f32 %v3131_v43, %v3129_v35 }
 0x261   :  { %v3140_v45 = vmul.f32 %v6236_v48, %v3110_v63  ;;  %v3141_v60 = vmul.f32 %v6236_v48, %v3111_v7  ;;  %v3138_v4 = vadd.f32 %v3136_v18, %v3134_v58  ;;  %v3142_v12 = vmul.f32 %v6254_v10, %v3104_v26 }
 0x262   :  { %v3139_v14 = vadd.f32 %v3137_v22, %v3135_v25  ;;  %v3143_v11 = vmul.f32 %v6269_v42, %v3105_v57  ;;  %v3156_v37 = vmul.f32 %v6276_v21, %v3126_v33  ;;  %v3157_v59 = vmul.f32 %v6276_v21, %v3127_v13 }
 0x263   :  { %v3162_v30 = vmul.f32 %v6276_v21, %v3132_v62  ;;  %v3163_v53 = vmul.f32 %v6276_v21, %v3133_v3  ;;  %v3144_v2 = vsub.f32 %v3140_v45, %v3142_v12  ;;  %v3158_v46 = vmul.f32 %v6272_v54, %v3138_v4 }
 0x264   :  { %v3145_v8 = vsub.f32 %v3141_v60, %v3143_v11  ;;  %v3159_v48 = vmul.f32 %v6283_v23, %v3139_v14  ;;  %v3177_v28 = vrot.slane %v6034_v29, %v7080_v32  ;;  %v7093_v10 = vand.u32 2147483647, %v5968_v40 }
 0x265   :  { %v2327_v26 = vand.u32 2147483647, %v6251_v34  ;;  %v3160_v21 = vadd.f32 %v3158_v46, %v3156_v37  ;;  %v3164_v63 = vmul.f32 %v6272_v54, %v3144_v2  ;;  %v3172_v31 = vmul.f32 %v7078_v19, %v6280_v39 }
 0x266   :  { %vm6344_vm10 = vcmp.le.f32.partialorder %v7093_v10, 0.7853982  ;;  %v3161_v57 = vadd.f32 %v3159_v48, %v3157_v59  ;;  %v3165_v7 = vmul.f32 %v6283_v23, %v3145_v8  ;;  %v3173_v36 = vmul.f32 %v7079_v52, %v6280_v39 }
 0x267   :  { %v7096_v51 = vcvt.s32.f32 %v6245_v50  ;;  %v7097_v16 = vsub.s32 4, %v6031_v27  ;;  %v3166_v35 = vadd.f32 %v3164_v63, %v3162_v30  ;;  %v3178_v54 = vmul.f32 %v3177_v28, %v3160_v21 }
 0x268   :  { %v3167_v33 = vadd.f32 %v3165_v7, %v3163_v53  ;;  %v3179_v49 = vmul.f32 %v3177_v28, %v3161_v57  ;;  %v3186_v23 = vmul.f32 %v3172_v31, %v3160_v21  ;;  %v3187_v43 = vmul.f32 %v3173_v36, %v3161_v57 }
 0x269   :  { %v2330_v9 = vmul.f32 %v7096_v51, %v2327_v26  ;;  %v2334_v34 = vsel %vm2249_vm1, %v7097_v16, %v6031_v27  ;;  %v6365_v58 = vrot.slane %v6036_v24, %v7081_v47  ;;  %v3180_v13 = vmul.f32 %v3172_v31, %v3166_v35 }
 0x26a   :  { %v3181_v50 = vmul.f32 %v3173_v36, %v3167_v33  ;;  %v3184_v25 = vmul.f32 %v3177_v28, %v3166_v35  ;;  %v3185_v18 = vmul.f32 %v3177_v28, %v3167_v33  ;;  %v3206_v22 = vmul.f32 -1.0, %v6242_v1 }
 0x26b   :  { %v2331_v39 = vxor.u32 2147483648, %v2330_v9  ;;  %v3240_v62 = vmul.f32 -1.0, %v6262_v61  ;;  %v6373_v3 = vsel %vm6344_vm10, 0, %v2334_v34  ;;  %v3182_v45 = vsub.f32 %v3178_v54, %v3180_v13 }
 0x26c   :  { %v3183_v60 = vsub.f32 %v3179_v49, %v3181_v50  ;;  %v3188_v4 = vadd.f32 %v3186_v23, %v3184_v25  ;;  %v3189_v14 = vadd.f32 %v3187_v43, %v3185_v18  ;;  %v3274_v12 = vmul.f32 -1.0, %v6365_v58 }
 0x26d   :  { %v2332_v27 = vsel %vm2249_vm1, %v2331_v39, %v2330_v9  ;;  %v3279_v11 = vrot.slane %v6034_v29, %v7081_v47  ;;  %v6380_v37 = vrot.slane %v6036_v24, %v7082_v56  ;;  %v3212_v30 = vmul.f32 %v6258_v41, %v3182_v45 }
 0x26e   :  { %v2335_v59 = vsel %vm6344_vm10, %v5968_v40, %v2332_v27  ;;  %v3213_v53 = vmul.f32 %v6258_v41, %v3183_v60  ;;  %v3214_v2 = vmul.f32 %v3206_v22, %v3183_v60  ;;  %v3215_v8 = vmul.f32 %v6242_v1, %v3182_v45 }
 0x26f   :  { %v3218_v46 = vmul.f32 %v6258_v41, %v3188_v4  ;;  %v3219_v48 = vmul.f32 %v6258_v41, %v3189_v14  ;;  %v3220_v28 = vmul.f32 %v3206_v22, %v3189_v14  ;;  %v3221_v10 = vmul.f32 %v6242_v1, %v3188_v4 }
 0x270   :  { %v3216_v24 = vadd.f32 %v3214_v2, %v3212_v30  ;;  %v3217_v26 = vadd.f32 %v3215_v8, %v3213_v53  ;;  %v3226_v21 = vmul.f32 %v3206_v22, %v3182_v45  ;;  %v3227_v42 = vmul.f32 %v6242_v1, %v3183_v60 }
 0x271   :  { %v3222_v57 = vadd.f32 %v3220_v28, %v3218_v46  ;;  %v3223_v63 = vadd.f32 %v3221_v10, %v3219_v48  ;;  %v3232_v7 = vmul.f32 %v3206_v22, %v3188_v4  ;;  %v3233_v31 = vmul.f32 %v6242_v1, %v3189_v14 }
 0x272   :  { %v3228_v36 = vsub.f32 %v3213_v53, %v3226_v21  ;;  %v3229_v51 = vsub.f32 %v3212_v30, %v3227_v42  ;;  %v3246_v9 = vmul.f32 %v6266_v20, %v3216_v24  ;;  %v3247_v16 = vmul.f32 %v6266_v20, %v3217_v26 }
 0x273   :  { %v3234_v41 = vsub.f32 %v3219_v48, %v3232_v7  ;;  %v3235_v34 = vsub.f32 %v3218_v46, %v3233_v31  ;;  %v3248_v35 = vmul.f32 %v3240_v62, %v3222_v57  ;;  %v3249_v33 = vmul.f32 %v6262_v61, %v3223_v63 }
 0x274   :  { %v3252_v54 = vmul.f32 %v6266_v20, %v3222_v57  ;;  %v3253_v49 = vmul.f32 %v6266_v20, %v3223_v63  ;;  %v3254_v23 = vmul.f32 %v3240_v62, %v3216_v24  ;;  %v3255_v43 = vmul.f32 %v6262_v61, %v3217_v26 }
 0x275   :  { %v3250_v39 = vsub.f32 %v3246_v9, %v3248_v35  ;;  %v3251_v1 = vsub.f32 %v3247_v16, %v3249_v33  ;;  %v3258_v13 = vmul.f32 %v6266_v20, %v3228_v36  ;;  %v3259_v50 = vmul.f32 %v6266_v20, %v3229_v51 }
 0x276   :  { %v3256_v25 = vadd.f32 %v3254_v23, %v3252_v54  ;;  %v3257_v18 = vadd.f32 %v3255_v43, %v3253_v49  ;;  %v3260_v22 = vmul.f32 %v3240_v62, %v3234_v41  ;;  %v3261_v27 = vmul.f32 %v6262_v61, %v3235_v34 }
 0x277   :  { %v3264_v45 = vmul.f32 %v6266_v20, %v3234_v41  ;;  %v3265_v60 = vmul.f32 %v6266_v20, %v3235_v34  ;;  %v3266_v4 = vmul.f32 %v3240_v62, %v3228_v36  ;;  %v3267_v14 = vmul.f32 %v6262_v61, %v3229_v51 }
 0x278   :  { %v3262_v30 = vadd.f32 %v3260_v22, %v3258_v13  ;;  %v3263_v53 = vadd.f32 %v3261_v27, %v3259_v50  ;;  %v3280_v2 = vmul.f32 %v3279_v11, %v3250_v39  ;;  %v3281_v8 = vmul.f32 %v3279_v11, %v3251_v1 }
 0x279   :  { %v3268_v46 = vsub.f32 %v3264_v45, %v3266_v4  ;;  %v3269_v48 = vsub.f32 %v3265_v60, %v3267_v14  ;;  %v3286_v28 = vmul.f32 %v3279_v11, %v3256_v25  ;;  %v3287_v10 = vmul.f32 %v3279_v11, %v3257_v18 }
 0x27a   :  { %v3282_v24 = vmul.f32 %v3274_v12, %v3262_v30  ;;  %v3283_v26 = vmul.f32 %v6365_v58, %v3263_v53  ;;  %4216 = vcosq.f32 %v2335_v59  ;;  %v2651_v20 = vadd.s32 3, %v6373_v3 }
 0x27b   :  { %v3288_v21 = vmul.f32 %v3274_v12, %v3268_v46  ;;  %v3289_v42 = vmul.f32 %v6365_v58, %v3269_v48  ;;  %4218 = vsinq.f32 %v2335_v59  ;;  %v3296_v57 = vmul.f32 -1.0, %v6380_v37 }
 0x27c   :  { %v3284_v62 = vadd.f32 %v3282_v24, %v3280_v2  ;;  %v3285_v61 = vadd.f32 %v3283_v26, %v3281_v8  ;;  %v3301_v63 = vrot.slane %v6034_v29, %v7082_v56  ;;  %v2340_v41 = vand.u32 3, %v6373_v3 }
 0x27d   :  { %v3290_v7 = vadd.f32 %v3288_v21, %v3286_v28  ;;  %v3291_v31 = vadd.f32 %v3289_v42, %v3287_v10  ;;  %v2652_v34 = vand.u32 3, %v2651_v20  ;;  %vm2339_vm14 = vweird.f32 %v5968_v40 }
 0x27e   :  { %v3302_v11 = vmul.f32 %v3301_v63, %v3284_v62  ;;  %v3303_v36 = vmul.f32 %v3301_v63, %v3285_v61  ;;  %v3310_v51 = vmul.f32 %v3296_v57, %v3284_v62  ;;  %v3311_v9 = vmul.f32 %v6380_v37, %v3285_v61 }
 0x27f   :  { %v3304_v12 = vmul.f32 %v3296_v57, %v3290_v7  ;;  %v3305_v58 = vmul.f32 %v6380_v37, %v3291_v31  ;;  %v3308_v59 = vmul.f32 %v3301_v63, %v3290_v7  ;;  %v3309_v16 = vmul.f32 %v3301_v63, %v3291_v31 }
 0x280   :  { %vm2345_vm5 = vcmp.eq.s32.totalorder %v2340_v41, 2  ;;  %vm2657_vm4 = vcmp.eq.s32.totalorder %v2652_v34, 2  ;;  %vm2342_vm11 = vcmp.eq.s32.totalorder %v2340_v41, 0  ;;  %vm2654_vm3 = vcmp.eq.s32.totalorder %v2652_v34, 0 }
 0x281   :  { %v6414_v35 = vsub.f32 %v3302_v11, %v3304_v12  ;;  %v6416_v33 = vsub.f32 %v3303_v36, %v3305_v58  ;;  %v6418_v29 = vadd.f32 %v3310_v51, %v3308_v59  ;;  %v6420_v54 = vadd.f32 %v3311_v9, %v3309_v16 }
 0x282   :  { %vm2341_vm6 = vcmp.lt.s32.totalorder %v2340_v41, 2  ;;  %vm2653_vm13 = vcmp.lt.s32.totalorder %v2652_v34, 2  ;;  %vm7098_vm0 = vcmask 1045504  }
 0x283   :  { %3317 = vst [vmem:[#allocation2 + $0x30] sm:$0xff] %v6416_v33  ;;  %3321 = vst [vmem:[#allocation2 + $0x38] sm:$0xff] %v6420_v54  ;;  %v3341_v50 = vrot.slane %v6416_v33, 2  ;;  %v3344_v25 = vrot.slane %v6420_v54, 2  ;;  %v3361_v27 = vrot.slane %v6414_v35, 6  ;;  %v3364_v45 = vrot.slane %v6418_v29, 6 }
 0x284   :  { %3314 = vst [vmem:[#allocation2] sm:$0xff] %v6414_v35  ;;  %3315 = vst [vmem:[#allocation2 + $0x10] sm:$0xff] %v6416_v33  ;;  %v4217_v3 = vpop.eup %4216 }
 0x285   :  { %3316 = vst [vmem:[#allocation2 + $0x20] sm:$0xff] %v6414_v35  ;;  %3318 = vst [vmem:[#allocation2 + $0x8] sm:$0xff] %v6418_v29  ;;  %v4219_v37 = vpop.eup %4218  ;;  %v2346_v49 = vxor.u32 2147483648, %v4217_v3 }
 0x286   :  { %3319 = vst [vmem:[#allocation2 + $0x18] sm:$0xff] %v6420_v54  ;;  %3320 = vst [vmem:[#allocation2 + $0x28] sm:$0xff] %v6418_v29  ;;  %v2343_v23 = vxor.u32 2147483648, %v4219_v37 }
 0x287   :  { %v2347_v43 = vsel %vm2345_vm5, %v2346_v49, %v4219_v37  ;;  %v2659_v39 = vsel %vm2657_vm4, %v2346_v49, %v4219_v37  ;;  %vm7099_vm10 = vmmov %vm7098_vm0  ;;  %vm7102_vm4 = vcmask 1041408  }
 0x288   :  { %v2344_v1 = vsel %vm2342_vm11, %v4217_v3, %v2343_v23  ;;  %v2656_v13 = vsel %vm2654_vm3, %v4217_v3, %v2343_v23  ;;  %vm7100_vm1 = vmmov %vm7098_vm0 }
 0x289   :  { %v2348_v18 = vsel %vm2341_vm6, %v2344_v1, %v2347_v43  ;;  %v2660_v22 = vsel %vm2653_vm13, %v2656_v13, %v2659_v39  ;;  %vm7101_vm5 = vmmov %vm7098_vm0  ;;  %vm7112_vm13 = vcmask 1043456  }
 0x28a   :  { %v6435_v60 = vsel %vm2339_vm14, nan, %v2348_v18  ;;  %v6437_v4 = vsel %vm2339_vm14, nan, %v2660_v22  ;;  %v3332_v46 = vld [vmem:[#allocation2 + $0x30] sm:$0x3f]  ;;  %v3333_v48 = vld [vmem:[#allocation2 + $0x38] sm:$0x3f]  ;;  %vm7103_vm11 = vmmov %vm7102_vm4 }
 0x28b   :  { %v3322_v14 = vld [vmem:[#allocation2] sm:$0xfc]  ;;  %v3328_v2 = vld [vmem:[#allocation2 + $0x10] sm:$0xc0]  ;;  %v3381_v28 = vrot.slane %v6435_v60, %v7050_v44  ;;  %v3387_v10 = vrot.slane %v6437_v4, %v7050_v44  ;;  %v3366_v61 = vrot.slane %v3332_v46, 6  ;;  %v3368_v57 = vrot.slane %v3333_v48, 6  ;;  %vm7104_vm3 = vmmov %vm7102_vm4 }
 0x28c   :  { %v3323_v40 = vld [vmem:[#allocation2 + $0x8] sm:$0xfc]  ;;  %v3326_v30 = vld [vmem:[#allocation2 + $0x20] sm:$0x3]  ;;  %v3340_v24 = vrot.slane %v3322_v14, 2  ;;  %v3360_v20 = vrot.slane %v3328_v2, 6  ;;  %vm7105_vm6 = vmmov %vm7104_vm3  ;;  %v3424_v2 = vrot.slane %v6437_v4, %v7059_v17 }
 0x28d   :  { %v3327_v53 = vld [vmem:[#allocation2 + $0x28] sm:$0x3]  ;;  %v3329_v8 = vld [vmem:[#allocation2 + $0x18] sm:$0xc0]  ;;  %v3343_v26 = vrot.slane %v3323_v40, 2  ;;  %v3346_v21 = vrot.slane %v3326_v30, 2  ;;  %v3367_v51 = vsel %vm7104_vm3, %v3361_v27, %v3366_v61  ;;  %v3369_v9 = vsel %vm7105_vm6, %v3364_v45, %v3368_v57  ;;  %vm7113_vm14 = vmmov %vm7112_vm13 }
 0x28e   :  { %v3348_v42 = vrot.slane %v3327_v53, 2  ;;  %v3363_v62 = vrot.slane %v3329_v8, 6  ;;  %v3342_v63 = vsel %vm7098_vm0, %v3340_v24, %v3341_v50  ;;  %v3362_v36 = vsel %vm7102_vm4, %v3360_v20, %v3361_v27  ;;  %v7106_v14 = vld [vmem:[#allocation14_spill] sm:$0xff]  ;;  %v7107_v30 = vld [vmem:[#allocation17_spill] sm:$0xff]  ;;  %vm7114_vm0 = vmmov %vm7112_vm13 }
 0x28f   :  { %v3345_v7 = vsel %vm7099_vm10, %v3343_v26, %v3344_v25  ;;  %v3347_v31 = vsel %vm7100_vm1, %v3341_v50, %v3346_v21  ;;  %v3374_v12 = vsel %vm4896_vm8, %v3342_v63, %v3362_v36  ;;  %v3382_v41 = vmul.f32 %v3381_v28, %v6414_v35  ;;  %v7109_v61 = vld [vmem:[#allocation38_spill] sm:$0xff]  ;;  %vm7115_vm10 = vmmov %vm7114_vm0 }
 0x290   :  { %v3349_v11 = vsel %vm7101_vm5, %v3344_v25, %v3348_v42  ;;  %v3365_v44 = vsel %vm7103_vm11, %v3363_v62, %v3364_v45  ;;  %v3376_v59 = vsel %vm4903_vm9, %v3347_v31, %v3367_v51  ;;  %v3388_v34 = vmul.f32 %v7065_v15, %v3387_v10  ;;  %v7108_v62 = vld [vmem:[#allocation37_spill] sm:$0xff]  ;;  %vm7116_vm1 = vmmov %vm7114_vm0 }
 0x291   :  { %v3375_v58 = vsel %vm4896_vm8, %v3345_v7, %v3365_v44  ;;  %v3377_v16 = vsel %vm4903_vm9, %v3349_v11, %v3369_v9  ;;  %v3389_v3 = vmul.f32 %v7066_v38, %v3387_v10  ;;  %v3383_v37 = vmul.f32 %v3381_v28, %v6416_v33  ;;  %vm7117_vm5 = vmmov %vm7114_vm0 }
 0x292   :  { %v3394_v49 = vmul.f32 %v3381_v28, %v6418_v29  ;;  %v3395_v23 = vmul.f32 %v3381_v28, %v6420_v54  ;;  %v6466_v43 = vadd.f32 -1.0, %v6435_v60  ;;  %v3390_v39 = vmul.f32 %v3388_v34, %v3374_v12  ;;  %vm7118_vm4 = vmmov %vm7114_vm0 }
 0x293   :  { %v3391_v1 = vmul.f32 %v3389_v3, %v3376_v59  ;;  %v3396_v13 = vmul.f32 %v3388_v34, %v3375_v58  ;;  %v3397_v50 = vmul.f32 %v3389_v3, %v3377_v16  ;;  %v3426_v57 = vmul.f32 %v3424_v2, %v7109_v61  ;;  %vm7119_vm11 = vmmov %vm7114_vm0 }
 0x294   :  { %v3416_v25 = vrot.slane %v6466_v43, %v7059_v17  ;;  %v3392_v18 = vadd.f32 %v3390_v39, %v3382_v41  ;;  %v3425_v17 = vmul.f32 %v3424_v2, %v7108_v62  ;;  %vm7130_vm3 = vcmask 1046528  }
 0x295   :  { %v3393_v22 = vadd.f32 %v3391_v1, %v3383_v37  ;;  %v3398_v27 = vadd.f32 %v3396_v13, %v3394_v49  ;;  %v3399_v45 = vadd.f32 %v3397_v50, %v3395_v23  ;;  %vm7131_vm6 = vmmov %vm7130_vm3 }
 0x296   :  { %v3417_v40 = vmul.f32 %v7106_v14, %v3416_v25  ;;  %v3418_v53 = vmul.f32 %v7107_v30, %v3416_v25  ;;  %v3400_v8 = vsub.f32 %v3392_v18, %v6414_v35 }
 0x297   :  { %v3401_v46 = vsub.f32 %v3393_v22, %v6416_v33  ;;  %v3406_v48 = vsub.f32 %v3398_v27, %v6418_v29  ;;  %v3407_v28 = vsub.f32 %v3399_v45, %v6420_v54 }
 0x298   :  { %v3402_v10 = vmul.f32 %v7106_v14, %v3400_v8  ;;  %v3419_v42 = vadd.f32 1.0, %v3417_v40  ;;  %v3420_v20 = vadd.f32 1.0, %v3418_v53 }
 0x299   :  { %v3403_v24 = vmul.f32 %v7107_v30, %v3401_v46  ;;  %v3408_v26 = vmul.f32 %v7106_v14, %v3406_v48  ;;  %v3409_v21 = vmul.f32 %v7107_v30, %v3407_v28  ;;  %v7111_v14 = vld [vmem:[#allocation29_spill] sm:$0xff] }
 0x29a   :  { %v3404_v63 = vadd.f32 %v3402_v10, %v6414_v35  ;;  %v3540_v40 = vrot.slane %v6466_v43, %v7111_v14 }
 0x29b   :  { %v3405_v7 = vadd.f32 %v3403_v24, %v6416_v33  ;;  %v3410_v31 = vadd.f32 %v3408_v26, %v6418_v29  ;;  %v3411_v11 = vadd.f32 %v3409_v21, %v6420_v54  ;;  %v7110_v33 = vld [vmem:[#allocation7_spill] sm:$0xff] }
 0x29c   :  { %v3427_v36 = vmul.f32 %v3419_v42, %v3404_v63  ;;  %v3435_v59 = vmul.f32 %v3425_v17, %v3404_v63  ;;  %v3512_v29 = vrot.slane %v6437_v4, %v7110_v33  ;;  %v3506_v50 = vrot.slane %v6435_v60, %v7110_v33 }
 0x29d   :  { %v3428_v44 = vmul.f32 %v3420_v20, %v3405_v7  ;;  %v3429_v51 = vmul.f32 %v3425_v17, %v3410_v31  ;;  %v3430_v9 = vmul.f32 %v3426_v57, %v3411_v11  ;;  %v3433_v12 = vmul.f32 %v3419_v42, %v3410_v31 }
 0x29e   :  { %v3434_v58 = vmul.f32 %v3420_v20, %v3411_v11  ;;  %v3436_v16 = vmul.f32 %v3426_v57, %v3405_v7  ;;  %v3513_v27 = vmul.f32 %v7078_v19, %v3512_v29  ;;  %v3514_v45 = vmul.f32 %v7079_v52, %v3512_v29 }
 0x29f   :  { %v6488_v41 = vsub.f32 %v3427_v36, %v3429_v51  ;;  %v6490_v34 = vsub.f32 %v3428_v44, %v3430_v9  ;;  %v6492_v3 = vadd.f32 %v3435_v59, %v3433_v12 }
 0x2a0   :  { %v6494_v35 = vadd.f32 %v3436_v16, %v3434_v58 }
 0x2a1   :  { %3439 = vst [vmem:[#allocation2] sm:$0xff] %v6488_v41  ;;  %3440 = vst [vmem:[#allocation2 + $0x10] sm:$0xff] %v6490_v34  ;;  %v3466_v54 = vrot.slane %v6490_v34, 4  ;;  %v3486_v49 = vrot.slane %v6488_v41, 4  ;;  %v3489_v23 = vrot.slane %v6492_v3, 4  ;;  %v3507_v46 = vmul.f32 %v3506_v50, %v6488_v41 }
 0x2a2   :  { %3441 = vst [vmem:[#allocation2 + $0x20] sm:$0xff] %v6488_v41  ;;  %3442 = vst [vmem:[#allocation2 + $0x30] sm:$0xff] %v6490_v34  ;;  %v3469_v37 = vrot.slane %v6494_v35, 4  ;;  %v3519_v48 = vmul.f32 %v3506_v50, %v6492_v3  ;;  %v3508_v58 = vmul.f32 %v3506_v50, %v6490_v34  ;;  %v3520_v16 = vmul.f32 %v3506_v50, %v6494_v35 }
 0x2a3   :  { %3443 = vst [vmem:[#allocation2 + $0x8] sm:$0xff] %v6492_v3  ;;  %3444 = vst [vmem:[#allocation2 + $0x18] sm:$0xff] %v6494_v35 }
 0x2a4   :  { %3445 = vst [vmem:[#allocation2 + $0x28] sm:$0xff] %v6492_v3  ;;  %3446 = vst [vmem:[#allocation2 + $0x38] sm:$0xff] %v6494_v35 }
 0x2a8   :  { %v3447_v39 = vld [vmem:[#allocation2] sm:$0xf0]  ;;  %v3453_v13 = vld [vmem:[#allocation2 + $0x10] sm:$0xf0] }
 0x2a9   :  { %v3451_v1 = vld [vmem:[#allocation2 + $0x20] sm:$0xf]  ;;  %v3457_v30 = vld [vmem:[#allocation2 + $0x30] sm:$0xf]  ;;  %v3465_v2 = vrot.slane %v3447_v39, 4  ;;  %v3485_v24 = vrot.slane %v3453_v13, 4 }
 0x2aa   :  { %v3448_v25 = vld [vmem:[#allocation2 + $0x8] sm:$0xf0]  ;;  %v3454_v22 = vld [vmem:[#allocation2 + $0x18] sm:$0xf0]  ;;  %v3471_v28 = vrot.slane %v3451_v1, 4  ;;  %v3491_v20 = vrot.slane %v3457_v30, 4 }
 0x2ab   :  { %v3452_v18 = vld [vmem:[#allocation2 + $0x28] sm:$0xf]  ;;  %v3458_v53 = vld [vmem:[#allocation2 + $0x38] sm:$0xf]  ;;  %v3468_v8 = vrot.slane %v3448_v25, 4  ;;  %v3488_v26 = vrot.slane %v3454_v22, 4  ;;  %v3467_v21 = vsel %vm7112_vm13, %v3465_v2, %v3466_v54  ;;  %v3487_v57 = vsel %vm7116_vm1, %v3485_v24, %v3486_v49  ;;  %vm7132_vm13 = vmmov %vm7130_vm3 }
 0x2ac   :  { %v3473_v10 = vrot.slane %v3452_v18, 4  ;;  %v3493_v62 = vrot.slane %v3458_v53, 4  ;;  %v3472_v17 = vsel %vm7114_vm0, %v3466_v54, %v3471_v28  ;;  %v3492_v7 = vsel %vm7118_vm4, %v3486_v49, %v3491_v20  ;;  %v7120_v1 = vld [vmem:[#allocation15_spill] sm:$0xff]  ;;  %vm7141_vm4 = vmmov %vm7130_vm3 }
 0x2ad   :  { %v3470_v42 = vsel %vm7113_vm14, %v3468_v8, %v3469_v37  ;;  %v3490_v63 = vsel %vm7117_vm5, %v3488_v26, %v3489_v23  ;;  %v3499_v11 = vsel %vm5114_vm12, %v3467_v21, %v3487_v57  ;;  %v3501_v44 = vsel %vm5121_vm15, %v3472_v17, %v3492_v7  ;;  %v7122_v8 = vld [vmem:[#allocation9_spill] sm:$0xff]  ;;  %vm7133_vm14 = vmmov %vm7130_vm3 }
 0x2ae   :  { %v3474_v61 = vsel %vm7115_vm10, %v3469_v37, %v3473_v10  ;;  %v3494_v31 = vsel %vm7119_vm11, %v3489_v23, %v3493_v62  ;;  %v3500_v36 = vsel %vm5114_vm12, %v3470_v42, %v3490_v63  ;;  %v3515_v9 = vmul.f32 %v3513_v27, %v3499_v11  ;;  %v7123_v10 = vld [vmem:[#allocation41_spill] sm:$0xff]  ;;  %v7124_v42 = vld [vmem:[#allocation42_spill] sm:$0xff]  ;;  %vm7142_vm11 = vmmov %vm7130_vm3 }
 0x2af   :  { %v3502_v51 = vsel %vm5121_vm15, %v3474_v61, %v3494_v31  ;;  %v3521_v12 = vmul.f32 %v3513_v27, %v3500_v36  ;;  %v3516_v59 = vmul.f32 %v3514_v45, %v3501_v44  ;;  %v3541_v13 = vmul.f32 %v7120_v1, %v3540_v40  ;;  %v7121_v27 = vld [vmem:[#allocation18_spill] sm:$0xff] }
 0x2b0   :  { %v3522_v33 = vmul.f32 %v3514_v45, %v3502_v51  ;;  %v3517_v29 = vadd.f32 %v3515_v9, %v3507_v46  ;;  %v3548_v25 = vrot.slane %v6437_v4, %v7111_v14  ;;  %v3542_v50 = vmul.f32 %v7121_v27, %v3540_v40 }
 0x2b1   :  { %v3523_v54 = vadd.f32 %v3521_v12, %v3519_v48  ;;  %v3518_v37 = vadd.f32 %v3516_v59, %v3508_v58  ;;  %v3584_v46 = vrot.slane %v6437_v4, %v7122_v8  ;;  %v3543_v28 = vadd.f32 1.0, %v3541_v13 }
 0x2b2   :  { %v3524_v49 = vadd.f32 %v3522_v33, %v3520_v16  ;;  %v3525_v23 = vsub.f32 %v3517_v29, %v6488_v41  ;;  %v3549_v24 = vmul.f32 %v3548_v25, %v7123_v10  ;;  %v3544_v21 = vadd.f32 1.0, %v3542_v50 }
 0x2b3   :  { %v3531_v39 = vsub.f32 %v3523_v54, %v6492_v3  ;;  %v3526_v18 = vsub.f32 %v3518_v37, %v6490_v34  ;;  %v3550_v20 = vmul.f32 %v3548_v25, %v7124_v42  ;;  %v3578_v36 = vrot.slane %v6435_v60, %v7122_v8  ;;  %v7126_v25 = vld [vmem:[#allocation24_spill] sm:$0xff] }
 0x2b4   :  { %v3532_v22 = vsub.f32 %v3524_v49, %v6494_v35  ;;  %v3527_v45 = vmul.f32 %v7120_v1, %v3525_v23  ;;  %v3585_v51 = vmul.f32 -1.0, %v3584_v46  ;;  %vm7134_vm0 = vcmask 1040384  }
 0x2b5   :  { %v3533_v30 = vmul.f32 %v7120_v1, %v3531_v39  ;;  %v3528_v53 = vmul.f32 %v7121_v27, %v3526_v18  ;;  %v7125_v1 = vld [vmem:[#allocation21_spill] sm:$0xff]  ;;  %vm7135_vm10 = vmmov %vm7134_vm0 }
 0x2b6   :  { %v3534_v2 = vmul.f32 %v7121_v27, %v3532_v22  ;;  %v3529_v48 = vadd.f32 %v3527_v45, %v6488_v41  ;;  %v3620_v22 = vrot.slane %v6437_v4, %v7080_v32  ;;  %vm7136_vm1 = vmmov %vm7134_vm0 }
 0x2b7   :  { %v3535_v14 = vadd.f32 %v3533_v30, %v6492_v3  ;;  %v3530_v40 = vadd.f32 %v3528_v53, %v6490_v34  ;;  %vm7137_vm5 = vmmov %vm7134_vm0 }
 0x2b8   :  { %v3536_v26 = vadd.f32 %v3534_v2, %v6494_v35  ;;  %v3551_v62 = vmul.f32 %v3543_v28, %v3529_v48  ;;  %v3559_v57 = vmul.f32 %v3549_v24, %v3529_v48  ;;  %v3612_v35 = vrot.slane %v6466_v43, %v7080_v32 }
 0x2b9   :  { %v3553_v17 = vmul.f32 %v3549_v24, %v3535_v14  ;;  %v3557_v61 = vmul.f32 %v3543_v28, %v3535_v14  ;;  %v3552_v63 = vmul.f32 %v3544_v21, %v3530_v40  ;;  %v3560_v41 = vmul.f32 %v3550_v20, %v3530_v40  ;;  %v7127_v28 = vld [vmem:[#allocation39_spill] sm:$0xff] }
 0x2ba   :  { %v3554_v7 = vmul.f32 %v3550_v20, %v3536_v26  ;;  %v3558_v31 = vmul.f32 %v3544_v21, %v3536_v26  ;;  %v3613_v13 = vmul.f32 %v7125_v1, %v3612_v35  ;;  %v3614_v18 = vmul.f32 %v7126_v25, %v3612_v35 }
 0x2bb   :  { %v3555_v11 = vsub.f32 %v3551_v62, %v3553_v17  ;;  %v3561_v3 = vadd.f32 %v3559_v57, %v3557_v61  ;;  %v3621_v10 = vmul.f32 %v3620_v22, %v7127_v28  ;;  %v3622_v24 = vmul.f32 %v7126_v25, %v3620_v22 }
 0x2bc   :  { %v3556_v44 = vsub.f32 %v3552_v63, %v3554_v7  ;;  %v3562_v34 = vadd.f32 %v3560_v41, %v3558_v31  ;;  %v3615_v48 = vadd.f32 1.0, %v3613_v13  ;;  %v3616_v14 = vadd.f32 1.0, %v3614_v18  ;;  %v7129_v18 = vld [vmem:[#allocation22_spill] sm:$0xff] }
 0x2bd   :  { %v3579_v9 = vmul.f32 %v3578_v36, %v3555_v11  ;;  %v3588_v12 = vmul.f32 %v3584_v46, %v3555_v11  ;;  %v3591_v58 = vmul.f32 %v3578_v36, %v3561_v3  ;;  %v3594_v59 = vmul.f32 %v3584_v46, %v3561_v3 }
 0x2be   :  { %v3580_v16 = vmul.f32 %v3578_v36, %v3556_v44  ;;  %v3587_v33 = vmul.f32 %v3585_v51, %v3556_v44  ;;  %v3592_v29 = vmul.f32 %v3578_v36, %v3562_v34  ;;  %v3593_v54 = vmul.f32 %v3585_v51, %v3562_v34 }
 0x2bf   :  { %v3702_v36 = vrot.slane %v6435_v60, %v7081_v47  ;;  %v3708_v35 = vrot.slane %v6437_v4, %v7081_v47 }
 0x2c0   :  { %v3589_v37 = vadd.f32 %v3587_v33, %v3579_v9  ;;  %v3590_v49 = vadd.f32 %v3588_v12, %v3580_v16  ;;  %v3595_v23 = vadd.f32 %v3593_v54, %v3591_v58  ;;  %v3596_v39 = vadd.f32 %v3594_v59, %v3592_v29 }
 0x2c1   :  { %v3710_v22 = vmul.f32 %v7129_v18, %v3708_v35 }
 0x2c2   :  { %v3597_v27 = vsub.f32 %v3589_v37, %v3555_v11  ;;  %v3598_v50 = vsub.f32 %v3590_v49, %v3556_v44  ;;  %v3603_v45 = vsub.f32 %v3595_v23, %v3561_v3  ;;  %v3604_v30 = vsub.f32 %v3596_v39, %v3562_v34  ;;  %v7128_v23 = vld [vmem:[#allocation20_spill] sm:$0xff] }
 0x2c3   :  { %v3709_v39 = vmul.f32 %v7128_v23, %v3708_v35 }
 0x2c4   :  { %v3599_v53 = vmul.f32 %v7125_v1, %v3597_v27  ;;  %v3600_v2 = vmul.f32 %v7126_v25, %v3598_v50  ;;  %v3605_v8 = vmul.f32 %v7125_v1, %v3603_v45  ;;  %v3606_v46 = vmul.f32 %v7126_v25, %v3604_v30 }
 0x2c5   :  { %v3736_v27 = vrot.slane %v6466_v43, %v7082_v56 }
 0x2c6   :  { %v3601_v40 = vadd.f32 %v3599_v53, %v3555_v11  ;;  %v3602_v32 = vadd.f32 %v3600_v2, %v3556_v44  ;;  %v3607_v26 = vadd.f32 %v3605_v8, %v3561_v3  ;;  %v3608_v21 = vadd.f32 %v3606_v46, %v3562_v34 }
 0x2c8   :  { %v3623_v42 = vmul.f32 %v3615_v48, %v3601_v40  ;;  %v3624_v20 = vmul.f32 %v3616_v14, %v3602_v32  ;;  %v3625_v62 = vmul.f32 %v3621_v10, %v3607_v26  ;;  %v3626_v17 = vmul.f32 %v3622_v24, %v3608_v21 }
 0x2c9   :  { %v3629_v61 = vmul.f32 %v3615_v48, %v3607_v26  ;;  %v3630_v57 = vmul.f32 %v3616_v14, %v3608_v21  ;;  %v3631_v63 = vmul.f32 %v3621_v10, %v3601_v40  ;;  %v3632_v7 = vmul.f32 %v3622_v24, %v3602_v32 }
 0x2ca   :  { %v6570_v31 = vsub.f32 %v3623_v42, %v3625_v62  ;;  %v6572_v41 = vsub.f32 %v3624_v20, %v3626_v17 }
 0x2cb   :  { %v6576_v51 = vadd.f32 %v3631_v63, %v3629_v61  ;;  %v6578_v11 = vadd.f32 %v3632_v7, %v3630_v57 }
 0x2cc   :  { %3635 = vst [vmem:[#allocation2] sm:$0xff] %v6570_v31  ;;  %3636 = vst [vmem:[#allocation2 + $0x10] sm:$0xff] %v6572_v41  ;;  %v3703_v3 = vmul.f32 %v3702_v36, %v6570_v31  ;;  %v3704_v44 = vmul.f32 %v3702_v36, %v6572_v41  ;;  %v3662_v9 = vrot.slane %v6572_v41, 1  ;;  %v3682_v58 = vrot.slane %v6570_v31, 7 }
 0x2cd   :  { %3637 = vst [vmem:[#allocation2 + $0x20] sm:$0xff] %v6570_v31  ;;  %3638 = vst [vmem:[#allocation2 + $0x30] sm:$0xff] %v6572_v41  ;;  %v3715_v60 = vmul.f32 %v3702_v36, %v6576_v51  ;;  %v3716_v34 = vmul.f32 %v3702_v36, %v6578_v11  ;;  %v3665_v12 = vrot.slane %v6578_v11, 1  ;;  %v3685_v59 = vrot.slane %v6576_v51, 7 }
 0x2ce   :  { %3639 = vst [vmem:[#allocation2 + $0x8] sm:$0xff] %v6576_v51  ;;  %3640 = vst [vmem:[#allocation2 + $0x18] sm:$0xff] %v6578_v11 }
 0x2cf   :  { %3641 = vst [vmem:[#allocation2 + $0x28] sm:$0xff] %v6576_v51  ;;  %3642 = vst [vmem:[#allocation2 + $0x38] sm:$0xff] %v6578_v11 }
 0x2d3   :  { %v3643_v16 = vld [vmem:[#allocation2] sm:$0xfe]  ;;  %v3649_v29 = vld [vmem:[#allocation2 + $0x10] sm:$0x80] }
 0x2d4   :  { %v3647_v33 = vld [vmem:[#allocation2 + $0x20] sm:$0x1]  ;;  %v3653_v1 = vld [vmem:[#allocation2 + $0x30] sm:$0x7f]  ;;  %v3661_v25 = vrot.slane %v3643_v16, 1  ;;  %v3681_v30 = vrot.slane %v3649_v29, 7 }
 0x2d5   :  { %v3644_v54 = vld [vmem:[#allocation2 + $0x8] sm:$0xfe]  ;;  %v3650_v49 = vld [vmem:[#allocation2 + $0x18] sm:$0x80]  ;;  %v3667_v50 = vrot.slane %v3647_v33, 1  ;;  %v3687_v46 = vrot.slane %v3653_v1, 7 }
 0x2d6   :  { %v3648_v37 = vld [vmem:[#allocation2 + $0x28] sm:$0x1]  ;;  %v3654_v13 = vld [vmem:[#allocation2 + $0x38] sm:$0x7f]  ;;  %v3664_v47 = vrot.slane %v3644_v54, 1  ;;  %v3684_v53 = vrot.slane %v3650_v49, 7  ;;  %v3663_v2 = vsel %vm7130_vm3, %v3661_v25, %v3662_v9  ;;  %v3683_v10 = vsel %vm7134_vm0, %v3681_v30, %v3682_v58 }
 0x2d7   :  { %v3669_v45 = vrot.slane %v3648_v37, 1  ;;  %v3689_v48 = vrot.slane %v3654_v13, 7  ;;  %v3668_v14 = vsel %vm7132_vm13, %v3662_v9, %v3667_v50  ;;  %v3688_v43 = vsel %vm7136_vm1, %v3682_v58, %v3687_v46  ;;  %v7140_v13 = vld [vmem:[#allocation40_spill] sm:$0xff]  ;;  %vm7144_vm13 = vmmov %vm7134_vm0 }
 0x2d8   :  { %v3666_v8 = vsel %vm7131_vm6, %v3664_v47, %v3665_v12  ;;  %v3686_v24 = vsel %vm7135_vm10, %v3684_v53, %v3685_v59  ;;  %v3695_v26 = vsel %vm4706_vm7, %v3663_v2, %v3683_v10  ;;  %v3697_v20 = vsel %vm4681_vm2, %v3668_v14, %v3688_v43  ;;  %vm7143_vm6 = vmmov %vm7130_vm3 }
 0x2d9   :  { %v3670_v28 = vsel %vm7133_vm14, %v3665_v12, %v3669_v45  ;;  %v3690_v40 = vsel %vm7137_vm5, %v3685_v59, %v3689_v48  ;;  %v3696_v21 = vsel %vm4706_vm7, %v3666_v8, %v3686_v24  ;;  %v3711_v17 = vmul.f32 %v3709_v39, %v3695_v26  ;;  %vm7145_vm14 = vmmov %vm7134_vm0 }
 0x2da   :  { %v3698_v62 = vsel %vm4681_vm2, %v3670_v28, %v3690_v40  ;;  %v3717_v61 = vmul.f32 %v3709_v39, %v3696_v21  ;;  %v3712_v57 = vmul.f32 %v3710_v22, %v3697_v20  ;;  %v3744_v12 = vrot.slane %v6437_v4, %v7082_v56  ;;  %vm7146_vm10 = vmmov %vm7134_vm0 }
 0x2db   :  { %v3718_v63 = vmul.f32 %v3710_v22, %v3698_v62  ;;  %v3713_v7 = vadd.f32 %v3711_v17, %v3703_v3  ;;  %v3737_v16 = vmul.f32 0.0, %v3736_v27  ;;  %v3843_v49 = vsub.f32 0.0, %v7128_v23 }
 0x2dc   :  { %v3719_v36 = vadd.f32 %v3717_v61, %v3715_v60  ;;  %v3714_v35 = vadd.f32 %v3712_v57, %v3704_v44  ;;  %v3844_v3 = vsub.f32 0.0, %v7129_v18  ;;  %v3740_v56 = vadd.f32 1.0, %v3736_v27 }
 0x2dd   :  { %v3720_v9 = vadd.f32 %v3718_v63, %v3716_v34  ;;  %v3721_v58 = vsub.f32 %v3713_v7, %v6570_v31  ;;  %v3746_v4 = vmul.f32 %v7129_v18, %v3744_v12  ;;  %v3739_v1 = vadd.f32 1.0, %v3737_v16 }
 0x2de   :  { %v3727_v59 = vsub.f32 %v3719_v36, %v6576_v51  ;;  %v3722_v33 = vsub.f32 %v3714_v35, %v6572_v41  ;;  %v3745_v25 = vmul.f32 %v3744_v12, %v7140_v13  ;;  %v3925_v18 = vsub.f32 0.0, %v7065_v15 }
 0x2df   :  { %v3728_v29 = vsub.f32 %v3720_v9, %v6578_v11  ;;  %v3723_v54 = vmul.f32 0.0, %v3721_v58  ;;  %v4007_v8 = vsub.f32 0.0, %v7078_v19  ;;  %v4008_v46 = vsub.f32 0.0, %v7079_v52 }
 0x2e0   :  { %v3729_v37 = vmul.f32 0.0, %v3727_v59  ;;  %v3726_v44 = vadd.f32 %v3722_v33, %v6572_v41 }
 0x2e1   :  { %v3732_v60 = vadd.f32 %v3728_v29, %v6578_v11  ;;  %v3725_v34 = vadd.f32 %v3723_v54, %v6570_v31  ;;  %v3926_v31 = vsub.f32 0.0, %v7066_v38 }
 0x2e2   :  { %v3731_v39 = vadd.f32 %v3729_v37, %v6576_v51  ;;  %v3748_v47 = vmul.f32 %v3740_v56, %v3726_v44  ;;  %v3756_v23 = vmul.f32 %v3746_v4, %v3726_v44 }
 0x2e3   :  { %v3750_v22 = vmul.f32 %v3746_v4, %v3732_v60  ;;  %v3754_v50 = vmul.f32 %v3740_v56, %v3732_v60  ;;  %v3747_v45 = vmul.f32 %v3739_v1, %v3725_v34  ;;  %v3755_v41 = vmul.f32 %v3745_v25, %v3725_v34 }
 0x2e4   :  { %v3749_v30 = vmul.f32 %v3745_v25, %v3731_v39  ;;  %v3753_v53 = vmul.f32 %v3739_v1, %v3731_v39 }
 0x2e5   :  { %v6632_v2 = vsub.f32 %v3748_v47, %v3750_v22  ;;  %v6634_v11 = vadd.f32 %v3756_v23, %v3754_v50 }
 0x2e6   :  { %v6638_v51 = vsub.f32 %v3747_v45, %v3749_v30  ;;  %v6640_v27 = vadd.f32 %v3755_v41, %v3753_v53 }
 0x2e7   :  { %3768 = vst [vmem:[#allocation2 + $0x30] sm:$0xff] %v6632_v2  ;;  %3772 = vst [vmem:[#allocation2 + $0x38] sm:$0xff] %v6634_v11  ;;  %v3760_v15 = vmul.f32 %v6632_v2, %v6632_v2  ;;  %v3762_v38 = vmul.f32 %v6634_v11, %v6634_v11  ;;  %v3792_v48 = vrot.slane %v6632_v2, 1  ;;  %v3795_v19 = vrot.slane %v6634_v11, 1 }
 0x2e8   :  { %3766 = vst [vmem:[#allocation2 + $0x10] sm:$0xff] %v6632_v2  ;;  %3770 = vst [vmem:[#allocation2 + $0x18] sm:$0xff] %v6634_v11  ;;  %v3759_v52 = vmul.f32 %v6638_v51, %v6638_v51  ;;  %v3761_v14 = vmul.f32 %v6640_v27, %v6640_v27  ;;  %v3812_v28 = vrot.slane %v6638_v51, 7  ;;  %v3815_v10 = vrot.slane %v6640_v27, 7 }
 0x2e9   :  { %3767 = vst [vmem:[#allocation2 + $0x20] sm:$0xff] %v6638_v51  ;;  %3771 = vst [vmem:[#allocation2 + $0x28] sm:$0xff] %v6640_v27  ;;  %v6664_v24 = vadd.f32 %v3762_v38, %v3760_v15  ;;  %v3874_v43 = vrot.slane %v6632_v2, 2  ;;  %v3877_v40 = vrot.slane %v6634_v11, 2  ;;  %v3894_v26 = vrot.slane %v6638_v51, 6 }
 0x2ea   :  { %3765 = vst [vmem:[#allocation2] sm:$0xff] %v6638_v51  ;;  %3769 = vst [vmem:[#allocation2 + $0x8] sm:$0xff] %v6640_v27  ;;  %v6669_v21 = vadd.f32 %v3761_v14, %v3759_v52  ;;  %v3897_v20 = vrot.slane %v6640_v27, 6  ;;  %v3956_v62 = vrot.slane %v6632_v2, 4  ;;  %v3959_v17 = vrot.slane %v6634_v11, 4 }
 0x2eb   :  { %v3846_v61 = vmul.f32 %v3844_v3, %v6664_v24  ;;  %v3928_v57 = vmul.f32 %v3926_v31, %v6664_v24  ;;  %v3976_v63 = vrot.slane %v6638_v51, 4  ;;  %v3979_v7 = vrot.slane %v6640_v27, 4 }
 0x2ec   :  { %v3845_v36 = vmul.f32 %v3843_v49, %v6669_v21  ;;  %v3927_v35 = vmul.f32 %v3925_v18, %v6669_v21  ;;  %v4009_v9 = vmul.f32 %v4007_v8, %v6669_v21  ;;  %v4010_v12 = vmul.f32 %v4008_v46, %v6664_v24 }
 0x2ed   :  { %v4023_v58 = vmul.f32 %v6632_v2, %v6638_v51  ;;  %v4025_v59 = vmul.f32 %v6634_v11, %v6640_v27 }
 0x2ee   :  { %v3783_v29 = vld [vmem:[#allocation2 + $0x30] sm:$0x7f]  ;;  %v3847_v54 = vadd.f32 %v3846_v61, %v3845_v36  ;;  %v6686_v37 = vadd.f32 %v3928_v57, %v3927_v35  ;;  %v6688_v3 = vadd.f32 %v4010_v12, %v4009_v9  ;;  %v3784_v34 = vld [vmem:[#allocation2 + $0x38] sm:$0x7f] }
 0x2ef   :  { %v3779_v16 = vld [vmem:[#allocation2 + $0x10] sm:$0x80]  ;;  %v3780_v33 = vld [vmem:[#allocation2 + $0x18] sm:$0x80]  ;;  %v6690_v56 = vadd.f32 %v4025_v59, %v4023_v58  ;;  %v3817_v45 = vrot.slane %v3783_v29, 7  ;;  %v3819_v30 = vrot.slane %v3784_v34, 7 }
 0x2f0   :  { %v3777_v60 = vld [vmem:[#allocation2 + $0x20] sm:$0x1]  ;;  %v3778_v4 = vld [vmem:[#allocation2 + $0x28] sm:$0x1]  ;;  %v3811_v47 = vrot.slane %v3779_v16, 7  ;;  %v3814_v22 = vrot.slane %v3780_v33, 7 }
 0x2f1   :  { %v3773_v49 = vld [vmem:[#allocation2] sm:$0xfe]  ;;  %v3774_v44 = vld [vmem:[#allocation2 + $0x8] sm:$0xfe]  ;;  %v3797_v13 = vrot.slane %v3777_v60, 1  ;;  %v3799_v25 = vrot.slane %v3778_v4, 1  ;;  %v3818_v46 = vsel %vm7134_vm0, %v3812_v28, %v3817_v45  ;;  %v3820_v15 = vsel %vm7146_vm10, %v3815_v10, %v3819_v30 }
 0x2f2   :  { %v3791_v39 = vrot.slane %v3773_v49, 1  ;;  %v3794_v1 = vrot.slane %v3774_v44, 1  ;;  %v3813_v18 = vsel %vm7144_vm13, %v3811_v47, %v3812_v28  ;;  %v3816_v31 = vsel %vm7145_vm14, %v3814_v22, %v3815_v10  ;;  %v3855_v8 = vld [vmem:[#allocation2] sm:$0xfc]  ;;  %v3856_v14 = vld [vmem:[#allocation2 + $0x8] sm:$0xfc] }
 0x2f3   :  { %v3798_v53 = vsel %vm7130_vm3, %v3792_v48, %v3797_v13  ;;  %v3800_v41 = vsel %vm7143_vm6, %v3795_v19, %v3799_v25  ;;  %v3859_v61 = vld [vmem:[#allocation2 + $0x20] sm:$0x3]  ;;  %v3861_v10 = vld [vmem:[#allocation2 + $0x10] sm:$0xc0]  ;;  %v3848_v32 = vrot.slane %v3847_v54, 4  ;;  %v3873_v58 = vrot.slane %v3855_v8, 2 }
 0x2f4   :  { %v3793_v50 = vsel %vm7141_vm4, %v3791_v39, %v3792_v48  ;;  %v3796_v23 = vsel %vm7142_vm11, %v3794_v1, %v3795_v19  ;;  %v3860_v48 = vld [vmem:[#allocation2 + $0x28] sm:$0x3]  ;;  %v3827_v19 = vsel %vm4681_vm2, %v3798_v53, %v3818_v46  ;;  %v3828_v57 = vsel %vm4681_vm2, %v3800_v41, %v3820_v15  ;;  %v3862_v12 = vld [vmem:[#allocation2 + $0x18] sm:$0xc0]  ;;  %v3865_v16 = vld [vmem:[#allocation2 + $0x30] sm:$0x3f] }
 0x2f5   :  { %v3825_v38 = vsel %vm4706_vm7, %v3793_v50, %v3813_v18  ;;  %v3826_v52 = vsel %vm4706_vm7, %v3796_v23, %v3816_v31  ;;  %v3830_v35 = vmul.f32 %v3827_v19, %v6632_v2  ;;  %v3832_v9 = vmul.f32 %v3828_v57, %v6634_v11  ;;  %v3866_v60 = vld [vmem:[#allocation2 + $0x38] sm:$0x3f]  ;;  %v3937_v31 = vld [vmem:[#allocation2] sm:$0xf0]  ;;  %v3942_v19 = vld [vmem:[#allocation2 + $0x28] sm:$0xf] }
 0x2f6   :  { %v3829_v36 = vmul.f32 %v3825_v38, %v6638_v51  ;;  %v3831_v28 = vmul.f32 %v3826_v52, %v6640_v27  ;;  %v3876_v33 = vrot.slane %v3856_v14, 2  ;;  %v3879_v29 = vrot.slane %v3859_v61, 2  ;;  %v3938_v52 = vld [vmem:[#allocation2 + $0x8] sm:$0xf0]  ;;  %v3941_v14 = vld [vmem:[#allocation2 + $0x20] sm:$0xf] }
 0x2f7   :  { %v3881_v49 = vrot.slane %v3860_v48, 2  ;;  %v3834_v44 = vadd.f32 %v3832_v9, %v3830_v35  ;;  %v3849_v42 = vadd.f32 %v3848_v32, %v3847_v54  ;;  %vm7147_vm2 = vcmask 1045504   ;;  %v3944_v32 = vld [vmem:[#allocation2 + $0x18] sm:$0xf0]  ;;  %v3948_v5 = vld [vmem:[#allocation2 + $0x38] sm:$0xf] }
 0x2f8   :  { %v3833_v59 = vadd.f32 %v3831_v28, %v3829_v36  ;;  %v3875_v4 = vsel %vm7147_vm2, %v3873_v58, %v3874_v43  ;;  %v3893_v34 = vrot.slane %v3861_v10, 6  ;;  %vm7148_vm7 = vmmov %vm7147_vm2  ;;  %v3896_v25 = vrot.slane %v3862_v12, 6  ;;  %v3943_v28 = vld [vmem:[#allocation2 + $0x10] sm:$0xf0] }
 0x2f9   :  { %v3878_v39 = vsel %vm7148_vm7, %v3876_v33, %v3877_v40  ;;  %vm7149_vm1 = vmmov %vm7147_vm2  ;;  %v3850_v47 = vrot.slane %v3849_v42, 2  ;;  %vm7151_vm4 = vcmask 1041408   ;;  %v3899_v50 = vrot.slane %v3865_v16, 6  ;;  %v3947_v33 = vld [vmem:[#allocation2 + $0x30] sm:$0xf] }
 0x2fa   :  { %v3880_v1 = vsel %vm7149_vm1, %v3874_v43, %v3879_v29  ;;  %vm7150_vm5 = vmmov %vm7149_vm1  ;;  %v3835_v54 = vadd.f32 %v3834_v44, %v3833_v59  ;;  %v3895_v22 = vsel %vm7151_vm4, %v3893_v34, %v3894_v26  ;;  %v3901_v45 = vrot.slane %v3866_v60, 6 }
 0x2fb   :  { %v3882_v13 = vsel %vm7150_vm5, %v3877_v40, %v3881_v49  ;;  %vm7152_vm11 = vmmov %vm7151_vm4  ;;  %v3907_v43 = vsel %vm4896_vm8, %v3875_v4, %v3895_v22  ;;  %v3930_v30 = vrot.slane %v6686_v37, 4  ;;  %v3851_v40 = vadd.f32 %v3850_v47, %v3849_v42 }
 0x2fc   :  { %v3898_v23 = vsel %vm7152_vm11, %v3896_v25, %v3897_v20  ;;  %v3836_v53 = vrot.slane %v3835_v54, 4  ;;  %vm7153_vm3 = vmmov %vm7151_vm4  ;;  %v3911_v15 = vmul.f32 %v3907_v43, %v6638_v51  ;;  %v3955_v10 = vrot.slane %v3937_v31, 4 }
 0x2fd   :  { %v3900_v41 = vsel %vm7153_vm3, %v3894_v26, %v3899_v50  ;;  %v3908_v18 = vsel %vm4896_vm8, %v3878_v39, %v3898_v23  ;;  %vm7154_vm6 = vmmov %vm7153_vm3  ;;  %v3852_v48 = vrot.slane %v3851_v40, 1  ;;  %v3931_v36 = vadd.f32 %v3930_v30, %v6686_v37 }
 0x2fe   :  { %v3902_v8 = vsel %vm7154_vm6, %v3897_v20, %v3901_v45  ;;  %v3909_v46 = vsel %vm4903_vm9, %v3880_v1, %v3900_v41  ;;  %v3913_v38 = vmul.f32 %v3908_v18, %v6640_v27  ;;  %v3837_v61 = vadd.f32 %v3836_v53, %v3835_v54 }
 0x2ff   :  { %v3910_v55 = vsel %vm4903_vm9, %v3882_v13, %v3902_v8  ;;  %v3912_v26 = vmul.f32 %v3909_v46, %v6632_v2  ;;  %v3853_v9 = vadd.f32 %v3852_v48, %v3851_v40  ;;  %v3958_v12 = vrot.slane %v3938_v52, 4 }
 0x300   :  { %v3914_v57 = vmul.f32 %v3910_v55, %v6634_v11  ;;  %v3915_v20 = vadd.f32 %v3913_v38, %v3911_v15  ;;  %v3838_v35 = vrot.slane %v3837_v61, 2  ;;  %v3961_v58 = vrot.slane %v3941_v14, 4 }
 0x301   :  { %v3932_v16 = vrot.slane %v3931_v36, 2  ;;  %vm7155_vm8 = vcmask 1043456   ;;  %v3963_v49 = vrot.slane %v3942_v19, 4  ;;  %3854 = vst [vmem:[#allocation3 + $0x4] sm:$0x1] %v3853_v9  ;;  %v3975_v60 = vrot.slane %v3943_v28, 4 }
 0x302   :  { %v3916_v59 = vadd.f32 %v3914_v57, %v3912_v26  ;;  %v3957_v29 = vsel %vm7155_vm8, %v3955_v10, %v3956_v62  ;;  %v3839_v44 = vadd.f32 %v3838_v35, %v3837_v61  ;;  %vm7156_vm9 = vmmov %vm7155_vm8  ;;  %v3978_v1 = vrot.slane %v3944_v32, 4 }
 0x303   :  { %v3960_v37 = vsel %vm7156_vm9, %v3958_v12, %v3959_v17  ;;  %vm7157_vm13 = vmmov %vm7155_vm8  ;;  %v3933_v34 = vadd.f32 %v3932_v16, %v3931_v36  ;;  %v3981_v54 = vrot.slane %v3947_v33, 4  ;;  %v3983_v47 = vrot.slane %v3948_v5, 4 }
 0x304   :  { %v3962_v42 = vsel %vm7157_vm13, %v3956_v62, %v3961_v58  ;;  %v3917_v4 = vadd.f32 %v3916_v59, %v3915_v20  ;;  %vm7158_vm14 = vmmov %vm7155_vm8  ;;  %v3840_v13 = vrot.slane %v3839_v44, 1  ;;  %v4012_v6 = vrot.slane %v6688_v3, 4 }
 0x305   :  { %v3964_v39 = vsel %vm7158_vm14, %v3959_v17, %v3963_v49  ;;  %vm7159_vm0 = vmmov %vm7155_vm8  ;;  %v3934_v50 = vrot.slane %v3933_v34, 1  ;;  %v4029_v15 = vadd.f32 %v6690_v56, %v6690_v56  ;;  %v4040_v38 = vmul.f32 -1.0, %v6664_v24 }
 0x306   :  { %v3977_v25 = vsel %vm7159_vm0, %v3975_v60, %v3976_v63  ;;  %v3918_v22 = vrot.slane %v3917_v4, 4  ;;  %vm7160_vm10 = vmmov %vm7159_vm0  ;;  %v3841_v45 = vadd.f32 %v3840_v13, %v3839_v44 }
 0x307   :  { %v3980_v62 = vsel %vm7160_vm10, %v3978_v1, %v3979_v7  ;;  %v3989_v23 = vsel %vm5114_vm12, %v3957_v29, %v3977_v25  ;;  %vm7161_vm2 = vmmov %vm7159_vm0  ;;  %v3935_v40 = vadd.f32 %v3934_v50, %v3933_v34  ;;  %v4030_v61 = vrot.slane %v4029_v15, 4 }
 0x308   :  { %v3982_v17 = vsel %vm7161_vm2, %v3976_v63, %v3981_v54  ;;  %vm7162_vm7 = vmmov %vm7159_vm0  ;;  %v3990_v30 = vsel %vm5114_vm12, %v3960_v37, %v3980_v62  ;;  %v3919_v53 = vadd.f32 %v3918_v22, %v3917_v4  ;;  %3842 = vst [vmem:[#allocation3] sm:$0x1] %v3841_v45  ;;  %v3993_v31 = vmul.f32 %v3989_v23, %v6638_v51 }
 0x309   :  { %v3984_v43 = vsel %vm7162_vm7, %v3979_v7, %v3983_v47  ;;  %v3991_v41 = vsel %vm5121_vm15, %v3962_v42, %v3982_v17  ;;  %v3995_v8 = vmul.f32 %v3990_v30, %v6640_v27  ;;  %3936 = vst [vmem:[#allocation3 + $0x5] sm:$0x1] %v3935_v40  ;;  %v4013_v51 = vadd.f32 %v4012_v6, %v6688_v3 }
 0x30a   :  { %v3992_v18 = vsel %vm5121_vm15, %v3964_v39, %v3984_v43  ;;  %v3994_v63 = vmul.f32 %v3991_v41, %v6632_v2  ;;  %v3920_v46 = vrot.slane %v3919_v53, 2  ;;  %v4041_v2 = vadd.f32 %v4040_v38, %v6669_v21 }
 0x30b   :  { %v3996_v7 = vmul.f32 %v3992_v18, %v6634_v11  ;;  %v3997_v0 = vadd.f32 %v3995_v8, %v3993_v31  ;;  %v4014_v11 = vrot.slane %v4013_v51, 2  ;;  %v4031_v55 = vadd.f32 %v4030_v61, %v4029_v15 }
 0x30c   :  { %v3921_v14 = vadd.f32 %v3920_v46, %v3919_v53  ;;  %v4042_v26 = vrot.slane %v4041_v2, 4 }
 0x30d   :  { %v3998_v52 = vadd.f32 %v3996_v7, %v3994_v63  ;;  %v4015_v20 = vadd.f32 %v4014_v11, %v4013_v51  ;;  %v4032_v36 = vrot.slane %v4031_v55, 2 }
 0x30e   :  { %v3922_v48 = vrot.slane %v3921_v14, 1  ;;  %v4043_v56 = vadd.f32 %v4042_v26, %v4041_v2 }
 0x30f   :  { %v3999_v27 = vadd.f32 %v3998_v52, %v3997_v0  ;;  %v4016_v24 = vrot.slane %v4015_v20, 1  ;;  %v4033_v10 = vadd.f32 %v4032_v36, %v4031_v55 }
 0x310   :  { %v3923_v57 = vadd.f32 %v3922_v48, %v3921_v14  ;;  %v4044_v35 = vrot.slane %v4043_v56, 2 }
 0x311   :  { %v4000_v19 = vrot.slane %v3999_v27, 4  ;;  %v4017_v3 = vadd.f32 %v4016_v24, %v4015_v20  ;;  %v4034_v32 = vrot.slane %v4033_v10, 1 }
 0x312   :  { %3924 = vst [vmem:[#allocation3 + $0x1] sm:$0x1] %v3923_v57  ;;  %v4045_v12 = vadd.f32 %v4044_v35, %v4043_v56 }
 0x313   :  { %v4001_v28 = vadd.f32 %v4000_v19, %v3999_v27  ;;  %4018 = vst [vmem:[#allocation3 + $0x6] sm:$0x1] %v4017_v3  ;;  %v4035_v58 = vadd.f32 %v4034_v32, %v4033_v10 }
 0x314   :  { %v4046_v59 = vrot.slane %v4045_v12, 1 }
 0x315   :  { %v4002_v9 = vrot.slane %v4001_v28, 2  ;;  %4036 = vst [vmem:[#allocation3 + $0x3] sm:$0x1] %v4035_v58 }
 0x316   :  { %v4047_v33 = vadd.f32 %v4046_v59, %v4045_v12 }
 0x317   :  { %v4003_v21 = vadd.f32 %v4002_v9, %v4001_v28 }
 0x318   :  { %4048 = vst [vmem:[#allocation3 + $0x7] sm:$0x1] %v4047_v33 }
 0x319   :  { %v4004_v16 = vrot.slane %v4003_v21, 1 }
 0x31b   :  { %v4005_v5 = vadd.f32 %v4004_v16, %v4003_v21 }
 0x31d   :  { %4006 = vst [vmem:[#allocation3 + $0x2] sm:$0x1] %v4005_v5 }
 0x31e   :  { %4231 = shalt.err (!%p4228_p4)
}
 0x31f   :  { %s4232_s13 = scalar_lea.hbm %s6807_s3, 128 }
 0x320   :  { %p4233_p5 = scmp.ne.s32.totalorder %s6807_s3, %s4232_s13  ;;  %p4236_p6 = scmp.lt.u32.totalorder %s4232_s13, %s6807_s3 }
 0x322   :  { %p4238_p7 = pnand %p4236_p6, %p4233_p5 }
 0x324   :  { %4241 = shalt.err (!%p4238_p7)
}
 0x325   :  { %4058 = dma.vmem_to_hbm [thread:$0]  %s4056_s9, 128, %s6807_s3, [#allocation4]  }
 0x326   :  { %4242 = dma.done.wait [#allocation4], 128  }
 0x327   :  { %4243 = vsyncadd [#allocation4], 4294967168 }
 0x328   :  { %4062 = vsyncpa [#allocation4], 1 }

</bundles_post_ra>
